<compile_context>
chip_gen: v6e
topology: v6e:2x2x1
jax: 0.10.0
libtpu: 0.0.40
codegen_flags: <defaults>
</compile_context>

<pallas_src>
import jax
import jax.numpy as jnp
from jax.experimental import pallas as pl
from jax.experimental.pallas import tpu as pltpu

D_MODEL = 768
D_FF = 1024
LN_EPS = 1e-5
VMEM_LIMIT_BYTES = 48 * 1024 * 1024  # fits v5e/v6e (128 MiB) and v7x (64 MiB)


def ffn_kernel(x_ref, w1_ref, b1_ref, w2_ref, b2_ref, gamma_ref, beta_ref, o_ref):
    # Keep the residual / bias / LayerNorm path in f32; run the two GEMMs in
    # the weights' dtype (bf16 by default) with f32 accumulation on the MXU.
    x = x_ref[...].astype(jnp.float32)                                   # (tm, 768)

    # Linear1 + ReLU
    h = jnp.dot(x.astype(w1_ref.dtype), w1_ref[...],
                preferred_element_type=jnp.float32)                      # (tm, 1024)
    h = jnp.maximum(h + b1_ref[...], 0.0)

    # Linear2
    y = jnp.dot(h.astype(w2_ref.dtype), w2_ref[...],
                preferred_element_type=jnp.float32)                      # (tm, 768)

    # Bias + residual (original f32 x)
    y = y + b2_ref[...] + x

    # LayerNorm over last dim (elementwise affine, eps=1e-5, biased variance).
    # Reductions -> XLU, rsqrt -> EUP: off the MXU critical path.
    mean = jnp.mean(y, axis=-1, keepdims=True)
    cent = y - mean
    var = jnp.mean(cent * cent, axis=-1, keepdims=True)
    out = cent * jax.lax.rsqrt(var + LN_EPS) * gamma_ref[...] + beta_ref[...]

    o_ref[...] = out.astype(o_ref.dtype)


def _const_spec(block_shape, *, single_buffered):
    """BlockSpec for an operand whose block is identical at every grid step."""
    if single_buffered:
        # Constant index_map => the block never changes between steps; a single
        # VMEM buffer suffices (saves ~half of the resident-weight VMEM).
        return pl.BlockSpec(block_shape, lambda i: (0, 0),
                            pipeline_mode=pl.Buffered(1))
    return pl.BlockSpec(block_shape, lambda i: (0, 0))


def feed_forward(x, w1, b1, w2, b2, gamma, beta, *, tm=256,
                 matmul_dtype=jnp.bfloat16):
    """x: (..., 768) float32. Returns same shape/dtype."""
    orig_shape = x.shape
    orig_dtype = x.dtype
    rows = 1
    for s in orig_shape[:-1]:
        rows *= s
    x2d = x.reshape(rows, D_MODEL)

    # Sublane-align the row count (multiple of 8). Usually a no-op; the ragged
    # tail beyond the last full tile is handled by Pallas block masking, so we
    # never materialize a pad-to-tile copy of the activations.
    pad = (-rows) % 8
    if pad:
        x2d = jnp.pad(x2d, ((0, pad), (0, 0)))
    padded_rows = rows + pad

    tm_eff = min(tm, padded_rows)              # padded_rows is a multiple of 8
    grid = (pl.cdiv(padded_rows, tm_eff),)

    # Cast weights to the matmul dtype once at the wrapper level (halves the
    # resident-weight VMEM and HBM traffic for bf16).
    if matmul_dtype is not None and w1.dtype != matmul_dtype:
        w1c = w1.astype(matmul_dtype)
        w2c = w2.astype(matmul_dtype)
    else:
        w1c, w2c = w1, w2

    # Broadcastable (1, D) views for bias / LN params so they tile cleanly.
    b1_2d = b1.reshape(1, D_FF).astype(jnp.float32)
    b2_2d = b2.reshape(1, D_MODEL).astype(jnp.float32)
    g_2d = gamma.reshape(1, D_MODEL).astype(jnp.float32)
    be_2d = beta.reshape(1, D_MODEL).astype(jnp.float32)

    w_bytes = jnp.dtype(w1c.dtype).itemsize
    cost = pl.CostEstimate(
        flops=2 * padded_rows * (D_MODEL * D_FF + D_FF * D_MODEL),
        transcendentals=padded_rows,  # one rsqrt per row
        bytes_accessed=(2 * padded_rows * D_MODEL * 4
                        + 2 * D_MODEL * D_FF * w_bytes
                        + (D_FF + 3 * D_MODEL) * 4),
    )

    def build_and_run(single_buffered_consts):
        in_specs = [
            pl.BlockSpec((tm_eff, D_MODEL), lambda i: (i, 0)),                  # x rows
            _const_spec((D_MODEL, D_FF), single_buffered=single_buffered_consts),   # W1
            _const_spec((1, D_FF), single_buffered=single_buffered_consts),         # b1
            _const_spec((D_FF, D_MODEL), single_buffered=single_buffered_consts),   # W2
            _const_spec((1, D_MODEL), single_buffered=single_buffered_consts),      # b2
            _const_spec((1, D_MODEL), single_buffered=single_buffered_consts),      # gamma
            _const_spec((1, D_MODEL), single_buffered=single_buffered_consts),      # beta
        ]
        return pl.pallas_call(
            ffn_kernel,
            out_shape=jax.ShapeDtypeStruct((padded_rows, D_MODEL), orig_dtype),
            grid_spec=pltpu.PrefetchScalarGridSpec(
                num_scalar_prefetch=0,
                grid=grid,
                in_specs=in_specs,
                out_specs=pl.BlockSpec((tm_eff, D_MODEL), lambda i: (i, 0)),
            ),
            compiler_params=pltpu.CompilerParams(
                dimension_semantics=("parallel",),
                vmem_limit_bytes=VMEM_LIMIT_BYTES,
            ),
            cost_estimate=cost,
        )(x2d, w1c, b1_2d, w2c, b2_2d, g_2d, be_2d)

    try:
        out = build_and_run(True)
    except Exception:
        # pipeline_mode=pl.Buffered(1) not accepted by this jax build -- fall
        # back to default (double-buffered) constant operands; still correct
        # and still fits comfortably under the raised VMEM limit.
        out = build_and_run(False)

    if pad:
        out = out[:rows]
    return out.reshape(orig_shape)


def init_params(key):
    """Deterministic init mirroring PyTorch defaults (U(-1/sqrt(fan_in), ...))."""
    k1, k2, k3, k4 = jax.random.split(key, 4)
    bound1 = 1.0 / (D_MODEL ** 0.5)
    bound2 = 1.0 / (D_FF ** 0.5)
    # Stored transposed vs. torch (in, out) so the kernel does x @ W.
    w1 = jax.random.uniform(k1, (D_MODEL, D_FF), jnp.float32, -bound1, bound1)
    b1 = jax.random.uniform(k2, (D_FF,), jnp.float32, -bound1, bound1)
    w2 = jax.random.uniform(k3, (D_FF, D_MODEL), jnp.float32, -bound2, bound2)
    b2 = jax.random.uniform(k4, (D_MODEL,), jnp.float32, -bound2, bound2)
    gamma = jnp.ones((D_MODEL,), jnp.float32)
    beta = jnp.zeros((D_MODEL,), jnp.float32)
    return w1, b1, w2, b2, gamma, beta


def reference(x, w1, b1, w2, b2, gamma, beta, *, matmul_dtype=None):
    """Pure-JAX reference. matmul_dtype=None -> full f32; else matched-precision
    (GEMMs in matmul_dtype with f32 accumulation, like the kernel)."""
    xf = x.astype(jnp.float32)
    if matmul_dtype is None:
        h = xf @ w1
    else:
        h = jnp.dot(xf.astype(matmul_dtype), w1.astype(matmul_dtype),
                    preferred_element_type=jnp.float32)
    h = jnp.maximum(h + b1, 0.0)
    if matmul_dtype is None:
        y = h @ w2
    else:
        y = jnp.dot(h.astype(matmul_dtype), w2.astype(matmul_dtype),
                    preferred_element_type=jnp.float32)
    y = y + b2 + xf
    mean = jnp.mean(y, axis=-1, keepdims=True)
    var = jnp.mean((y - mean) ** 2, axis=-1, keepdims=True)
    out = (y - mean) * jax.lax.rsqrt(var + LN_EPS) * gamma + beta
    return out.astype(x.dtype)


if __name__ == "__main__":
    key = jax.random.PRNGKey(0)
    kx, kp = jax.random.split(key)

    B, S = 2, 8
    x = jax.random.normal(kx, (B, S, D_MODEL), jnp.float32)
    params = init_params(kp)

    out = jax.block_until_ready(feed_forward(x, *params))
    assert out.shape == x.shape and out.dtype == x.dtype

    # Tight check vs. a matched-precision reference (bf16 GEMMs, f32 elsewhere).
    ref_mm = reference(x, *params, matmul_dtype=jnp.bfloat16)
    assert jnp.allclose(out, ref_mm, atol=2e-3, rtol=2e-3), "mismatch vs matched-precision reference"

    # Loose sanity check vs. the full-f32 reference (bf16 GEMM rounding only).
    ref_f32 = reference(x, *params, matmul_dtype=None)
    assert jnp.allclose(out, ref_f32, atol=5e-2, rtol=5e-2), "mismatch vs f32 reference"

    print("KERNEL_OK")
</pallas_src>

<mosaic_0001>
module attributes {stable_mosaic.version = 11 : i64} {
  func.func @ffn_kernel(%arg0: i32, %arg1: memref<16x768xf32, #tpu.memory_space<vmem>>, %arg2: memref<768x1024xbf16, #tpu.memory_space<vmem>>, %arg3: memref<1x1024xf32, #tpu.memory_space<vmem>>, %arg4: memref<1024x768xbf16, #tpu.memory_space<vmem>>, %arg5: memref<1x768xf32, #tpu.memory_space<vmem>>, %arg6: memref<1x768xf32, #tpu.memory_space<vmem>>, %arg7: memref<1x768xf32, #tpu.memory_space<vmem>>, %arg8: memref<16x768xf32, #tpu.memory_space<vmem>>) attributes {dimension_semantics = [#tpu.dimension_semantics<parallel>], iteration_bounds = array<i64: 1>, scalar_prefetch = 0 : i64, scratch_operands = 0 : i64, tpu.core_type = #tpu.core_type<tc>, window_params = [{transform_indices = @transform_0, window_bounds = array<i64: 16, 768>}, {pipeline_mode = #tpu.pipeline_mode<synchronous>, transform_indices = @transform_1, window_bounds = array<i64: 768, 1024>}, {pipeline_mode = #tpu.pipeline_mode<synchronous>, transform_indices = @transform_2, window_bounds = array<i64: 1, 1024>}, {pipeline_mode = #tpu.pipeline_mode<synchronous>, transform_indices = @transform_3, window_bounds = array<i64: 1024, 768>}, {pipeline_mode = #tpu.pipeline_mode<synchronous>, transform_indices = @transform_4, window_bounds = array<i64: 1, 768>}, {pipeline_mode = #tpu.pipeline_mode<synchronous>, transform_indices = @transform_5, window_bounds = array<i64: 1, 768>}, {pipeline_mode = #tpu.pipeline_mode<synchronous>, transform_indices = @transform_6, window_bounds = array<i64: 1, 768>}, {transform_indices = @transform_7, window_bounds = array<i64: 16, 768>}]} {
    %c0 = arith.constant 0 : index
    %c0_0 = arith.constant 0 : index
    %0 = vector.load %arg1[%c0, %c0_0] : memref<16x768xf32, #tpu.memory_space<vmem>>, vector<16x768xf32>
    %1 = arith.truncf %0 : vector<16x768xf32> to vector<16x768xbf16>
    %c0_1 = arith.constant 0 : index
    %c0_2 = arith.constant 0 : index
    %2 = vector.load %arg2[%c0_1, %c0_2] : memref<768x1024xbf16, #tpu.memory_space<vmem>>, vector<768x1024xbf16>
    %cst = arith.constant dense<0.000000e+00> : vector<16x1024xf32>
    %3 = tpu.matmul %1, %2, %cst {dimension_numbers = #tpu.dot_dimension_numbers<[1], [0], [0], [1], [0, 0, 1, 1], [], []>} : vector<16x768xbf16>, vector<768x1024xbf16>, vector<16x1024xf32> -> vector<16x1024xf32>
    %c0_3 = arith.constant 0 : index
    %c0_4 = arith.constant 0 : index
    %4 = vector.load %arg3[%c0_3, %c0_4] : memref<1x1024xf32, #tpu.memory_space<vmem>>, vector<1x1024xf32>
    %5 = vector.broadcast %4 : vector<1x1024xf32> to vector<16x1024xf32>
    %6 = arith.addf %3, %5 : vector<16x1024xf32>
    %cst_5 = arith.constant 0.000000e+00 : f32
    %7 = vector.broadcast %cst_5 : f32 to vector<16x1024xf32>
    %8 = arith.maximumf %6, %7 : vector<16x1024xf32>
    %9 = arith.truncf %8 : vector<16x1024xf32> to vector<16x1024xbf16>
    %c0_6 = arith.constant 0 : index
    %c0_7 = arith.constant 0 : index
    %10 = vector.load %arg4[%c0_6, %c0_7] : memref<1024x768xbf16, #tpu.memory_space<vmem>>, vector<1024x768xbf16>
    %cst_8 = arith.constant dense<0.000000e+00> : vector<16x768xf32>
    %11 = tpu.matmul %9, %10, %cst_8 {dimension_numbers = #tpu.dot_dimension_numbers<[1], [0], [0], [1], [0, 0, 1, 1], [], []>} : vector<16x1024xbf16>, vector<1024x768xbf16>, vector<16x768xf32> -> vector<16x768xf32>
    %c0_9 = arith.constant 0 : index
    %c0_10 = arith.constant 0 : index
    %12 = vector.load %arg5[%c0_9, %c0_10] : memref<1x768xf32, #tpu.memory_space<vmem>>, vector<1x768xf32>
    %13 = vector.broadcast %12 : vector<1x768xf32> to vector<16x768xf32>
    %14 = arith.addf %11, %13 : vector<16x768xf32>
    %15 = arith.addf %14, %0 : vector<16x768xf32>
    %cst_11 = arith.constant dense<0.000000e+00> : vector<16xf32>
    %16 = vector.multi_reduction <add>, %15, %cst_11 [1] : vector<16x768xf32> to vector<16xf32>
    %17 = vector.shape_cast %16 : vector<16xf32> to vector<16x1xf32>
    %cst_12 = arith.constant 7.680000e+02 : f32
    %18 = vector.broadcast %cst_12 : f32 to vector<16x1xf32>
    %19 = arith.divf %17, %18 : vector<16x1xf32>
    %20 = vector.broadcast %19 : vector<16x1xf32> to vector<16x768xf32>
    %21 = arith.subf %15, %20 : vector<16x768xf32>
    %22 = arith.mulf %21, %21 : vector<16x768xf32>
    %cst_13 = arith.constant dense<0.000000e+00> : vector<16xf32>
    %23 = vector.multi_reduction <add>, %22, %cst_13 [1] : vector<16x768xf32> to vector<16xf32>
    %24 = vector.shape_cast %23 : vector<16xf32> to vector<16x1xf32>
    %cst_14 = arith.constant 7.680000e+02 : f32
    %25 = vector.broadcast %cst_14 : f32 to vector<16x1xf32>
    %26 = arith.divf %24, %25 : vector<16x1xf32>
    %cst_15 = arith.constant 9.99999974E-6 : f32
    %27 = vector.broadcast %cst_15 : f32 to vector<16x1xf32>
    %28 = arith.addf %26, %27 : vector<16x1xf32>
    %29 = math.rsqrt %28 : vector<16x1xf32>
    %30 = vector.broadcast %29 : vector<16x1xf32> to vector<16x768xf32>
    %31 = arith.mulf %21, %30 : vector<16x768xf32>
    %c0_16 = arith.constant 0 : index
    %c0_17 = arith.constant 0 : index
    %32 = vector.load %arg6[%c0_16, %c0_17] : memref<1x768xf32, #tpu.memory_space<vmem>>, vector<1x768xf32>
    %33 = vector.broadcast %32 : vector<1x768xf32> to vector<16x768xf32>
    %34 = arith.mulf %31, %33 : vector<16x768xf32>
    %c0_18 = arith.constant 0 : index
    %c0_19 = arith.constant 0 : index
    %35 = vector.load %arg7[%c0_18, %c0_19] : memref<1x768xf32, #tpu.memory_space<vmem>>, vector<1x768xf32>
    %36 = vector.broadcast %35 : vector<1x768xf32> to vector<16x768xf32>
    %37 = arith.addf %34, %36 : vector<16x768xf32>
    %c0_20 = arith.constant 0 : index
    %c0_21 = arith.constant 0 : index
    %38 = vector.load %arg8[%c0_20, %c0_21] : memref<16x768xf32, #tpu.memory_space<vmem>>, vector<16x768xf32>
    tpu.vector_store %arg8[%c0_20, %c0_21], %37 {strides = array<i32>} : memref<16x768xf32, #tpu.memory_space<vmem>>, vector<16x768xf32>,
    return
  }
  func.func @transform_0(%arg0: i32) -> (i32, i32) {
    %c0_i32 = arith.constant 0 : i32
    %c0_i32_0 = arith.constant 0 : i32
    return %arg0, %c0_i32 : i32, i32
  }
  func.func @transform_1(%arg0: i32) -> (i32, i32) {
    %c0_i32 = arith.constant 0 : i32
    %c0_i32_0 = arith.constant 0 : i32
    %c0_i32_1 = arith.constant 0 : i32
    return %c0_i32, %c0_i32_0 : i32, i32
  }
  func.func @transform_2(%arg0: i32) -> (i32, i32) {
    %c0_i32 = arith.constant 0 : i32
    %c0_i32_0 = arith.constant 0 : i32
    %c0_i32_1 = arith.constant 0 : i32
    return %c0_i32, %c0_i32_0 : i32, i32
  }
  func.func @transform_3(%arg0: i32) -> (i32, i32) {
    %c0_i32 = arith.constant 0 : i32
    %c0_i32_0 = arith.constant 0 : i32
    %c0_i32_1 = arith.constant 0 : i32
    return %c0_i32, %c0_i32_0 : i32, i32
  }
  func.func @transform_4(%arg0: i32) -> (i32, i32) {
    %c0_i32 = arith.constant 0 : i32
    %c0_i32_0 = arith.constant 0 : i32
    %c0_i32_1 = arith.constant 0 : i32
    return %c0_i32, %c0_i32_0 : i32, i32
  }
  func.func @transform_5(%arg0: i32) -> (i32, i32) {
    %c0_i32 = arith.constant 0 : i32
    %c0_i32_0 = arith.constant 0 : i32
    %c0_i32_1 = arith.constant 0 : i32
    return %c0_i32, %c0_i32_0 : i32, i32
  }
  func.func @transform_6(%arg0: i32) -> (i32, i32) {
    %c0_i32 = arith.constant 0 : i32
    %c0_i32_0 = arith.constant 0 : i32
    %c0_i32_1 = arith.constant 0 : i32
    return %c0_i32, %c0_i32_0 : i32, i32
  }
  func.func @transform_7(%arg0: i32) -> (i32, i32) {
    %c0_i32 = arith.constant 0 : i32
    %c0_i32_0 = arith.constant 0 : i32
    return %arg0, %c0_i32 : i32, i32
  }
}

module attributes {stable_mosaic.version = 11 : i64} {
  func.func @ffn_kernel(%arg0: i32, %arg1: memref<16x768xf32, #tpu.memory_space<vmem>>, %arg2: memref<768x1024xbf16, #tpu.memory_space<vmem>>, %arg3: memref<1x1024xf32, #tpu.memory_space<vmem>>, %arg4: memref<1024x768xbf16, #tpu.memory_space<vmem>>, %arg5: memref<1x768xf32, #tpu.memory_space<vmem>>, %arg6: memref<1x768xf32, #tpu.memory_space<vmem>>, %arg7: memref<1x768xf32, #tpu.memory_space<vmem>>, %arg8: memref<16x768xf32, #tpu.memory_space<vmem>>) attributes {dimension_semantics = [#tpu.dimension_semantics<parallel>], iteration_bounds = array<i64: 1>, scalar_prefetch = 0 : i64, scratch_operands = 0 : i64, tpu.core_type = #tpu.core_type<tc>, window_params = [{transform_indices = @transform_0, window_bounds = array<i64: 16, 768>}, {pipeline_mode = #tpu.pipeline_mode<synchronous>, transform_indices = @transform_1, window_bounds = array<i64: 768, 1024>}, {pipeline_mode = #tpu.pipeline_mode<synchronous>, transform_indices = @transform_2, window_bounds = array<i64: 1, 1024>}, {pipeline_mode = #tpu.pipeline_mode<synchronous>, transform_indices = @transform_3, window_bounds = array<i64: 1024, 768>}, {pipeline_mode = #tpu.pipeline_mode<synchronous>, transform_indices = @transform_4, window_bounds = array<i64: 1, 768>}, {pipeline_mode = #tpu.pipeline_mode<synchronous>, transform_indices = @transform_5, window_bounds = array<i64: 1, 768>}, {pipeline_mode = #tpu.pipeline_mode<synchronous>, transform_indices = @transform_6, window_bounds = array<i64: 1, 768>}, {transform_indices = @transform_7, window_bounds = array<i64: 16, 768>}]} {
    %c0 = arith.constant 0 : index
    %c0_0 = arith.constant 0 : index
    %0 = vector.load %arg1[%c0, %c0_0] : memref<16x768xf32, #tpu.memory_space<vmem>>, vector<16x768xf32>
    %1 = arith.truncf %0 : vector<16x768xf32> to vector<16x768xbf16>
    %c0_1 = arith.constant 0 : index
    %c0_2 = arith.constant 0 : index
    %2 = vector.load %arg2[%c0_1, %c0_2] : memref<768x1024xbf16, #tpu.memory_space<vmem>>, vector<768x1024xbf16>
    %cst = arith.constant dense<0.000000e+00> : vector<16x1024xf32>
    %3 = tpu.matmul %1, %2, %cst {dimension_numbers = #tpu.dot_dimension_numbers<[1], [0], [0], [1], [0, 0, 1, 1], [], []>} : vector<16x768xbf16>, vector<768x1024xbf16>, vector<16x1024xf32> -> vector<16x1024xf32>
    %c0_3 = arith.constant 0 : index
    %c0_4 = arith.constant 0 : index
    %4 = vector.load %arg3[%c0_3, %c0_4] : memref<1x1024xf32, #tpu.memory_space<vmem>>, vector<1x1024xf32>
    %5 = vector.broadcast %4 : vector<1x1024xf32> to vector<16x1024xf32>
    %6 = arith.addf %3, %5 : vector<16x1024xf32>
    %cst_5 = arith.constant 0.000000e+00 : f32
    %7 = vector.broadcast %cst_5 : f32 to vector<16x1024xf32>
    %8 = arith.maximumf %6, %7 : vector<16x1024xf32>
    %9 = arith.truncf %8 : vector<16x1024xf32> to vector<16x1024xbf16>
    %c0_6 = arith.constant 0 : index
    %c0_7 = arith.constant 0 : index
    %10 = vector.load %arg4[%c0_6, %c0_7] : memref<1024x768xbf16, #tpu.memory_space<vmem>>, vector<1024x768xbf16>
    %cst_8 = arith.constant dense<0.000000e+00> : vector<16x768xf32>
    %11 = tpu.matmul %9, %10, %cst_8 {dimension_numbers = #tpu.dot_dimension_numbers<[1], [0], [0], [1], [0, 0, 1, 1], [], []>} : vector<16x1024xbf16>, vector<1024x768xbf16>, vector<16x768xf32> -> vector<16x768xf32>
    %c0_9 = arith.constant 0 : index
    %c0_10 = arith.constant 0 : index
    %12 = vector.load %arg5[%c0_9, %c0_10] : memref<1x768xf32, #tpu.memory_space<vmem>>, vector<1x768xf32>
    %13 = vector.broadcast %12 : vector<1x768xf32> to vector<16x768xf32>
    %14 = arith.addf %11, %13 : vector<16x768xf32>
    %15 = arith.addf %14, %0 : vector<16x768xf32>
    %cst_11 = arith.constant dense<0.000000e+00> : vector<16xf32>
    %16 = vector.multi_reduction <add>, %15, %cst_11 [1] : vector<16x768xf32> to vector<16xf32>
    %17 = vector.shape_cast %16 : vector<16xf32> to vector<16x1xf32>
    %cst_12 = arith.constant 7.680000e+02 : f32
    %18 = vector.broadcast %cst_12 : f32 to vector<16x1xf32>
    %19 = arith.divf %17, %18 : vector<16x1xf32>
    %20 = vector.broadcast %19 : vector<16x1xf32> to vector<16x768xf32>
    %21 = arith.subf %15, %20 : vector<16x768xf32>
    %22 = arith.mulf %21, %21 : vector<16x768xf32>
    %cst_13 = arith.constant dense<0.000000e+00> : vector<16xf32>
    %23 = vector.multi_reduction <add>, %22, %cst_13 [1] : vector<16x768xf32> to vector<16xf32>
    %24 = vector.shape_cast %23 : vector<16xf32> to vector<16x1xf32>
    %cst_14 = arith.constant 7.680000e+02 : f32
    %25 = vector.broadcast %cst_14 : f32 to vector<16x1xf32>
    %26 = arith.divf %24, %25 : vector<16x1xf32>
    %cst_15 = arith.constant 9.99999974E-6 : f32
    %27 = vector.broadcast %cst_15 : f32 to vector<16x1xf32>
    %28 = arith.addf %26, %27 : vector<16x1xf32>
    %29 = math.rsqrt %28 : vector<16x1xf32>
    %30 = vector.broadcast %29 : vector<16x1xf32> to vector<16x768xf32>
    %31 = arith.mulf %21, %30 : vector<16x768xf32>
    %c0_16 = arith.constant 0 : index
    %c0_17 = arith.constant 0 : index
    %32 = vector.load %arg6[%c0_16, %c0_17] : memref<1x768xf32, #tpu.memory_space<vmem>>, vector<1x768xf32>
    %33 = vector.broadcast %32 : vector<1x768xf32> to vector<16x768xf32>
    %34 = arith.mulf %31, %33 : vector<16x768xf32>
    %c0_18 = arith.constant 0 : index
    %c0_19 = arith.constant 0 : index
    %35 = vector.load %arg7[%c0_18, %c0_19] : memref<1x768xf32, #tpu.memory_space<vmem>>, vector<1x768xf32>
    %36 = vector.broadcast %35 : vector<1x768xf32> to vector<16x768xf32>
    %37 = arith.addf %34, %36 : vector<16x768xf32>
    %c0_20 = arith.constant 0 : index
    %c0_21 = arith.constant 0 : index
    %38 = vector.load %arg8[%c0_20, %c0_21] : memref<16x768xf32, #tpu.memory_space<vmem>>, vector<16x768xf32>
    tpu.vector_store %arg8[%c0_20, %c0_21], %37 {strides = array<i32>} : memref<16x768xf32, #tpu.memory_space<vmem>>, vector<16x768xf32>,
    return
  }
  func.func @transform_0(%arg0: i32) -> (i32, i32) {
    %c0_i32 = arith.constant 0 : i32
    %c0_i32_0 = arith.constant 0 : i32
    return %arg0, %c0_i32 : i32, i32
  }
  func.func @transform_1(%arg0: i32) -> (i32, i32) {
    %c0_i32 = arith.constant 0 : i32
    %c0_i32_0 = arith.constant 0 : i32
    %c0_i32_1 = arith.constant 0 : i32
    return %c0_i32, %c0_i32_0 : i32, i32
  }
  func.func @transform_2(%arg0: i32) -> (i32, i32) {
    %c0_i32 = arith.constant 0 : i32
    %c0_i32_0 = arith.constant 0 : i32
    %c0_i32_1 = arith.constant 0 : i32
    return %c0_i32, %c0_i32_0 : i32, i32
  }
  func.func @transform_3(%arg0: i32) -> (i32, i32) {
    %c0_i32 = arith.constant 0 : i32
    %c0_i32_0 = arith.constant 0 : i32
    %c0_i32_1 = arith.constant 0 : i32
    return %c0_i32, %c0_i32_0 : i32, i32
  }
  func.func @transform_4(%arg0: i32) -> (i32, i32) {
    %c0_i32 = arith.constant 0 : i32
    %c0_i32_0 = arith.constant 0 : i32
    %c0_i32_1 = arith.constant 0 : i32
    return %c0_i32, %c0_i32_0 : i32, i32
  }
  func.func @transform_5(%arg0: i32) -> (i32, i32) {
    %c0_i32 = arith.constant 0 : i32
    %c0_i32_0 = arith.constant 0 : i32
    %c0_i32_1 = arith.constant 0 : i32
    return %c0_i32, %c0_i32_0 : i32, i32
  }
  func.func @transform_6(%arg0: i32) -> (i32, i32) {
    %c0_i32 = arith.constant 0 : i32
    %c0_i32_0 = arith.constant 0 : i32
    %c0_i32_1 = arith.constant 0 : i32
    return %c0_i32, %c0_i32_0 : i32, i32
  }
  func.func @transform_7(%arg0: i32) -> (i32, i32) {
    %c0_i32 = arith.constant 0 : i32
    %c0_i32_0 = arith.constant 0 : i32
    return %arg0, %c0_i32 : i32, i32
  }
}

</mosaic_0001>

<bundles_post_ra>
// kernel: tpu_custom_call.1
= control target key start
LH: loop header
LB: loop body
LE: loop exit
PB: predicated region body
PF: predicated region fallthrough
CT: control target
= control target key end

     0   :  { %12 = vsyncpa [#allocation3], 0  ;;  %s7908_s0 = inlined_call_operand.hbm [shape: f32[16,768], index: 0, kind: input, shape index: {}]   ;;  %s7909_s1 = inlined_call_operand.hbm [shape: bf16[768,1024], index: 1, kind: input, shape index: {}]   ;;  %s7910_s2 = inlined_call_operand.hbm [shape: f32[1,1024], index: 2, kind: input, shape index: {}]   ;;  %s7911_s3 = inlined_call_operand.hbm [shape: bf16[1024,768], index: 3, kind: input, shape index: {}]   ;;  %s7912_s4 = inlined_call_operand.hbm [shape: f32[1,768], index: 4, kind: input, shape index: {}]   ;;  %s7913_s5 = inlined_call_operand.hbm [shape: f32[1,768], index: 5, kind: input, shape index: {}]   ;;  %s7914_s6 = inlined_call_operand.hbm [shape: f32[1,768], index: 6, kind: input, shape index: {}]   ;;  %s7915_s7 = inlined_call_operand.hbm [shape: f32[16,768], index: 7, kind: output, shape index: {}]  }
   0x1   :  { %13 = vsyncpa [#allocation6], 0 }
   0x2   :  { %14 = vsyncpa [#allocation9], 0 }
   0x3   :  { %15 = vsyncpa [#allocation12], 0 }
   0x4   :  { %16 = vsyncpa [#allocation4], 0  ;;  %s7620_s24 = smov [#allocation5]  }
   0x5   :  { %s34_s25 = sshll.u32 %s7620_s24, 4  ;;  %s35_s25 = int_to_ptr.vmem [resolvable:$true] %s34_s25 }
   0x6   :  { %s7458_s26 = scalar_lea.vmem %s35_s25, 49152  ;;  %p7463_p1 = scmp.lt.s32.totalorder %s35_s25, %s35_s25 }
   0x7   :  { %p7459_p0 = scmp.ne.s32.totalorder %s35_s25, %s7458_s26  ;;  %p7464_p2 = scmp.lt.s32.totalorder %s7458_s26, %s7458_s26 }
   0x9   :  { %p7465_p3 = por %p7464_p2, %p7463_p1 }
   0xb   :  { %p7466_p4 = pnand %p7465_p3, %p7459_p0 }
   0xd   :  { %7469 = shalt.err (!%p7466_p4)
}
   0xe   :  { %s7621_s27 = smov 512   ;;  %s7622_s28 = smov 32  }
   0xf   :  { %40 = dma.hbm_to_vmem [thread:$0]  %s7909_s1, 49152, %s35_s25, [#allocation6], %s7621_s27, %s7621_s27, %s7622_s28  }
  0x10   :  { %s7623_s8 = smov [#allocation8]  }
  0x11   :  { %s56_s9 = sshll.u32 %s7623_s8, 4  ;;  %s57_s9 = int_to_ptr.vmem [resolvable:$true] %s56_s9 }
  0x12   :  { %s7478_s10 = scalar_lea.vmem %s57_s9, 49152  ;;  %p7483_p6 = scmp.lt.s32.totalorder %s57_s9, %s57_s9 }
  0x13   :  { %p7479_p5 = scmp.ne.s32.totalorder %s57_s9, %s7478_s10  ;;  %p7484_p7 = scmp.lt.s32.totalorder %s7478_s10, %s7478_s10 }
  0x15   :  { %p7485_p8 = por %p7484_p7, %p7483_p6 }
  0x17   :  { %p7486_p9 = pnand %p7485_p8, %p7479_p5 }
  0x19   :  { %7489 = shalt.err (!%p7486_p9)
}
  0x1a   :  { %s7624_s11 = smov 384   ;;  %s7625_s12 = smov 24  }
  0x1b   :  { %62 = dma.hbm_to_vmem [thread:$0]  %s7911_s3, 49152, %s57_s9, [#allocation9], %s7624_s11, %s7624_s11, %s7625_s12  }
  0x1c   :  { %s7626_s15 = smov [#allocation11]   ;;  %s7627_s17 = smov [#allocation2]  }
  0x1d   :  { %s79_s16 = sshll.u32 %s7626_s15, 4  ;;  %s22_s1 = sshll.u32 %s7627_s17, 4  ;;  %s80_s16 = int_to_ptr.vmem [resolvable:$true] %s79_s16  ;;  %s23_s1 = int_to_ptr.vmem [resolvable:$true] %s22_s1 }
  0x1e   :  { %s7498_s18 = scalar_lea.vmem %s80_s16, 96  ;;  %p7503_p11 = scmp.lt.s32.totalorder %s80_s16, %s80_s16 }
  0x1f   :  { %p7499_p10 = scmp.ne.s32.totalorder %s80_s16, %s7498_s18  ;;  %p7504_p12 = scmp.lt.s32.totalorder %s7498_s18, %s7498_s18 }
  0x21   :  { %p7505_p13 = por %p7504_p12, %p7503_p11 }
  0x23   :  { %p7506_p0 = pnand %p7505_p13, %p7499_p10 }
  0x25   :  { %7509 = shalt.err (!%p7506_p0)
}
  0x26   :  { %82 = dma.hbm_to_vmem [thread:$0]  %s7913_s5, 96, %s80_s16, [#allocation12]  }
  0x27   :  { %s7518_s21 = scalar_lea.vmem %s23_s1, 1536  ;;  %p7523_p2 = scmp.lt.s32.totalorder %s23_s1, %s23_s1 }
  0x28   :  { %p7519_p1 = scmp.ne.s32.totalorder %s23_s1, %s7518_s21  ;;  %p7524_p3 = scmp.lt.s32.totalorder %s7518_s21, %s7518_s21 }
  0x2a   :  { %p7525_p4 = por %p7524_p3, %p7523_p2 }
  0x2c   :  { %p7526_p5 = pnand %p7525_p4, %p7519_p1 }
  0x2e   :  { %7529 = shalt.err (!%p7526_p5)
}
  0x2f   :  { %s7628_s3 = smov 768   ;;  %s7629_s22 = smov 48  }
  0x30   :  { %28 = dma.hbm_to_vmem [thread:$0]  %s7908_s0, 1536, %s23_s1, [#allocation3], %s7628_s3, %s7628_s3, %s7629_s22  }
  0x31   :  { %s7630_s25 = smov [#allocation7]   ;;  %s7631_s27 = smov [#allocation10]  }
  0x32   :  { %s47_s26 = sshll.u32 %s7630_s25, 4  ;;  %s69_s5 = sshll.u32 %s7631_s27, 4  ;;  %s48_s26 = int_to_ptr.vmem [resolvable:$true] %s47_s26  ;;  %s70_s5 = int_to_ptr.vmem [resolvable:$true] %s69_s5 }
  0x33   :  { %s7538_s28 = scalar_lea.vmem %s48_s26, 128  ;;  %p7543_p7 = scmp.lt.s32.totalorder %s48_s26, %s48_s26 }
  0x34   :  { %p7539_p6 = scmp.ne.s32.totalorder %s48_s26, %s7538_s28  ;;  %p7544_p8 = scmp.lt.s32.totalorder %s7538_s28, %s7538_s28 }
  0x36   :  { %p7545_p9 = por %p7544_p8, %p7543_p7 }
  0x38   :  { %p7546_p10 = pnand %p7545_p9, %p7539_p6 }
  0x3a   :  { %7549 = shalt.err (!%p7546_p10)
}
  0x3b   :  { %50 = dma.hbm_to_vmem [thread:$0]  %s7910_s2, 128, %s48_s26, [#allocation6]  }
  0x3c   :  { %s7558_s8 = scalar_lea.vmem %s70_s5, 96  ;;  %p7563_p12 = scmp.lt.s32.totalorder %s70_s5, %s70_s5 }
  0x3d   :  { %p7559_p11 = scmp.ne.s32.totalorder %s70_s5, %s7558_s8  ;;  %p7564_p13 = scmp.lt.s32.totalorder %s7558_s8, %s7558_s8 }
  0x3f   :  { %p7565_p0 = por %p7564_p13, %p7563_p12 }
  0x41   :  { %p7566_p1 = pnand %p7565_p0, %p7559_p11 }
  0x43   :  { %7569 = shalt.err (!%p7566_p1)
}
  0x44   :  { %72 = dma.hbm_to_vmem [thread:$0]  %s7912_s4, 96, %s70_s5, [#allocation9]  }
  0x45   :  { %s7632_s10 = smov [#allocation13]  }
  0x46   :  { %s89_s11 = sshll.u32 %s7632_s10, 4  ;;  %s90_s11 = int_to_ptr.vmem [resolvable:$true] %s89_s11 }
  0x47   :  { %s7578_s12 = scalar_lea.vmem %s90_s11, 96  ;;  %p7583_p3 = scmp.lt.s32.totalorder %s90_s11, %s90_s11 }
  0x48   :  { %p7579_p2 = scmp.ne.s32.totalorder %s90_s11, %s7578_s12  ;;  %p7584_p4 = scmp.lt.s32.totalorder %s7578_s12, %s7578_s12 }
  0x4a   :  { %p7585_p5 = por %p7584_p4, %p7583_p3 }
  0x4c   :  { %p7586_p6 = pnand %p7585_p5, %p7579_p2 }
  0x4e   :  { %7589 = shalt.err (!%p7586_p6)
}
  0x4f   :  { %92 = dma.hbm_to_vmem [thread:$0]  %s7914_s6, 96, %s90_s11, [#allocation12]  }
  0x50   :  { %7610 = dma.done.wait [#allocation3], 1536  }
  0x51   :  { %7611 = vsyncadd [#allocation3], 4294965760 }
  0x52   :  { %7612 = dma.done.wait [#allocation6], 49280  }
  0x53   :  { %7613 = vsyncadd [#allocation6], 4294918016 }
  0x54   :  { %7614 = dma.done.wait [#allocation9], 49248  }
  0x55   :  { %7615 = vsyncadd [#allocation9], 4294918048 }
  0x56   :  { %7616 = dma.done.wait [#allocation12], 192  }
  0x57   :  { %7617 = vsyncadd [#allocation12], 4294967104  ;;  %v188_v0 = vld [vmem:[#allocation5 + $0x1c0] sm:$0xff]  ;;  %v115_v54 = vld [vmem:[#allocation2 + $0x8] sm:$0xff]  ;;  %s7633_s4 = smov [#allocation14]  }
  0x58   :  { %v192_v1 = vld [vmem:[#allocation5 + $0x1e0] sm:$0xff]  ;;  %v121_v55 = vld [vmem:[#allocation2 + $0x38] sm:$0xff]  ;;  %v123_v60 = vld [vmem:[#allocation2 + $0x48] sm:$0xff]  ;;  %s6060_s6 = sshll.u32 %s7633_s4, 4  ;;  %s6061_s6 = int_to_ptr.vmem [resolvable:$true] %s6060_s6 }
  0x59   :  { %v316_v2 = vld [vmem:[#allocation5 + $0x5c0] sm:$0xff]  ;;  %v6132_v3 = vcombine.high %v188_v0, %v192_v1  ;;  %v6131_v5 = vcombine.low %v188_v0, %v192_v1  ;;  %v7698_v58 = vpack.c.bf16 %v121_v55, %v115_v54  ;;  %v117_v59 = vld [vmem:[#allocation2 + $0x18] sm:$0xff]  ;;  %s7590_s14 = scalar_lea.vmem %s6061_s6, 1536  ;;  %p7595_p8 = scmp.lt.s32.totalorder %s6061_s6, %s6061_s6 }
  0x5a   :  { %v320_v4 = vld [vmem:[#allocation5 + $0x5e0] sm:$0xff]  ;;  %v7700_v63 = vpack.c.bf16 %v123_v60, %v117_v59  ;;  %p7591_p7 = scmp.ne.s32.totalorder %s6061_s6, %s7590_s14  ;;  %p7596_p9 = scmp.lt.s32.totalorder %s7590_s14, %s7590_s14 }
  0x5b   :  { %v180_v6 = vld [vmem:[#allocation5 + $0x180] sm:$0xff]  ;;  %v6260_v8 = vcombine.high %v316_v2, %v320_v4  ;;  %v6259_v9 = vcombine.low %v316_v2, %v320_v4  ;;  %2478 = vmatprep.subr.bf16.mxu0 %v6132_v3  ;;  %2510 = vmatprep.mubr.bf16.mxu0 %v7698_v58 }
  0x5c   :  { %v184_v7 = vld [vmem:[#allocation5 + $0x1a0] sm:$0xff]  ;;  %2479 = vmatpush1.bf16.msra.mxu0 %v6131_v5  ;;  %2553 = vmatprep.mubr.bf16.mxu1 %v7700_v63  ;;  %p7597_p10 = por %p7596_p9, %p7595_p8 }
  0x5d   :  { %v6124_v10 = vcombine.high %v180_v6, %v184_v7  ;;  %v308_v11 = vld [vmem:[#allocation5 + $0x580] sm:$0xff]  ;;  %2521 = vmatprep.subr.bf16.mxu1 %v6260_v8  ;;  %v6123_v18 = vcombine.low %v180_v6, %v184_v7 }
  0x5e   :  { %v312_v12 = vld [vmem:[#allocation5 + $0x5a0] sm:$0xff]  ;;  %2522 = vmatpush1.bf16.msra.mxu1 %v6259_v9  ;;  %p7598_p11 = pnand %p7597_p10, %p7591_p7 }
  0x5f   :  { %v172_v13 = vld [vmem:[#allocation5 + $0x140] sm:$0xff]  ;;  %v6252_v14 = vcombine.high %v308_v11, %v312_v12  ;;  %2480 = vmatprep.subr.bf16.mxu0 %v6124_v10  ;;  %v6251_v19 = vcombine.low %v308_v11, %v312_v12 }
  0x60   :  { %v176_v15 = vld [vmem:[#allocation5 + $0x160] sm:$0xff]  ;;  %2481 = vmatpush1.bf16.msra.mxu0 %v6123_v18 }
  0x61   :  { %v300_v16 = vld [vmem:[#allocation5 + $0x540] sm:$0xff]  ;;  %v6116_v20 = vcombine.high %v172_v13, %v176_v15  ;;  %2523 = vmatprep.subr.bf16.mxu1 %v6252_v14  ;;  %v6115_v26 = vcombine.low %v172_v13, %v176_v15 }
  0x62   :  { %v304_v17 = vld [vmem:[#allocation5 + $0x560] sm:$0xff]  ;;  %2524 = vmatpush1.bf16.msra.mxu1 %v6251_v19 }
  0x63   :  { %v6244_v21 = vcombine.high %v300_v16, %v304_v17  ;;  %v164_v22 = vld [vmem:[#allocation5 + $0x100] sm:$0xff]  ;;  %2482 = vmatprep.subr.bf16.mxu0 %v6116_v20  ;;  %v6243_v27 = vcombine.low %v300_v16, %v304_v17 }
  0x64   :  { %v168_v23 = vld [vmem:[#allocation5 + $0x120] sm:$0xff]  ;;  %2483 = vmatpush1.bf16.msra.mxu0 %v6115_v26 }
  0x65   :  { %v292_v24 = vld [vmem:[#allocation5 + $0x500] sm:$0xff]  ;;  %v6108_v28 = vcombine.high %v164_v22, %v168_v23  ;;  %2525 = vmatprep.subr.bf16.mxu1 %v6244_v21  ;;  %v6107_v34 = vcombine.low %v164_v22, %v168_v23 }
  0x66   :  { %v296_v25 = vld [vmem:[#allocation5 + $0x520] sm:$0xff]  ;;  %2526 = vmatpush1.bf16.msra.mxu1 %v6243_v27 }
  0x67   :  { %v6236_v29 = vcombine.high %v292_v24, %v296_v25  ;;  %v156_v30 = vld [vmem:[#allocation5 + $0xc0] sm:$0xff]  ;;  %2484 = vmatprep.subr.bf16.mxu0 %v6108_v28  ;;  %v6235_v35 = vcombine.low %v292_v24, %v296_v25 }
  0x68   :  { %v160_v31 = vld [vmem:[#allocation5 + $0xe0] sm:$0xff]  ;;  %2485 = vmatpush1.bf16.msra.mxu0 %v6107_v34 }
  0x69   :  { %v284_v32 = vld [vmem:[#allocation5 + $0x4c0] sm:$0xff]  ;;  %v6100_v36 = vcombine.high %v156_v30, %v160_v31  ;;  %2527 = vmatprep.subr.bf16.mxu1 %v6236_v29  ;;  %v6099_v42 = vcombine.low %v156_v30, %v160_v31 }
  0x6a   :  { %v288_v33 = vld [vmem:[#allocation5 + $0x4e0] sm:$0xff]  ;;  %2528 = vmatpush1.bf16.msra.mxu1 %v6235_v35 }
  0x6b   :  { %v6228_v37 = vcombine.high %v284_v32, %v288_v33  ;;  %v148_v38 = vld [vmem:[#allocation5 + $0x80] sm:$0xff]  ;;  %2486 = vmatprep.subr.bf16.mxu0 %v6100_v36  ;;  %v6227_v43 = vcombine.low %v284_v32, %v288_v33 }
  0x6c   :  { %v152_v39 = vld [vmem:[#allocation5 + $0xa0] sm:$0xff]  ;;  %2487 = vmatpush1.bf16.msra.mxu0 %v6099_v42 }
  0x6d   :  { %v276_v40 = vld [vmem:[#allocation5 + $0x480] sm:$0xff]  ;;  %v6092_v44 = vcombine.high %v148_v38, %v152_v39  ;;  %2529 = vmatprep.subr.bf16.mxu1 %v6228_v37  ;;  %v6091_v50 = vcombine.low %v148_v38, %v152_v39 }
  0x6e   :  { %v280_v41 = vld [vmem:[#allocation5 + $0x4a0] sm:$0xff]  ;;  %2530 = vmatpush1.bf16.msra.mxu1 %v6227_v43 }
  0x6f   :  { %v6220_v45 = vcombine.high %v276_v40, %v280_v41  ;;  %v140_v46 = vld [vmem:[#allocation5 + $0x40] sm:$0xff]  ;;  %2488 = vmatprep.subr.bf16.mxu0 %v6092_v44  ;;  %v6219_v51 = vcombine.low %v276_v40, %v280_v41 }
  0x70   :  { %v144_v47 = vld [vmem:[#allocation5 + $0x60] sm:$0xff]  ;;  %2489 = vmatpush1.bf16.msra.mxu0 %v6091_v50 }
  0x71   :  { %v268_v48 = vld [vmem:[#allocation5 + $0x440] sm:$0xff]  ;;  %v6084_v52 = vcombine.high %v140_v46, %v144_v47  ;;  %2531 = vmatprep.subr.bf16.mxu1 %v6220_v45  ;;  %v6083_v0 = vcombine.low %v140_v46, %v144_v47 }
  0x72   :  { %v272_v49 = vld [vmem:[#allocation5 + $0x460] sm:$0xff]  ;;  %2532 = vmatpush1.bf16.msra.mxu1 %v6219_v51 }
  0x73   :  { %v132_v53 = vld [vmem:[#allocation5] sm:$0xff]  ;;  %v6212_v56 = vcombine.high %v268_v48, %v272_v49  ;;  %2490 = vmatprep.subr.bf16.mxu0 %v6084_v52  ;;  %v6211_v1 = vcombine.low %v268_v48, %v272_v49 }
  0x74   :  { %v136_v57 = vld [vmem:[#allocation5 + $0x20] sm:$0xff]  ;;  %2491 = vmatpush1.bf16.msra.mxu0 %v6083_v0 }
  0x75   :  { %v260_v61 = vld [vmem:[#allocation5 + $0x400] sm:$0xff]  ;;  %v6076_v2 = vcombine.high %v132_v53, %v136_v57  ;;  %2533 = vmatprep.subr.bf16.mxu1 %v6212_v56  ;;  %v6075_v8 = vcombine.low %v132_v53, %v136_v57 }
  0x76   :  { %v264_v62 = vld [vmem:[#allocation5 + $0x420] sm:$0xff]  ;;  %2534 = vmatpush1.bf16.msra.mxu1 %v6211_v1 }
  0x77   :  { %v6204_v3 = vcombine.high %v260_v61, %v264_v62  ;;  %v252_v4 = vld [vmem:[#allocation5 + $0x3c0] sm:$0xff]  ;;  %2492 = vmatprep.subr.bf16.mxu0 %v6076_v2  ;;  %v6203_v9 = vcombine.low %v260_v61, %v264_v62 }
  0x78   :  { %v256_v5 = vld [vmem:[#allocation5 + $0x3e0] sm:$0xff]  ;;  %2493 = vmatpush1.bf16.msra.mxu0 %v6075_v8  ;;  %v189_v8 = vld [vmem:[#allocation5 + $0x1c8] sm:$0xff] }
  0x79   :  { %v380_v6 = vld [vmem:[#allocation5 + $0x7c0] sm:$0xff]  ;;  %v6196_v10 = vcombine.high %v252_v4, %v256_v5  ;;  %2535 = vmatprep.subr.bf16.mxu1 %v6204_v3  ;;  %v6195_v16 = vcombine.low %v252_v4, %v256_v5 }
  0x7a   :  { %v384_v7 = vld [vmem:[#allocation5 + $0x7e0] sm:$0xff]  ;;  %2536 = vmatpush1.bf16.msra.mxu1 %v6203_v9  ;;  %v193_v9 = vld [vmem:[#allocation5 + $0x1e8] sm:$0xff] }
  0x7b   :  { %v6324_v11 = vcombine.high %v380_v6, %v384_v7  ;;  %v244_v12 = vld [vmem:[#allocation5 + $0x380] sm:$0xff]  ;;  %2494 = vmatprep.subr.bf16.mxu0 %v6196_v10  ;;  %v6323_v17 = vcombine.low %v380_v6, %v384_v7 }
  0x7c   :  { %v248_v13 = vld [vmem:[#allocation5 + $0x3a0] sm:$0xff]  ;;  %2495 = vmatpush2.bf16.msra.mxu0 %v6195_v16 }
  0x7d   :  { %v372_v14 = vld [vmem:[#allocation5 + $0x780] sm:$0xff]  ;;  %v6188_v18 = vcombine.high %v244_v12, %v248_v13  ;;  %2537 = vmatprep.subr.bf16.mxu1 %v6324_v11  ;;  %v6187_v24 = vcombine.low %v244_v12, %v248_v13  ;;  %v120_v12 = vld [vmem:[#allocation2 + $0x30] sm:$0xff] }
  0x7e   :  { %v376_v15 = vld [vmem:[#allocation5 + $0x7a0] sm:$0xff]  ;;  %2538 = vmatpush2.bf16.msra.mxu1 %v6323_v17  ;;  %v6134_v17 = vcombine.high %v189_v8, %v193_v9 }
  0x7f   :  { %v6316_v19 = vcombine.high %v372_v14, %v376_v15  ;;  %v236_v20 = vld [vmem:[#allocation5 + $0x340] sm:$0xff]  ;;  %2496 = vmatprep.subr.bf16.mxu0 %v6188_v18  ;;  %v6315_v25 = vcombine.low %v372_v14, %v376_v15  ;;  %v116_v14 = vld [vmem:[#allocation2 + $0x10] sm:$0xff] }
  0x80   :  { %v240_v21 = vld [vmem:[#allocation5 + $0x360] sm:$0xff]  ;;  %2497 = vmatpush2.bf16.msra.mxu0 %v6187_v24  ;;  %v125_v24 = vld [vmem:[#allocation2 + $0x58] sm:$0xff] }
  0x81   :  { %v364_v22 = vld [vmem:[#allocation5 + $0x740] sm:$0xff]  ;;  %v6180_v26 = vcombine.high %v236_v20, %v240_v21  ;;  %2539 = vmatprep.subr.bf16.mxu1 %v6316_v19  ;;  %v6179_v32 = vcombine.low %v236_v20, %v240_v21  ;;  %v181_v20 = vld [vmem:[#allocation5 + $0x188] sm:$0xff] }
  0x82   :  { %v368_v23 = vld [vmem:[#allocation5 + $0x760] sm:$0xff]  ;;  %2540 = vmatpush2.bf16.msra.mxu1 %v6315_v25 }
  0x83   :  { %v6308_v27 = vcombine.high %v364_v22, %v368_v23  ;;  %v228_v28 = vld [vmem:[#allocation5 + $0x300] sm:$0xff]  ;;  %2498 = vmatprep.subr.bf16.mxu0 %v6180_v26  ;;  %v6307_v33 = vcombine.low %v364_v22, %v368_v23  ;;  %v185_v22 = vld [vmem:[#allocation5 + $0x1a8] sm:$0xff] }
  0x84   :  { %v232_v29 = vld [vmem:[#allocation5 + $0x320] sm:$0xff]  ;;  %2499 = vmatpush2.bf16.msra.mxu0 %v6179_v32  ;;  %v119_v23 = vld [vmem:[#allocation2 + $0x28] sm:$0xff] }
  0x85   :  { %v356_v30 = vld [vmem:[#allocation5 + $0x700] sm:$0xff]  ;;  %v6172_v34 = vcombine.high %v228_v28, %v232_v29  ;;  %2541 = vmatprep.subr.bf16.mxu1 %v6308_v27  ;;  %v6171_v40 = vcombine.low %v228_v28, %v232_v29  ;;  %v6133_v27 = vcombine.low %v189_v8, %v193_v9  ;;  %v6126_v29 = vcombine.high %v181_v20, %v185_v22 }
  0x86   :  { %v360_v31 = vld [vmem:[#allocation5 + $0x720] sm:$0xff]  ;;  %2542 = vmatpush2.bf16.msra.mxu1 %v6307_v33  ;;  %v7708_v32 = vpack.c.bf16 %v125_v24, %v119_v23  ;;  %v173_v33 = vld [vmem:[#allocation5 + $0x148] sm:$0xff] }
  0x87   :  { %v6300_v35 = vcombine.high %v356_v30, %v360_v31  ;;  %v220_v36 = vld [vmem:[#allocation5 + $0x2c0] sm:$0xff]  ;;  %2500 = vmatprep.subr.bf16.mxu0 %v6172_v34  ;;  %v6299_v41 = vcombine.low %v356_v30, %v360_v31  ;;  %v177_v34 = vld [vmem:[#allocation5 + $0x168] sm:$0xff] }
  0x88   :  { %v224_v37 = vld [vmem:[#allocation5 + $0x2e0] sm:$0xff]  ;;  %2501 = vmatpush2.bf16.msra.mxu0 %v6171_v40  ;;  %v6118_v40 = vcombine.high %v173_v33, %v177_v34 }
  0x89   :  { %v348_v38 = vld [vmem:[#allocation5 + $0x6c0] sm:$0xff]  ;;  %v6164_v42 = vcombine.high %v220_v36, %v224_v37  ;;  %2543 = vmatprep.subr.bf16.mxu1 %v6300_v35  ;;  %v6163_v48 = vcombine.low %v220_v36, %v224_v37  ;;  %v6125_v36 = vcombine.low %v181_v20, %v185_v22  ;;  %v257_v20 = vld [vmem:[#allocation5 + $0x3e8] sm:$0xff] }
  0x8a   :  { %v352_v39 = vld [vmem:[#allocation5 + $0x6e0] sm:$0xff]  ;;  %2544 = vmatpush2.bf16.msra.mxu1 %v6299_v41  ;;  %v165_v41 = vld [vmem:[#allocation5 + $0x108] sm:$0xff] }
  0x8b   :  { %v6292_v43 = vcombine.high %v348_v38, %v352_v39  ;;  %v212_v44 = vld [vmem:[#allocation5 + $0x280] sm:$0xff]  ;;  %2502 = vmatprep.subr.bf16.mxu0 %v6164_v42  ;;  %v6291_v49 = vcombine.low %v348_v38, %v352_v39  ;;  %v169_v42 = vld [vmem:[#allocation5 + $0x128] sm:$0xff] }
  0x8c   :  { %v216_v45 = vld [vmem:[#allocation5 + $0x2a0] sm:$0xff]  ;;  %2503 = vmatpush2.bf16.msra.mxu0 %v6163_v48  ;;  %v157_v48 = vld [vmem:[#allocation5 + $0xc8] sm:$0xff] }
  0x8d   :  { %v340_v46 = vld [vmem:[#allocation5 + $0x680] sm:$0xff]  ;;  %v6156_v50 = vcombine.high %v212_v44, %v216_v45  ;;  %2545 = vmatprep.subr.bf16.mxu1 %v6292_v43  ;;  %v6155_v56 = vcombine.low %v212_v44, %v216_v45  ;;  %v6117_v44 = vcombine.low %v173_v33, %v177_v34 }
  0x8e   :  { %v344_v47 = vld [vmem:[#allocation5 + $0x6a0] sm:$0xff]  ;;  %2546 = vmatpush2.bf16.msra.mxu1 %v6291_v49  ;;  %v6110_v49 = vcombine.high %v165_v41, %v169_v42 }
  0x8f   :  { %v6284_v51 = vcombine.high %v340_v46, %v344_v47  ;;  %v204_v52 = vld [vmem:[#allocation5 + $0x240] sm:$0xff]  ;;  %2504 = vmatprep.subr.bf16.mxu0 %v6156_v50  ;;  %v6283_v57 = vcombine.low %v340_v46, %v344_v47  ;;  %v161_v50 = vld [vmem:[#allocation5 + $0xe8] sm:$0xff] }
  0x90   :  { %v208_v53 = vld [vmem:[#allocation5 + $0x260] sm:$0xff]  ;;  %2505 = vmatpush2.bf16.msra.mxu0 %v6155_v56  ;;  %v149_v56 = vld [vmem:[#allocation5 + $0x88] sm:$0xff] }
  0x91   :  { %v332_v54 = vld [vmem:[#allocation5 + $0x640] sm:$0xff]  ;;  %v6148_v59 = vcombine.high %v204_v52, %v208_v53  ;;  %2547 = vmatprep.subr.bf16.mxu1 %v6284_v51  ;;  %v6147_v2 = vcombine.low %v204_v52, %v208_v53  ;;  %v6109_v52 = vcombine.low %v165_v41, %v169_v42 }
  0x92   :  { %v336_v55 = vld [vmem:[#allocation5 + $0x660] sm:$0xff]  ;;  %2548 = vmatpush2.bf16.msra.mxu1 %v6283_v57  ;;  %v6102_v57 = vcombine.high %v157_v48, %v161_v50 }
  0x93   :  { %v6276_v60 = vcombine.high %v332_v54, %v336_v55  ;;  %v196_v61 = vld [vmem:[#allocation5 + $0x200] sm:$0xff]  ;;  %2506 = vmatprep.subr.bf16.mxu0 %v6148_v59  ;;  %v6275_v3 = vcombine.low %v332_v54, %v336_v55  ;;  %v153_v59 = vld [vmem:[#allocation5 + $0xa8] sm:$0xff] }
  0x94   :  { %v200_v62 = vld [vmem:[#allocation5 + $0x220] sm:$0xff]  ;;  %2507 = vmatpush2.bf16.msra.mxu0 %v6147_v2  ;;  %v141_v2 = vld [vmem:[#allocation5 + $0x48] sm:$0xff] }
  0x95   :  { %v324_v0 = vld [vmem:[#allocation5 + $0x600] sm:$0xff]  ;;  %v6140_v4 = vcombine.high %v196_v61, %v200_v62  ;;  %2549 = vmatprep.subr.bf16.mxu1 %v6276_v60  ;;  %v6139_v10 = vcombine.low %v196_v61, %v200_v62  ;;  %v6101_v61 = vcombine.low %v157_v48, %v161_v50 }
  0x96   :  { %v328_v1 = vld [vmem:[#allocation5 + $0x620] sm:$0xff]  ;;  %2550 = vmatpush2.bf16.msra.mxu1 %v6275_v3  ;;  %v6094_v3 = vcombine.high %v149_v56, %v153_v59 }
  0x97   :  { %v6268_v5 = vcombine.high %v324_v0, %v328_v1  ;;  %v444_v6 = vld [vmem:[#allocation5 + $0x9c0] sm:$0xff]  ;;  %2508 = vmatprep.subr.bf16.mxu0 %v6140_v4  ;;  %v6267_v13 = vcombine.low %v324_v0, %v328_v1  ;;  %v145_v4 = vld [vmem:[#allocation5 + $0x68] sm:$0xff] }
  0x98   :  { %v448_v7 = vld [vmem:[#allocation5 + $0x9e0] sm:$0xff]  ;;  %2509 = vmatpush2.bf16.msra.mxu0 %v6139_v10  ;;  %v133_v10 = vld [vmem:[#allocation5 + $0x8] sm:$0xff] }
  0x99   :  { %v114_v11 = vld [vmem:[#allocation2] sm:$0xff]  ;;  %v6388_v16 = vcombine.high %v444_v6, %v448_v7  ;;  %2551 = vmatprep.subr.bf16.mxu1 %v6268_v5  ;;  %v6387_v26 = vcombine.low %v444_v6, %v448_v7  ;;  %v6093_v6 = vcombine.low %v149_v56, %v153_v59 }
  0x9a   :  { %v122_v15 = vld [vmem:[#allocation2 + $0x40] sm:$0xff]  ;;  %v7704_v21 = vpack.c.bf16 %v120_v12, %v114_v11  ;;  %2552 = vmatpush2.bf16.msra.mxu1 %v6267_v13  ;;  %v6086_v11 = vcombine.high %v141_v2, %v145_v4  ;;  %v137_v12 = vld [vmem:[#allocation5 + $0x28] sm:$0xff] }
  0x9b   :  { %v436_v18 = vld [vmem:[#allocation5 + $0x980] sm:$0xff]  ;;  %v7706_v25 = vpack.c.bf16 %v122_v15, %v116_v14  ;;  %2564 = vmatprep.subr.bf16.mxu0 %v6388_v16  ;;  %2607 = vmatprep.subr.bf16.mxu1 %v6134_v17  ;;  %v6085_v14 = vcombine.low %v141_v2, %v145_v4  ;;  %v6077_v23 = vcombine.low %v133_v10, %v137_v12 }
  0x9c   :  { %v440_v19 = vld [vmem:[#allocation5 + $0x9a0] sm:$0xff]  ;;  %2511 = vmatmul.mubr.bf16.vlgmr.msra.gmra.mxu0 %v7704_v21 }
  0x9d   :  { %v6380_v28 = vcombine.high %v436_v18, %v440_v19  ;;  %v428_v30 = vld [vmem:[#allocation5 + $0x940] sm:$0xff]  ;;  %2554 = vmatmul.mubr.bf16.vlgmr.msra.gmra.mxu1 %v7706_v25  ;;  %2565 = vmatpush1.bf16.msra.mxu0 %v6387_v26  ;;  %v6379_v35 = vcombine.low %v436_v18, %v440_v19  ;;  %v253_v18 = vld [vmem:[#allocation5 + $0x3c8] sm:$0xff]  ;;  %v6078_v19 = vcombine.high %v133_v10, %v137_v12 }
  0x9e   :  { %v432_v31 = vld [vmem:[#allocation5 + $0x960] sm:$0xff]  ;;  %2608 = vmatpush1.bf16.msra.mxu1 %v6133_v27  ;;  %2596 = vmatprep.mubr.bf16.mxu0 %v7708_v32  ;;  %v6197_v33 = vcombine.low %v253_v18, %v257_v20 }
  0x9f   :  { %2566 = vmatprep.subr.bf16.mxu0 %v6380_v28  ;;  %v6372_v37 = vcombine.high %v428_v30, %v432_v31  ;;  %v420_v38 = vld [vmem:[#allocation5 + $0x900] sm:$0xff]  ;;  %2609 = vmatprep.subr.bf16.mxu1 %v6126_v29  ;;  %v6371_v43 = vcombine.low %v428_v30, %v432_v31  ;;  %v245_v28 = vld [vmem:[#allocation5 + $0x388] sm:$0xff]  ;;  %v6198_v29 = vcombine.high %v253_v18, %v257_v20 }
  0xa0   :  { %v424_v39 = vld [vmem:[#allocation5 + $0x920] sm:$0xff]  ;;  %2639 = vmatprep.mubr.bf16.mxu1 %v7698_v58  ;;  %v249_v30 = vld [vmem:[#allocation5 + $0x3a8] sm:$0xff] }
  0xa1   :  { %2567 = vmatpush1.bf16.msra.mxu0 %v6379_v35  ;;  %v6364_v45 = vcombine.high %v420_v38, %v424_v39  ;;  %v412_v46 = vld [vmem:[#allocation5 + $0x8c0] sm:$0xff]  ;;  %v6363_v51 = vcombine.low %v420_v38, %v424_v39  ;;  %v6190_v38 = vcombine.high %v245_v28, %v249_v30  ;;  %v241_v39 = vld [vmem:[#allocation5 + $0x368] sm:$0xff]  ;;  %v6189_v41 = vcombine.low %v245_v28, %v249_v30  ;;  %v124_v28 = vld [vmem:[#allocation2 + $0x50] sm:$0xff] }
  0xa2   :  { %2610 = vmatpush1.bf16.msra.mxu1 %v6125_v36  ;;  %2568 = vmatprep.subr.bf16.mxu0 %v6372_v37  ;;  %v416_v47 = vld [vmem:[#allocation5 + $0x8e0] sm:$0xff]  ;;  %v237_v37 = vld [vmem:[#allocation5 + $0x348] sm:$0xff] }
  0xa3   :  { %2611 = vmatprep.subr.bf16.mxu1 %v6118_v40  ;;  %v6356_v53 = vcombine.high %v412_v46, %v416_v47  ;;  %v404_v54 = vld [vmem:[#allocation5 + $0x880] sm:$0xff]  ;;  %v6355_v60 = vcombine.low %v412_v46, %v416_v47  ;;  %v6182_v46 = vcombine.high %v237_v37, %v241_v39  ;;  %v233_v47 = vld [vmem:[#allocation5 + $0x328] sm:$0xff] }
  0xa4   :  { %v408_v55 = vld [vmem:[#allocation5 + $0x8a0] sm:$0xff] }
  0xa5   :  { %2569 = vmatpush1.bf16.msra.mxu0 %v6371_v43  ;;  %v6348_v62 = vcombine.high %v404_v54, %v408_v55  ;;  %v396_v0 = vld [vmem:[#allocation5 + $0x840] sm:$0xff]  ;;  %v6347_v5 = vcombine.low %v404_v54, %v408_v55  ;;  %v225_v55 = vld [vmem:[#allocation5 + $0x2e8] sm:$0xff] }
  0xa6   :  { %2612 = vmatpush1.bf16.msra.mxu1 %v6117_v44  ;;  %2570 = vmatprep.subr.bf16.mxu0 %v6364_v45  ;;  %v400_v1 = vld [vmem:[#allocation5 + $0x860] sm:$0xff]  ;;  %v229_v45 = vld [vmem:[#allocation5 + $0x308] sm:$0xff] }
  0xa7   :  { %2613 = vmatprep.subr.bf16.mxu1 %v6110_v49  ;;  %v6340_v7 = vcombine.high %v396_v0, %v400_v1  ;;  %v388_v8 = vld [vmem:[#allocation5 + $0x800] sm:$0xff]  ;;  %v6339_v13 = vcombine.low %v396_v0, %v400_v1  ;;  %v6181_v49 = vcombine.low %v237_v37, %v241_v39  ;;  %v6174_v54 = vcombine.high %v229_v45, %v233_v47  ;;  %v217_v1 = vld [vmem:[#allocation5 + $0x2a8] sm:$0xff] }
  0xa8   :  { %v392_v9 = vld [vmem:[#allocation5 + $0x820] sm:$0xff] }
  0xa9   :  { %2571 = vmatpush1.bf16.msra.mxu0 %v6363_v51  ;;  %v6332_v15 = vcombine.high %v388_v8, %v392_v9  ;;  %v508_v16 = vld [vmem:[#allocation5 + $0xbc0] sm:$0xff]  ;;  %v6331_v22 = vcombine.low %v388_v8, %v392_v9  ;;  %v209_v9 = vld [vmem:[#allocation5 + $0x268] sm:$0xff] }
  0xaa   :  { %2614 = vmatpush1.bf16.msra.mxu1 %v6109_v52  ;;  %2572 = vmatprep.subr.bf16.mxu0 %v6356_v53  ;;  %v512_v17 = vld [vmem:[#allocation5 + $0xbe0] sm:$0xff]  ;;  %v221_v53 = vld [vmem:[#allocation5 + $0x2c8] sm:$0xff] }
  0xab   :  { %2615 = vmatprep.subr.bf16.mxu1 %v6102_v57  ;;  %v6452_v24 = vcombine.high %v508_v16, %v512_v17  ;;  %v500_v26 = vld [vmem:[#allocation5 + $0xb80] sm:$0xff]  ;;  %v6451_v31 = vcombine.low %v508_v16, %v512_v17  ;;  %v6173_v57 = vcombine.low %v229_v45, %v233_v47  ;;  %v6166_v0 = vcombine.high %v221_v53, %v225_v55  ;;  %v201_v17 = vld [vmem:[#allocation5 + $0x228] sm:$0xff] }
  0xac   :  { %v504_v27 = vld [vmem:[#allocation5 + $0xba0] sm:$0xff]  ;;  %v433_v47 = vld [vmem:[#allocation5 + $0x968] sm:$0xff] }
  0xad   :  { %2573 = vmatpush1.bf16.msra.mxu0 %v6355_v60  ;;  %v6444_v34 = vcombine.high %v500_v26, %v504_v27  ;;  %v492_v35 = vld [vmem:[#allocation5 + $0xb40] sm:$0xff]  ;;  %v6443_v40 = vcombine.low %v500_v26, %v504_v27 }
  0xae   :  { %2616 = vmatpush1.bf16.msra.mxu1 %v6101_v61  ;;  %2574 = vmatprep.subr.bf16.mxu0 %v6348_v62  ;;  %v496_v36 = vld [vmem:[#allocation5 + $0xb60] sm:$0xff]  ;;  %v213_v62 = vld [vmem:[#allocation5 + $0x288] sm:$0xff] }
  0xaf   :  { %2617 = vmatprep.subr.bf16.mxu1 %v6094_v3  ;;  %v6436_v42 = vcombine.high %v492_v35, %v496_v36  ;;  %v484_v43 = vld [vmem:[#allocation5 + $0xb00] sm:$0xff]  ;;  %v6435_v48 = vcombine.low %v492_v35, %v496_v36  ;;  %v6165_v3 = vcombine.low %v221_v53, %v225_v55  ;;  %v6158_v8 = vcombine.high %v213_v62, %v217_v1  ;;  %v313_v35 = vld [vmem:[#allocation5 + $0x5a8] sm:$0xff] }
  0xb0   :  { %v488_v44 = vld [vmem:[#allocation5 + $0xb20] sm:$0xff]  ;;  %v437_v36 = vld [vmem:[#allocation5 + $0x988] sm:$0xff] }
  0xb1   :  { %2575 = vmatpush1.bf16.msra.mxu0 %v6347_v5  ;;  %v6428_v50 = vcombine.high %v484_v43, %v488_v44  ;;  %v476_v51 = vld [vmem:[#allocation5 + $0xac0] sm:$0xff]  ;;  %v6427_v56 = vcombine.low %v484_v43, %v488_v44  ;;  %v301_v43 = vld [vmem:[#allocation5 + $0x548] sm:$0xff] }
  0xb2   :  { %2618 = vmatpush1.bf16.msra.mxu1 %v6093_v6  ;;  %2576 = vmatprep.subr.bf16.mxu0 %v6340_v7  ;;  %v480_v52 = vld [vmem:[#allocation5 + $0xae0] sm:$0xff]  ;;  %v205_v7 = vld [vmem:[#allocation5 + $0x248] sm:$0xff] }
  0xb3   :  { %2619 = vmatprep.subr.bf16.mxu1 %v6086_v11  ;;  %v6420_v59 = vcombine.high %v476_v51, %v480_v52  ;;  %v468_v60 = vld [vmem:[#allocation5 + $0xa80] sm:$0xff]  ;;  %v6419_v2 = vcombine.low %v476_v51, %v480_v52  ;;  %v6157_v11 = vcombine.low %v213_v62, %v217_v1  ;;  %v6150_v16 = vcombine.high %v205_v7, %v209_v9  ;;  %v305_v44 = vld [vmem:[#allocation5 + $0x568] sm:$0xff] }
  0xb4   :  { %v472_v61 = vld [vmem:[#allocation5 + $0xaa0] sm:$0xff]  ;;  %v293_v51 = vld [vmem:[#allocation5 + $0x508] sm:$0xff] }
  0xb5   :  { %2577 = vmatpush1.bf16.msra.mxu0 %v6339_v13  ;;  %v6412_v4 = vcombine.high %v468_v60, %v472_v61  ;;  %v460_v5 = vld [vmem:[#allocation5 + $0xa40] sm:$0xff]  ;;  %v6411_v10 = vcombine.low %v468_v60, %v472_v61  ;;  %v297_v52 = vld [vmem:[#allocation5 + $0x528] sm:$0xff] }
  0xb6   :  { %2620 = vmatpush1.bf16.msra.mxu1 %v6085_v14  ;;  %2578 = vmatprep.subr.bf16.mxu0 %v6332_v15  ;;  %v464_v6 = vld [vmem:[#allocation5 + $0xa60] sm:$0xff]  ;;  %v197_v15 = vld [vmem:[#allocation5 + $0x208] sm:$0xff] }
  0xb7   :  { %2621 = vmatprep.subr.bf16.mxu1 %v6078_v19  ;;  %v6404_v12 = vcombine.high %v460_v5, %v464_v6  ;;  %v452_v13 = vld [vmem:[#allocation5 + $0xa00] sm:$0xff]  ;;  %v6403_v18 = vcombine.low %v460_v5, %v464_v6  ;;  %v6149_v19 = vcombine.low %v205_v7, %v209_v9  ;;  %v6142_v26 = vcombine.high %v197_v15, %v201_v17  ;;  %v421_v53 = vld [vmem:[#allocation5 + $0x908] sm:$0xff] }
  0xb8   :  { %v456_v14 = vld [vmem:[#allocation5 + $0xa20] sm:$0xff]  ;;  %v425_v55 = vld [vmem:[#allocation5 + $0x928] sm:$0xff] }
  0xb9   :  { %2579 = vmatpush1.bf16.msra.mxu0 %v6331_v22  ;;  %v6396_v20 = vcombine.high %v452_v13, %v456_v14  ;;  %v317_v22 = vld [vmem:[#allocation5 + $0x5c8] sm:$0xff]  ;;  %v118_v27 = vld [vmem:[#allocation2 + $0x20] sm:$0xff]  ;;  %v6395_v30 = vcombine.low %v452_v13, %v456_v14 }
  0xba   :  { %2622 = vmatpush1.bf16.msra.mxu1 %v6077_v23  ;;  %2580 = vmatprep.subr.bf16.mxu0 %v6452_v24  ;;  %v321_v23 = vld [vmem:[#allocation5 + $0x5e8] sm:$0xff]  ;;  %v7714_v39 = vpack.c.bf16 %v124_v28, %v118_v27 }
  0xbb   :  { %2623 = vmatprep.subr.bf16.mxu1 %v6198_v29  ;;  %v445_v24 = vld [vmem:[#allocation5 + $0x9c8] sm:$0xff] }
  0xbc   :  { %v449_v29 = vld [vmem:[#allocation5 + $0x9e8] sm:$0xff] }
  0xbd   :  { %2581 = vmatpush2.bf16.msra.mxu0 %v6451_v31  ;;  %v6141_v31 = vcombine.low %v197_v15, %v201_v17  ;;  %v6390_v37 = vcombine.high %v445_v24, %v449_v29  ;;  %v285_v60 = vld [vmem:[#allocation5 + $0x4c8] sm:$0xff] }
  0xbe   :  { %2624 = vmatpush2.bf16.msra.mxu1 %v6197_v33  ;;  %2582 = vmatprep.subr.bf16.mxu0 %v6444_v34  ;;  %v6262_v33 = vcombine.high %v317_v22, %v321_v23  ;;  %v309_v34 = vld [vmem:[#allocation5 + $0x588] sm:$0xff] }
  0xbf   :  { %2625 = vmatprep.subr.bf16.mxu1 %v6190_v38  ;;  %v441_v38 = vld [vmem:[#allocation5 + $0x9a8] sm:$0xff] }
  0xc0   :  { %v6382_v45 = vcombine.high %v437_v36, %v441_v38  ;;  %v289_v61 = vld [vmem:[#allocation5 + $0x4e8] sm:$0xff] }
  0xc1   :  { %2583 = vmatpush2.bf16.msra.mxu0 %v6443_v40  ;;  %v6261_v40 = vcombine.low %v317_v22, %v321_v23  ;;  %v413_v62 = vld [vmem:[#allocation5 + $0x8c8] sm:$0xff] }
  0xc2   :  { %2626 = vmatpush2.bf16.msra.mxu1 %v6189_v41  ;;  %2584 = vmatprep.subr.bf16.mxu0 %v6436_v42  ;;  %v6389_v41 = vcombine.low %v445_v24, %v449_v29  ;;  %v6254_v42 = vcombine.high %v309_v34, %v313_v35  ;;  %v417_v1 = vld [vmem:[#allocation5 + $0x8e8] sm:$0xff] }
  0xc3   :  { %2627 = vmatprep.subr.bf16.mxu1 %v6182_v46  ;;  %v429_v46 = vld [vmem:[#allocation5 + $0x948] sm:$0xff] }
  0xc4   :  { %v277_v5 = vld [vmem:[#allocation5 + $0x488] sm:$0xff] }
  0xc5   :  { %2585 = vmatpush2.bf16.msra.mxu0 %v6435_v48  ;;  %v6253_v48 = vcombine.low %v309_v34, %v313_v35  ;;  %v281_v6 = vld [vmem:[#allocation5 + $0x4a8] sm:$0xff] }
  0xc6   :  { %2628 = vmatpush2.bf16.msra.mxu1 %v6181_v49  ;;  %2586 = vmatprep.subr.bf16.mxu0 %v6428_v50  ;;  %v6381_v49 = vcombine.low %v437_v36, %v441_v38  ;;  %v6246_v50 = vcombine.high %v301_v43, %v305_v44  ;;  %v405_v7 = vld [vmem:[#allocation5 + $0x888] sm:$0xff] }
  0xc7   :  { %2629 = vmatprep.subr.bf16.mxu1 %v6174_v54  ;;  %v6374_v54 = vcombine.high %v429_v46, %v433_v47  ;;  %v409_v9 = vld [vmem:[#allocation5 + $0x8a8] sm:$0xff] }
  0xc8   :  { %v269_v13 = vld [vmem:[#allocation5 + $0x448] sm:$0xff] }
  0xc9   :  { %2587 = vmatpush2.bf16.msra.mxu0 %v6427_v56  ;;  %v6245_v56 = vcombine.low %v301_v43, %v305_v44  ;;  %v273_v14 = vld [vmem:[#allocation5 + $0x468] sm:$0xff] }
  0xca   :  { %2630 = vmatpush2.bf16.msra.mxu1 %v6173_v57  ;;  %2588 = vmatprep.subr.bf16.mxu0 %v6420_v59  ;;  %v6373_v57 = vcombine.low %v429_v46, %v433_v47  ;;  %v6238_v59 = vcombine.high %v293_v51, %v297_v52  ;;  %v397_v15 = vld [vmem:[#allocation5 + $0x848] sm:$0xff]  ;;  %v6213_v28 = vcombine.low %v269_v13, %v273_v14 }
  0xcb   :  { %2631 = vmatprep.subr.bf16.mxu1 %v6166_v0  ;;  %v6366_v0 = vcombine.high %v421_v53, %v425_v55  ;;  %v401_v17 = vld [vmem:[#allocation5 + $0x868] sm:$0xff] }
  0xcc   :  { %v261_v22 = vld [vmem:[#allocation5 + $0x408] sm:$0xff]  ;;  %v6341_v29 = vcombine.low %v397_v15, %v401_v17 }
  0xcd   :  { %2589 = vmatpush2.bf16.msra.mxu0 %v6419_v2  ;;  %v6237_v2 = vcombine.low %v293_v51, %v297_v52  ;;  %v265_v23 = vld [vmem:[#allocation5 + $0x428] sm:$0xff] }
  0xce   :  { %2632 = vmatpush2.bf16.msra.mxu1 %v6165_v3  ;;  %2590 = vmatprep.subr.bf16.mxu0 %v6412_v4  ;;  %v6365_v3 = vcombine.low %v421_v53, %v425_v55  ;;  %v6230_v4 = vcombine.high %v285_v60, %v289_v61  ;;  %v389_v24 = vld [vmem:[#allocation5 + $0x808] sm:$0xff] }
  0xcf   :  { %2633 = vmatprep.subr.bf16.mxu1 %v6158_v8  ;;  %v6358_v8 = vcombine.high %v413_v62, %v417_v1  ;;  %v393_v27 = vld [vmem:[#allocation5 + $0x828] sm:$0xff] }
  0xd0   :  { %v509_v34 = vld [vmem:[#allocation5 + $0xbc8] sm:$0xff]  ;;  %v6334_v35 = vcombine.high %v389_v24, %v393_v27  ;;  %v6333_v38 = vcombine.low %v389_v24, %v393_v27 }
  0xd1   :  { %2591 = vmatpush2.bf16.msra.mxu0 %v6411_v10  ;;  %v6229_v10 = vcombine.low %v285_v60, %v289_v61  ;;  %v513_v36 = vld [vmem:[#allocation5 + $0xbe8] sm:$0xff] }
  0xd2   :  { %2634 = vmatpush2.bf16.msra.mxu1 %v6157_v11  ;;  %2592 = vmatprep.subr.bf16.mxu0 %v6404_v12  ;;  %v6357_v11 = vcombine.low %v413_v62, %v417_v1  ;;  %v6222_v12 = vcombine.high %v277_v5, %v281_v6  ;;  %v501_v43 = vld [vmem:[#allocation5 + $0xb88] sm:$0xff]  ;;  %v6454_v44 = vcombine.high %v509_v34, %v513_v36 }
  0xd3   :  { %2635 = vmatprep.subr.bf16.mxu1 %v6150_v16  ;;  %v6350_v16 = vcombine.high %v405_v7, %v409_v9  ;;  %v6453_v47 = vcombine.low %v509_v34, %v513_v36  ;;  %v493_v51 = vld [vmem:[#allocation5 + $0xb48] sm:$0xff] }
  0xd4   :  { %v497_v53 = vld [vmem:[#allocation5 + $0xb68] sm:$0xff] }
  0xd5   :  { %2593 = vmatpush2.bf16.msra.mxu0 %v6403_v18  ;;  %v6221_v18 = vcombine.low %v277_v5, %v281_v6  ;;  %v485_v60 = vld [vmem:[#allocation5 + $0xb08] sm:$0xff]  ;;  %v6438_v61 = vcombine.high %v493_v51, %v497_v53  ;;  %v6437_v1 = vcombine.low %v493_v51, %v497_v53  ;;  %v314_v51 = vld [vmem:[#allocation5 + $0x5b0] sm:$0xff] }
  0xd6   :  { %2636 = vmatpush2.bf16.msra.mxu1 %v6149_v19  ;;  %2594 = vmatprep.subr.bf16.mxu0 %v6396_v20  ;;  %v6349_v19 = vcombine.low %v405_v7, %v409_v9  ;;  %v6214_v20 = vcombine.high %v269_v13, %v273_v14  ;;  %v489_v62 = vld [vmem:[#allocation5 + $0xb28] sm:$0xff] }
  0xd7   :  { %2637 = vmatprep.subr.bf16.mxu1 %v6142_v26  ;;  %v6342_v26 = vcombine.high %v397_v15, %v401_v17  ;;  %v477_v5 = vld [vmem:[#allocation5 + $0xac8] sm:$0xff]  ;;  %v6430_v6 = vcombine.high %v485_v60, %v489_v62  ;;  %v6429_v9 = vcombine.low %v485_v60, %v489_v62  ;;  %v306_v60 = vld [vmem:[#allocation5 + $0x570] sm:$0xff] }
  0xd8   :  { %v481_v7 = vld [vmem:[#allocation5 + $0xae8] sm:$0xff] }
  0xd9   :  { %2595 = vmatpush2.bf16.msra.mxu0 %v6395_v30  ;;  %v6206_v30 = vcombine.high %v261_v22, %v265_v23  ;;  %v469_v13 = vld [vmem:[#allocation5 + $0xa88] sm:$0xff]  ;;  %v6422_v14 = vcombine.high %v477_v5, %v481_v7  ;;  %v6421_v17 = vcombine.low %v477_v5, %v481_v7  ;;  %v298_v5 = vld [vmem:[#allocation5 + $0x530] sm:$0xff] }
  0xda   :  { %2638 = vmatpush2.bf16.msra.mxu1 %v6141_v31  ;;  %2650 = vmatprep.subr.bf16.mxu0 %v6262_v33  ;;  %v381_v31 = vld [vmem:[#allocation5 + $0x7c8] sm:$0xff] }
  0xdb   :  { %2693 = vmatprep.subr.bf16.mxu1 %v6390_v37  ;;  %v385_v33 = vld [vmem:[#allocation5 + $0x7e8] sm:$0xff]  ;;  %v6205_v37 = vcombine.low %v261_v22, %v265_v23 }
  0xdc   :  { %2597 = vmatmul.mubr.bf16.vlgmr.msra.gmra.mxu0 %v7714_v39  ;;  %v6325_v46 = vcombine.low %v381_v31, %v385_v33  ;;  %v473_v15 = vld [vmem:[#allocation5 + $0xaa8] sm:$0xff] }
  0xdd   :  { %2640 = vmatmul.mubr.bf16.vlgmr.msra.gmra.mxu1 %v7704_v21  ;;  %2651 = vmatpush1.bf16.msra.mxu0 %v6261_v40  ;;  %v6326_v40 = vcombine.high %v381_v31, %v385_v33  ;;  %v461_v22 = vld [vmem:[#allocation5 + $0xa48] sm:$0xff]  ;;  %v6414_v23 = vcombine.high %v469_v13, %v473_v15  ;;  %v6413_v27 = vcombine.low %v469_v13, %v473_v15  ;;  %v290_v13 = vld [vmem:[#allocation5 + $0x4f0] sm:$0xff] }
  0xde   :  { %2694 = vmatpush1.bf16.msra.mxu1 %v6389_v41  ;;  %2652 = vmatprep.subr.bf16.mxu0 %v6254_v42  ;;  %v373_v41 = vld [vmem:[#allocation5 + $0x788] sm:$0xff] }
  0xdf   :  { %2695 = vmatprep.subr.bf16.mxu1 %v6382_v45  ;;  %2682 = vmatprep.mubr.bf16.mxu0 %v7700_v63  ;;  %v377_v42 = vld [vmem:[#allocation5 + $0x7a8] sm:$0xff] }
  0xe0   :  { %2725 = vmatprep.mubr.bf16.mxu1 %v7708_v32  ;;  %v505_v45 = vld [vmem:[#allocation5 + $0xba8] sm:$0xff] }
  0xe1   :  { %2653 = vmatpush1.bf16.msra.mxu0 %v6253_v48  ;;  %v6318_v48 = vcombine.high %v373_v41, %v377_v42  ;;  %v6446_v52 = vcombine.high %v501_v43, %v505_v45  ;;  %v6445_v55 = vcombine.low %v501_v43, %v505_v45  ;;  %v465_v24 = vld [vmem:[#allocation5 + $0xa68] sm:$0xff]  ;;  %v322_v43 = vld [vmem:[#allocation5 + $0x5f0] sm:$0xff] }
  0xe2   :  { %2696 = vmatpush1.bf16.msra.mxu1 %v6381_v49  ;;  %2654 = vmatprep.subr.bf16.mxu0 %v6246_v50  ;;  %v365_v49 = vld [vmem:[#allocation5 + $0x748] sm:$0xff]  ;;  %v6406_v33 = vcombine.high %v461_v22, %v465_v24  ;;  %v6405_v36 = vcombine.low %v461_v22, %v465_v24  ;;  %v282_v22 = vld [vmem:[#allocation5 + $0x4b0] sm:$0xff] }
  0xe3   :  { %2697 = vmatprep.subr.bf16.mxu1 %v6374_v54  ;;  %v369_v50 = vld [vmem:[#allocation5 + $0x768] sm:$0xff]  ;;  %v6317_v54 = vcombine.low %v373_v41, %v377_v42  ;;  %v318_v41 = vld [vmem:[#allocation5 + $0x5d0] sm:$0xff] }
  0xe4   :  { %v453_v31 = vld [vmem:[#allocation5 + $0xa08] sm:$0xff]  ;;  %v6263_v53 = vcombine.low %v318_v41, %v322_v43 }
  0xe5   :  { %2655 = vmatpush1.bf16.msra.mxu0 %v6245_v56  ;;  %v6310_v56 = vcombine.high %v365_v49, %v369_v50  ;;  %v457_v34 = vld [vmem:[#allocation5 + $0xa28] sm:$0xff] }
  0xe6   :  { %2698 = vmatpush1.bf16.msra.mxu1 %v6373_v57  ;;  %2656 = vmatprep.subr.bf16.mxu0 %v6238_v59  ;;  %v357_v57 = vld [vmem:[#allocation5 + $0x708] sm:$0xff]  ;;  %v6398_v42 = vcombine.high %v453_v31, %v457_v34  ;;  %v6397_v45 = vcombine.low %v453_v31, %v457_v34  ;;  %v274_v31 = vld [vmem:[#allocation5 + $0x470] sm:$0xff] }
  0xe7   :  { %2699 = vmatprep.subr.bf16.mxu1 %v6366_v0  ;;  %v361_v59 = vld [vmem:[#allocation5 + $0x728] sm:$0xff]  ;;  %v6309_v0 = vcombine.low %v365_v49, %v369_v50  ;;  %v310_v49 = vld [vmem:[#allocation5 + $0x590] sm:$0xff]  ;;  %v6264_v50 = vcombine.high %v318_v41, %v322_v43 }
  0xe8   :  { %v6255_v62 = vcombine.low %v310_v49, %v314_v51  ;;  %v266_v41 = vld [vmem:[#allocation5 + $0x430] sm:$0xff] }
  0xe9   :  { %2657 = vmatpush1.bf16.msra.mxu0 %v6237_v2  ;;  %v6302_v2 = vcombine.high %v357_v57, %v361_v59 }
  0xea   :  { %2700 = vmatpush1.bf16.msra.mxu1 %v6365_v3  ;;  %2658 = vmatprep.subr.bf16.mxu0 %v6230_v4  ;;  %v349_v3 = vld [vmem:[#allocation5 + $0x6c8] sm:$0xff] }
  0xeb   :  { %2701 = vmatprep.subr.bf16.mxu1 %v6358_v8  ;;  %v353_v4 = vld [vmem:[#allocation5 + $0x6e8] sm:$0xff]  ;;  %v6301_v8 = vcombine.low %v357_v57, %v361_v59  ;;  %v302_v57 = vld [vmem:[#allocation5 + $0x550] sm:$0xff]  ;;  %v6256_v59 = vcombine.high %v310_v49, %v314_v51 }
  0xec   :  { %v6247_v7 = vcombine.low %v302_v57, %v306_v60  ;;  %v386_v49 = vld [vmem:[#allocation5 + $0x7f0] sm:$0xff] }
  0xed   :  { %2659 = vmatpush1.bf16.msra.mxu0 %v6229_v10  ;;  %v6294_v10 = vcombine.high %v349_v3, %v353_v4 }
  0xee   :  { %2702 = vmatpush1.bf16.msra.mxu1 %v6357_v11  ;;  %2660 = vmatprep.subr.bf16.mxu0 %v6222_v12  ;;  %v341_v11 = vld [vmem:[#allocation5 + $0x688] sm:$0xff] }
  0xef   :  { %2703 = vmatprep.subr.bf16.mxu1 %v6350_v16  ;;  %v345_v12 = vld [vmem:[#allocation5 + $0x6a8] sm:$0xff]  ;;  %v6293_v16 = vcombine.low %v349_v3, %v353_v4  ;;  %v294_v3 = vld [vmem:[#allocation5 + $0x510] sm:$0xff]  ;;  %v6248_v4 = vcombine.high %v302_v57, %v306_v60 }
  0xf0   :  { %v6239_v15 = vcombine.low %v294_v3, %v298_v5  ;;  %v378_v57 = vld [vmem:[#allocation5 + $0x7b0] sm:$0xff] }
  0xf1   :  { %2661 = vmatpush1.bf16.msra.mxu0 %v6221_v18  ;;  %v6286_v18 = vcombine.high %v341_v11, %v345_v12 }
  0xf2   :  { %2704 = vmatpush1.bf16.msra.mxu1 %v6349_v19  ;;  %2662 = vmatprep.subr.bf16.mxu0 %v6214_v20  ;;  %v333_v19 = vld [vmem:[#allocation5 + $0x648] sm:$0xff] }
  0xf3   :  { %2705 = vmatprep.subr.bf16.mxu1 %v6342_v26  ;;  %v337_v20 = vld [vmem:[#allocation5 + $0x668] sm:$0xff]  ;;  %v6285_v26 = vcombine.low %v341_v11, %v345_v12  ;;  %v286_v11 = vld [vmem:[#allocation5 + $0x4d0] sm:$0xff]  ;;  %v6240_v12 = vcombine.high %v294_v3, %v298_v5 }
  0xf4   :  { %v6231_v24 = vcombine.low %v286_v11, %v290_v13  ;;  %v370_v3 = vld [vmem:[#allocation5 + $0x770] sm:$0xff] }
  0xf5   :  { %2663 = vmatpush1.bf16.msra.mxu0 %v6213_v28  ;;  %v6278_v28 = vcombine.high %v333_v19, %v337_v20 }
  0xf6   :  { %2706 = vmatpush1.bf16.msra.mxu1 %v6341_v29  ;;  %2664 = vmatprep.subr.bf16.mxu0 %v6206_v30  ;;  %v325_v29 = vld [vmem:[#allocation5 + $0x608] sm:$0xff] }
  0xf7   :  { %2707 = vmatprep.subr.bf16.mxu1 %v6334_v35  ;;  %v329_v30 = vld [vmem:[#allocation5 + $0x628] sm:$0xff]  ;;  %v6277_v35 = vcombine.low %v333_v19, %v337_v20  ;;  %v278_v19 = vld [vmem:[#allocation5 + $0x490] sm:$0xff]  ;;  %v6232_v20 = vcombine.high %v286_v11, %v290_v13 }
  0xf8   :  { %v6223_v34 = vcombine.low %v278_v19, %v282_v22  ;;  %v362_v11 = vld [vmem:[#allocation5 + $0x730] sm:$0xff] }
  0xf9   :  { %2665 = vmatpush1.bf16.msra.mxu0 %v6205_v37  ;;  %v6270_v37 = vcombine.high %v325_v29, %v329_v30 }
  0xfa   :  { %2708 = vmatpush1.bf16.msra.mxu1 %v6333_v38  ;;  %2666 = vmatprep.subr.bf16.mxu0 %v6326_v40  ;;  %v190_v38 = vld [vmem:[#allocation5 + $0x1d0] sm:$0xff] }
  0xfb   :  { %2709 = vmatprep.subr.bf16.mxu1 %v6454_v44  ;;  %v194_v40 = vld [vmem:[#allocation5 + $0x1f0] sm:$0xff]  ;;  %v6269_v44 = vcombine.low %v325_v29, %v329_v30  ;;  %v6224_v30 = vcombine.high %v278_v19, %v282_v22 }
  0xfc   :  { %v270_v29 = vld [vmem:[#allocation5 + $0x450] sm:$0xff] }
  0xfd   :  { %2667 = vmatpush2.bf16.msra.mxu0 %v6325_v46  ;;  %v6136_v46 = vcombine.high %v190_v38, %v194_v40  ;;  %v6215_v43 = vcombine.low %v270_v29, %v274_v31  ;;  %v354_v19 = vld [vmem:[#allocation5 + $0x6f0] sm:$0xff] }
  0xfe   :  { %2710 = vmatpush2.bf16.msra.mxu1 %v6453_v47  ;;  %2668 = vmatprep.subr.bf16.mxu0 %v6318_v48  ;;  %v182_v47 = vld [vmem:[#allocation5 + $0x190] sm:$0xff] }
  0xff   :  { %2711 = vmatprep.subr.bf16.mxu1 %v6446_v52  ;;  %v186_v48 = vld [vmem:[#allocation5 + $0x1b0] sm:$0xff]  ;;  %v6135_v52 = vcombine.low %v190_v38, %v194_v40  ;;  %v6216_v40 = vcombine.high %v270_v29, %v274_v31 }
 0x100   :  { %v262_v38 = vld [vmem:[#allocation5 + $0x410] sm:$0xff] }
 0x101   :  { %2669 = vmatpush2.bf16.msra.mxu0 %v6317_v54  ;;  %v6128_v54 = vcombine.high %v182_v47, %v186_v48  ;;  %v6207_v51 = vcombine.low %v262_v38, %v266_v41  ;;  %v346_v29 = vld [vmem:[#allocation5 + $0x6b0] sm:$0xff] }
 0x102   :  { %2712 = vmatpush2.bf16.msra.mxu1 %v6445_v55  ;;  %2670 = vmatprep.subr.bf16.mxu0 %v6310_v56  ;;  %v174_v55 = vld [vmem:[#allocation5 + $0x150] sm:$0xff] }
 0x103   :  { %2713 = vmatprep.subr.bf16.mxu1 %v6438_v61  ;;  %v178_v56 = vld [vmem:[#allocation5 + $0x170] sm:$0xff]  ;;  %v6127_v61 = vcombine.low %v182_v47, %v186_v48  ;;  %v6208_v48 = vcombine.high %v262_v38, %v266_v41  ;;  %v518_v41 = vlaneseq }
 0x104   :  { %v382_v47 = vld [vmem:[#allocation5 + $0x7d0] sm:$0xff] }
 0x105   :  { %2671 = vmatpush2.bf16.msra.mxu0 %v6309_v0  ;;  %v6120_v0 = vcombine.high %v174_v55, %v178_v56  ;;  %v6327_v60 = vcombine.low %v382_v47, %v386_v49  ;;  %v338_v38 = vld [vmem:[#allocation5 + $0x670] sm:$0xff] }
 0x106   :  { %2714 = vmatpush2.bf16.msra.mxu1 %v6437_v1  ;;  %2672 = vmatprep.subr.bf16.mxu0 %v6302_v2  ;;  %v166_v1 = vld [vmem:[#allocation5 + $0x110] sm:$0xff] }
 0x107   :  { %2715 = vmatprep.subr.bf16.mxu1 %v6430_v6  ;;  %v170_v2 = vld [vmem:[#allocation5 + $0x130] sm:$0xff]  ;;  %v6119_v6 = vcombine.low %v174_v55, %v178_v56  ;;  %v6328_v56 = vcombine.high %v382_v47, %v386_v49 }
 0x108   :  { %v374_v55 = vld [vmem:[#allocation5 + $0x790] sm:$0xff] }
 0x109   :  { %2673 = vmatpush2.bf16.msra.mxu0 %v6301_v8  ;;  %v6112_v8 = vcombine.high %v166_v1, %v170_v2  ;;  %v6319_v5 = vcombine.low %v374_v55, %v378_v57 }
 0x10a   :  { %2716 = vmatpush2.bf16.msra.mxu1 %v6429_v9  ;;  %2674 = vmatprep.subr.bf16.mxu0 %v6294_v10  ;;  %v158_v9 = vld [vmem:[#allocation5 + $0xd0] sm:$0xff] }
 0x10b   :  { %2717 = vmatprep.subr.bf16.mxu1 %v6422_v14  ;;  %v162_v10 = vld [vmem:[#allocation5 + $0xf0] sm:$0xff]  ;;  %v6111_v14 = vcombine.low %v166_v1, %v170_v2  ;;  %v6320_v2 = vcombine.high %v374_v55, %v378_v57  ;;  %v191_v55 = vld [vmem:[#allocation5 + $0x1d8] sm:$0xff] }
 0x10c   :  { %v366_v1 = vld [vmem:[#allocation5 + $0x750] sm:$0xff]  ;;  %v195_v57 = vld [vmem:[#allocation5 + $0x1f8] sm:$0xff] }
 0x10d   :  { %2675 = vmatpush2.bf16.msra.mxu0 %v6293_v16  ;;  %v6104_v16 = vcombine.high %v158_v9, %v162_v10  ;;  %v6311_v13 = vcombine.low %v366_v1, %v370_v3 }
 0x10e   :  { %2718 = vmatpush2.bf16.msra.mxu1 %v6421_v17  ;;  %2676 = vmatprep.subr.bf16.mxu0 %v6286_v18  ;;  %v150_v17 = vld [vmem:[#allocation5 + $0x90] sm:$0xff] }
 0x10f   :  { %2719 = vmatprep.subr.bf16.mxu1 %v6414_v23  ;;  %v154_v18 = vld [vmem:[#allocation5 + $0xb0] sm:$0xff]  ;;  %v6103_v23 = vcombine.low %v158_v9, %v162_v10  ;;  %v6312_v10 = vcombine.high %v366_v1, %v370_v3  ;;  %v183_v3 = vld [vmem:[#allocation5 + $0x198] sm:$0xff] }
 0x110   :  { %v358_v9 = vld [vmem:[#allocation5 + $0x710] sm:$0xff] }
 0x111   :  { %2677 = vmatpush2.bf16.msra.mxu0 %v6285_v26  ;;  %v6096_v26 = vcombine.high %v150_v17, %v154_v18  ;;  %v6303_v22 = vcombine.low %v358_v9, %v362_v11  ;;  %v438_v1 = vld [vmem:[#allocation5 + $0x990] sm:$0xff] }
 0x112   :  { %2720 = vmatpush2.bf16.msra.mxu1 %v6413_v27  ;;  %2678 = vmatprep.subr.bf16.mxu0 %v6278_v28  ;;  %v142_v27 = vld [vmem:[#allocation5 + $0x50] sm:$0xff] }
 0x113   :  { %2721 = vmatprep.subr.bf16.mxu1 %v6406_v33  ;;  %v146_v28 = vld [vmem:[#allocation5 + $0x70] sm:$0xff]  ;;  %v6095_v33 = vcombine.low %v150_v17, %v154_v18  ;;  %v6304_v18 = vcombine.high %v358_v9, %v362_v11 }
 0x114   :  { %v350_v17 = vld [vmem:[#allocation5 + $0x6d0] sm:$0xff] }
 0x115   :  { %2679 = vmatpush2.bf16.msra.mxu0 %v6277_v35  ;;  %v6088_v35 = vcombine.high %v142_v27, %v146_v28  ;;  %v6295_v31 = vcombine.low %v350_v17, %v354_v19  ;;  %v430_v11 = vld [vmem:[#allocation5 + $0x950] sm:$0xff] }
 0x116   :  { %2722 = vmatpush2.bf16.msra.mxu1 %v6405_v36  ;;  %2680 = vmatprep.subr.bf16.mxu0 %v6270_v37  ;;  %v134_v36 = vld [vmem:[#allocation5 + $0x10] sm:$0xff] }
 0x117   :  { %2723 = vmatprep.subr.bf16.mxu1 %v6398_v42  ;;  %v138_v37 = vld [vmem:[#allocation5 + $0x30] sm:$0xff]  ;;  %v6087_v42 = vcombine.low %v142_v27, %v146_v28  ;;  %v6296_v28 = vcombine.high %v350_v17, %v354_v19 }
 0x118   :  { %v342_v27 = vld [vmem:[#allocation5 + $0x690] sm:$0xff] }
 0x119   :  { %2681 = vmatpush2.bf16.msra.mxu0 %v6269_v44  ;;  %v6080_v44 = vcombine.high %v134_v36, %v138_v37 }
 0x11a   :  { %2724 = vmatpush2.bf16.msra.mxu1 %v6397_v45  ;;  %2736 = vmatprep.subr.bf16.mxu0 %v6136_v46  ;;  %v254_v45 = vld [vmem:[#allocation5 + $0x3d0] sm:$0xff] }
 0x11b   :  { %2779 = vmatprep.subr.bf16.mxu1 %v6264_v50  ;;  %v258_v46 = vld [vmem:[#allocation5 + $0x3f0] sm:$0xff]  ;;  %v6079_v50 = vcombine.low %v134_v36, %v138_v37  ;;  %v6288_v37 = vcombine.high %v342_v27, %v346_v29 }
 0x11c   :  { %2683 = vmatmul.mubr.bf16.vlgmr.msra.gmra.mxu0 %v7706_v25  ;;  %v334_v36 = vld [vmem:[#allocation5 + $0x650] sm:$0xff] }
 0x11d   :  { %2726 = vmatmul.mubr.bf16.vlgmr.msra.gmra.mxu1 %v7714_v39  ;;  %2737 = vmatpush1.bf16.msra.mxu0 %v6135_v52  ;;  %v6200_v52 = vcombine.high %v254_v45, %v258_v46  ;;  %v6280_v47 = vcombine.high %v334_v36, %v338_v38 }
 0x11e   :  { %2780 = vmatpush1.bf16.msra.mxu1 %v6263_v53  ;;  %2738 = vmatprep.subr.bf16.mxu0 %v6128_v54  ;;  %v246_v53 = vld [vmem:[#allocation5 + $0x390] sm:$0xff] }
 0x11f   :  { %2781 = vmatprep.subr.bf16.mxu1 %v6256_v59  ;;  %2768 = vmatprep.mubr.bf16.mxu0 %v7698_v58  ;;  %v250_v54 = vld [vmem:[#allocation5 + $0x3b0] sm:$0xff]  ;;  %v6199_v59 = vcombine.low %v254_v45, %v258_v46 }
 0x120   :  { %2811 = vmatprep.mubr.bf16.mxu1 %v7700_v63  ;;  %v202_v45 = vld [vmem:[#allocation5 + $0x230] sm:$0xff] }
 0x121   :  { %2739 = vmatpush1.bf16.msra.mxu0 %v6127_v61  ;;  %v6192_v61 = vcombine.high %v246_v53, %v250_v54  ;;  %v326_v46 = vld [vmem:[#allocation5 + $0x610] sm:$0xff] }
 0x122   :  { %2782 = vmatpush1.bf16.msra.mxu1 %v6255_v62  ;;  %2740 = vmatprep.subr.bf16.mxu0 %v6120_v0  ;;  %v238_v62 = vld [vmem:[#allocation5 + $0x350] sm:$0xff] }
 0x123   :  { %2783 = vmatprep.subr.bf16.mxu1 %v6248_v4  ;;  %v242_v0 = vld [vmem:[#allocation5 + $0x370] sm:$0xff]  ;;  %v6191_v4 = vcombine.low %v246_v53, %v250_v54 }
 0x124   :  { %v446_v53 = vld [vmem:[#allocation5 + $0x9d0] sm:$0xff] }
 0x125   :  { %2741 = vmatpush1.bf16.msra.mxu0 %v6119_v6  ;;  %v6184_v6 = vcombine.high %v238_v62, %v242_v0  ;;  %v450_v54 = vld [vmem:[#allocation5 + $0x9f0] sm:$0xff] }
 0x126   :  { %2784 = vmatpush1.bf16.msra.mxu1 %v6247_v7  ;;  %2742 = vmatprep.subr.bf16.mxu0 %v6112_v8  ;;  %v230_v7 = vld [vmem:[#allocation5 + $0x310] sm:$0xff] }
 0x127   :  { %2785 = vmatprep.subr.bf16.mxu1 %v6240_v12  ;;  %v234_v8 = vld [vmem:[#allocation5 + $0x330] sm:$0xff]  ;;  %v6183_v12 = vcombine.low %v238_v62, %v242_v0  ;;  %v6392_v0 = vcombine.high %v446_v53, %v450_v54 }
 0x129   :  { %2743 = vmatpush1.bf16.msra.mxu0 %v6111_v14  ;;  %v6176_v14 = vcombine.high %v230_v7, %v234_v8 }
 0x12a   :  { %2786 = vmatpush1.bf16.msra.mxu1 %v6239_v15  ;;  %2744 = vmatprep.subr.bf16.mxu0 %v6104_v16  ;;  %v222_v15 = vld [vmem:[#allocation5 + $0x2d0] sm:$0xff] }
 0x12b   :  { %2787 = vmatprep.subr.bf16.mxu1 %v6232_v20  ;;  %v226_v16 = vld [vmem:[#allocation5 + $0x2f0] sm:$0xff]  ;;  %v6175_v20 = vcombine.low %v230_v7, %v234_v8  ;;  %v6391_v7 = vcombine.low %v446_v53, %v450_v54  ;;  %v6137_v8 = vcombine.low %v191_v55, %v195_v57 }
 0x12d   :  { %2745 = vmatpush1.bf16.msra.mxu0 %v6103_v23  ;;  %v6168_v23 = vcombine.high %v222_v15, %v226_v16 }
 0x12e   :  { %2788 = vmatpush1.bf16.msra.mxu1 %v6231_v24  ;;  %2746 = vmatprep.subr.bf16.mxu0 %v6096_v26  ;;  %v214_v24 = vld [vmem:[#allocation5 + $0x290] sm:$0xff] }
 0x12f   :  { %2789 = vmatprep.subr.bf16.mxu1 %v6224_v30  ;;  %v218_v26 = vld [vmem:[#allocation5 + $0x2b0] sm:$0xff]  ;;  %v6167_v30 = vcombine.low %v222_v15, %v226_v16  ;;  %v179_v15 = vld [vmem:[#allocation5 + $0x178] sm:$0xff] }
 0x131   :  { %2747 = vmatpush1.bf16.msra.mxu0 %v6095_v33  ;;  %v6160_v33 = vcombine.high %v214_v24, %v218_v26 }
 0x132   :  { %2790 = vmatpush1.bf16.msra.mxu1 %v6223_v34  ;;  %2748 = vmatprep.subr.bf16.mxu0 %v6088_v35  ;;  %v206_v34 = vld [vmem:[#allocation5 + $0x250] sm:$0xff] }
 0x133   :  { %2791 = vmatprep.subr.bf16.mxu1 %v6216_v40  ;;  %v210_v35 = vld [vmem:[#allocation5 + $0x270] sm:$0xff]  ;;  %v6159_v40 = vcombine.low %v214_v24, %v218_v26 }
 0x134   :  { %v6151_v49 = vcombine.low %v206_v34, %v210_v35 }
 0x135   :  { %2749 = vmatpush1.bf16.msra.mxu0 %v6087_v42  ;;  %v6287_v42 = vcombine.low %v342_v27, %v346_v29  ;;  %v422_v27 = vld [vmem:[#allocation5 + $0x910] sm:$0xff] }
 0x136   :  { %2792 = vmatpush1.bf16.msra.mxu1 %v6215_v43  ;;  %2750 = vmatprep.subr.bf16.mxu0 %v6080_v44  ;;  %v6152_v43 = vcombine.high %v206_v34, %v210_v35  ;;  %v198_v44 = vld [vmem:[#allocation5 + $0x210] sm:$0xff] }
 0x137   :  { %2793 = vmatprep.subr.bf16.mxu1 %v6208_v48  ;;  %v330_v48 = vld [vmem:[#allocation5 + $0x630] sm:$0xff] }
 0x138   :  { %v6271_v62 = vcombine.low %v326_v46, %v330_v48 }
 0x139   :  { %2751 = vmatpush1.bf16.msra.mxu0 %v6079_v50  ;;  %v7724_v50 = vshrl.u32 %v518_v41, 7  ;;  %v414_v41 = vld [vmem:[#allocation5 + $0x8d0] sm:$0xff] }
 0x13a   :  { %2794 = vmatpush1.bf16.msra.mxu1 %v6207_v51  ;;  %2752 = vmatprep.subr.bf16.mxu0 %v6200_v52  ;;  %v6279_v51 = vcombine.low %v334_v36, %v338_v38  ;;  %v6144_v52 = vcombine.high %v198_v44, %v202_v45 }
 0x13b   :  { %2795 = vmatprep.subr.bf16.mxu1 %v6328_v56  ;;  %v6272_v56 = vcombine.high %v326_v46, %v330_v48  ;;  %v406_v48 = vld [vmem:[#allocation5 + $0x890] sm:$0xff] }
 0x13d   :  { %2753 = vmatpush2.bf16.msra.mxu0 %v6199_v59  ;;  %v7726_v59 = vld [vmem:[#allocation7] sm:$0xff] }
 0x13e   :  { %2796 = vmatpush2.bf16.msra.mxu1 %v6327_v60  ;;  %2754 = vmatprep.subr.bf16.mxu0 %v6192_v61  ;;  %v6143_v60 = vcombine.low %v198_v44, %v202_v45  ;;  %v7729_v61 = vsub.s32 0, %v7724_v50  ;;  %v163_v44 = vld [vmem:[#allocation5 + $0xf8] sm:$0xff] }
 0x13f   :  { %2797 = vmatprep.subr.bf16.mxu1 %v6320_v2  ;;  %v442_v2 = vld [vmem:[#allocation5 + $0x9b0] sm:$0xff] }
 0x140   :  { %v6384_v9 = vcombine.high %v438_v1, %v442_v2 }
 0x141   :  { %2755 = vmatpush2.bf16.msra.mxu0 %v6191_v4  ;;  %v6138_v4 = vcombine.high %v191_v55, %v195_v57  ;;  %v398_v57 = vld [vmem:[#allocation5 + $0x850] sm:$0xff] }
 0x142   :  { %2798 = vmatpush2.bf16.msra.mxu1 %v6319_v5  ;;  %2756 = vmatprep.subr.bf16.mxu0 %v6184_v6  ;;  %v187_v5 = vld [vmem:[#allocation5 + $0x1b8] sm:$0xff]  ;;  %v521_v6 = vrot.slane %v7726_v59, %v7729_v61 }
 0x143   :  { %2799 = vmatprep.subr.bf16.mxu1 %v6312_v10  ;;  %v6130_v10 = vcombine.high %v183_v3, %v187_v5 }
 0x145   :  { %2757 = vmatpush2.bf16.msra.mxu0 %v6183_v12  ;;  %v434_v12 = vld [vmem:[#allocation5 + $0x970] sm:$0xff] }
 0x146   :  { %2800 = vmatpush2.bf16.msra.mxu1 %v6311_v13  ;;  %2758 = vmatprep.subr.bf16.mxu0 %v6176_v14  ;;  %v175_v14 = vld [vmem:[#allocation5 + $0x158] sm:$0xff]  ;;  %v6375_v34 = vcombine.low %v430_v11, %v434_v12 }
 0x147   :  { %2801 = vmatprep.subr.bf16.mxu1 %v6304_v18  ;;  %v6383_v18 = vcombine.low %v438_v1, %v442_v2  ;;  %v6122_v26 = vcombine.high %v175_v14, %v179_v15  ;;  %v6121_v36 = vcombine.low %v175_v14, %v179_v15  ;;  %v514_v14 = vld [vmem:[#allocation5 + $0xbf0] sm:$0xff]  ;;  %v255_v15 = vld [vmem:[#allocation5 + $0x3d8] sm:$0xff] }
 0x149   :  { %2759 = vmatpush2.bf16.msra.mxu0 %v6175_v20  ;;  %v6129_v20 = vcombine.low %v183_v3, %v187_v5  ;;  %v390_v5 = vld [vmem:[#allocation5 + $0x810] sm:$0xff] }
 0x14a   :  { %2802 = vmatpush2.bf16.msra.mxu1 %v6303_v22  ;;  %2760 = vmatprep.subr.bf16.mxu0 %v6168_v23  ;;  %v6376_v22 = vcombine.high %v430_v11, %v434_v12 }
 0x14b   :  { %2803 = vmatprep.subr.bf16.mxu1 %v6296_v28  ;;  %v426_v28 = vld [vmem:[#allocation5 + $0x930] sm:$0xff] }
 0x14c   :  { %v6367_v45 = vcombine.low %v422_v27, %v426_v28 }
 0x14d   :  { %2761 = vmatpush2.bf16.msra.mxu0 %v6167_v30  ;;  %v167_v30 = vld [vmem:[#allocation5 + $0x118] sm:$0xff] }
 0x14e   :  { %2804 = vmatpush2.bf16.msra.mxu1 %v6295_v31  ;;  %2762 = vmatprep.subr.bf16.mxu0 %v6160_v33  ;;  %v171_v31 = vld [vmem:[#allocation5 + $0x138] sm:$0xff] }
 0x14f   :  { %2805 = vmatprep.subr.bf16.mxu1 %v6288_v37  ;;  %v6368_v37 = vcombine.high %v422_v27, %v426_v28  ;;  %v506_v27 = vld [vmem:[#allocation5 + $0xbb0] sm:$0xff]  ;;  %v247_v28 = vld [vmem:[#allocation5 + $0x398] sm:$0xff] }
 0x151   :  { %2763 = vmatpush2.bf16.msra.mxu0 %v6159_v40  ;;  %v6114_v40 = vcombine.high %v167_v30, %v171_v31 }
 0x152   :  { %2806 = vmatpush2.bf16.msra.mxu1 %v6287_v42  ;;  %2764 = vmatprep.subr.bf16.mxu0 %v6152_v43  ;;  %v418_v42 = vld [vmem:[#allocation5 + $0x8f0] sm:$0xff]  ;;  %v159_v43 = vld [vmem:[#allocation5 + $0xd8] sm:$0xff] }
 0x153   :  { %2807 = vmatprep.subr.bf16.mxu1 %v6280_v47  ;;  %v6360_v46 = vcombine.high %v414_v41, %v418_v42  ;;  %v6106_v47 = vcombine.high %v159_v43, %v163_v44  ;;  %v6359_v53 = vcombine.low %v414_v41, %v418_v42  ;;  %v6105_v54 = vcombine.low %v159_v43, %v163_v44 }
 0x155   :  { %2765 = vmatpush2.bf16.msra.mxu0 %v6151_v49  ;;  %v410_v49 = vld [vmem:[#allocation5 + $0x8b0] sm:$0xff] }
 0x156   :  { %2808 = vmatpush2.bf16.msra.mxu1 %v6279_v51  ;;  %2766 = vmatprep.subr.bf16.mxu0 %v6144_v52  ;;  %v151_v51 = vld [vmem:[#allocation5 + $0x98] sm:$0xff]  ;;  %v6352_v55 = vcombine.high %v406_v48, %v410_v49  ;;  %v6351_v1 = vcombine.low %v406_v48, %v410_v49 }
 0x157   :  { %2809 = vmatprep.subr.bf16.mxu1 %v6272_v56  ;;  %v155_v52 = vld [vmem:[#allocation5 + $0xb8] sm:$0xff] }
 0x158   :  { %v6098_v56 = vcombine.high %v151_v51, %v155_v52  ;;  %v6097_v2 = vcombine.low %v151_v51, %v155_v52 }
 0x159   :  { %2767 = vmatpush2.bf16.msra.mxu0 %v6143_v60  ;;  %v402_v60 = vld [vmem:[#allocation5 + $0x870] sm:$0xff] }
 0x15a   :  { %2810 = vmatpush2.bf16.msra.mxu1 %v6271_v62  ;;  %2822 = vmatprep.subr.bf16.mxu0 %v6392_v0  ;;  %v143_v62 = vld [vmem:[#allocation5 + $0x58] sm:$0xff]  ;;  %v6344_v3 = vcombine.high %v398_v57, %v402_v60 }
 0x15b   :  { %2865 = vmatprep.subr.bf16.mxu1 %v6138_v4  ;;  %v147_v0 = vld [vmem:[#allocation5 + $0x78] sm:$0xff] }
 0x15c   :  { %v2512_v13 = vpop.f32.mrf.mxu0  ;;  %2769 = vmatmul.mubr.bf16.vlgmr.msra.gmra.mxu0 %v7704_v21  ;;  %v6090_v4 = vcombine.high %v143_v62, %v147_v0 }
 0x15d   :  { %v2513_v16 = vadd.f32 %v2512_v13, %v521_v6  ;;  %v2555_v17 = vpop.f32.mrf.mxu1  ;;  %2812 = vmatmul.mubr.bf16.vlgmr.msra.gmra.mxu1 %v7706_v25  ;;  %2823 = vmatpush1.bf16.msra.mxu0 %v6391_v7  ;;  %v135_v7 = vld [vmem:[#allocation5 + $0x18] sm:$0xff]  ;;  %v510_v13 = vld [vmem:[#allocation5 + $0xbd0] sm:$0xff] }
 0x15e   :  { %2866 = vmatpush1.bf16.msra.mxu1 %v6137_v8  ;;  %v7735_v19 = vpop.f32.mrf.mxu0  ;;  %2824 = vmatprep.subr.bf16.mxu0 %v6384_v9  ;;  %v139_v8 = vld [vmem:[#allocation5 + $0x38] sm:$0xff]  ;;  %v6343_v9 = vcombine.low %v398_v57, %v402_v60 }
 0x15f   :  { %v7737_v23 = vadd.f32 %v2555_v17, %v2513_v16  ;;  %v7739_v24 = vpop.f32.mrf.mxu1  ;;  %2867 = vmatprep.subr.bf16.mxu1 %v6130_v10  ;;  %2854 = vmatprep.mubr.bf16.mxu0 %v7708_v32  ;;  %v6089_v10 = vcombine.low %v143_v62, %v147_v0  ;;  %v6082_v12 = vcombine.high %v135_v7, %v139_v8  ;;  %v259_v16 = vld [vmem:[#allocation5 + $0x3f8] sm:$0xff] }
 0x160   :  { %v2516_v29 = vpop.f32.mrf.mxu0  ;;  %2897 = vmatprep.mubr.bf16.mxu1 %v7698_v58  ;;  %v6113_v58 = vcombine.low %v167_v30, %v171_v31  ;;  %v6455_v30 = vcombine.low %v510_v13, %v514_v14  ;;  %v6201_v31 = vcombine.low %v255_v15, %v259_v16 }
 0x161   :  { %v2517_v33 = vadd.f32 %v2516_v29, %v521_v6  ;;  %2825 = vmatpush1.bf16.msra.mxu0 %v6383_v18  ;;  %v2559_v35 = vpop.f32.mrf.mxu1  ;;  %v394_v6 = vld [vmem:[#allocation5 + $0x830] sm:$0xff]  ;;  %v6081_v18 = vcombine.low %v135_v7, %v139_v8  ;;  %v251_v29 = vld [vmem:[#allocation5 + $0x3b8] sm:$0xff] }
 0x162   :  { %2868 = vmatpush1.bf16.msra.mxu1 %v6129_v20  ;;  %2826 = vmatprep.subr.bf16.mxu0 %v6376_v22  ;;  %v6336_v11 = vcombine.high %v390_v5, %v394_v6  ;;  %v6335_v17 = vcombine.low %v390_v5, %v394_v6  ;;  %v6456_v20 = vcombine.high %v510_v13, %v514_v14 }
 0x163   :  { %v7743_v38 = vadd.f32 %v2559_v35, %v2517_v33  ;;  %2869 = vmatprep.subr.bf16.mxu1 %v6122_v26  ;;  %v6202_v22 = vcombine.high %v255_v15, %v259_v16  ;;  %v502_v26 = vld [vmem:[#allocation5 + $0xb90] sm:$0xff]  ;;  %v6193_v42 = vcombine.low %v247_v28, %v251_v29 }
 0x164   :  { %v6448_v33 = vcombine.high %v502_v26, %v506_v27  ;;  %v494_v35 = vld [vmem:[#allocation5 + $0xb50] sm:$0xff]  ;;  %v6447_v41 = vcombine.low %v502_v26, %v506_v27 }
 0x165   :  { %2827 = vmatpush1.bf16.msra.mxu0 %v6375_v34  ;;  %v6194_v34 = vcombine.high %v247_v28, %v251_v29 }
 0x166   :  { %2870 = vmatpush1.bf16.msra.mxu1 %v6121_v36  ;;  %2828 = vmatprep.subr.bf16.mxu0 %v6368_v37  ;;  %v498_v36 = vld [vmem:[#allocation5 + $0xb70] sm:$0xff]  ;;  %v239_v37 = vld [vmem:[#allocation5 + $0x358] sm:$0xff] }
 0x167   :  { %2871 = vmatprep.subr.bf16.mxu1 %v6114_v40  ;;  %v243_v40 = vld [vmem:[#allocation5 + $0x378] sm:$0xff]  ;;  %v6440_v43 = vcombine.high %v494_v35, %v498_v36  ;;  %v6439_v48 = vcombine.low %v494_v35, %v498_v36 }
 0x168   :  { %v6186_v44 = vcombine.high %v239_v37, %v243_v40  ;;  %v6185_v49 = vcombine.low %v239_v37, %v243_v40 }
 0x169   :  { %2829 = vmatpush1.bf16.msra.mxu0 %v6367_v45  ;;  %v486_v45 = vld [vmem:[#allocation5 + $0xb10] sm:$0xff] }
 0x16a   :  { %2872 = vmatpush1.bf16.msra.mxu1 %v6113_v58  ;;  %2830 = vmatprep.subr.bf16.mxu0 %v6360_v46  ;;  %v490_v58 = vld [vmem:[#allocation5 + $0xb30] sm:$0xff]  ;;  %v231_v46 = vld [vmem:[#allocation5 + $0x318] sm:$0xff] }
 0x16b   :  { %2873 = vmatprep.subr.bf16.mxu1 %v6106_v47  ;;  %v235_v47 = vld [vmem:[#allocation5 + $0x338] sm:$0xff]  ;;  %v6432_v51 = vcombine.high %v486_v45, %v490_v58  ;;  %v6431_v57 = vcombine.low %v486_v45, %v490_v58  ;;  %v7745_v58 = vpop.f32.mrf.mxu0 }
 0x16c   :  { %v6178_v52 = vcombine.high %v231_v46, %v235_v47  ;;  %v6177_v60 = vcombine.low %v231_v46, %v235_v47 }
 0x16d   :  { %2831 = vmatpush1.bf16.msra.mxu0 %v6359_v53  ;;  %v478_v53 = vld [vmem:[#allocation5 + $0xad0] sm:$0xff] }
 0x16e   :  { %2874 = vmatpush1.bf16.msra.mxu1 %v6105_v54  ;;  %2832 = vmatprep.subr.bf16.mxu0 %v6352_v55  ;;  %v482_v54 = vld [vmem:[#allocation5 + $0xaf0] sm:$0xff]  ;;  %v223_v55 = vld [vmem:[#allocation5 + $0x2d8] sm:$0xff] }
 0x16f   :  { %2875 = vmatprep.subr.bf16.mxu1 %v6098_v56  ;;  %v227_v56 = vld [vmem:[#allocation5 + $0x2f8] sm:$0xff]  ;;  %v6424_v62 = vcombine.high %v478_v53, %v482_v54  ;;  %v6423_v5 = vcombine.low %v478_v53, %v482_v54 }
 0x170   :  { %v6170_v0 = vcombine.high %v223_v55, %v227_v56  ;;  %v6169_v6 = vcombine.low %v223_v55, %v227_v56  ;;  %v431_v53 = vld [vmem:[#allocation5 + $0x958] sm:$0xff] }
 0x171   :  { %2833 = vmatpush1.bf16.msra.mxu0 %v6351_v1  ;;  %v470_v1 = vld [vmem:[#allocation5 + $0xa90] sm:$0xff]  ;;  %v435_v54 = vld [vmem:[#allocation5 + $0x978] sm:$0xff] }
 0x172   :  { %2876 = vmatpush1.bf16.msra.mxu1 %v6097_v2  ;;  %2834 = vmatprep.subr.bf16.mxu0 %v6344_v3  ;;  %v474_v2 = vld [vmem:[#allocation5 + $0xab0] sm:$0xff]  ;;  %v215_v3 = vld [vmem:[#allocation5 + $0x298] sm:$0xff] }
 0x173   :  { %2877 = vmatprep.subr.bf16.mxu1 %v6090_v4  ;;  %v219_v4 = vld [vmem:[#allocation5 + $0x2b8] sm:$0xff]  ;;  %v6416_v7 = vcombine.high %v470_v1, %v474_v2  ;;  %v6415_v13 = vcombine.low %v470_v1, %v474_v2 }
 0x174   :  { %v6162_v8 = vcombine.high %v215_v3, %v219_v4  ;;  %v6161_v14 = vcombine.low %v215_v3, %v219_v4  ;;  %v295_v1 = vld [vmem:[#allocation5 + $0x518] sm:$0xff] }
 0x175   :  { %2835 = vmatpush1.bf16.msra.mxu0 %v6343_v9  ;;  %v462_v9 = vld [vmem:[#allocation5 + $0xa50] sm:$0xff]  ;;  %v299_v2 = vld [vmem:[#allocation5 + $0x538] sm:$0xff] }
 0x176   :  { %2878 = vmatpush1.bf16.msra.mxu1 %v6089_v10  ;;  %2836 = vmatprep.subr.bf16.mxu0 %v6336_v11  ;;  %v466_v10 = vld [vmem:[#allocation5 + $0xa70] sm:$0xff]  ;;  %v207_v11 = vld [vmem:[#allocation5 + $0x258] sm:$0xff] }
 0x177   :  { %2879 = vmatprep.subr.bf16.mxu1 %v6082_v12  ;;  %v211_v12 = vld [vmem:[#allocation5 + $0x278] sm:$0xff]  ;;  %v6408_v15 = vcombine.high %v462_v9, %v466_v10  ;;  %v6407_v26 = vcombine.low %v462_v9, %v466_v10 }
 0x178   :  { %v6154_v16 = vcombine.high %v207_v11, %v211_v12  ;;  %v6153_v27 = vcombine.low %v207_v11, %v211_v12  ;;  %v423_v4 = vld [vmem:[#allocation5 + $0x918] sm:$0xff] }
 0x179   :  { %2837 = vmatpush1.bf16.msra.mxu0 %v6335_v17  ;;  %v454_v17 = vld [vmem:[#allocation5 + $0xa10] sm:$0xff]  ;;  %v287_v11 = vld [vmem:[#allocation5 + $0x4d8] sm:$0xff] }
 0x17a   :  { %2880 = vmatpush1.bf16.msra.mxu1 %v6081_v18  ;;  %2838 = vmatprep.subr.bf16.mxu0 %v6456_v20  ;;  %v458_v18 = vld [vmem:[#allocation5 + $0xa30] sm:$0xff]  ;;  %v199_v20 = vld [vmem:[#allocation5 + $0x218] sm:$0xff] }
 0x17b   :  { %2881 = vmatprep.subr.bf16.mxu1 %v6202_v22  ;;  %v203_v22 = vld [vmem:[#allocation5 + $0x238] sm:$0xff]  ;;  %v6400_v28 = vcombine.high %v454_v17, %v458_v18  ;;  %v6399_v35 = vcombine.low %v454_v17, %v458_v18 }
 0x17c   :  { %v6146_v29 = vcombine.high %v199_v20, %v203_v22  ;;  %v6145_v36 = vcombine.low %v199_v20, %v203_v22  ;;  %v291_v12 = vld [vmem:[#allocation5 + $0x4f8] sm:$0xff] }
 0x17d   :  { %2839 = vmatpush2.bf16.msra.mxu0 %v6455_v30  ;;  %v319_v30 = vld [vmem:[#allocation5 + $0x5d8] sm:$0xff] }
 0x17e   :  { %2882 = vmatpush2.bf16.msra.mxu1 %v6201_v31  ;;  %2840 = vmatprep.subr.bf16.mxu0 %v6448_v33  ;;  %v323_v31 = vld [vmem:[#allocation5 + $0x5f8] sm:$0xff] }
 0x17f   :  { %2883 = vmatprep.subr.bf16.mxu1 %v6194_v34  ;;  %v447_v33 = vld [vmem:[#allocation5 + $0x9d8] sm:$0xff]  ;;  %v6266_v37 = vcombine.high %v319_v30, %v323_v31  ;;  %v6265_v45 = vcombine.low %v319_v30, %v323_v31 }
 0x180   :  { %v451_v34 = vld [vmem:[#allocation5 + $0x9f8] sm:$0xff] }
 0x181   :  { %2841 = vmatpush2.bf16.msra.mxu0 %v6447_v41  ;;  %v6394_v40 = vcombine.high %v447_v33, %v451_v34  ;;  %v311_v41 = vld [vmem:[#allocation5 + $0x598] sm:$0xff]  ;;  %v6393_v46 = vcombine.low %v447_v33, %v451_v34 }
 0x182   :  { %2884 = vmatpush2.bf16.msra.mxu1 %v6193_v42  ;;  %2842 = vmatprep.subr.bf16.mxu0 %v6440_v43  ;;  %v315_v42 = vld [vmem:[#allocation5 + $0x5b8] sm:$0xff] }
 0x183   :  { %2885 = vmatprep.subr.bf16.mxu1 %v6186_v44  ;;  %v439_v43 = vld [vmem:[#allocation5 + $0x998] sm:$0xff]  ;;  %v6258_v47 = vcombine.high %v311_v41, %v315_v42  ;;  %v6257_v56 = vcombine.low %v311_v41, %v315_v42 }
 0x184   :  { %v443_v44 = vld [vmem:[#allocation5 + $0x9b8] sm:$0xff] }
 0x185   :  { %2843 = vmatpush2.bf16.msra.mxu0 %v6439_v48  ;;  %v6386_v48 = vcombine.high %v439_v43, %v443_v44  ;;  %v279_v17 = vld [vmem:[#allocation5 + $0x498] sm:$0xff] }
 0x186   :  { %2886 = vmatpush2.bf16.msra.mxu1 %v6185_v49  ;;  %2844 = vmatprep.subr.bf16.mxu0 %v6432_v51  ;;  %v303_v49 = vld [vmem:[#allocation5 + $0x558] sm:$0xff] }
 0x187   :  { %2887 = vmatprep.subr.bf16.mxu1 %v6178_v52  ;;  %v307_v51 = vld [vmem:[#allocation5 + $0x578] sm:$0xff] }
 0x188   :  { %v283_v18 = vld [vmem:[#allocation5 + $0x4b8] sm:$0xff] }
 0x189   :  { %2845 = vmatpush2.bf16.msra.mxu0 %v6431_v57  ;;  %v407_v20 = vld [vmem:[#allocation5 + $0x898] sm:$0xff] }
 0x18a   :  { %2888 = vmatpush2.bf16.msra.mxu1 %v6177_v60  ;;  %2846 = vmatprep.subr.bf16.mxu0 %v6424_v62  ;;  %v6385_v60 = vcombine.low %v439_v43, %v443_v44  ;;  %v6250_v62 = vcombine.high %v303_v49, %v307_v51  ;;  %v411_v22 = vld [vmem:[#allocation5 + $0x8b8] sm:$0xff] }
 0x18b   :  { %2889 = vmatprep.subr.bf16.mxu1 %v6170_v0  ;;  %v6378_v0 = vcombine.high %v431_v53, %v435_v54  ;;  %v271_v30 = vld [vmem:[#allocation5 + $0x458] sm:$0xff] }
 0x18c   :  { %v275_v31 = vld [vmem:[#allocation5 + $0x478] sm:$0xff] }
 0x18d   :  { %2847 = vmatpush2.bf16.msra.mxu0 %v6423_v5  ;;  %v427_v5 = vld [vmem:[#allocation5 + $0x938] sm:$0xff] }
 0x18e   :  { %2890 = vmatpush2.bf16.msra.mxu1 %v6169_v6  ;;  %2848 = vmatprep.subr.bf16.mxu0 %v6416_v7  ;;  %v6377_v6 = vcombine.low %v431_v53, %v435_v54  ;;  %v6242_v7 = vcombine.high %v295_v1, %v299_v2  ;;  %v6370_v10 = vcombine.high %v423_v4, %v427_v5  ;;  %v399_v33 = vld [vmem:[#allocation5 + $0x858] sm:$0xff] }
 0x18f   :  { %2891 = vmatprep.subr.bf16.mxu1 %v6162_v8  ;;  %v403_v34 = vld [vmem:[#allocation5 + $0x878] sm:$0xff] }
 0x190   :  { %v263_v41 = vld [vmem:[#allocation5 + $0x418] sm:$0xff] }
 0x191   :  { %2849 = vmatpush2.bf16.msra.mxu0 %v6415_v13  ;;  %v419_v13 = vld [vmem:[#allocation5 + $0x8f8] sm:$0xff] }
 0x192   :  { %2892 = vmatpush2.bf16.msra.mxu1 %v6161_v14  ;;  %2850 = vmatprep.subr.bf16.mxu0 %v6408_v15  ;;  %v6234_v15 = vcombine.high %v287_v11, %v291_v12  ;;  %v267_v42 = vld [vmem:[#allocation5 + $0x438] sm:$0xff] }
 0x193   :  { %2893 = vmatprep.subr.bf16.mxu1 %v6154_v16  ;;  %v391_v43 = vld [vmem:[#allocation5 + $0x818] sm:$0xff]  ;;  %v6209_v54 = vcombine.low %v263_v41, %v267_v42 }
 0x194   :  { %v395_v44 = vld [vmem:[#allocation5 + $0x838] sm:$0xff] }
 0x195   :  { %2851 = vmatpush2.bf16.msra.mxu0 %v6407_v26  ;;  %v6233_v26 = vcombine.low %v287_v11, %v291_v12  ;;  %v515_v53 = vld [vmem:[#allocation5 + $0xbf8] sm:$0xff] }
 0x196   :  { %2894 = vmatpush2.bf16.msra.mxu1 %v6153_v27  ;;  %2852 = vmatprep.subr.bf16.mxu0 %v6400_v28  ;;  %v6226_v28 = vcombine.high %v279_v17, %v283_v18 }
 0x197   :  { %2895 = vmatprep.subr.bf16.mxu1 %v6146_v29  ;;  %v6354_v29 = vcombine.high %v407_v20, %v411_v22 }
 0x199   :  { %2853 = vmatpush2.bf16.msra.mxu0 %v6399_v35  ;;  %v6225_v35 = vcombine.low %v279_v17, %v283_v18 }
 0x19a   :  { %2896 = vmatpush2.bf16.msra.mxu1 %v6145_v36  ;;  %2908 = vmatprep.subr.bf16.mxu0 %v6266_v37  ;;  %v6353_v36 = vcombine.low %v407_v20, %v411_v22  ;;  %v6218_v37 = vcombine.high %v271_v30, %v275_v31  ;;  %v351_v20 = vld [vmem:[#allocation5 + $0x6d8] sm:$0xff] }
 0x19b   :  { %2951 = vmatprep.subr.bf16.mxu1 %v6394_v40  ;;  %v6346_v40 = vcombine.high %v399_v33, %v403_v34  ;;  %v355_v22 = vld [vmem:[#allocation5 + $0x6f8] sm:$0xff] }
 0x19c   :  { %v2598_v52 = vpop.f32.mrf.mxu0  ;;  %2855 = vmatmul.mubr.bf16.vlgmr.msra.gmra.mxu0 %v7714_v39 }
 0x19d   :  { %v2599_v55 = vadd.f32 %v2598_v52, %v7737_v23  ;;  %2898 = vmatmul.mubr.bf16.vlgmr.msra.gmra.mxu1 %v7704_v21  ;;  %2909 = vmatpush1.bf16.msra.mxu0 %v6265_v45  ;;  %v6249_v23 = vcombine.low %v303_v49, %v307_v51  ;;  %v6217_v45 = vcombine.low %v271_v30, %v275_v31  ;;  %v383_v49 = vld [vmem:[#allocation5 + $0x7d8] sm:$0xff] }
 0x19e   :  { %2952 = vmatpush1.bf16.msra.mxu1 %v6393_v46  ;;  %v7750_v57 = vpop.f32.mrf.mxu0  ;;  %2910 = vmatprep.subr.bf16.mxu0 %v6258_v47  ;;  %v6345_v46 = vcombine.low %v399_v33, %v403_v34  ;;  %v6210_v47 = vcombine.high %v263_v41, %v267_v42  ;;  %v387_v51 = vld [vmem:[#allocation5 + $0x7f8] sm:$0xff]  ;;  %v6298_v30 = vcombine.high %v351_v20, %v355_v22 }
 0x19f   :  { %2953 = vmatprep.subr.bf16.mxu1 %v6386_v48  ;;  %2940 = vmatprep.mubr.bf16.mxu0 %v7700_v63  ;;  %v2994_v8 = vmax.f32 %v2599_v55, 0.0  ;;  %v415_v63 = vld [vmem:[#allocation5 + $0x8d8] sm:$0xff]  ;;  %v6338_v48 = vcombine.high %v391_v43, %v395_v44  ;;  %v6337_v55 = vcombine.low %v391_v43, %v395_v44 }
 0x1a0   :  { %v2602_v3 = vpop.f32.mrf.mxu0  ;;  %2983 = vmatprep.mubr.bf16.mxu1 %v7708_v32  ;;  %v6241_v32 = vcombine.low %v295_v1, %v299_v2  ;;  %v6362_v16 = vcombine.high %v415_v63, %v419_v13  ;;  %v6361_v27 = vcombine.low %v415_v63, %v419_v13  ;;  %v511_v52 = vld [vmem:[#allocation5 + $0xbd8] sm:$0xff] }
 0x1a1   :  { %v2603_v21 = vadd.f32 %v2602_v3, %v7743_v38  ;;  %2911 = vmatpush1.bf16.msra.mxu0 %v6257_v56  ;;  %v6369_v38 = vcombine.low %v423_v4, %v427_v5  ;;  %v6330_v56 = vcombine.high %v383_v49, %v387_v51  ;;  %v503_v1 = vld [vmem:[#allocation5 + $0xb98] sm:$0xff]  ;;  %v6329_v3 = vcombine.low %v383_v49, %v387_v51  ;;  %v2561_v49 = vpop.f32.mrf.mxu1 }
 0x1a2   :  { %2954 = vmatpush1.bf16.msra.mxu1 %v6385_v60  ;;  %2912 = vmatprep.subr.bf16.mxu0 %v6250_v62  ;;  %v6458_v60 = vcombine.high %v511_v52, %v515_v53  ;;  %v375_v62 = vld [vmem:[#allocation5 + $0x798] sm:$0xff]  ;;  %v6457_v4 = vcombine.low %v511_v52, %v515_v53 }
 0x1a3   :  { %v3002_v9 = vmax.f32 %v2603_v21, 0.0  ;;  %2955 = vmatprep.subr.bf16.mxu1 %v6378_v0  ;;  %v379_v0 = vld [vmem:[#allocation5 + $0x7b8] sm:$0xff] }
 0x1a4   :  { %v507_v2 = vld [vmem:[#allocation5 + $0xbb8] sm:$0xff]  ;;  %v6322_v5 = vcombine.high %v375_v62, %v379_v0 }
 0x1a5   :  { %v7755_v14 = vpack.c.bf16 %v3002_v9, %v2994_v8  ;;  %2913 = vmatpush1.bf16.msra.mxu0 %v6249_v23  ;;  %v6450_v21 = vcombine.high %v503_v1, %v507_v2  ;;  %v367_v23 = vld [vmem:[#allocation5 + $0x758] sm:$0xff]  ;;  %v6321_v9 = vcombine.low %v375_v62, %v379_v0 }
 0x1a6   :  { %2956 = vmatpush1.bf16.msra.mxu1 %v6377_v6  ;;  %2914 = vmatprep.subr.bf16.mxu0 %v6242_v7  ;;  %v371_v6 = vld [vmem:[#allocation5 + $0x778] sm:$0xff] }
 0x1a7   :  { %2957 = vmatprep.subr.bf16.mxu1 %v6370_v10  ;;  %v495_v7 = vld [vmem:[#allocation5 + $0xb58] sm:$0xff]  ;;  %v6449_v10 = vcombine.low %v503_v1, %v507_v2  ;;  %v6314_v11 = vcombine.high %v367_v23, %v371_v6 }
 0x1a8   :  { %v499_v8 = vld [vmem:[#allocation5 + $0xb78] sm:$0xff] }
 0x1a9   :  { %2915 = vmatpush1.bf16.msra.mxu0 %v6241_v32  ;;  %v6442_v12 = vcombine.high %v495_v7, %v499_v8  ;;  %v359_v63 = vld [vmem:[#allocation5 + $0x718] sm:$0xff] }
 0x1aa   :  { %2958 = vmatpush1.bf16.msra.mxu1 %v6369_v38  ;;  %2916 = vmatprep.subr.bf16.mxu0 %v6234_v15  ;;  %v363_v13 = vld [vmem:[#allocation5 + $0x738] sm:$0xff]  ;;  %v6313_v15 = vcombine.low %v367_v23, %v371_v6 }
 0x1ab   :  { %2959 = vmatprep.subr.bf16.mxu1 %v6362_v16  ;;  %v487_v32 = vld [vmem:[#allocation5 + $0xb18] sm:$0xff]  ;;  %v6441_v16 = vcombine.low %v495_v7, %v499_v8  ;;  %v6306_v17 = vcombine.high %v359_v63, %v363_v13 }
 0x1ac   :  { %v491_v38 = vld [vmem:[#allocation5 + $0xb38] sm:$0xff] }
 0x1ad   :  { %2917 = vmatpush1.bf16.msra.mxu0 %v6233_v26  ;;  %v6434_v18 = vcombine.high %v487_v32, %v491_v38  ;;  %v479_v26 = vld [vmem:[#allocation5 + $0xad8] sm:$0xff] }
 0x1ae   :  { %2960 = vmatpush1.bf16.msra.mxu1 %v6361_v27  ;;  %2918 = vmatprep.subr.bf16.mxu0 %v6226_v28  ;;  %v483_v27 = vld [vmem:[#allocation5 + $0xaf8] sm:$0xff]  ;;  %v6305_v28 = vcombine.low %v359_v63, %v363_v13 }
 0x1af   :  { %2961 = vmatprep.subr.bf16.mxu1 %v6354_v29  ;;  %v6433_v29 = vcombine.low %v487_v32, %v491_v38  ;;  %v6426_v31 = vcombine.high %v479_v26, %v483_v27  ;;  %v343_v33 = vld [vmem:[#allocation5 + $0x698] sm:$0xff]  ;;  %v6425_v41 = vcombine.low %v479_v26, %v483_v27 }
 0x1b0   :  { %v347_v34 = vld [vmem:[#allocation5 + $0x6b8] sm:$0xff] }
 0x1b1   :  { %2919 = vmatpush1.bf16.msra.mxu0 %v6225_v35  ;;  %v7758_v35 = vsub.s32 1, %v7724_v50  ;;  %v6290_v42 = vcombine.high %v343_v33, %v347_v34  ;;  %v335_v44 = vld [vmem:[#allocation5 + $0x658] sm:$0xff]  ;;  %v6289_v51 = vcombine.low %v343_v33, %v347_v34 }
 0x1b2   :  { %2962 = vmatpush1.bf16.msra.mxu1 %v6353_v36  ;;  %2920 = vmatprep.subr.bf16.mxu0 %v6218_v37  ;;  %v471_v36 = vld [vmem:[#allocation5 + $0xa98] sm:$0xff] }
 0x1b3   :  { %2963 = vmatprep.subr.bf16.mxu1 %v6346_v40  ;;  %v475_v37 = vld [vmem:[#allocation5 + $0xab8] sm:$0xff]  ;;  %v6297_v40 = vcombine.low %v351_v20, %v355_v22 }
 0x1b4   :  { %v6418_v43 = vcombine.high %v471_v36, %v475_v37  ;;  %v6417_v53 = vcombine.low %v471_v36, %v475_v37  ;;  %v331_v62 = vld [vmem:[#allocation5 + $0x638] sm:$0xff] }
 0x1b5   :  { %2921 = vmatpush1.bf16.msra.mxu0 %v6217_v45  ;;  %v339_v45 = vld [vmem:[#allocation5 + $0x678] sm:$0xff] }
 0x1b6   :  { %2964 = vmatpush1.bf16.msra.mxu1 %v6345_v46  ;;  %2922 = vmatprep.subr.bf16.mxu0 %v6210_v47  ;;  %v525_v46 = vrot.slane %v7726_v59, %v7758_v35  ;;  %v463_v47 = vld [vmem:[#allocation5 + $0xa58] sm:$0xff] }
 0x1b7   :  { %2965 = vmatprep.subr.bf16.mxu1 %v6338_v48  ;;  %v467_v48 = vld [vmem:[#allocation5 + $0xa78] sm:$0xff] }
 0x1b8   :  { %v2519_v52 = vadd.f32 %v7745_v58, %v525_v46  ;;  %v2515_v0 = vadd.f32 %v7735_v19, %v525_v46  ;;  %v455_v1 = vld [vmem:[#allocation5 + $0xa18] sm:$0xff]  ;;  %v6409_v58 = vcombine.low %v463_v47, %v467_v48 }
 0x1b9   :  { %2923 = vmatpush1.bf16.msra.mxu0 %v6209_v54  ;;  %v6282_v54 = vcombine.high %v335_v44, %v339_v45  ;;  %v459_v2 = vld [vmem:[#allocation5 + $0xa38] sm:$0xff] }
 0x1ba   :  { %2966 = vmatpush1.bf16.msra.mxu1 %v6337_v55  ;;  %2924 = vmatprep.subr.bf16.mxu0 %v6330_v56  ;;  %v7763_v55 = vpop.f32.mrf.mxu1  ;;  %v6410_v56 = vcombine.high %v463_v47, %v467_v48  ;;  %v6402_v6 = vcombine.high %v455_v1, %v459_v2  ;;  %v2558_v7 = vadd.f32 %v7739_v24, %v2515_v0  ;;  %v6862_v13 = vld [vmem:[#allocation8 + $0x454] ss:$24 sps:$4 sm:$0xff]   ;;  %v6857_v38 = vld [vmem:[#allocation8 + $0x150] ss:$24 sps:$4 sm:$0xff]   ;;  %v6875_v48 = vld [vmem:[#allocation8 + $0xc0] ss:$24 sps:$4 sm:$0xff]  }
 0x1bb   :  { %2967 = vmatprep.subr.bf16.mxu1 %v6458_v60  ;;  %v327_v60 = vld [vmem:[#allocation5 + $0x618] sm:$0xff]  ;;  %v6889_v0 = vld [vmem:[#allocation8 + $0x64] ss:$24 sps:$4 sm:$0xff]  }
 0x1bc   :  { %v2643_v23 = vpop.f32.mrf.mxu1  ;;  %v6273_v19 = vcombine.low %v327_v60, %v331_v62  ;;  %v6874_v34 = vld [vmem:[#allocation8 + $0x3f4] ss:$24 sps:$4 sm:$0xff]  }
 0x1bd   :  { %2925 = vmatpush2.bf16.msra.mxu0 %v6329_v3  ;;  %v2604_v3 = vpop.f32.mrf.mxu0 }
 0x1be   :  { %2968 = vmatpush2.bf16.msra.mxu1 %v6457_v4  ;;  %2926 = vmatprep.subr.bf16.mxu0 %v6322_v5  ;;  %v6281_v4 = vcombine.low %v335_v44, %v339_v45  ;;  %v2562_v5 = vadd.f32 %v2561_v49, %v2519_v52  ;;  %v7771_v63 = vpop.f32.mrf.mxu1  ;;  %v6880_v45 = vld [vmem:[#allocation8 + $0x3c4] ss:$24 sps:$4 sm:$0xff]   ;;  %v6878_v49 = vld [vmem:[#allocation8 + $0x3c0] ss:$24 sps:$4 sm:$0xff]  }
 0x1bf   :  { %2969 = vmatprep.subr.bf16.mxu1 %v6450_v21  ;;  %v6274_v21 = vcombine.high %v327_v60, %v331_v62  ;;  %v6881_v60 = vld [vmem:[#allocation8 + $0x90] ss:$24 sps:$4 sm:$0xff]  }
 0x1c0   :  { %v2605_v8 = vadd.f32 %v2604_v3, %v2562_v5  ;;  %v6884_v62 = vld [vmem:[#allocation8 + $0x390] ss:$24 sps:$4 sm:$0xff]   ;;  %v6890_v3 = vld [vmem:[#allocation8 + $0x360] ss:$24 sps:$4 sm:$0xff]   ;;  %v6898_v5 = vld [vmem:[#allocation8 + $0x334] ss:$24 sps:$4 sm:$0xff]  }
 0x1c1   :  { %2927 = vmatpush2.bf16.msra.mxu0 %v6321_v9  ;;  %v7768_v9 = vsub.s32 3, %v7724_v50 }
 0x1c2   :  { %2970 = vmatpush2.bf16.msra.mxu1 %v6449_v10  ;;  %2928 = vmatprep.subr.bf16.mxu0 %v6314_v11  ;;  %v2601_v10 = vadd.f32 %v7750_v57, %v2558_v7  ;;  %v6401_v11 = vcombine.low %v455_v1, %v459_v2  ;;  %v3003_v32 = vmax.f32 %v2605_v8, 0.0  ;;  %v6865_v57 = vld [vmem:[#allocation8 + $0x124] ss:$24 sps:$4 sm:$0xff]   ;;  %v6887_v2 = vld [vmem:[#allocation8 + $0x60] ss:$24 sps:$4 sm:$0xff]  }
 0x1c3   :  { %2971 = vmatprep.subr.bf16.mxu1 %v6442_v12  ;;  %v6859_v12 = vld [vmem:[#allocation8 + $0x154] ss:$24 sps:$4 sm:$0xff]   ;;  %v533_v24 = vrot.slane %v7726_v59, %v7768_v9  ;;  %v6863_v59 = vld [vmem:[#allocation8 + $0x120] ss:$24 sps:$4 sm:$0xff]   ;;  %v6892_v1 = vld [vmem:[#allocation8 + $0x364] ss:$24 sps:$4 sm:$0xff]  }
 0x1c4   :  { %v6899_v7 = vld [vmem:[#allocation8] ss:$24 sps:$4 sm:$0xff]  }
 0x1c5   :  { %2929 = vmatpush2.bf16.msra.mxu0 %v6313_v15  ;;  %v2995_v15 = vmax.f32 %v2601_v10, 0.0  ;;  %v2644_v26 = vadd.f32 %v2643_v23, %v533_v24  ;;  %v6901_v23 = vld [vmem:[#allocation8 + $0x4] ss:$24 sps:$4 sm:$0xff]   ;;  %v6902_v8 = vld [vmem:[#allocation8 + $0x300] ss:$24 sps:$4 sm:$0xff]  }
 0x1c6   :  { %2972 = vmatpush2.bf16.msra.mxu1 %v6441_v16  ;;  %2930 = vmatprep.subr.bf16.mxu0 %v6306_v17  ;;  %v6860_v16 = vld [vmem:[#allocation8 + $0x450] ss:$24 sps:$4 sm:$0xff]   ;;  %v2647_v17 = vpop.f32.mrf.mxu1  ;;  %v6910_v10 = vld [vmem:[#allocation8 + $0x5d4] ss:$24 sps:$4 sm:$0xff]  }
 0x1c7   :  { %2973 = vmatprep.subr.bf16.mxu1 %v6434_v18  ;;  %v6868_v18 = vld [vmem:[#allocation8 + $0x424] ss:$24 sps:$4 sm:$0xff]   ;;  %v7775_v20 = vpack.c.bf16 %v3003_v32, %v2995_v15  ;;  %v6919_v15 = vld [vmem:[#allocation8 + $0x274] ss:$24 sps:$4 sm:$0xff]  }
 0x1c8   :  { %v6916_v32 = vld [vmem:[#allocation8 + $0x5a4] ss:$24 sps:$4 sm:$0xff]  }
 0x1c9   :  { %2931 = vmatpush2.bf16.msra.mxu0 %v6305_v28 }
 0x1ca   :  { %2974 = vmatpush2.bf16.msra.mxu1 %v6433_v29  ;;  %2932 = vmatprep.subr.bf16.mxu0 %v6298_v30  ;;  %v6866_v29 = vld [vmem:[#allocation8 + $0x420] ss:$24 sps:$4 sm:$0xff]   ;;  %v6871_v30 = vld [vmem:[#allocation8 + $0xf4] ss:$24 sps:$4 sm:$0xff]  }
 0x1cb   :  { %2975 = vmatprep.subr.bf16.mxu1 %v6426_v31 }
 0x1cd   :  { %2933 = vmatpush2.bf16.msra.mxu0 %v6297_v40 }
 0x1ce   :  { %2976 = vmatpush2.bf16.msra.mxu1 %v6425_v41  ;;  %2934 = vmatprep.subr.bf16.mxu0 %v6290_v42  ;;  %v6872_v41 = vld [vmem:[#allocation8 + $0x3f0] ss:$24 sps:$4 sm:$0xff]   ;;  %v6877_v42 = vld [vmem:[#allocation8 + $0xc4] ss:$24 sps:$4 sm:$0xff]  }
 0x1cf   :  { %2977 = vmatprep.subr.bf16.mxu1 %v6418_v43 }
 0x1d1   :  { %2935 = vmatpush2.bf16.msra.mxu0 %v6289_v51  ;;  %v6883_v51 = vld [vmem:[#allocation8 + $0x94] ss:$24 sps:$4 sm:$0xff]  }
 0x1d2   :  { %2978 = vmatpush2.bf16.msra.mxu1 %v6417_v53  ;;  %2936 = vmatprep.subr.bf16.mxu0 %v6282_v54  ;;  %v6886_v54 = vld [vmem:[#allocation8 + $0x394] ss:$24 sps:$4 sm:$0xff]  }
 0x1d3   :  { %2979 = vmatprep.subr.bf16.mxu1 %v6410_v56 }
 0x1d5   :  { %2937 = vmatpush2.bf16.msra.mxu0 %v6281_v4  ;;  %v6895_v4 = vld [vmem:[#allocation8 + $0x34] ss:$24 sps:$4 sm:$0xff]  }
 0x1d6   :  { %2980 = vmatpush2.bf16.msra.mxu1 %v6409_v58  ;;  %2938 = vmatprep.subr.bf16.mxu0 %v6274_v21  ;;  %v6893_v58 = vld [vmem:[#allocation8 + $0x30] ss:$24 sps:$4 sm:$0xff]  }
 0x1d7   :  { %2981 = vmatprep.subr.bf16.mxu1 %v6402_v6  ;;  %v6896_v21 = vld [vmem:[#allocation8 + $0x330] ss:$24 sps:$4 sm:$0xff]   ;;  %v6904_v6 = vld [vmem:[#allocation8 + $0x304] ss:$24 sps:$4 sm:$0xff]  }
 0x1d9   :  { %2939 = vmatpush2.bf16.msra.mxu0 %v6273_v19  ;;  %v6907_v19 = vld [vmem:[#allocation8 + $0x2d4] ss:$24 sps:$4 sm:$0xff]  }
 0x1da   :  { %2982 = vmatpush2.bf16.msra.mxu1 %v6401_v11  ;;  %5354 = vmatprep.subr.bf16.mxu0 %v6859_v12  ;;  %v6905_v11 = vld [vmem:[#allocation8 + $0x2d0] ss:$24 sps:$4 sm:$0xff]  }
 0x1db   :  { %5397 = vmatprep.subr.bf16.mxu1 %v6862_v13  ;;  %v6908_v12 = vld [vmem:[#allocation8 + $0x5d0] ss:$24 sps:$4 sm:$0xff]   ;;  %v6913_v13 = vld [vmem:[#allocation8 + $0x2a4] ss:$24 sps:$4 sm:$0xff]  }
 0x1dc   :  { %v7777_v22 = vpop.f32.mrf.mxu0  ;;  %2941 = vmatmul.mubr.bf16.vlgmr.msra.gmra.mxu0 %v7706_v25  ;;  %v2648_v25 = vadd.f32 %v2647_v17, %v533_v24  ;;  %v6911_v24 = vld [vmem:[#allocation8 + $0x2a0] ss:$24 sps:$4 sm:$0xff]   ;;  %v6917_v17 = vld [vmem:[#allocation8 + $0x270] ss:$24 sps:$4 sm:$0xff]  }
 0x1dd   :  { %v7780_v27 = vpop.f32.mrf.mxu1  ;;  %2984 = vmatmul.mubr.bf16.vlgmr.msra.gmra.mxu1 %v7714_v39  ;;  %5355 = vmatpush1.bf16.msra.mxu0 %v6857_v38  ;;  %v6869_v39 = vld [vmem:[#allocation8 + $0xf0] ss:$24 sps:$4 sm:$0xff]   ;;  %v6914_v38 = vld [vmem:[#allocation8 + $0x5a0] ss:$24 sps:$4 sm:$0xff]  }
 0x1de   :  { %5386 = vmatprep.mubr.bf16.mxu0 %v7775_v20  ;;  %5398 = vmatpush1.bf16.msra.mxu1 %v6860_v16  ;;  %v2686_v28 = vpop.f32.mrf.mxu0  ;;  %v6922_v16 = vld [vmem:[#allocation8 + $0x574] ss:$24 sps:$4 sm:$0xff]  }
 0x1df   :  { %v2687_v31 = vadd.f32 %v2686_v28, %v2644_v26  ;;  %v2729_v33 = vpop.f32.mrf.mxu1  ;;  %5356 = vmatprep.subr.bf16.mxu0 %v6865_v57  ;;  %5399 = vmatprep.subr.bf16.mxu1 %v6868_v18  ;;  %v6920_v57 = vld [vmem:[#allocation8 + $0x570] ss:$24 sps:$4 sm:$0xff]   ;;  %v6925_v18 = vld [vmem:[#allocation8 + $0x244] ss:$24 sps:$4 sm:$0xff]   ;;  %v6923_v28 = vld [vmem:[#allocation8 + $0x240] ss:$24 sps:$4 sm:$0xff]  }
 0x1e0   :  { %v7784_v36 = vpop.f32.mrf.mxu0  ;;  %v6928_v26 = vld [vmem:[#allocation8 + $0x544] ss:$24 sps:$4 sm:$0xff]  }
 0x1e1   :  { %v7786_v37 = vpop.f32.mrf.mxu1  ;;  %5357 = vmatpush1.bf16.msra.mxu0 %v6863_v59  ;;  %v2730_v43 = vadd.f32 %v2729_v33, %v2687_v31  ;;  %v7792_v59 = vsub.s32 2, %v7724_v50  ;;  %v6934_v31 = vld [vmem:[#allocation8 + $0x514] ss:$24 sps:$4 sm:$0xff]   ;;  %v7794_v33 = vld [vmem:[#allocation7] sm:$0xff] }
 0x1e2   :  { %5400 = vmatpush1.bf16.msra.mxu1 %v6866_v29  ;;  %v2690_v40 = vpop.f32.mrf.mxu0  ;;  %5358 = vmatprep.subr.bf16.mxu0 %v6871_v30  ;;  %v6926_v29 = vld [vmem:[#allocation8 + $0x540] ss:$24 sps:$4 sm:$0xff]   ;;  %v6931_v30 = vld [vmem:[#allocation8 + $0x214] ss:$24 sps:$4 sm:$0xff]  }
 0x1e3   :  { %v2691_v44 = vadd.f32 %v2690_v40, %v2648_v25  ;;  %5401 = vmatprep.subr.bf16.mxu1 %v6874_v34  ;;  %v2733_v46 = vpop.f32.mrf.mxu1  ;;  %v2997_v52 = vmax.f32 %v2730_v43, 0.0  ;;  %v529_v34 = vrot.slane %v7794_v33, %v7792_v59  ;;  %v6929_v25 = vld [vmem:[#allocation8 + $0x210] ss:$24 sps:$4 sm:$0xff]   ;;  %v6937_v40 = vld [vmem:[#allocation8 + $0x1e4] ss:$24 sps:$4 sm:$0xff]  }
 0x1e4   :  { %v6935_v43 = vld [vmem:[#allocation8 + $0x1e0] ss:$24 sps:$4 sm:$0xff]  }
 0x1e5   :  { %v2734_v47 = vadd.f32 %v2733_v46, %v2691_v44  ;;  %5359 = vmatpush1.bf16.msra.mxu0 %v6869_v39  ;;  %v6932_v39 = vld [vmem:[#allocation8 + $0x510] ss:$24 sps:$4 sm:$0xff]   ;;  %v6938_v44 = vld [vmem:[#allocation8 + $0x4e0] ss:$24 sps:$4 sm:$0xff]   ;;  %v2642_v46 = vadd.f32 %v7763_v55, %v529_v34 }
 0x1e6   :  { %5402 = vmatpush1.bf16.msra.mxu1 %v6872_v41  ;;  %5360 = vmatprep.subr.bf16.mxu0 %v6877_v42  ;;  %v6940_v41 = vld [vmem:[#allocation8 + $0x4e4] ss:$24 sps:$4 sm:$0xff]   ;;  %v2646_v42 = vadd.f32 %v7771_v63, %v529_v34  ;;  %v6947_v55 = vld [vmem:[#allocation8 + $0x180] ss:$24 sps:$4 sm:$0xff]   ;;  %v6979_v34 = vld [vmem:[#allocation8 + $0x8d4] ss:$24 sps:$4 sm:$0xff]  }
 0x1e7   :  { %v3005_v53 = vmax.f32 %v2734_v47, 0.0  ;;  %5403 = vmatprep.subr.bf16.mxu1 %v6880_v45  ;;  %v6943_v45 = vld [vmem:[#allocation8 + $0x1b4] ss:$24 sps:$4 sm:$0xff]   ;;  %v6949_v63 = vld [vmem:[#allocation8 + $0x184] ss:$24 sps:$4 sm:$0xff]  }
 0x1e8   :  { %v2689_v47 = vadd.f32 %v7784_v36, %v2646_v42  ;;  %v6950_v36 = vld [vmem:[#allocation8 + $0x480] ss:$24 sps:$4 sm:$0xff]   ;;  %v7052_v42 = vld [vmem:[#allocation8 + $0xbd0] ss:$24 sps:$4 sm:$0xff]  }
 0x1e9   :  { %v7788_v56 = vpack.c.bf16 %v3005_v53, %v2997_v52  ;;  %5361 = vmatpush1.bf16.msra.mxu0 %v6875_v48  ;;  %v6946_v48 = vld [vmem:[#allocation8 + $0x4b4] ss:$24 sps:$4 sm:$0xff]   ;;  %v6944_v52 = vld [vmem:[#allocation8 + $0x4b0] ss:$24 sps:$4 sm:$0xff]  }
 0x1ea   :  { %5404 = vmatpush1.bf16.msra.mxu1 %v6878_v49  ;;  %5362 = vmatprep.subr.bf16.mxu0 %v6883_v51  ;;  %v2685_v49 = vadd.f32 %v7777_v22, %v2642_v46  ;;  %v6941_v51 = vld [vmem:[#allocation8 + $0x1b0] ss:$24 sps:$4 sm:$0xff]   ;;  %v2732_v53 = vadd.f32 %v7786_v37, %v2689_v47  ;;  %v7006_v22 = vld [vmem:[#allocation8 + $0xa54] ss:$24 sps:$4 sm:$0xff]   ;;  %v7058_v46 = vld [vmem:[#allocation8 + $0xba0] ss:$24 sps:$4 sm:$0xff]  }
 0x1eb   :  { %5429 = vmatprep.mubr.bf16.mxu1 %v7788_v56  ;;  %5405 = vmatprep.subr.bf16.mxu1 %v6886_v54  ;;  %v6952_v54 = vld [vmem:[#allocation8 + $0x484] ss:$24 sps:$4 sm:$0xff]   ;;  %v7004_v37 = vld [vmem:[#allocation8 + $0xa50] ss:$24 sps:$4 sm:$0xff]   ;;  %v7066_v47 = vld [vmem:[#allocation8 + $0xb74] ss:$24 sps:$4 sm:$0xff]  }
 0x1ed   :  { %5363 = vmatpush1.bf16.msra.mxu0 %v6881_v60  ;;  %v2728_v60 = vadd.f32 %v7780_v27, %v2685_v49  ;;  %v7012_v27 = vld [vmem:[#allocation8 + $0xa24] ss:$24 sps:$4 sm:$0xff]  }
 0x1ee   :  { %5406 = vmatpush1.bf16.msra.mxu1 %v6884_v62  ;;  %5364 = vmatprep.subr.bf16.mxu0 %v6889_v0  ;;  %v6955_v62 = vld [vmem:[#allocation8 + $0x754] ss:$24 sps:$4 sm:$0xff]   ;;  %v3004_v0 = vmax.f32 %v2732_v53, 0.0  ;;  %v6988_v49 = vld [vmem:[#allocation8 + $0x844] ss:$24 sps:$4 sm:$0xff]  }
 0x1ef   :  { %5407 = vmatprep.subr.bf16.mxu1 %v6892_v1  ;;  %v2996_v1 = vmax.f32 %v2728_v60, 0.0  ;;  %v6991_v53 = vld [vmem:[#allocation8 + $0x814] ss:$24 sps:$4 sm:$0xff]  }
 0x1f0   :  { %v7078_v60 = vld [vmem:[#allocation8 + $0xb14] ss:$24 sps:$4 sm:$0xff]  }
 0x1f1   :  { %5365 = vmatpush1.bf16.msra.mxu0 %v6887_v2  ;;  %v6953_v2 = vld [vmem:[#allocation8 + $0x750] ss:$24 sps:$4 sm:$0xff]  }
 0x1f2   :  { %5408 = vmatpush1.bf16.msra.mxu1 %v6890_v3  ;;  %5366 = vmatprep.subr.bf16.mxu0 %v6895_v4  ;;  %v6958_v3 = vld [vmem:[#allocation8 + $0x724] ss:$24 sps:$4 sm:$0xff]   ;;  %v7804_v4 = vpack.c.bf16 %v3004_v0, %v2996_v1 }
 0x1f3   :  { %5409 = vmatprep.subr.bf16.mxu1 %v6898_v5  ;;  %v6956_v5 = vld [vmem:[#allocation8 + $0x720] ss:$24 sps:$4 sm:$0xff]   ;;  %v7084_v0 = vld [vmem:[#allocation8 + $0xae4] ss:$24 sps:$4 sm:$0xff]  }
 0x1f5   :  { %5367 = vmatpush1.bf16.msra.mxu0 %v6893_v58  ;;  %v6961_v58 = vld [vmem:[#allocation8 + $0x6f4] ss:$24 sps:$4 sm:$0xff]  }
 0x1f6   :  { %5410 = vmatpush1.bf16.msra.mxu1 %v6896_v21  ;;  %5368 = vmatprep.subr.bf16.mxu0 %v6901_v23  ;;  %v7010_v21 = vld [vmem:[#allocation8 + $0xa20] ss:$24 sps:$4 sm:$0xff]   ;;  %v7018_v23 = vld [vmem:[#allocation8 + $0x9f4] ss:$24 sps:$4 sm:$0xff]  }
 0x1f7   :  { %5411 = vmatprep.subr.bf16.mxu1 %v6904_v6  ;;  %v6959_v6 = vld [vmem:[#allocation8 + $0x6f0] ss:$24 sps:$4 sm:$0xff]  }
 0x1f9   :  { %5369 = vmatpush1.bf16.msra.mxu0 %v6899_v7  ;;  %v6964_v7 = vld [vmem:[#allocation8 + $0x6c4] ss:$24 sps:$4 sm:$0xff]  }
 0x1fa   :  { %5412 = vmatpush1.bf16.msra.mxu1 %v6902_v8  ;;  %5370 = vmatprep.subr.bf16.mxu0 %v6907_v19  ;;  %v7016_v8 = vld [vmem:[#allocation8 + $0x9f0] ss:$24 sps:$4 sm:$0xff]   ;;  %v7024_v19 = vld [vmem:[#allocation8 + $0x9c4] ss:$24 sps:$4 sm:$0xff]  }
 0x1fb   :  { %5413 = vmatprep.subr.bf16.mxu1 %v6910_v10  ;;  %v6962_v10 = vld [vmem:[#allocation8 + $0x6c0] ss:$24 sps:$4 sm:$0xff]  }
 0x1fd   :  { %5371 = vmatpush2.bf16.msra.mxu0 %v6905_v11  ;;  %v6967_v11 = vld [vmem:[#allocation8 + $0x694] ss:$24 sps:$4 sm:$0xff]  }
 0x1fe   :  { %5414 = vmatpush2.bf16.msra.mxu1 %v6908_v12  ;;  %5372 = vmatprep.subr.bf16.mxu0 %v6913_v13  ;;  %v7022_v12 = vld [vmem:[#allocation8 + $0x9c0] ss:$24 sps:$4 sm:$0xff]   ;;  %v7030_v13 = vld [vmem:[#allocation8 + $0x994] ss:$24 sps:$4 sm:$0xff]  }
 0x1ff   :  { %5415 = vmatprep.subr.bf16.mxu1 %v6916_v32  ;;  %v6965_v32 = vld [vmem:[#allocation8 + $0x690] ss:$24 sps:$4 sm:$0xff]  }
 0x201   :  { %5373 = vmatpush2.bf16.msra.mxu0 %v6911_v24  ;;  %v6970_v24 = vld [vmem:[#allocation8 + $0x664] ss:$24 sps:$4 sm:$0xff]  }
 0x202   :  { %5416 = vmatpush2.bf16.msra.mxu1 %v6914_v38  ;;  %5374 = vmatprep.subr.bf16.mxu0 %v6919_v15  ;;  %v7028_v38 = vld [vmem:[#allocation8 + $0x990] ss:$24 sps:$4 sm:$0xff]   ;;  %v7036_v15 = vld [vmem:[#allocation8 + $0x964] ss:$24 sps:$4 sm:$0xff]  }
 0x203   :  { %5417 = vmatprep.subr.bf16.mxu1 %v6922_v16  ;;  %v6968_v16 = vld [vmem:[#allocation8 + $0x660] ss:$24 sps:$4 sm:$0xff]  }
 0x205   :  { %5375 = vmatpush2.bf16.msra.mxu0 %v6917_v17  ;;  %v6973_v17 = vld [vmem:[#allocation8 + $0x634] ss:$24 sps:$4 sm:$0xff]  }
 0x206   :  { %5418 = vmatpush2.bf16.msra.mxu1 %v6920_v57  ;;  %5376 = vmatprep.subr.bf16.mxu0 %v6925_v18  ;;  %v7034_v57 = vld [vmem:[#allocation8 + $0x960] ss:$24 sps:$4 sm:$0xff]   ;;  %v7042_v18 = vld [vmem:[#allocation8 + $0x934] ss:$24 sps:$4 sm:$0xff]  }
 0x207   :  { %5419 = vmatprep.subr.bf16.mxu1 %v6928_v26  ;;  %v6971_v26 = vld [vmem:[#allocation8 + $0x630] ss:$24 sps:$4 sm:$0xff]  }
 0x209   :  { %5377 = vmatpush2.bf16.msra.mxu0 %v6923_v28  ;;  %v6976_v28 = vld [vmem:[#allocation8 + $0x604] ss:$24 sps:$4 sm:$0xff]  }
 0x20a   :  { %5420 = vmatpush2.bf16.msra.mxu1 %v6926_v29  ;;  %5378 = vmatprep.subr.bf16.mxu0 %v6931_v30  ;;  %v7040_v29 = vld [vmem:[#allocation8 + $0x930] ss:$24 sps:$4 sm:$0xff]   ;;  %v7048_v30 = vld [vmem:[#allocation8 + $0x904] ss:$24 sps:$4 sm:$0xff]  }
 0x20b   :  { %5421 = vmatprep.subr.bf16.mxu1 %v6934_v31  ;;  %v6974_v31 = vld [vmem:[#allocation8 + $0x600] ss:$24 sps:$4 sm:$0xff]  }
 0x20d   :  { %5379 = vmatpush2.bf16.msra.mxu0 %v6929_v25  ;;  %v7046_v25 = vld [vmem:[#allocation8 + $0x900] ss:$24 sps:$4 sm:$0xff]  }
 0x20e   :  { %5422 = vmatpush2.bf16.msra.mxu1 %v6932_v39  ;;  %5380 = vmatprep.subr.bf16.mxu0 %v6937_v40  ;;  %v7054_v39 = vld [vmem:[#allocation8 + $0xbd4] ss:$24 sps:$4 sm:$0xff]   ;;  %v6977_v40 = vld [vmem:[#allocation8 + $0x8d0] ss:$24 sps:$4 sm:$0xff]  }
 0x20f   :  { %5423 = vmatprep.subr.bf16.mxu1 %v6940_v41  ;;  %v6982_v41 = vld [vmem:[#allocation8 + $0x8a4] ss:$24 sps:$4 sm:$0xff]  }
 0x211   :  { %5381 = vmatpush2.bf16.msra.mxu0 %v6935_v43  ;;  %v7060_v43 = vld [vmem:[#allocation8 + $0xba4] ss:$24 sps:$4 sm:$0xff]  }
 0x212   :  { %5424 = vmatpush2.bf16.msra.mxu1 %v6938_v44  ;;  %5382 = vmatprep.subr.bf16.mxu0 %v6943_v45  ;;  %v6980_v44 = vld [vmem:[#allocation8 + $0x8a0] ss:$24 sps:$4 sm:$0xff]   ;;  %v6985_v45 = vld [vmem:[#allocation8 + $0x874] ss:$24 sps:$4 sm:$0xff]  }
 0x213   :  { %5425 = vmatprep.subr.bf16.mxu1 %v6946_v48  ;;  %v6983_v48 = vld [vmem:[#allocation8 + $0x870] ss:$24 sps:$4 sm:$0xff]  }
 0x215   :  { %5383 = vmatpush2.bf16.msra.mxu0 %v6941_v51  ;;  %v7064_v51 = vld [vmem:[#allocation8 + $0xb70] ss:$24 sps:$4 sm:$0xff]  }
 0x216   :  { %5426 = vmatpush2.bf16.msra.mxu1 %v6944_v52  ;;  %5384 = vmatprep.subr.bf16.mxu0 %v6949_v63  ;;  %v7072_v52 = vld [vmem:[#allocation8 + $0xb44] ss:$24 sps:$4 sm:$0xff]   ;;  %v6986_v63 = vld [vmem:[#allocation8 + $0x840] ss:$24 sps:$4 sm:$0xff]  }
 0x217   :  { %5427 = vmatprep.subr.bf16.mxu1 %v6952_v54  ;;  %v7070_v54 = vld [vmem:[#allocation8 + $0xb40] ss:$24 sps:$4 sm:$0xff]  }
 0x219   :  { %5385 = vmatpush2.bf16.msra.mxu0 %v6947_v55  ;;  %v6989_v55 = vld [vmem:[#allocation8 + $0x810] ss:$24 sps:$4 sm:$0xff]  }
 0x21a   :  { %5428 = vmatpush2.bf16.msra.mxu1 %v6950_v36  ;;  %5440 = vmatprep.subr.bf16.mxu0 %v6955_v62  ;;  %v6994_v36 = vld [vmem:[#allocation8 + $0x7e4] ss:$24 sps:$4 sm:$0xff]   ;;  %v7076_v62 = vld [vmem:[#allocation8 + $0xb10] ss:$24 sps:$4 sm:$0xff]  }
 0x21b   :  { %5483 = vmatprep.subr.bf16.mxu1 %v7006_v22  ;;  %v6992_v22 = vld [vmem:[#allocation8 + $0x7e0] ss:$24 sps:$4 sm:$0xff]  }
 0x21c   :  { %5387 = vmatmul.mubr.bf16.vlgmr.msra.gmra.mxu0 %v7755_v14  ;;  %v2770_v1 = vpop.f32.mrf.mxu0 }
 0x21d   :  { %5430 = vmatmul.mubr.bf16.vlgmr.msra.gmra.mxu1 %v7804_v4  ;;  %5441 = vmatpush1.bf16.msra.mxu0 %v6953_v2  ;;  %v6997_v2 = vld [vmem:[#allocation8 + $0x7b4] ss:$24 sps:$4 sm:$0xff]  }
 0x21e   :  { %5442 = vmatprep.subr.bf16.mxu0 %v6958_v3  ;;  %5484 = vmatpush1.bf16.msra.mxu1 %v7004_v37  ;;  %v7082_v3 = vld [vmem:[#allocation8 + $0xae0] ss:$24 sps:$4 sm:$0xff]   ;;  %v7090_v37 = vld [vmem:[#allocation8 + $0xab4] ss:$24 sps:$4 sm:$0xff]  }
 0x21f   :  { %5485 = vmatprep.subr.bf16.mxu1 %v7012_v27  ;;  %v6995_v27 = vld [vmem:[#allocation8 + $0x7b0] ss:$24 sps:$4 sm:$0xff]  }
 0x221   :  { %5443 = vmatpush1.bf16.msra.mxu0 %v6956_v5  ;;  %v2772_v5 = vpop.f32.mrf.mxu0 }
 0x222   :  { %5444 = vmatprep.subr.bf16.mxu0 %v6961_v58  ;;  %5486 = vmatpush1.bf16.msra.mxu1 %v7010_v21  ;;  %v7000_v58 = vld [vmem:[#allocation8 + $0x784] ss:$24 sps:$4 sm:$0xff]   ;;  %v7088_v21 = vld [vmem:[#allocation8 + $0xab0] ss:$24 sps:$4 sm:$0xff]  }
 0x223   :  { %5487 = vmatprep.subr.bf16.mxu1 %v7018_v23  ;;  %v7809_v23 = vsub.s32 5, %v7724_v50 }
 0x225   :  { %5445 = vmatpush1.bf16.msra.mxu0 %v6959_v6  ;;  %v7096_v6 = vld [vmem:[#allocation8 + $0xa84] ss:$24 sps:$4 sm:$0xff]  }
 0x226   :  { %5446 = vmatprep.subr.bf16.mxu0 %v6964_v7  ;;  %5488 = vmatpush1.bf16.msra.mxu1 %v7016_v8  ;;  %v7812_v7 = vsub.s32 4, %v7724_v50  ;;  %v2813_v8 = vpop.f32.mrf.mxu1 }
 0x227   :  { %5489 = vmatprep.subr.bf16.mxu1 %v7024_v19  ;;  %v6998_v19 = vld [vmem:[#allocation8 + $0x780] ss:$24 sps:$4 sm:$0xff]  }
 0x229   :  { %5447 = vmatpush1.bf16.msra.mxu0 %v6962_v10  ;;  %v2774_v10 = vpop.f32.mrf.mxu0 }
 0x22a   :  { %5448 = vmatprep.subr.bf16.mxu0 %v6967_v11  ;;  %5490 = vmatpush1.bf16.msra.mxu1 %v7022_v12  ;;  %v7003_v11 = vld [vmem:[#allocation8 + $0x15c] ss:$24 sps:$4 sm:$0xff]   ;;  %v7094_v12 = vld [vmem:[#allocation8 + $0xa80] ss:$24 sps:$4 sm:$0xff]  }
 0x22b   :  { %5491 = vmatprep.subr.bf16.mxu1 %v7030_v13  ;;  %v541_v13 = vrot.slane %v7794_v33, %v7809_v23 }
 0x22d   :  { %5449 = vmatpush1.bf16.msra.mxu0 %v6965_v32  ;;  %v7102_v32 = vld [vmem:[#allocation8 + $0x45c] ss:$24 sps:$4 sm:$0xff]  }
 0x22e   :  { %5450 = vmatprep.subr.bf16.mxu0 %v6970_v24  ;;  %5492 = vmatpush1.bf16.msra.mxu1 %v7028_v38  ;;  %v537_v24 = vrot.slane %v7794_v33, %v7812_v7  ;;  %v2815_v38 = vpop.f32.mrf.mxu1 }
 0x22f   :  { %5493 = vmatprep.subr.bf16.mxu1 %v7036_v15  ;;  %v2776_v15 = vpop.f32.mrf.mxu0 }
 0x231   :  { %5451 = vmatpush1.bf16.msra.mxu0 %v6968_v16  ;;  %v2773_v16 = vadd.f32 %v2772_v5, %v541_v13  ;;  %v7043_v5 = vld [vmem:[#allocation8 + $0x8] ss:$24 sps:$4 sm:$0xff]  }
 0x232   :  { %5452 = vmatprep.subr.bf16.mxu0 %v6973_v17  ;;  %5494 = vmatpush1.bf16.msra.mxu1 %v7034_v57  ;;  %v2775_v17 = vadd.f32 %v2774_v10, %v537_v24  ;;  %v2771_v57 = vadd.f32 %v2770_v1, %v537_v24  ;;  %v7033_v1 = vld [vmem:[#allocation8 + $0x6c] ss:$24 sps:$4 sm:$0xff]   ;;  %v7075_v24 = vld [vmem:[#allocation8 + $0x21c] ss:$24 sps:$4 sm:$0xff]  }
 0x233   :  { %5495 = vmatprep.subr.bf16.mxu1 %v7042_v18  ;;  %v2817_v18 = vpop.f32.mrf.mxu1 }
 0x235   :  { %5453 = vmatpush1.bf16.msra.mxu0 %v6971_v26 }
 0x236   :  { %5454 = vmatprep.subr.bf16.mxu0 %v6976_v28  ;;  %5496 = vmatpush1.bf16.msra.mxu1 %v7040_v29  ;;  %v2777_v28 = vadd.f32 %v2776_v15, %v541_v13  ;;  %v544_v15 = vsub.s32 6, %v7724_v50 }
 0x237   :  { %5497 = vmatprep.subr.bf16.mxu1 %v7048_v30  ;;  %v2816_v30 = vadd.f32 %v2815_v38, %v2773_v16  ;;  %v548_v38 = vsub.s32 7, %v7724_v50 }
 0x239   :  { %5455 = vmatpush1.bf16.msra.mxu0 %v6974_v31  ;;  %v2818_v31 = vadd.f32 %v2817_v18, %v2775_v17  ;;  %v7073_v17 = vld [vmem:[#allocation8 + $0x218] ss:$24 sps:$4 sm:$0xff]   ;;  %v549_v18 = vrot.slane %v7794_v33, %v548_v38  ;;  %v7120_v38 = vld [vmem:[#allocation8 + $0x3cc] ss:$24 sps:$4 sm:$0xff]  }
 0x23a   :  { %5456 = vmatprep.subr.bf16.mxu0 %v6979_v34  ;;  %5498 = vmatpush1.bf16.msra.mxu1 %v7046_v25  ;;  %v2814_v34 = vadd.f32 %v2813_v8, %v2771_v57  ;;  %v2819_v25 = vpop.f32.mrf.mxu1  ;;  %v7055_v8 = vld [vmem:[#allocation8 + $0x2a8] ss:$24 sps:$4 sm:$0xff]   ;;  %v7081_v57 = vld [vmem:[#allocation8 + $0x1ec] ss:$24 sps:$4 sm:$0xff]  }
 0x23b   :  { %5499 = vmatprep.subr.bf16.mxu1 %v7054_v39 }
 0x23d   :  { %5457 = vmatpush2.bf16.msra.mxu0 %v6977_v40  ;;  %v2820_v40 = vadd.f32 %v2819_v25, %v2777_v28 }
 0x23e   :  { %5458 = vmatprep.subr.bf16.mxu0 %v6982_v41  ;;  %5500 = vmatpush2.bf16.msra.mxu1 %v7052_v42 }
 0x23f   :  { %5501 = vmatprep.subr.bf16.mxu1 %v7060_v43 }
 0x241   :  { %5459 = vmatpush2.bf16.msra.mxu0 %v6980_v44 }
 0x242   :  { %5460 = vmatprep.subr.bf16.mxu0 %v6985_v45  ;;  %5502 = vmatpush2.bf16.msra.mxu1 %v7058_v46 }
 0x243   :  { %5503 = vmatprep.subr.bf16.mxu1 %v7066_v47 }
 0x245   :  { %5461 = vmatpush2.bf16.msra.mxu0 %v6983_v48 }
 0x246   :  { %5462 = vmatprep.subr.bf16.mxu0 %v6988_v49  ;;  %5504 = vmatpush2.bf16.msra.mxu1 %v7064_v51 }
 0x247   :  { %5505 = vmatprep.subr.bf16.mxu1 %v7072_v52  ;;  %v7001_v52 = vld [vmem:[#allocation8 + $0x158] ss:$24 sps:$4 sm:$0xff]  }
 0x249   :  { %5463 = vmatpush2.bf16.msra.mxu0 %v6986_v63 }
 0x24a   :  { %5464 = vmatprep.subr.bf16.mxu0 %v6991_v53  ;;  %5506 = vmatpush2.bf16.msra.mxu1 %v7070_v54  ;;  %v7009_v53 = vld [vmem:[#allocation8 + $0x12c] ss:$24 sps:$4 sm:$0xff]   ;;  %v7007_v54 = vld [vmem:[#allocation8 + $0x128] ss:$24 sps:$4 sm:$0xff]  }
 0x24b   :  { %5507 = vmatprep.subr.bf16.mxu1 %v7078_v60  ;;  %v7015_v60 = vld [vmem:[#allocation8 + $0xfc] ss:$24 sps:$4 sm:$0xff]  }
 0x24d   :  { %5465 = vmatpush2.bf16.msra.mxu0 %v6989_v55  ;;  %v7013_v55 = vld [vmem:[#allocation8 + $0xf8] ss:$24 sps:$4 sm:$0xff]  }
 0x24e   :  { %5466 = vmatprep.subr.bf16.mxu0 %v6994_v36  ;;  %5508 = vmatpush2.bf16.msra.mxu1 %v7076_v62  ;;  %v7021_v36 = vld [vmem:[#allocation8 + $0xcc] ss:$24 sps:$4 sm:$0xff]   ;;  %v7019_v62 = vld [vmem:[#allocation8 + $0xc8] ss:$24 sps:$4 sm:$0xff]  }
 0x24f   :  { %5509 = vmatprep.subr.bf16.mxu1 %v7084_v0  ;;  %v7027_v0 = vld [vmem:[#allocation8 + $0x9c] ss:$24 sps:$4 sm:$0xff]  }
 0x251   :  { %5467 = vmatpush2.bf16.msra.mxu0 %v6992_v22  ;;  %v7025_v22 = vld [vmem:[#allocation8 + $0x98] ss:$24 sps:$4 sm:$0xff]  }
 0x252   :  { %5468 = vmatprep.subr.bf16.mxu0 %v6997_v2  ;;  %5510 = vmatpush2.bf16.msra.mxu1 %v7082_v3  ;;  %v7031_v2 = vld [vmem:[#allocation8 + $0x68] ss:$24 sps:$4 sm:$0xff]   ;;  %v7039_v3 = vld [vmem:[#allocation8 + $0x3c] ss:$24 sps:$4 sm:$0xff]  }
 0x253   :  { %5511 = vmatprep.subr.bf16.mxu1 %v7090_v37  ;;  %v7037_v37 = vld [vmem:[#allocation8 + $0x38] ss:$24 sps:$4 sm:$0xff]  }
 0x255   :  { %5469 = vmatpush2.bf16.msra.mxu0 %v6995_v27  ;;  %v7045_v27 = vld [vmem:[#allocation8 + $0xc] ss:$24 sps:$4 sm:$0xff]  }
 0x256   :  { %5470 = vmatprep.subr.bf16.mxu0 %v7000_v58  ;;  %5512 = vmatpush2.bf16.msra.mxu1 %v7088_v21  ;;  %v7051_v58 = vld [vmem:[#allocation8 + $0x2dc] ss:$24 sps:$4 sm:$0xff]   ;;  %v7049_v21 = vld [vmem:[#allocation8 + $0x2d8] ss:$24 sps:$4 sm:$0xff]  }
 0x257   :  { %5513 = vmatprep.subr.bf16.mxu1 %v7096_v6  ;;  %v7057_v6 = vld [vmem:[#allocation8 + $0x2ac] ss:$24 sps:$4 sm:$0xff]  }
 0x259   :  { %5471 = vmatpush2.bf16.msra.mxu0 %v6998_v19  ;;  %v7063_v19 = vld [vmem:[#allocation8 + $0x27c] ss:$24 sps:$4 sm:$0xff]  }
 0x25a   :  { %5526 = vmatprep.subr.bf16.mxu0 %v7003_v11  ;;  %5514 = vmatpush2.bf16.msra.mxu1 %v7094_v12  ;;  %v7061_v11 = vld [vmem:[#allocation8 + $0x278] ss:$24 sps:$4 sm:$0xff]   ;;  %v7069_v12 = vld [vmem:[#allocation8 + $0x24c] ss:$24 sps:$4 sm:$0xff]  }
 0x25b   :  { %5569 = vmatprep.subr.bf16.mxu1 %v7102_v32  ;;  %v7067_v32 = vld [vmem:[#allocation8 + $0x248] ss:$24 sps:$4 sm:$0xff]  }
 0x25c   :  { %v2856_v26 = vpop.f32.mrf.mxu0 }
 0x25d   :  { %v2857_v43 = vadd.f32 %v2856_v26, %v2814_v34  ;;  %v2899_v10 = vpop.f32.mrf.mxu1  ;;  %v545_v26 = vrot.slane %v7794_v33, %v544_v15  ;;  %v7123_v15 = vld [vmem:[#allocation8 + $0x69c] ss:$24 sps:$4 sm:$0xff]  }
 0x25e   :  { %v2858_v29 = vpop.f32.mrf.mxu0 }
 0x25f   :  { %v2859_v41 = vadd.f32 %v2858_v29, %v2816_v30  ;;  %v2998_v49 = vmax.f32 %v2857_v43, 0.0  ;;  %v2901_v13 = vpop.f32.mrf.mxu1  ;;  %v7079_v29 = vld [vmem:[#allocation8 + $0x1e8] ss:$24 sps:$4 sm:$0xff]   ;;  %v7085_v43 = vld [vmem:[#allocation8 + $0x1b8] ss:$24 sps:$4 sm:$0xff]  }
 0x260   :  { %v2860_v39 = vpop.f32.mrf.mxu0  ;;  %v2902_v34 = vadd.f32 %v2901_v13, %v549_v18  ;;  %v7117_v13 = vld [vmem:[#allocation8 + $0x6cc] ss:$24 sps:$4 sm:$0xff]  }
 0x261   :  { %v2861_v42 = vadd.f32 %v2860_v39, %v2818_v31  ;;  %v2999_v47 = vmax.f32 %v2859_v41, 0.0  ;;  %v2903_v16 = vpop.f32.mrf.mxu1  ;;  %v7087_v31 = vld [vmem:[#allocation8 + $0x1bc] ss:$24 sps:$4 sm:$0xff]  }
 0x262   :  { %v2862_v44 = vpop.f32.mrf.mxu0  ;;  %v2904_v50 = vadd.f32 %v2903_v16, %v545_v26  ;;  %v7118_v16 = vld [vmem:[#allocation8 + $0x3c8] ss:$24 sps:$4 sm:$0xff]  }
 0x263   :  { %v2863_v45 = vadd.f32 %v2862_v44, %v2820_v40  ;;  %v3006_v46 = vmax.f32 %v2861_v42, 0.0  ;;  %v2905_v28 = vpop.f32.mrf.mxu1  ;;  %v2900_v40 = vadd.f32 %v2899_v10, %v545_v26  ;;  %v7106_v10 = vld [vmem:[#allocation8 + $0x428] ss:$24 sps:$4 sm:$0xff]   ;;  %v7124_v26 = vld [vmem:[#allocation8 + $0x398] ss:$24 sps:$4 sm:$0xff]  }
 0x265   :  { %v3007_v48 = vmax.f32 %v2863_v45, 0.0  ;;  %v7820_v63 = vpack.c.bf16 %v3006_v46, %v2998_v49  ;;  %v7093_v45 = vld [vmem:[#allocation8 + $0x18c] ss:$24 sps:$4 sm:$0xff]   ;;  %v2906_v46 = vadd.f32 %v2905_v28, %v549_v18  ;;  %v7127_v28 = vld [vmem:[#allocation8 + $0x668] ss:$24 sps:$4 sm:$0xff]  }
 0x266   :  { %v7129_v18 = vld [vmem:[#allocation8 + $0x66c] ss:$24 sps:$4 sm:$0xff]  }
 0x267   :  { %v7818_v51 = vpack.c.bf16 %v3007_v48, %v2999_v47 }
 0x269   :  { %5472 = vmatprep.mubr.bf16.mxu0 %v7818_v51 }
 0x26a   :  { %5473 = vmatmul.mubr.bf16.vlgmr.msra.gmra.mxu0 %v7820_v63 }
 0x26b   :  { %5527 = vmatpush1.bf16.msra.mxu0 %v7001_v52  ;;  %5558 = vmatprep.mubr.bf16.mxu0 %v7775_v20 }
 0x26c   :  { %5528 = vmatprep.subr.bf16.mxu0 %v7009_v53 }
 0x26f   :  { %5529 = vmatpush1.bf16.msra.mxu0 %v7007_v54 }
 0x270   :  { %5530 = vmatprep.subr.bf16.mxu0 %v7015_v60  ;;  %v7091_v60 = vld [vmem:[#allocation8 + $0x188] ss:$24 sps:$4 sm:$0xff]  }
 0x273   :  { %5531 = vmatpush1.bf16.msra.mxu0 %v7013_v55 }
 0x274   :  { %5532 = vmatprep.subr.bf16.mxu0 %v7021_v36  ;;  %v7099_v36 = vld [vmem:[#allocation8 + $0x75c] ss:$24 sps:$4 sm:$0xff]  }
 0x277   :  { %5533 = vmatpush1.bf16.msra.mxu0 %v7019_v62 }
 0x278   :  { %5534 = vmatprep.subr.bf16.mxu0 %v7027_v0 }
 0x27b   :  { %5535 = vmatpush1.bf16.msra.mxu0 %v7025_v22 }
 0x27c   :  { %5536 = vmatprep.subr.bf16.mxu0 %v7033_v1 }
 0x27f   :  { %5537 = vmatpush1.bf16.msra.mxu0 %v7031_v2 }
 0x280   :  { %5538 = vmatprep.subr.bf16.mxu0 %v7039_v3  ;;  %v7097_v3 = vld [vmem:[#allocation8 + $0x758] ss:$24 sps:$4 sm:$0xff]  }
 0x283   :  { %5539 = vmatpush1.bf16.msra.mxu0 %v7037_v37  ;;  %v7105_v37 = vld [vmem:[#allocation8 + $0x72c] ss:$24 sps:$4 sm:$0xff]  }
 0x284   :  { %5540 = vmatprep.subr.bf16.mxu0 %v7045_v27 }
 0x287   :  { %5541 = vmatpush1.bf16.msra.mxu0 %v7043_v5 }
 0x288   :  { %5542 = vmatprep.subr.bf16.mxu0 %v7051_v58  ;;  %v7100_v58 = vld [vmem:[#allocation8 + $0x458] ss:$24 sps:$4 sm:$0xff]  }
 0x28b   :  { %5543 = vmatpush2.bf16.msra.mxu0 %v7049_v21 }
 0x28c   :  { %5544 = vmatprep.subr.bf16.mxu0 %v7057_v6  ;;  %v7103_v6 = vld [vmem:[#allocation8 + $0x728] ss:$24 sps:$4 sm:$0xff]  }
 0x28f   :  { %5545 = vmatpush2.bf16.msra.mxu0 %v7055_v8  ;;  %v7108_v8 = vld [vmem:[#allocation8 + $0x42c] ss:$24 sps:$4 sm:$0xff]  }
 0x290   :  { %5546 = vmatprep.subr.bf16.mxu0 %v7063_v19  ;;  %v7111_v19 = vld [vmem:[#allocation8 + $0x6fc] ss:$24 sps:$4 sm:$0xff]  }
 0x293   :  { %5547 = vmatpush2.bf16.msra.mxu0 %v7061_v11  ;;  %v7109_v11 = vld [vmem:[#allocation8 + $0x6f8] ss:$24 sps:$4 sm:$0xff]  }
 0x294   :  { %5548 = vmatprep.subr.bf16.mxu0 %v7069_v12  ;;  %v7114_v12 = vld [vmem:[#allocation8 + $0x3fc] ss:$24 sps:$4 sm:$0xff]  }
 0x297   :  { %5549 = vmatpush2.bf16.msra.mxu0 %v7067_v32  ;;  %v7112_v32 = vld [vmem:[#allocation8 + $0x3f8] ss:$24 sps:$4 sm:$0xff]  }
 0x298   :  { %5550 = vmatprep.subr.bf16.mxu0 %v7075_v24  ;;  %v7115_v24 = vld [vmem:[#allocation8 + $0x6c8] ss:$24 sps:$4 sm:$0xff]  }
 0x29b   :  { %5551 = vmatpush2.bf16.msra.mxu0 %v7073_v17  ;;  %v7121_v17 = vld [vmem:[#allocation8 + $0x698] ss:$24 sps:$4 sm:$0xff]  }
 0x29c   :  { %v2942_v30 = vpop.f32.mrf.mxu0  ;;  %5552 = vmatprep.subr.bf16.mxu0 %v7081_v57  ;;  %v7126_v57 = vld [vmem:[#allocation8 + $0x39c] ss:$24 sps:$4 sm:$0xff]  }
 0x29d   :  { %v2985_v25 = vpop.f32.mrf.mxu1  ;;  %v2943_v33 = vadd.f32 %v2942_v30, %v2900_v40  ;;  %v7135_v30 = vld [vmem:[#allocation8 + $0x63c] ss:$24 sps:$4 sm:$0xff]   ;;  %v7136_v40 = vld [vmem:[#allocation8 + $0x338] ss:$24 sps:$4 sm:$0xff]  }
 0x29e   :  { %v2944_v39 = vpop.f32.mrf.mxu0 }
 0x29f   :  { %v2945_v41 = vadd.f32 %v2944_v39, %v2902_v34  ;;  %v2987_v42 = vpop.f32.mrf.mxu1  ;;  %5553 = vmatpush2.bf16.msra.mxu0 %v7079_v29  ;;  %v2986_v62 = vadd.f32 %v2985_v25, %v2943_v33  ;;  %v7132_v29 = vld [vmem:[#allocation8 + $0x36c] ss:$24 sps:$4 sm:$0xff]   ;;  %v7133_v34 = vld [vmem:[#allocation8 + $0x638] ss:$24 sps:$4 sm:$0xff]   ;;  %v7138_v25 = vld [vmem:[#allocation8 + $0x33c] ss:$24 sps:$4 sm:$0xff]  }
 0x2a0   :  { %v2946_v44 = vpop.f32.mrf.mxu0  ;;  %5554 = vmatprep.subr.bf16.mxu0 %v7087_v31  ;;  %v7130_v31 = vld [vmem:[#allocation8 + $0x368] ss:$24 sps:$4 sm:$0xff]   ;;  %v7141_v39 = vld [vmem:[#allocation8 + $0x60c] ss:$24 sps:$4 sm:$0xff]   ;;  %v7148_v33 = vld [vmem:[#allocation8 + $0x5d8] ss:$24 sps:$4 sm:$0xff]  }
 0x2a1   :  { %v2947_v47 = vadd.f32 %v2946_v44, %v2904_v50  ;;  %v2989_v48 = vpop.f32.mrf.mxu1  ;;  %v2988_v52 = vadd.f32 %v2987_v42, %v2945_v41  ;;  %v3000_v27 = vmax.f32 %v2986_v62, 0.0  ;;  %v7139_v50 = vld [vmem:[#allocation8 + $0x608] ss:$24 sps:$4 sm:$0xff]   ;;  %v7144_v41 = vld [vmem:[#allocation8 + $0x30c] ss:$24 sps:$4 sm:$0xff]  }
 0x2a2   :  { %v2948_v49 = vpop.f32.mrf.mxu0  ;;  %v7147_v42 = vld [vmem:[#allocation8 + $0x8dc] ss:$24 sps:$4 sm:$0xff]   ;;  %v7145_v44 = vld [vmem:[#allocation8 + $0x8d8] ss:$24 sps:$4 sm:$0xff]   ;;  %v7168_v62 = vld [vmem:[#allocation8 + $0x54c] ss:$24 sps:$4 sm:$0xff]  }
 0x2a3   :  { %v2990_v53 = vadd.f32 %v2989_v48, %v2947_v47  ;;  %v2949_v54 = vadd.f32 %v2948_v49, %v2906_v46  ;;  %5555 = vmatpush2.bf16.msra.mxu0 %v7085_v43  ;;  %v2991_v55 = vpop.f32.mrf.mxu1  ;;  %v3001_v22 = vmax.f32 %v2988_v52, 0.0  ;;  %v7142_v43 = vld [vmem:[#allocation8 + $0x308] ss:$24 sps:$4 sm:$0xff]   ;;  %v7153_v46 = vld [vmem:[#allocation8 + $0x8ac] ss:$24 sps:$4 sm:$0xff]  }
 0x2a4   :  { %5556 = vmatprep.subr.bf16.mxu0 %v7093_v45  ;;  %v7150_v45 = vld [vmem:[#allocation8 + $0x5dc] ss:$24 sps:$4 sm:$0xff]   ;;  %v7151_v47 = vld [vmem:[#allocation8 + $0x8a8] ss:$24 sps:$4 sm:$0xff]   ;;  %v7156_v48 = vld [vmem:[#allocation8 + $0x5ac] ss:$24 sps:$4 sm:$0xff]  }
 0x2a5   :  { %v2992_v0 = vadd.f32 %v2991_v55, %v2949_v54  ;;  %v3008_v1 = vmax.f32 %v2990_v53, 0.0  ;;  %v7159_v49 = vld [vmem:[#allocation8 + $0x87c] ss:$24 sps:$4 sm:$0xff]   ;;  %v7154_v52 = vld [vmem:[#allocation8 + $0x5a8] ss:$24 sps:$4 sm:$0xff]  }
 0x2a6   :  { %v7157_v53 = vld [vmem:[#allocation8 + $0x878] ss:$24 sps:$4 sm:$0xff]   ;;  %v7162_v54 = vld [vmem:[#allocation8 + $0x57c] ss:$24 sps:$4 sm:$0xff]  }
 0x2a7   :  { %v3009_v2 = vmax.f32 %v2992_v0, 0.0  ;;  %5557 = vmatpush2.bf16.msra.mxu0 %v7091_v60  ;;  %v7832_v21 = vpack.c.bf16 %v3008_v1, %v3000_v27  ;;  %v7165_v60 = vld [vmem:[#allocation8 + $0x84c] ss:$24 sps:$4 sm:$0xff]   ;;  %v7160_v55 = vld [vmem:[#allocation8 + $0x578] ss:$24 sps:$4 sm:$0xff]  }
 0x2a8   :  { %5612 = vmatprep.subr.bf16.mxu0 %v7099_v36  ;;  %v7163_v36 = vld [vmem:[#allocation8 + $0x848] ss:$24 sps:$4 sm:$0xff]   ;;  %v7171_v0 = vld [vmem:[#allocation8 + $0x81c] ss:$24 sps:$4 sm:$0xff]   ;;  %v7169_v1 = vld [vmem:[#allocation8 + $0x818] ss:$24 sps:$4 sm:$0xff]  }
 0x2a9   :  { %v7829_v5 = vpack.c.bf16 %v3009_v2, %v3001_v22  ;;  %v7166_v22 = vld [vmem:[#allocation8 + $0x548] ss:$24 sps:$4 sm:$0xff]   ;;  %v7174_v2 = vld [vmem:[#allocation8 + $0x51c] ss:$24 sps:$4 sm:$0xff]  }
 0x2aa   :  { %5559 = vmatmul.mubr.bf16.vlgmr.msra.gmra.mxu0 %v7755_v14  ;;  %v7175_v27 = vld [vmem:[#allocation8 + $0x7e8] ss:$24 sps:$4 sm:$0xff]  }
 0x2ab   :  { %5613 = vmatpush1.bf16.msra.mxu0 %v7097_v3  ;;  %5644 = vmatprep.mubr.bf16.mxu0 %v7818_v51  ;;  %v7177_v3 = vld [vmem:[#allocation8 + $0x7ec] ss:$24 sps:$4 sm:$0xff]  }
 0x2ac   :  { %5515 = vmatprep.mubr.bf16.mxu1 %v7829_v5  ;;  %5614 = vmatprep.subr.bf16.mxu0 %v7105_v37  ;;  %v7172_v37 = vld [vmem:[#allocation8 + $0x518] ss:$24 sps:$4 sm:$0xff]  }
 0x2ad   :  { %5516 = vmatmul.mubr.bf16.vlgmr.msra.gmra.mxu1 %v7832_v21 }
 0x2ae   :  { %5570 = vmatpush1.bf16.msra.mxu1 %v7100_v58  ;;  %5601 = vmatprep.mubr.bf16.mxu1 %v7788_v56  ;;  %v7180_v58 = vld [vmem:[#allocation8 + $0x4ec] ss:$24 sps:$4 sm:$0xff]  }
 0x2af   :  { %5615 = vmatpush1.bf16.msra.mxu0 %v7103_v6  ;;  %5571 = vmatprep.subr.bf16.mxu1 %v7108_v8  ;;  %v7183_v6 = vld [vmem:[#allocation8 + $0x7bc] ss:$24 sps:$4 sm:$0xff]   ;;  %v7178_v8 = vld [vmem:[#allocation8 + $0x4e8] ss:$24 sps:$4 sm:$0xff]  }
 0x2b0   :  { %5616 = vmatprep.subr.bf16.mxu0 %v7111_v19  ;;  %v7181_v19 = vld [vmem:[#allocation8 + $0x7b8] ss:$24 sps:$4 sm:$0xff]  }
 0x2b2   :  { %5572 = vmatpush1.bf16.msra.mxu1 %v7106_v10  ;;  %v7186_v10 = vld [vmem:[#allocation8 + $0x4bc] ss:$24 sps:$4 sm:$0xff]  }
 0x2b3   :  { %5617 = vmatpush1.bf16.msra.mxu0 %v7109_v11  ;;  %5573 = vmatprep.subr.bf16.mxu1 %v7114_v12  ;;  %v7189_v11 = vld [vmem:[#allocation8 + $0x78c] ss:$24 sps:$4 sm:$0xff]   ;;  %v7184_v12 = vld [vmem:[#allocation8 + $0x4b8] ss:$24 sps:$4 sm:$0xff]  }
 0x2b4   :  { %5618 = vmatprep.subr.bf16.mxu0 %v7117_v13  ;;  %v7187_v13 = vld [vmem:[#allocation8 + $0x788] ss:$24 sps:$4 sm:$0xff]  }
 0x2b6   :  { %5574 = vmatpush1.bf16.msra.mxu1 %v7112_v32  ;;  %v7192_v32 = vld [vmem:[#allocation8 + $0x48c] ss:$24 sps:$4 sm:$0xff]  }
 0x2b7   :  { %5619 = vmatpush1.bf16.msra.mxu0 %v7115_v24  ;;  %5575 = vmatprep.subr.bf16.mxu1 %v7120_v38  ;;  %v7195_v24 = vld [vmem:[#allocation8 + $0x164] ss:$24 sps:$4 sm:$0xff]   ;;  %v7190_v38 = vld [vmem:[#allocation8 + $0x488] ss:$24 sps:$4 sm:$0xff]  }
 0x2b8   :  { %5620 = vmatprep.subr.bf16.mxu0 %v7123_v15  ;;  %v7193_v15 = vld [vmem:[#allocation8 + $0x160] ss:$24 sps:$4 sm:$0xff]  }
 0x2ba   :  { %5576 = vmatpush1.bf16.msra.mxu1 %v7118_v16  ;;  %v7198_v16 = vld [vmem:[#allocation8 + $0xa5c] ss:$24 sps:$4 sm:$0xff]  }
 0x2bb   :  { %5621 = vmatpush1.bf16.msra.mxu0 %v7121_v17  ;;  %5577 = vmatprep.subr.bf16.mxu1 %v7126_v57  ;;  %v7201_v17 = vld [vmem:[#allocation8 + $0x134] ss:$24 sps:$4 sm:$0xff]   ;;  %v7196_v57 = vld [vmem:[#allocation8 + $0xa58] ss:$24 sps:$4 sm:$0xff]  }
 0x2bc   :  { %5622 = vmatprep.subr.bf16.mxu0 %v7129_v18  ;;  %v7199_v18 = vld [vmem:[#allocation8 + $0x130] ss:$24 sps:$4 sm:$0xff]  }
 0x2be   :  { %5578 = vmatpush1.bf16.msra.mxu1 %v7124_v26  ;;  %v7204_v26 = vld [vmem:[#allocation8 + $0xa2c] ss:$24 sps:$4 sm:$0xff]  }
 0x2bf   :  { %5623 = vmatpush1.bf16.msra.mxu0 %v7127_v28  ;;  %5579 = vmatprep.subr.bf16.mxu1 %v7132_v29  ;;  %v7207_v28 = vld [vmem:[#allocation8 + $0x104] ss:$24 sps:$4 sm:$0xff]   ;;  %v7202_v29 = vld [vmem:[#allocation8 + $0xa28] ss:$24 sps:$4 sm:$0xff]  }
 0x2c0   :  { %5624 = vmatprep.subr.bf16.mxu0 %v7135_v30  ;;  %v7205_v30 = vld [vmem:[#allocation8 + $0x100] ss:$24 sps:$4 sm:$0xff]  }
 0x2c2   :  { %5580 = vmatpush1.bf16.msra.mxu1 %v7130_v31  ;;  %v7210_v31 = vld [vmem:[#allocation8 + $0x9fc] ss:$24 sps:$4 sm:$0xff]  }
 0x2c3   :  { %5625 = vmatpush1.bf16.msra.mxu0 %v7133_v34  ;;  %5581 = vmatprep.subr.bf16.mxu1 %v7138_v25  ;;  %v7213_v34 = vld [vmem:[#allocation8 + $0xd4] ss:$24 sps:$4 sm:$0xff]   ;;  %v7208_v25 = vld [vmem:[#allocation8 + $0x9f8] ss:$24 sps:$4 sm:$0xff]  }
 0x2c4   :  { %5626 = vmatprep.subr.bf16.mxu0 %v7141_v39  ;;  %v7216_v39 = vld [vmem:[#allocation8 + $0x9cc] ss:$24 sps:$4 sm:$0xff]  }
 0x2c6   :  { %5582 = vmatpush1.bf16.msra.mxu1 %v7136_v40  ;;  %v7219_v40 = vld [vmem:[#allocation8 + $0xa4] ss:$24 sps:$4 sm:$0xff]  }
 0x2c7   :  { %5627 = vmatpush1.bf16.msra.mxu0 %v7139_v50  ;;  %5583 = vmatprep.subr.bf16.mxu1 %v7144_v41  ;;  %v7214_v50 = vld [vmem:[#allocation8 + $0x9c8] ss:$24 sps:$4 sm:$0xff]  }
 0x2c8   :  { %5628 = vmatprep.subr.bf16.mxu0 %v7147_v42  ;;  %v7217_v41 = vld [vmem:[#allocation8 + $0xa0] ss:$24 sps:$4 sm:$0xff]   ;;  %v7222_v42 = vld [vmem:[#allocation8 + $0x99c] ss:$24 sps:$4 sm:$0xff]  }
 0x2ca   :  { %5584 = vmatpush1.bf16.msra.mxu1 %v7142_v43  ;;  %v7225_v43 = vld [vmem:[#allocation8 + $0x74] ss:$24 sps:$4 sm:$0xff]  }
 0x2cb   :  { %5629 = vmatpush2.bf16.msra.mxu0 %v7145_v44  ;;  %5585 = vmatprep.subr.bf16.mxu1 %v7150_v45  ;;  %v7220_v44 = vld [vmem:[#allocation8 + $0x998] ss:$24 sps:$4 sm:$0xff]  }
 0x2cc   :  { %5630 = vmatprep.subr.bf16.mxu0 %v7153_v46  ;;  %v7223_v45 = vld [vmem:[#allocation8 + $0x70] ss:$24 sps:$4 sm:$0xff]   ;;  %v7228_v46 = vld [vmem:[#allocation8 + $0x96c] ss:$24 sps:$4 sm:$0xff]  }
 0x2ce   :  { %5586 = vmatpush2.bf16.msra.mxu1 %v7148_v33  ;;  %v7231_v33 = vld [vmem:[#allocation8 + $0x44] ss:$24 sps:$4 sm:$0xff]  }
 0x2cf   :  { %5631 = vmatpush2.bf16.msra.mxu0 %v7151_v47  ;;  %5587 = vmatprep.subr.bf16.mxu1 %v7156_v48  ;;  %v7226_v47 = vld [vmem:[#allocation8 + $0x968] ss:$24 sps:$4 sm:$0xff]  }
 0x2d0   :  { %5632 = vmatprep.subr.bf16.mxu0 %v7159_v49  ;;  %v7229_v48 = vld [vmem:[#allocation8 + $0x40] ss:$24 sps:$4 sm:$0xff]   ;;  %v7234_v49 = vld [vmem:[#allocation8 + $0x93c] ss:$24 sps:$4 sm:$0xff]  }
 0x2d2   :  { %5588 = vmatpush2.bf16.msra.mxu1 %v7154_v52  ;;  %v7237_v52 = vld [vmem:[#allocation8 + $0x14] ss:$24 sps:$4 sm:$0xff]  }
 0x2d3   :  { %5633 = vmatpush2.bf16.msra.mxu0 %v7157_v53  ;;  %5589 = vmatprep.subr.bf16.mxu1 %v7162_v54  ;;  %v7232_v53 = vld [vmem:[#allocation8 + $0x938] ss:$24 sps:$4 sm:$0xff]  }
 0x2d4   :  { %5634 = vmatprep.subr.bf16.mxu0 %v7165_v60  ;;  %v7235_v54 = vld [vmem:[#allocation8 + $0x10] ss:$24 sps:$4 sm:$0xff]   ;;  %v7240_v60 = vld [vmem:[#allocation8 + $0x90c] ss:$24 sps:$4 sm:$0xff]  }
 0x2d6   :  { %5590 = vmatpush2.bf16.msra.mxu1 %v7160_v55  ;;  %v7243_v55 = vld [vmem:[#allocation8 + $0x2e4] ss:$24 sps:$4 sm:$0xff]  }
 0x2d7   :  { %5635 = vmatpush2.bf16.msra.mxu0 %v7163_v36  ;;  %5591 = vmatprep.subr.bf16.mxu1 %v7168_v62  ;;  %v7238_v36 = vld [vmem:[#allocation8 + $0x908] ss:$24 sps:$4 sm:$0xff]  }
 0x2d8   :  { %5636 = vmatprep.subr.bf16.mxu0 %v7171_v0  ;;  %v7241_v62 = vld [vmem:[#allocation8 + $0x2e0] ss:$24 sps:$4 sm:$0xff]   ;;  %v7246_v0 = vld [vmem:[#allocation8 + $0xbdc] ss:$24 sps:$4 sm:$0xff]  }
 0x2da   :  { %5592 = vmatpush2.bf16.msra.mxu1 %v7166_v22  ;;  %v7249_v22 = vld [vmem:[#allocation8 + $0x2b4] ss:$24 sps:$4 sm:$0xff]  }
 0x2db   :  { %5637 = vmatpush2.bf16.msra.mxu0 %v7169_v1  ;;  %5593 = vmatprep.subr.bf16.mxu1 %v7174_v2  ;;  %v7244_v1 = vld [vmem:[#allocation8 + $0xbd8] ss:$24 sps:$4 sm:$0xff]  }
 0x2dc   :  { %5638 = vmatprep.subr.bf16.mxu0 %v7177_v3  ;;  %v7247_v2 = vld [vmem:[#allocation8 + $0x2b0] ss:$24 sps:$4 sm:$0xff]   ;;  %v7252_v3 = vld [vmem:[#allocation8 + $0xbac] ss:$24 sps:$4 sm:$0xff]  }
 0x2de   :  { %5594 = vmatpush2.bf16.msra.mxu1 %v7172_v37  ;;  %v7255_v37 = vld [vmem:[#allocation8 + $0x284] ss:$24 sps:$4 sm:$0xff]  }
 0x2df   :  { %5639 = vmatpush2.bf16.msra.mxu0 %v7175_v27  ;;  %5595 = vmatprep.subr.bf16.mxu1 %v7180_v58  ;;  %v7250_v27 = vld [vmem:[#allocation8 + $0xba8] ss:$24 sps:$4 sm:$0xff]  }
 0x2e0   :  { %5640 = vmatprep.subr.bf16.mxu0 %v7183_v6  ;;  %v7253_v58 = vld [vmem:[#allocation8 + $0x280] ss:$24 sps:$4 sm:$0xff]   ;;  %v7258_v6 = vld [vmem:[#allocation8 + $0xb7c] ss:$24 sps:$4 sm:$0xff]  }
 0x2e2   :  { %5596 = vmatpush2.bf16.msra.mxu1 %v7178_v8  ;;  %v7261_v8 = vld [vmem:[#allocation8 + $0x254] ss:$24 sps:$4 sm:$0xff]  }
 0x2e3   :  { %5641 = vmatpush2.bf16.msra.mxu0 %v7181_v19  ;;  %5597 = vmatprep.subr.bf16.mxu1 %v7186_v10  ;;  %v7256_v19 = vld [vmem:[#allocation8 + $0xb78] ss:$24 sps:$4 sm:$0xff]  }
 0x2e4   :  { %5642 = vmatprep.subr.bf16.mxu0 %v7189_v11  ;;  %v7259_v10 = vld [vmem:[#allocation8 + $0x250] ss:$24 sps:$4 sm:$0xff]   ;;  %v7264_v11 = vld [vmem:[#allocation8 + $0xb4c] ss:$24 sps:$4 sm:$0xff]  }
 0x2e6   :  { %5598 = vmatpush2.bf16.msra.mxu1 %v7184_v12  ;;  %v7267_v12 = vld [vmem:[#allocation8 + $0x224] ss:$24 sps:$4 sm:$0xff]  }
 0x2e7   :  { %5643 = vmatpush2.bf16.msra.mxu0 %v7187_v13  ;;  %5599 = vmatprep.subr.bf16.mxu1 %v7192_v32  ;;  %v7262_v13 = vld [vmem:[#allocation8 + $0xb48] ss:$24 sps:$4 sm:$0xff]  }
 0x2e8   :  { %5698 = vmatprep.subr.bf16.mxu0 %v7195_v24  ;;  %v7265_v32 = vld [vmem:[#allocation8 + $0x220] ss:$24 sps:$4 sm:$0xff]   ;;  %v7270_v24 = vld [vmem:[#allocation8 + $0xb1c] ss:$24 sps:$4 sm:$0xff]  }
 0x2ea   :  { %5600 = vmatpush2.bf16.msra.mxu1 %v7190_v38  ;;  %5645 = vmatmul.mubr.bf16.vlgmr.msra.gmra.mxu0 %v7820_v63  ;;  %v7273_v38 = vld [vmem:[#allocation8 + $0x1f4] ss:$24 sps:$4 sm:$0xff]  }
 0x2eb   :  { %5699 = vmatpush1.bf16.msra.mxu0 %v7193_v15  ;;  %5730 = vmatprep.mubr.bf16.mxu0 %v7775_v20  ;;  %v7211_v20 = vld [vmem:[#allocation8 + $0xd0] ss:$24 sps:$4 sm:$0xff]  }
 0x2ec   :  { %5655 = vmatprep.subr.bf16.mxu1 %v7198_v16  ;;  %5700 = vmatprep.subr.bf16.mxu0 %v7201_v17  ;;  %v7268_v15 = vld [vmem:[#allocation8 + $0xb18] ss:$24 sps:$4 sm:$0xff]   ;;  %v7276_v17 = vld [vmem:[#allocation8 + $0xaec] ss:$24 sps:$4 sm:$0xff]  }
 0x2ed   :  { %5602 = vmatmul.mubr.bf16.vlgmr.msra.gmra.mxu1 %v7804_v4  ;;  %v7271_v16 = vld [vmem:[#allocation8 + $0x1f0] ss:$24 sps:$4 sm:$0xff]  }
 0x2ee   :  { %5656 = vmatpush1.bf16.msra.mxu1 %v7196_v57  ;;  %5687 = vmatprep.mubr.bf16.mxu1 %v7829_v5  ;;  %v7279_v57 = vld [vmem:[#allocation8 + $0x1c4] ss:$24 sps:$4 sm:$0xff]  }
 0x2ef   :  { %5701 = vmatpush1.bf16.msra.mxu0 %v7199_v18  ;;  %5657 = vmatprep.subr.bf16.mxu1 %v7204_v26  ;;  %v7274_v18 = vld [vmem:[#allocation8 + $0xae8] ss:$24 sps:$4 sm:$0xff]  }
 0x2f0   :  { %5702 = vmatprep.subr.bf16.mxu0 %v7207_v28  ;;  %v7277_v26 = vld [vmem:[#allocation8 + $0x1c0] ss:$24 sps:$4 sm:$0xff]   ;;  %v7282_v28 = vld [vmem:[#allocation8 + $0xabc] ss:$24 sps:$4 sm:$0xff]  }
 0x2f2   :  { %5658 = vmatpush1.bf16.msra.mxu1 %v7202_v29  ;;  %v7285_v29 = vld [vmem:[#allocation8 + $0x194] ss:$24 sps:$4 sm:$0xff]  }
 0x2f3   :  { %5703 = vmatpush1.bf16.msra.mxu0 %v7205_v30  ;;  %5659 = vmatprep.subr.bf16.mxu1 %v7210_v31  ;;  %v7280_v30 = vld [vmem:[#allocation8 + $0xab8] ss:$24 sps:$4 sm:$0xff]  }
 0x2f4   :  { %5704 = vmatprep.subr.bf16.mxu0 %v7213_v34  ;;  %v7283_v31 = vld [vmem:[#allocation8 + $0x190] ss:$24 sps:$4 sm:$0xff]   ;;  %v7288_v34 = vld [vmem:[#allocation8 + $0xa8c] ss:$24 sps:$4 sm:$0xff]  }
 0x2f6   :  { %5660 = vmatpush1.bf16.msra.mxu1 %v7208_v25  ;;  %v7291_v25 = vld [vmem:[#allocation8 + $0x764] ss:$24 sps:$4 sm:$0xff]  }
 0x2f7   :  { %5705 = vmatpush1.bf16.msra.mxu0 %v7211_v20  ;;  %5661 = vmatprep.subr.bf16.mxu1 %v7216_v39  ;;  %v7286_v20 = vld [vmem:[#allocation8 + $0xa88] ss:$24 sps:$4 sm:$0xff]  }
 0x2f8   :  { %5706 = vmatprep.subr.bf16.mxu0 %v7219_v40  ;;  %v7289_v39 = vld [vmem:[#allocation8 + $0x760] ss:$24 sps:$4 sm:$0xff]   ;;  %v7294_v40 = vld [vmem:[#allocation8 + $0x464] ss:$24 sps:$4 sm:$0xff]  }
 0x2fa   :  { %5662 = vmatpush1.bf16.msra.mxu1 %v7214_v50  ;;  %v7297_v50 = vld [vmem:[#allocation8 + $0x734] ss:$24 sps:$4 sm:$0xff]  }
 0x2fb   :  { %5707 = vmatpush1.bf16.msra.mxu0 %v7217_v41  ;;  %5663 = vmatprep.subr.bf16.mxu1 %v7222_v42  ;;  %v7292_v41 = vld [vmem:[#allocation8 + $0x460] ss:$24 sps:$4 sm:$0xff]   ;;  %v7295_v42 = vld [vmem:[#allocation8 + $0x730] ss:$24 sps:$4 sm:$0xff]  }
 0x2fc   :  { %5708 = vmatprep.subr.bf16.mxu0 %v7225_v43  ;;  %v7300_v43 = vld [vmem:[#allocation8 + $0x434] ss:$24 sps:$4 sm:$0xff]  }
 0x2fe   :  { %5664 = vmatpush1.bf16.msra.mxu1 %v7220_v44  ;;  %v7303_v44 = vld [vmem:[#allocation8 + $0x704] ss:$24 sps:$4 sm:$0xff]  }
 0x2ff   :  { %5709 = vmatpush1.bf16.msra.mxu0 %v7223_v45  ;;  %5665 = vmatprep.subr.bf16.mxu1 %v7228_v46  ;;  %v7298_v45 = vld [vmem:[#allocation8 + $0x430] ss:$24 sps:$4 sm:$0xff]   ;;  %v7301_v46 = vld [vmem:[#allocation8 + $0x700] ss:$24 sps:$4 sm:$0xff]  }
 0x300   :  { %5710 = vmatprep.subr.bf16.mxu0 %v7231_v33  ;;  %v7306_v33 = vld [vmem:[#allocation8 + $0x404] ss:$24 sps:$4 sm:$0xff]  }
 0x302   :  { %5666 = vmatpush1.bf16.msra.mxu1 %v7226_v47  ;;  %v7304_v47 = vld [vmem:[#allocation8 + $0x400] ss:$24 sps:$4 sm:$0xff]  }
 0x303   :  { %5711 = vmatpush1.bf16.msra.mxu0 %v7229_v48  ;;  %5667 = vmatprep.subr.bf16.mxu1 %v7234_v49  ;;  %v7312_v48 = vld [vmem:[#allocation8 + $0x3d4] ss:$24 sps:$4 sm:$0xff]   ;;  %v7315_v49 = vld [vmem:[#allocation8 + $0x6a4] ss:$24 sps:$4 sm:$0xff]  }
 0x304   :  { %5712 = vmatprep.subr.bf16.mxu0 %v7237_v52  ;;  %v7310_v52 = vld [vmem:[#allocation8 + $0x3d0] ss:$24 sps:$4 sm:$0xff]  }
 0x306   :  { %5668 = vmatpush1.bf16.msra.mxu1 %v7232_v53  ;;  %v7318_v53 = vld [vmem:[#allocation8 + $0x3a4] ss:$24 sps:$4 sm:$0xff]  }
 0x307   :  { %5713 = vmatpush1.bf16.msra.mxu0 %v7235_v54  ;;  %5669 = vmatprep.subr.bf16.mxu1 %v7240_v60  ;;  %v7321_v54 = vld [vmem:[#allocation8 + $0x674] ss:$24 sps:$4 sm:$0xff]   ;;  %v7316_v60 = vld [vmem:[#allocation8 + $0x3a0] ss:$24 sps:$4 sm:$0xff]  }
 0x308   :  { %5714 = vmatprep.subr.bf16.mxu0 %v7243_v55  ;;  %v7319_v55 = vld [vmem:[#allocation8 + $0x670] ss:$24 sps:$4 sm:$0xff]  }
 0x30a   :  { %5670 = vmatpush1.bf16.msra.mxu1 %v7238_v36  ;;  %v7324_v36 = vld [vmem:[#allocation8 + $0x374] ss:$24 sps:$4 sm:$0xff]  }
 0x30b   :  { %5715 = vmatpush2.bf16.msra.mxu0 %v7241_v62  ;;  %5671 = vmatprep.subr.bf16.mxu1 %v7246_v0  ;;  %v7327_v62 = vld [vmem:[#allocation8 + $0x644] ss:$24 sps:$4 sm:$0xff]   ;;  %v7322_v0 = vld [vmem:[#allocation8 + $0x370] ss:$24 sps:$4 sm:$0xff]  }
 0x30c   :  { %5716 = vmatprep.subr.bf16.mxu0 %v7249_v22  ;;  %v7325_v22 = vld [vmem:[#allocation8 + $0x640] ss:$24 sps:$4 sm:$0xff]  }
 0x30e   :  { %5672 = vmatpush2.bf16.msra.mxu1 %v7244_v1  ;;  %v7330_v1 = vld [vmem:[#allocation8 + $0x344] ss:$24 sps:$4 sm:$0xff]  }
 0x30f   :  { %5717 = vmatpush2.bf16.msra.mxu0 %v7247_v2  ;;  %5673 = vmatprep.subr.bf16.mxu1 %v7252_v3  ;;  %v7333_v2 = vld [vmem:[#allocation8 + $0x614] ss:$24 sps:$4 sm:$0xff]   ;;  %v7328_v3 = vld [vmem:[#allocation8 + $0x340] ss:$24 sps:$4 sm:$0xff]  }
 0x310   :  { %5718 = vmatprep.subr.bf16.mxu0 %v7255_v37  ;;  %v7331_v37 = vld [vmem:[#allocation8 + $0x610] ss:$24 sps:$4 sm:$0xff]  }
 0x312   :  { %5674 = vmatpush2.bf16.msra.mxu1 %v7250_v27  ;;  %v7336_v27 = vld [vmem:[#allocation8 + $0x314] ss:$24 sps:$4 sm:$0xff]  }
 0x313   :  { %5719 = vmatpush2.bf16.msra.mxu0 %v7253_v58  ;;  %5675 = vmatprep.subr.bf16.mxu1 %v7258_v6  ;;  %v7339_v58 = vld [vmem:[#allocation8 + $0x8e4] ss:$24 sps:$4 sm:$0xff]   ;;  %v7334_v6 = vld [vmem:[#allocation8 + $0x310] ss:$24 sps:$4 sm:$0xff]  }
 0x314   :  { %5720 = vmatprep.subr.bf16.mxu0 %v7261_v8  ;;  %v7337_v8 = vld [vmem:[#allocation8 + $0x8e0] ss:$24 sps:$4 sm:$0xff]  }
 0x316   :  { %5676 = vmatpush2.bf16.msra.mxu1 %v7256_v19  ;;  %v7342_v19 = vld [vmem:[#allocation8 + $0x5e4] ss:$24 sps:$4 sm:$0xff]  }
 0x317   :  { %5721 = vmatpush2.bf16.msra.mxu0 %v7259_v10  ;;  %5677 = vmatprep.subr.bf16.mxu1 %v7264_v11  ;;  %v7345_v10 = vld [vmem:[#allocation8 + $0x8b4] ss:$24 sps:$4 sm:$0xff]   ;;  %v7340_v11 = vld [vmem:[#allocation8 + $0x5e0] ss:$24 sps:$4 sm:$0xff]  }
 0x318   :  { %5722 = vmatprep.subr.bf16.mxu0 %v7267_v12  ;;  %v7343_v12 = vld [vmem:[#allocation8 + $0x8b0] ss:$24 sps:$4 sm:$0xff]  }
 0x31a   :  { %5678 = vmatpush2.bf16.msra.mxu1 %v7262_v13  ;;  %v7348_v13 = vld [vmem:[#allocation8 + $0x5b4] ss:$24 sps:$4 sm:$0xff]  }
 0x31b   :  { %5723 = vmatpush2.bf16.msra.mxu0 %v7265_v32  ;;  %5679 = vmatprep.subr.bf16.mxu1 %v7270_v24  ;;  %v7351_v32 = vld [vmem:[#allocation8 + $0x884] ss:$24 sps:$4 sm:$0xff]   ;;  %v7346_v24 = vld [vmem:[#allocation8 + $0x5b0] ss:$24 sps:$4 sm:$0xff]  }
 0x31c   :  { %5724 = vmatprep.subr.bf16.mxu0 %v7273_v38  ;;  %v7349_v38 = vld [vmem:[#allocation8 + $0x880] ss:$24 sps:$4 sm:$0xff]  }
 0x31e   :  { %5680 = vmatpush2.bf16.msra.mxu1 %v7268_v15  ;;  %v7354_v15 = vld [vmem:[#allocation8 + $0x584] ss:$24 sps:$4 sm:$0xff]  }
 0x31f   :  { %5725 = vmatpush2.bf16.msra.mxu0 %v7271_v16  ;;  %5681 = vmatprep.subr.bf16.mxu1 %v7276_v17  ;;  %v7357_v16 = vld [vmem:[#allocation8 + $0x854] ss:$24 sps:$4 sm:$0xff]   ;;  %v7352_v17 = vld [vmem:[#allocation8 + $0x580] ss:$24 sps:$4 sm:$0xff]  }
 0x320   :  { %5726 = vmatprep.subr.bf16.mxu0 %v7279_v57  ;;  %v7355_v57 = vld [vmem:[#allocation8 + $0x850] ss:$24 sps:$4 sm:$0xff]  }
 0x322   :  { %5682 = vmatpush2.bf16.msra.mxu1 %v7274_v18  ;;  %v7360_v18 = vld [vmem:[#allocation8 + $0x554] ss:$24 sps:$4 sm:$0xff]  }
 0x323   :  { %5727 = vmatpush2.bf16.msra.mxu0 %v7277_v26  ;;  %5683 = vmatprep.subr.bf16.mxu1 %v7282_v28  ;;  %v7363_v26 = vld [vmem:[#allocation8 + $0x824] ss:$24 sps:$4 sm:$0xff]   ;;  %v7358_v28 = vld [vmem:[#allocation8 + $0x550] ss:$24 sps:$4 sm:$0xff]  }
 0x324   :  { %5728 = vmatprep.subr.bf16.mxu0 %v7285_v29  ;;  %v7361_v29 = vld [vmem:[#allocation8 + $0x820] ss:$24 sps:$4 sm:$0xff]  }
 0x326   :  { %5684 = vmatpush2.bf16.msra.mxu1 %v7280_v30  ;;  %v7366_v30 = vld [vmem:[#allocation8 + $0x524] ss:$24 sps:$4 sm:$0xff]  }
 0x327   :  { %5729 = vmatpush2.bf16.msra.mxu0 %v7283_v31  ;;  %5685 = vmatprep.subr.bf16.mxu1 %v7288_v34  ;;  %v7369_v31 = vld [vmem:[#allocation8 + $0x7f4] ss:$24 sps:$4 sm:$0xff]   ;;  %v7364_v34 = vld [vmem:[#allocation8 + $0x520] ss:$24 sps:$4 sm:$0xff]  }
 0x328   :  { %5784 = vmatprep.subr.bf16.mxu0 %v7291_v25  ;;  %v7367_v25 = vld [vmem:[#allocation8 + $0x7f0] ss:$24 sps:$4 sm:$0xff]  }
 0x32a   :  { %5686 = vmatpush2.bf16.msra.mxu1 %v7286_v20  ;;  %5731 = vmatmul.mubr.bf16.vlgmr.msra.gmra.mxu0 %v7755_v14  ;;  %v7309_v14 = vld [vmem:[#allocation8 + $0x6d4] ss:$24 sps:$4 sm:$0xff]  }
 0x32b   :  { %5785 = vmatpush1.bf16.msra.mxu0 %v7289_v39  ;;  %5816 = vmatprep.mubr.bf16.mxu0 %v7818_v51  ;;  %v7307_v51 = vld [vmem:[#allocation8 + $0x6d0] ss:$24 sps:$4 sm:$0xff]   ;;  %v7372_v20 = vld [vmem:[#allocation8 + $0x4f4] ss:$24 sps:$4 sm:$0xff]   ;;  %v7375_v39 = vld [vmem:[#allocation8 + $0x7c4] ss:$24 sps:$4 sm:$0xff]  }
 0x32c   :  { %5741 = vmatprep.subr.bf16.mxu1 %v7294_v40  ;;  %5786 = vmatprep.subr.bf16.mxu0 %v7297_v50  ;;  %v7370_v40 = vld [vmem:[#allocation8 + $0x4f0] ss:$24 sps:$4 sm:$0xff]   ;;  %v7373_v50 = vld [vmem:[#allocation8 + $0x7c0] ss:$24 sps:$4 sm:$0xff]  }
 0x32d   :  { %5688 = vmatmul.mubr.bf16.vlgmr.msra.gmra.mxu1 %v7832_v21 }
 0x32e   :  { %5742 = vmatpush1.bf16.msra.mxu1 %v7292_v41  ;;  %5773 = vmatprep.mubr.bf16.mxu1 %v7788_v56  ;;  %v7313_v56 = vld [vmem:[#allocation8 + $0x6a0] ss:$24 sps:$4 sm:$0xff]   ;;  %v7378_v41 = vld [vmem:[#allocation8 + $0x4c4] ss:$24 sps:$4 sm:$0xff]  }
 0x32f   :  { %5787 = vmatpush1.bf16.msra.mxu0 %v7295_v42  ;;  %5743 = vmatprep.subr.bf16.mxu1 %v7300_v43  ;;  %v7381_v42 = vld [vmem:[#allocation8 + $0x794] ss:$24 sps:$4 sm:$0xff]   ;;  %v7376_v43 = vld [vmem:[#allocation8 + $0x4c0] ss:$24 sps:$4 sm:$0xff]  }
 0x330   :  { %5788 = vmatprep.subr.bf16.mxu0 %v7303_v44  ;;  %v7379_v44 = vld [vmem:[#allocation8 + $0x790] ss:$24 sps:$4 sm:$0xff]  }
 0x332   :  { %5744 = vmatpush1.bf16.msra.mxu1 %v7298_v45  ;;  %v7384_v45 = vld [vmem:[#allocation8 + $0x494] ss:$24 sps:$4 sm:$0xff]  }
 0x333   :  { %5789 = vmatpush1.bf16.msra.mxu0 %v7301_v46  ;;  %5745 = vmatprep.subr.bf16.mxu1 %v7306_v33  ;;  %v7382_v46 = vld [vmem:[#allocation8 + $0x490] ss:$24 sps:$4 sm:$0xff]   ;;  %v7387_v33 = vld [vmem:[#allocation8 + $0xa64] ss:$24 sps:$4 sm:$0xff]  }
 0x334   :  { %5790 = vmatprep.subr.bf16.mxu0 %v7309_v14  ;;  %v7385_v14 = vld [vmem:[#allocation8 + $0xa60] ss:$24 sps:$4 sm:$0xff]  }
 0x336   :  { %5746 = vmatpush1.bf16.msra.mxu1 %v7304_v47  ;;  %v7390_v47 = vld [vmem:[#allocation8 + $0xa34] ss:$24 sps:$4 sm:$0xff]  }
 0x337   :  { %5791 = vmatpush1.bf16.msra.mxu0 %v7307_v51  ;;  %5747 = vmatprep.subr.bf16.mxu1 %v7312_v48  ;;  %v7388_v51 = vld [vmem:[#allocation8 + $0xa30] ss:$24 sps:$4 sm:$0xff]   ;;  %v7393_v48 = vld [vmem:[#allocation8 + $0xa04] ss:$24 sps:$4 sm:$0xff]  }
 0x338   :  { %5792 = vmatprep.subr.bf16.mxu0 %v7315_v49  ;;  %v7391_v49 = vld [vmem:[#allocation8 + $0xa00] ss:$24 sps:$4 sm:$0xff]  }
 0x33a   :  { %5748 = vmatpush1.bf16.msra.mxu1 %v7310_v52  ;;  %v7396_v52 = vld [vmem:[#allocation8 + $0x9d4] ss:$24 sps:$4 sm:$0xff]  }
 0x33b   :  { %5793 = vmatpush1.bf16.msra.mxu0 %v7313_v56  ;;  %5749 = vmatprep.subr.bf16.mxu1 %v7318_v53  ;;  %v7394_v56 = vld [vmem:[#allocation8 + $0x9d0] ss:$24 sps:$4 sm:$0xff]   ;;  %v7399_v53 = vld [vmem:[#allocation8 + $0x9a4] ss:$24 sps:$4 sm:$0xff]  }
 0x33c   :  { %5794 = vmatprep.subr.bf16.mxu0 %v7321_v54  ;;  %v7402_v54 = vld [vmem:[#allocation8 + $0x974] ss:$24 sps:$4 sm:$0xff]  }
 0x33e   :  { %5750 = vmatpush1.bf16.msra.mxu1 %v7316_v60  ;;  %v7405_v60 = vld [vmem:[#allocation8 + $0x944] ss:$24 sps:$4 sm:$0xff]  }
 0x33f   :  { %5795 = vmatpush1.bf16.msra.mxu0 %v7319_v55  ;;  %5751 = vmatprep.subr.bf16.mxu1 %v7324_v36  ;;  %v7408_v55 = vld [vmem:[#allocation8 + $0x914] ss:$24 sps:$4 sm:$0xff]   ;;  %v7406_v36 = vld [vmem:[#allocation8 + $0x910] ss:$24 sps:$4 sm:$0xff]  }
 0x340   :  { %5796 = vmatprep.subr.bf16.mxu0 %v7327_v62  ;;  %v7411_v62 = vld [vmem:[#allocation8 + $0xbe4] ss:$24 sps:$4 sm:$0xff]  }
 0x342   :  { %5752 = vmatpush1.bf16.msra.mxu1 %v7322_v0  ;;  %v7409_v0 = vld [vmem:[#allocation8 + $0xbe0] ss:$24 sps:$4 sm:$0xff]  }
 0x343   :  { %5797 = vmatpush1.bf16.msra.mxu0 %v7325_v22  ;;  %5753 = vmatprep.subr.bf16.mxu1 %v7330_v1  ;;  %v7414_v22 = vld [vmem:[#allocation8 + $0xbb4] ss:$24 sps:$4 sm:$0xff]   ;;  %v7412_v1 = vld [vmem:[#allocation8 + $0xbb0] ss:$24 sps:$4 sm:$0xff]  }
 0x344   :  { %5798 = vmatprep.subr.bf16.mxu0 %v7333_v2  ;;  %v7417_v2 = vld [vmem:[#allocation8 + $0xb84] ss:$24 sps:$4 sm:$0xff]  }
 0x346   :  { %5754 = vmatpush1.bf16.msra.mxu1 %v7328_v3  ;;  %v7415_v3 = vld [vmem:[#allocation8 + $0xb80] ss:$24 sps:$4 sm:$0xff]  }
 0x347   :  { %5799 = vmatpush1.bf16.msra.mxu0 %v7331_v37  ;;  %5755 = vmatprep.subr.bf16.mxu1 %v7336_v27  ;;  %v7420_v37 = vld [vmem:[#allocation8 + $0xb54] ss:$24 sps:$4 sm:$0xff]   ;;  %v7418_v27 = vld [vmem:[#allocation8 + $0xb50] ss:$24 sps:$4 sm:$0xff]  }
 0x348   :  { %5800 = vmatprep.subr.bf16.mxu0 %v7339_v58  ;;  %v7423_v58 = vld [vmem:[#allocation8 + $0xb24] ss:$24 sps:$4 sm:$0xff]  }
 0x34a   :  { %5756 = vmatpush1.bf16.msra.mxu1 %v7334_v6  ;;  %v7421_v6 = vld [vmem:[#allocation8 + $0xb20] ss:$24 sps:$4 sm:$0xff]  }
 0x34b   :  { %5801 = vmatpush2.bf16.msra.mxu0 %v7337_v8  ;;  %5757 = vmatprep.subr.bf16.mxu1 %v7342_v19  ;;  %v7426_v8 = vld [vmem:[#allocation8 + $0xaf4] ss:$24 sps:$4 sm:$0xff]   ;;  %v7424_v19 = vld [vmem:[#allocation8 + $0xaf0] ss:$24 sps:$4 sm:$0xff]  }
 0x34c   :  { %5802 = vmatprep.subr.bf16.mxu0 %v7345_v10  ;;  %v7429_v10 = vld [vmem:[#allocation8 + $0xac4] ss:$24 sps:$4 sm:$0xff]  }
 0x34e   :  { %5758 = vmatpush2.bf16.msra.mxu1 %v7340_v11  ;;  %v7427_v11 = vld [vmem:[#allocation8 + $0xac0] ss:$24 sps:$4 sm:$0xff]  }
 0x34f   :  { %5803 = vmatpush2.bf16.msra.mxu0 %v7343_v12  ;;  %5759 = vmatprep.subr.bf16.mxu1 %v7348_v13  ;;  %v7432_v12 = vld [vmem:[#allocation8 + $0xa94] ss:$24 sps:$4 sm:$0xff]   ;;  %v7430_v13 = vld [vmem:[#allocation8 + $0xa90] ss:$24 sps:$4 sm:$0xff]  }
 0x350   :  { %5804 = vmatprep.subr.bf16.mxu0 %v7351_v32  ;;  %v5388_v32 = vpop.f32.mrf.mxu0 }
 0x352   :  { %5760 = vmatpush2.bf16.msra.mxu1 %v7346_v24  ;;  %v5390_v24 = vpop.f32.mrf.mxu0 }
 0x353   :  { %5805 = vmatpush2.bf16.msra.mxu0 %v7349_v38  ;;  %5761 = vmatprep.subr.bf16.mxu1 %v7354_v15  ;;  %v5431_v38 = vpop.f32.mrf.mxu1 }
 0x354   :  { %5806 = vmatprep.subr.bf16.mxu0 %v7357_v16  ;;  %v5392_v15 = vpop.f32.mrf.mxu0 }
 0x355   :  { %v5433_v16 = vpop.f32.mrf.mxu1 }
 0x356   :  { %5762 = vmatpush2.bf16.msra.mxu1 %v7352_v17  ;;  %v5394_v17 = vpop.f32.mrf.mxu0 }
 0x357   :  { %5807 = vmatpush2.bf16.msra.mxu0 %v7355_v57  ;;  %5763 = vmatprep.subr.bf16.mxu1 %v7360_v18  ;;  %v5435_v18 = vpop.f32.mrf.mxu1 }
 0x358   :  { %5808 = vmatprep.subr.bf16.mxu0 %v7363_v26  ;;  %v5474_v57 = vpop.f32.mrf.mxu0 }
 0x35a   :  { %5764 = vmatpush2.bf16.msra.mxu1 %v7358_v28  ;;  %v5476_v26 = vpop.f32.mrf.mxu0  ;;  %v5437_v28 = vpop.f32.mrf.mxu1 }
 0x35b   :  { %5809 = vmatpush2.bf16.msra.mxu0 %v7361_v29  ;;  %5765 = vmatprep.subr.bf16.mxu1 %v7366_v30 }
 0x35c   :  { %5810 = vmatprep.subr.bf16.mxu0 %v7369_v31  ;;  %v5478_v29 = vpop.f32.mrf.mxu0 }
 0x35e   :  { %5766 = vmatpush2.bf16.msra.mxu1 %v7364_v34  ;;  %v5480_v31 = vpop.f32.mrf.mxu0 }
 0x35f   :  { %5811 = vmatpush2.bf16.msra.mxu0 %v7367_v25  ;;  %5767 = vmatprep.subr.bf16.mxu1 %v7372_v20 }
 0x360   :  { %5812 = vmatprep.subr.bf16.mxu0 %v7375_v39 }
 0x362   :  { %5768 = vmatpush2.bf16.msra.mxu1 %v7370_v40 }
 0x363   :  { %5813 = vmatpush2.bf16.msra.mxu0 %v7373_v50  ;;  %5769 = vmatprep.subr.bf16.mxu1 %v7378_v41 }
 0x364   :  { %5814 = vmatprep.subr.bf16.mxu0 %v7381_v42 }
 0x366   :  { %5770 = vmatpush2.bf16.msra.mxu1 %v7376_v43 }
 0x367   :  { %5815 = vmatpush2.bf16.msra.mxu0 %v7379_v44  ;;  %5771 = vmatprep.subr.bf16.mxu1 %v7384_v45 }
 0x36a   :  { %5772 = vmatpush2.bf16.msra.mxu1 %v7382_v46  ;;  %5817 = vmatmul.mubr.bf16.vlgmr.msra.gmra.mxu0 %v7820_v63  ;;  %v7397_v63 = vld [vmem:[#allocation8 + $0x9a0] ss:$24 sps:$4 sm:$0xff]   ;;  %v5560_v25 = vpop.f32.mrf.mxu0 }
 0x36b   :  { %5827 = vmatprep.subr.bf16.mxu1 %v7387_v33 }
 0x36c   :  { %v5562_v39 = vpop.f32.mrf.mxu0 }
 0x36d   :  { %5774 = vmatmul.mubr.bf16.vlgmr.msra.gmra.mxu1 %v7804_v4  ;;  %v7400_v4 = vld [vmem:[#allocation8 + $0x970] ss:$24 sps:$4 sm:$0xff]   ;;  %v5517_v30 = vpop.f32.mrf.mxu1 }
 0x36e   :  { %5828 = vmatpush1.bf16.msra.mxu1 %v7385_v14  ;;  %5859 = vmatprep.mubr.bf16.mxu1 %v7829_v5  ;;  %v7403_v5 = vld [vmem:[#allocation8 + $0x940] ss:$24 sps:$4 sm:$0xff]  }
 0x36f   :  { %5829 = vmatprep.subr.bf16.mxu1 %v7390_v47  ;;  %v5519_v34 = vpop.f32.mrf.mxu1  ;;  %v3402_v47 = vld [vmem:[#allocation10] sm:$0x3f] }
 0x371   :  { %v7850_v20 = vpop.f32.mrf.mxu1 }
 0x372   :  { %5830 = vmatpush1.bf16.msra.mxu1 %v7388_v51  ;;  %v3411_v51 = vrot.slane %v3402_v47, %v7758_v35 }
 0x373   :  { %5831 = vmatprep.subr.bf16.mxu1 %v7393_v48  ;;  %v5523_v40 = vpop.f32.mrf.mxu1 }
 0x376   :  { %5832 = vmatpush1.bf16.msra.mxu1 %v7391_v49 }
 0x377   :  { %5833 = vmatprep.subr.bf16.mxu1 %v7396_v52  ;;  %v3407_v52 = vrot.slane %v3402_v47, %v7729_v61 }
 0x37a   :  { %5834 = vmatpush1.bf16.msra.mxu1 %v7394_v56  ;;  %v3415_v56 = vrot.slane %v3402_v47, %v7792_v59 }
 0x37b   :  { %5835 = vmatprep.subr.bf16.mxu1 %v7399_v53 }
 0x37e   :  { %5836 = vmatpush1.bf16.msra.mxu1 %v7397_v63  ;;  %v5391_v63 = vadd.f32 %v5390_v24, %v3411_v51 }
 0x37f   :  { %5837 = vmatprep.subr.bf16.mxu1 %v7402_v54 }
 0x382   :  { %5838 = vmatpush1.bf16.msra.mxu1 %v7400_v4  ;;  %v5389_v4 = vadd.f32 %v5388_v32, %v3407_v52 }
 0x383   :  { %5839 = vmatprep.subr.bf16.mxu1 %v7405_v60  ;;  %v5561_v60 = vadd.f32 %v5560_v25, %v3415_v56 }
 0x386   :  { %5840 = vmatpush1.bf16.msra.mxu1 %v7403_v5  ;;  %v3419_v5 = vrot.slane %v3402_v47, %v7768_v9 }
 0x387   :  { %5841 = vmatprep.subr.bf16.mxu1 %v7408_v55 }
 0x38a   :  { %5842 = vmatpush1.bf16.msra.mxu1 %v7406_v36  ;;  %v5395_v36 = vadd.f32 %v5394_v17, %v3411_v51  ;;  %v3423_v17 = vrot.slane %v3402_v47, %v7812_v7 }
 0x38b   :  { %5843 = vmatprep.subr.bf16.mxu1 %v7411_v62  ;;  %v5434_v62 = vadd.f32 %v5433_v16, %v5391_v63 }
 0x38e   :  { %5844 = vmatpush2.bf16.msra.mxu1 %v7409_v0 }
 0x38f   :  { %5845 = vmatprep.subr.bf16.mxu1 %v7414_v22 }
 0x392   :  { %5846 = vmatpush2.bf16.msra.mxu1 %v7412_v1  ;;  %v5432_v1 = vadd.f32 %v5431_v38, %v5389_v4 }
 0x393   :  { %5847 = vmatprep.subr.bf16.mxu1 %v7417_v2  ;;  %v5393_v2 = vadd.f32 %v5392_v15, %v3407_v52 }
 0x395   :  { %v5436_v32 = vadd.f32 %v5435_v18, %v5393_v2 }
 0x396   :  { %5848 = vmatpush2.bf16.msra.mxu1 %v7415_v3  ;;  %v5477_v3 = vadd.f32 %v5476_v26, %v5434_v62  ;;  %v7443_v62 = vld [vmem:[#allocation2 + $0x18] sm:$0xff] }
 0x397   :  { %5849 = vmatprep.subr.bf16.mxu1 %v7420_v37  ;;  %v5563_v37 = vadd.f32 %v5562_v39, %v3419_v5  ;;  %v5479_v15 = vadd.f32 %v5478_v29, %v5436_v32  ;;  %v3427_v39 = vrot.slane %v3402_v47, %v7809_v23 }
 0x39a   :  { %5850 = vmatpush2.bf16.msra.mxu1 %v7418_v27 }
 0x39b   :  { %5851 = vmatprep.subr.bf16.mxu1 %v7423_v58 }
 0x39e   :  { %5852 = vmatpush2.bf16.msra.mxu1 %v7421_v6 }
 0x39f   :  { %5853 = vmatprep.subr.bf16.mxu1 %v7426_v8  ;;  %v5438_v8 = vadd.f32 %v5437_v28, %v5395_v36 }
 0x3a1   :  { %v5481_v16 = vadd.f32 %v5480_v31, %v5438_v8  ;;  %v5522_v31 = vadd.f32 %v7850_v20, %v5479_v15 }
 0x3a2   :  { %5854 = vmatpush2.bf16.msra.mxu1 %v7424_v19  ;;  %v5475_v19 = vadd.f32 %v5474_v57, %v5432_v1 }
 0x3a3   :  { %5855 = vmatprep.subr.bf16.mxu1 %v7429_v10  ;;  %v5520_v10 = vadd.f32 %v5519_v34, %v5477_v3  ;;  %v5524_v57 = vadd.f32 %v5523_v40, %v5481_v16 }
 0x3a4   :  { %v5518_v24 = vadd.f32 %v5517_v30, %v5475_v19 }
 0x3a6   :  { %5856 = vmatpush2.bf16.msra.mxu1 %v7427_v11 }
 0x3a7   :  { %5857 = vmatprep.subr.bf16.mxu1 %v7432_v12 }
 0x3aa   :  { %5858 = vmatpush2.bf16.msra.mxu1 %v7430_v13 }
 0x3ad   :  { %5860 = vmatmul.mubr.bf16.vlgmr.msra.gmra.mxu1 %v7832_v21  ;;  %v5564_v21 = vpop.f32.mrf.mxu0  ;;  %v5603_v50 = vpop.f32.mrf.mxu1 }
 0x3ae   :  { %v5604_v0 = vadd.f32 %v5603_v50, %v5561_v60  ;;  %v5565_v27 = vadd.f32 %v5564_v21, %v3415_v56  ;;  %v7438_v21 = vld [vmem:[#allocation2 + $0x8] sm:$0xff] }
 0x3af   :  { %v5566_v41 = vpop.f32.mrf.mxu0  ;;  %v5605_v42 = vpop.f32.mrf.mxu1  ;;  %v7858_v51 = vadd.f32 %v7438_v21, %v5520_v10 }
 0x3b0   :  { %v5606_v11 = vadd.f32 %v5605_v42, %v5563_v37  ;;  %v5567_v26 = vadd.f32 %v5566_v41, %v3419_v5  ;;  %v7442_v5 = vld [vmem:[#allocation2 + $0x30] sm:$0xff] }
 0x3b1   :  { %v5646_v43 = vpop.f32.mrf.mxu0  ;;  %v5607_v44 = vpop.f32.mrf.mxu1  ;;  %v5876_v20 = vadd.f32 %v7442_v5, %v5522_v31 }
 0x3b2   :  { %v5608_v12 = vadd.f32 %v5607_v44, %v5565_v27  ;;  %v5647_v13 = vadd.f32 %v5646_v43, %v5604_v0  ;;  %v7439_v43 = vld [vmem:[#allocation2] sm:$0xff] }
 0x3b3   :  { %v5648_v45 = vpop.f32.mrf.mxu0  ;;  %v5609_v46 = vpop.f32.mrf.mxu1  ;;  %v7860_v18 = vadd.f32 %v7439_v43, %v5518_v24  ;;  %v7446_v24 = vld [vmem:[#allocation2 + $0x20] sm:$0xff] }
 0x3b4   :  { %v5649_v28 = vadd.f32 %v5648_v45, %v5606_v11  ;;  %v5610_v30 = vadd.f32 %v5609_v46, %v5567_v26  ;;  %v7441_v45 = vld [vmem:[#allocation2 + $0x38] sm:$0xff]  ;;  %v7447_v26 = vld [vmem:[#allocation2 + $0x28] sm:$0xff] }
 0x3b5   :  { %v5650_v33 = vpop.f32.mrf.mxu0  ;;  %v5882_v40 = vadd.f32 %v7858_v51, %v7860_v18 }
 0x3b6   :  { %v5651_v34 = vadd.f32 %v5650_v33, %v5608_v12  ;;  %v7867_v33 = vadd.f32 %v7441_v45, %v5524_v57 }
 0x3b7   :  { %v5652_v48 = vpop.f32.mrf.mxu0 }
 0x3b8   :  { %v5653_v46 = vadd.f32 %v5652_v48, %v5610_v30  ;;  %v5889_v27 = vadd.f32 %v7867_v33, %v5876_v20 }
 0x3ea   :  { %v5732_v53 = vpop.f32.mrf.mxu0 }
 0x3eb   :  { %v5733_v44 = vadd.f32 %v5732_v53, %v3423_v17 }
 0x3ec   :  { %v5734_v55 = vpop.f32.mrf.mxu0 }
 0x3ed   :  { %v5689_v14 = vpop.f32.mrf.mxu1  ;;  %v5735_v56 = vadd.f32 %v5734_v55, %v3427_v39 }
 0x3ee   :  { %v5736_v58 = vpop.f32.mrf.mxu0  ;;  %v5690_v25 = vadd.f32 %v5689_v14, %v5647_v13  ;;  %v7440_v14 = vld [vmem:[#allocation2 + $0x10] sm:$0xff]  ;;  %v7445_v13 = vld [vmem:[#allocation2 + $0x48] sm:$0xff] }
 0x3ef   :  { %v5691_v49 = vpop.f32.mrf.mxu1  ;;  %v5737_v60 = vadd.f32 %v5736_v58, %v3423_v17 }
 0x3f0   :  { %v5738_v50 = vpop.f32.mrf.mxu0  ;;  %v7863_v52 = vadd.f32 %v7440_v14, %v5690_v25  ;;  %v5692_v29 = vadd.f32 %v5691_v49, %v5649_v28 }
 0x3f1   :  { %v5693_v54 = vpop.f32.mrf.mxu1  ;;  %v5739_v1 = vadd.f32 %v5738_v50, %v3427_v39 }
 0x3f2   :  { %v5694_v41 = vadd.f32 %v5693_v54, %v5651_v34  ;;  %v5883_v36 = vadd.f32 %v5882_v40, %v7863_v52  ;;  %v5873_v49 = vadd.f32 %v7443_v62, %v5692_v29  ;;  %v7444_v54 = vld [vmem:[#allocation2 + $0x40] sm:$0xff]  ;;  %v7448_v34 = vld [vmem:[#allocation2 + $0x50] sm:$0xff] }
 0x3f3   :  { %v5695_v22 = vpop.f32.mrf.mxu1 }
 0x3f4   :  { %v5878_v0 = vadd.f32 %v7444_v54, %v5694_v41  ;;  %v5696_v2 = vadd.f32 %v5695_v22, %v5653_v46  ;;  %v5884_v12 = vadd.f32 %v5883_v36, %v5873_v49 }
 0x3f6   :  { %v5890_v10 = vadd.f32 %v5889_v27, %v5878_v0  ;;  %v5879_v32 = vadd.f32 %v7445_v13, %v5696_v2 }
 0x3f8   :  { %v5891_v28 = vadd.f32 %v5890_v10, %v5879_v32 }
 0x42a   :  { %v5818_v42 = vpop.f32.mrf.mxu0 }
 0x42c   :  { %v5820_v4 = vpop.f32.mrf.mxu0 }
 0x42d   :  { %v5775_v6 = vpop.f32.mrf.mxu1 }
 0x42e   :  { %v5776_v63 = vadd.f32 %v5775_v6, %v5733_v44  ;;  %v5822_v6 = vpop.f32.mrf.mxu0  ;;  %v7449_v44 = vld [vmem:[#allocation2 + $0x58] sm:$0xff] }
 0x42f   :  { %v5777_v38 = vpop.f32.mrf.mxu1 }
 0x430   :  { %v5778_v53 = vadd.f32 %v5777_v38, %v5735_v56  ;;  %v5819_v37 = vadd.f32 %v5818_v42, %v5776_v63  ;;  %v5824_v50 = vpop.f32.mrf.mxu0 }
 0x431   :  { %v5779_v47 = vpop.f32.mrf.mxu1 }
 0x432   :  { %v5780_v3 = vadd.f32 %v5779_v47, %v5737_v60  ;;  %v5821_v19 = vadd.f32 %v5820_v4, %v5778_v53 }
 0x433   :  { %v5781_v55 = vpop.f32.mrf.mxu1 }
 0x434   :  { %v5782_v58 = vadd.f32 %v5781_v55, %v5739_v1  ;;  %v5823_v25 = vadd.f32 %v5822_v6, %v5780_v3 }
 0x436   :  { %v5825_v15 = vadd.f32 %v5824_v50, %v5782_v58 }
 0x46d   :  { %v5861_v8 = vpop.f32.mrf.mxu1 }
 0x46e   :  { %v5862_v48 = vadd.f32 %v5861_v8, %v5819_v37 }
 0x46f   :  { %v5863_v11 = vpop.f32.mrf.mxu1 }
 0x470   :  { %v5874_v17 = vadd.f32 %v7446_v24, %v5862_v48  ;;  %v5864_v16 = vadd.f32 %v5863_v11, %v5821_v19 }
 0x471   :  { %v5865_v22 = vpop.f32.mrf.mxu1 }
 0x472   :  { %v5866_v38 = vadd.f32 %v5865_v22, %v5823_v25  ;;  %v5875_v39 = vadd.f32 %v7447_v26, %v5864_v16  ;;  %v5885_v21 = vadd.f32 %v5884_v12, %v5874_v17  ;;  %v5999_v26 = vld [vmem:[#allocation13] sm:$0x3f] }
 0x473   :  { %v5867_v57 = vpop.f32.mrf.mxu1 }
 0x474   :  { %v5880_v42 = vadd.f32 %v7448_v34, %v5866_v38  ;;  %v5868_v43 = vadd.f32 %v5867_v57, %v5825_v15  ;;  %v5886_v30 = vadd.f32 %v5885_v21, %v5875_v39  ;;  %v5955_v15 = vld [vmem:[#allocation11] sm:$0x3f]  ;;  %v6004_v21 = vrot.slane %v5999_v26, %v7729_v61 }
 0x475   :  { %v5964_v57 = vrot.slane %v5955_v15, %v7758_v35 }
 0x476   :  { %v5881_v31 = vadd.f32 %v7449_v44, %v5868_v43  ;;  %5887 = vadd.xlane.f32.xlu0 %v5886_v30  ;;  %v5892_v14 = vadd.f32 %v5891_v28, %v5880_v42  ;;  %v6008_v28 = vrot.slane %v5999_v26, %v7758_v35  ;;  %v5972_v43 = vrot.slane %v5955_v15, %v7768_v9 }
 0x477   :  { %v5976_v30 = vrot.slane %v5955_v15, %v7812_v7  ;;  %v5980_v44 = vrot.slane %v5955_v15, %v7809_v23  ;;  %v6020_v35 = vrot.slane %v5999_v26, %v7812_v7 }
 0x478   :  { %v5893_v29 = vadd.f32 %v5892_v14, %v5881_v31 }
 0x47a   :  { %5894 = vadd.xlane.f32.xlu0 %v5893_v29 }
 0x4ff   :  { %v5888_v41 = vpop.xlane.xlu0 %5887 }
 0x500   :  { %v5897_v47 = vmul.f32 0.0013020834, %v5888_v41 }
 0x502   :  { %v5899_v56 = vsub.f32 %v7860_v18, %v5897_v47  ;;  %v5900_v63 = vsub.f32 %v7858_v51, %v5897_v47  ;;  %v5901_v40 = vsub.f32 %v7863_v52, %v5897_v47  ;;  %v5902_v4 = vsub.f32 %v5873_v49, %v5897_v47 }
 0x503   :  { %v5895_v45 = vpop.xlane.xlu0 %5894  ;;  %v5903_v5 = vsub.f32 %v5874_v17, %v5897_v47  ;;  %v5904_v18 = vsub.f32 %v5875_v39, %v5897_v47  ;;  %v5960_v39 = vrot.slane %v5955_v15, %v7729_v61  ;;  %v6012_v47 = vrot.slane %v5999_v26, %v7792_v59 }
 0x504   :  { %v5898_v60 = vmul.f32 0.0013020834, %v5895_v45  ;;  %v5911_v46 = vmul.f32 %v5899_v56, %v5899_v56  ;;  %v5912_v53 = vmul.f32 %v5900_v63, %v5900_v63  ;;  %v5913_v36 = vmul.f32 %v5901_v40, %v5901_v40 }
 0x505   :  { %v5914_v2 = vmul.f32 %v5902_v4, %v5902_v4  ;;  %v5915_v37 = vmul.f32 %v5903_v5, %v5903_v5  ;;  %v5916_v8 = vmul.f32 %v5904_v18, %v5904_v18  ;;  %v6016_v61 = vrot.slane %v5999_v26, %v7768_v9 }
 0x506   :  { %v5923_v62 = vadd.f32 %v5912_v53, %v5911_v46  ;;  %v7874_v54 = vsub.f32 %v5876_v20, %v5898_v60  ;;  %v7877_v55 = vsub.f32 %v7867_v33, %v5898_v60  ;;  %v7879_v1 = vsub.f32 %v5878_v0, %v5898_v60 }
 0x507   :  { %v5908_v3 = vsub.f32 %v5879_v32, %v5898_v60  ;;  %v5909_v6 = vsub.f32 %v5880_v42, %v5898_v60  ;;  %v5910_v58 = vsub.f32 %v5881_v31, %v5898_v60  ;;  %v5968_v42 = vrot.slane %v5955_v15, %v7792_v59 }
 0x508   :  { %v5924_v51 = vadd.f32 %v5923_v62, %v5913_v36  ;;  %v5917_v52 = vmul.f32 %v7874_v54, %v7874_v54  ;;  %v5918_v49 = vmul.f32 %v7877_v55, %v7877_v55  ;;  %v5919_v20 = vmul.f32 %v7879_v1, %v7879_v1 }
 0x509   :  { %v5920_v48 = vmul.f32 %v5908_v3, %v5908_v3  ;;  %v5921_v11 = vmul.f32 %v5909_v6, %v5909_v6  ;;  %v5922_v13 = vmul.f32 %v5910_v58, %v5910_v58  ;;  %v6024_v46 = vrot.slane %v5999_v26, %v7809_v23 }
 0x50a   :  { %v5925_v27 = vadd.f32 %v5924_v51, %v5914_v2  ;;  %v5930_v33 = vadd.f32 %v5918_v49, %v5917_v52 }
 0x50c   :  { %v5926_v0 = vadd.f32 %v5925_v27, %v5915_v37  ;;  %v5931_v19 = vadd.f32 %v5930_v33, %v5919_v20 }
 0x50e   :  { %v5927_v10 = vadd.f32 %v5926_v0, %v5916_v8  ;;  %v5932_v12 = vadd.f32 %v5931_v19, %v5920_v48 }
 0x510   :  { %5928 = vadd.xlane.f32.xlu1 %v5927_v10  ;;  %v5933_v32 = vadd.f32 %v5932_v12, %v5921_v11 }
 0x512   :  { %v5934_v24 = vadd.f32 %v5933_v32, %v5922_v13 }
 0x514   :  { %5935 = vadd.xlane.f32.xlu1 %v5934_v24 }
 0x599   :  { %v5929_v17 = vpop.xlane.xlu1 %5928 }
 0x59a   :  { %v5937_v16 = vmul.f32 0.0013020834, %v5929_v17 }
 0x59c   :  { %v5939_v25 = vadd.f32 1e-05, %v5937_v16 }
 0x59d   :  { %v5936_v50 = vpop.xlane.xlu1 %5935 }
 0x59e   :  { %7433 = vrsqrt.f32 %v5939_v25  ;;  %v5938_v22 = vmul.f32 0.0013020834, %v5936_v50 }
 0x5a0   :  { %v5940_v38 = vadd.f32 1e-05, %v5938_v22 }
 0x5a2   :  { %7435 = vrsqrt.f32 %v5940_v38 }
 0x5ab   :  { %v7434_v34 = vpop.eup %7433 }
 0x5ac   :  { %v5943_v31 = vmul.f32 %v7434_v34, %v5899_v56  ;;  %v5944_v14 = vmul.f32 %v7434_v34, %v5900_v63  ;;  %v5945_v29 = vmul.f32 %v7434_v34, %v5901_v40  ;;  %v5946_v41 = vmul.f32 %v7434_v34, %v5902_v4 }
 0x5ad   :  { %v5947_v45 = vmul.f32 %v7434_v34, %v5903_v5  ;;  %v5948_v60 = vmul.f32 %v7434_v34, %v5904_v18 }
 0x5ae   :  { %v5987_v53 = vmul.f32 %v5960_v39, %v5943_v31  ;;  %v5988_v36 = vmul.f32 %v5964_v57, %v5944_v14  ;;  %v5989_v2 = vmul.f32 %v5968_v42, %v5945_v29  ;;  %v5990_v51 = vmul.f32 %v5972_v43, %v5946_v41 }
 0x5af   :  { %v7436_v62 = vpop.eup %7435  ;;  %v5991_v52 = vmul.f32 %v5976_v30, %v5947_v45  ;;  %v5992_v56 = vmul.f32 %v5980_v44, %v5948_v60 }
 0x5b0   :  { %v5949_v63 = vmul.f32 %v7436_v62, %v7874_v54  ;;  %v5950_v40 = vmul.f32 %v7436_v62, %v7877_v55  ;;  %v5951_v59 = vmul.f32 %v7436_v62, %v7879_v1  ;;  %v5952_v9 = vmul.f32 %v7436_v62, %v5908_v3 }
 0x5b1   :  { %v5953_v4 = vmul.f32 %v7436_v62, %v5909_v6  ;;  %v5954_v5 = vmul.f32 %v7436_v62, %v5910_v58  ;;  %v6031_v18 = vadd.f32 %v6004_v21, %v5987_v53  ;;  %v6032_v7 = vadd.f32 %v6008_v28, %v5988_v36 }
 0x5b2   :  { %v5993_v49 = vmul.f32 %v5960_v39, %v5949_v63  ;;  %v5994_v23 = vmul.f32 %v5964_v57, %v5950_v40  ;;  %v5995_v37 = vmul.f32 %v5968_v42, %v5951_v59  ;;  %v5996_v27 = vmul.f32 %v5972_v43, %v5952_v9 }
 0x5b3   :  { %v5997_v20 = vmul.f32 %v5976_v30, %v5953_v4  ;;  %v5998_v33 = vmul.f32 %v5980_v44, %v5954_v5  ;;  %v6033_v8 = vadd.f32 %v6012_v47, %v5989_v2  ;;  %v6034_v0 = vadd.f32 %v6016_v61, %v5990_v51  ;;  %6043 = vst [vmem:[#allocation14] sm:$0xff] %v6031_v18 }
 0x5b4   :  { %6044 = vst [vmem:[#allocation14 + $0x8] sm:$0xff] %v6032_v7  ;;  %v6035_v54 = vadd.f32 %v6020_v35, %v5991_v52  ;;  %v6036_v55 = vadd.f32 %v6024_v46, %v5992_v56  ;;  %v6037_v1 = vadd.f32 %v6004_v21, %v5993_v49  ;;  %v6038_v3 = vadd.f32 %v6008_v28, %v5994_v23 }
 0x5b5   :  { %v6039_v6 = vadd.f32 %v6012_v47, %v5995_v37  ;;  %v6040_v58 = vadd.f32 %v6016_v61, %v5996_v27  ;;  %v6041_v48 = vadd.f32 %v6020_v35, %v5997_v20  ;;  %v6042_v19 = vadd.f32 %v6024_v46, %v5998_v33  ;;  %6045 = vst [vmem:[#allocation14 + $0x10] sm:$0xff] %v6033_v8 }
 0x5b6   :  { %6046 = vst [vmem:[#allocation14 + $0x18] sm:$0xff] %v6034_v0  ;;  %6047 = vst [vmem:[#allocation14 + $0x20] sm:$0xff] %v6035_v54 }
 0x5b7   :  { %6048 = vst [vmem:[#allocation14 + $0x28] sm:$0xff] %v6036_v55  ;;  %6049 = vst [vmem:[#allocation14 + $0x30] sm:$0xff] %v6037_v1 }
 0x5b8   :  { %6050 = vst [vmem:[#allocation14 + $0x38] sm:$0xff] %v6038_v3  ;;  %6051 = vst [vmem:[#allocation14 + $0x40] sm:$0xff] %v6039_v6 }
 0x5b9   :  { %6052 = vst [vmem:[#allocation14 + $0x48] sm:$0xff] %v6040_v58  ;;  %6053 = vst [vmem:[#allocation14 + $0x50] sm:$0xff] %v6041_v48 }
 0x5ba   :  { %6054 = vst [vmem:[#allocation14 + $0x58] sm:$0xff] %v6042_v19 }
 0x5bb   :  { %7601 = shalt.err (!%p7598_p11)
}
 0x5bc   :  { %6066 = dma.vmem_to_hbm [thread:$0]  %s6061_s6, 1536, %s7915_s7, [#allocation4], %s7628_s3, %s7628_s3, %s7629_s22  }
 0x5bd   :  { %7618 = dma.done.wait [#allocation4], 1536  }
 0x5be   :  { %7619 = vsyncadd [#allocation4], 4294965760 }
 0x5bf   :  { %6070 = vsyncpa [#allocation3], 1 }
 0x5c0   :  { %6071 = vsyncpa [#allocation6], 1 }
 0x5c1   :  { %6072 = vsyncpa [#allocation9], 1 }
 0x5c2   :  { %6073 = vsyncpa [#allocation12], 1 }
 0x5c3   :  { %6074 = vsyncpa [#allocation4], 1 }

// kernel: tpu_custom_call.1
= control target key start
LH: loop header
LB: loop body
LE: loop exit
PB: predicated region body
PF: predicated region fallthrough
CT: control target
= control target key end

     0   :  { %12 = vsyncpa [#allocation3], 0  ;;  %s7908_s0 = inlined_call_operand.hbm [shape: f32[16,768], index: 0, kind: input, shape index: {}]   ;;  %s7909_s1 = inlined_call_operand.hbm [shape: bf16[768,1024], index: 1, kind: input, shape index: {}]   ;;  %s7910_s2 = inlined_call_operand.hbm [shape: f32[1,1024], index: 2, kind: input, shape index: {}]   ;;  %s7911_s3 = inlined_call_operand.hbm [shape: bf16[1024,768], index: 3, kind: input, shape index: {}]   ;;  %s7912_s4 = inlined_call_operand.hbm [shape: f32[1,768], index: 4, kind: input, shape index: {}]   ;;  %s7913_s5 = inlined_call_operand.hbm [shape: f32[1,768], index: 5, kind: input, shape index: {}]   ;;  %s7914_s6 = inlined_call_operand.hbm [shape: f32[1,768], index: 6, kind: input, shape index: {}]   ;;  %s7915_s7 = inlined_call_operand.hbm [shape: f32[16,768], index: 7, kind: output, shape index: {}]  }
   0x1   :  { %13 = vsyncpa [#allocation6], 0 }
   0x2   :  { %14 = vsyncpa [#allocation9], 0 }
   0x3   :  { %15 = vsyncpa [#allocation12], 0 }
   0x4   :  { %16 = vsyncpa [#allocation4], 0  ;;  %s7620_s24 = smov [#allocation5]  }
   0x5   :  { %s34_s25 = sshll.u32 %s7620_s24, 4  ;;  %s35_s25 = int_to_ptr.vmem [resolvable:$true] %s34_s25 }
   0x6   :  { %s7458_s26 = scalar_lea.vmem %s35_s25, 49152  ;;  %p7463_p1 = scmp.lt.s32.totalorder %s35_s25, %s35_s25 }
   0x7   :  { %p7459_p0 = scmp.ne.s32.totalorder %s35_s25, %s7458_s26  ;;  %p7464_p2 = scmp.lt.s32.totalorder %s7458_s26, %s7458_s26 }
   0x9   :  { %p7465_p3 = por %p7464_p2, %p7463_p1 }
   0xb   :  { %p7466_p4 = pnand %p7465_p3, %p7459_p0 }
   0xd   :  { %7469 = shalt.err (!%p7466_p4)
}
   0xe   :  { %s7621_s27 = smov 512   ;;  %s7622_s28 = smov 32  }
   0xf   :  { %40 = dma.hbm_to_vmem [thread:$0]  %s7909_s1, 49152, %s35_s25, [#allocation6], %s7621_s27, %s7621_s27, %s7622_s28  }
  0x10   :  { %s7623_s8 = smov [#allocation8]  }
  0x11   :  { %s56_s9 = sshll.u32 %s7623_s8, 4  ;;  %s57_s9 = int_to_ptr.vmem [resolvable:$true] %s56_s9 }
  0x12   :  { %s7478_s10 = scalar_lea.vmem %s57_s9, 49152  ;;  %p7483_p6 = scmp.lt.s32.totalorder %s57_s9, %s57_s9 }
  0x13   :  { %p7479_p5 = scmp.ne.s32.totalorder %s57_s9, %s7478_s10  ;;  %p7484_p7 = scmp.lt.s32.totalorder %s7478_s10, %s7478_s10 }
  0x15   :  { %p7485_p8 = por %p7484_p7, %p7483_p6 }
  0x17   :  { %p7486_p9 = pnand %p7485_p8, %p7479_p5 }
  0x19   :  { %7489 = shalt.err (!%p7486_p9)
}
  0x1a   :  { %s7624_s11 = smov 384   ;;  %s7625_s12 = smov 24  }
  0x1b   :  { %62 = dma.hbm_to_vmem [thread:$0]  %s7911_s3, 49152, %s57_s9, [#allocation9], %s7624_s11, %s7624_s11, %s7625_s12  }
  0x1c   :  { %s7626_s15 = smov [#allocation11]   ;;  %s7627_s17 = smov [#allocation2]  }
  0x1d   :  { %s79_s16 = sshll.u32 %s7626_s15, 4  ;;  %s22_s1 = sshll.u32 %s7627_s17, 4  ;;  %s80_s16 = int_to_ptr.vmem [resolvable:$true] %s79_s16  ;;  %s23_s1 = int_to_ptr.vmem [resolvable:$true] %s22_s1 }
  0x1e   :  { %s7498_s18 = scalar_lea.vmem %s80_s16, 96  ;;  %p7503_p11 = scmp.lt.s32.totalorder %s80_s16, %s80_s16 }
  0x1f   :  { %p7499_p10 = scmp.ne.s32.totalorder %s80_s16, %s7498_s18  ;;  %p7504_p12 = scmp.lt.s32.totalorder %s7498_s18, %s7498_s18 }
  0x21   :  { %p7505_p13 = por %p7504_p12, %p7503_p11 }
  0x23   :  { %p7506_p0 = pnand %p7505_p13, %p7499_p10 }
  0x25   :  { %7509 = shalt.err (!%p7506_p0)
}
  0x26   :  { %82 = dma.hbm_to_vmem [thread:$0]  %s7913_s5, 96, %s80_s16, [#allocation12]  }
  0x27   :  { %s7518_s21 = scalar_lea.vmem %s23_s1, 1536  ;;  %p7523_p2 = scmp.lt.s32.totalorder %s23_s1, %s23_s1 }
  0x28   :  { %p7519_p1 = scmp.ne.s32.totalorder %s23_s1, %s7518_s21  ;;  %p7524_p3 = scmp.lt.s32.totalorder %s7518_s21, %s7518_s21 }
  0x2a   :  { %p7525_p4 = por %p7524_p3, %p7523_p2 }
  0x2c   :  { %p7526_p5 = pnand %p7525_p4, %p7519_p1 }
  0x2e   :  { %7529 = shalt.err (!%p7526_p5)
}
  0x2f   :  { %s7628_s3 = smov 768   ;;  %s7629_s22 = smov 48  }
  0x30   :  { %28 = dma.hbm_to_vmem [thread:$0]  %s7908_s0, 1536, %s23_s1, [#allocation3], %s7628_s3, %s7628_s3, %s7629_s22  }
  0x31   :  { %s7630_s25 = smov [#allocation7]   ;;  %s7631_s27 = smov [#allocation10]  }
  0x32   :  { %s47_s26 = sshll.u32 %s7630_s25, 4  ;;  %s69_s5 = sshll.u32 %s7631_s27, 4  ;;  %s48_s26 = int_to_ptr.vmem [resolvable:$true] %s47_s26  ;;  %s70_s5 = int_to_ptr.vmem [resolvable:$true] %s69_s5 }
  0x33   :  { %s7538_s28 = scalar_lea.vmem %s48_s26, 128  ;;  %p7543_p7 = scmp.lt.s32.totalorder %s48_s26, %s48_s26 }
  0x34   :  { %p7539_p6 = scmp.ne.s32.totalorder %s48_s26, %s7538_s28  ;;  %p7544_p8 = scmp.lt.s32.totalorder %s7538_s28, %s7538_s28 }
  0x36   :  { %p7545_p9 = por %p7544_p8, %p7543_p7 }
  0x38   :  { %p7546_p10 = pnand %p7545_p9, %p7539_p6 }
  0x3a   :  { %7549 = shalt.err (!%p7546_p10)
}
  0x3b   :  { %50 = dma.hbm_to_vmem [thread:$0]  %s7910_s2, 128, %s48_s26, [#allocation6]  }
  0x3c   :  { %s7558_s8 = scalar_lea.vmem %s70_s5, 96  ;;  %p7563_p12 = scmp.lt.s32.totalorder %s70_s5, %s70_s5 }
  0x3d   :  { %p7559_p11 = scmp.ne.s32.totalorder %s70_s5, %s7558_s8  ;;  %p7564_p13 = scmp.lt.s32.totalorder %s7558_s8, %s7558_s8 }
  0x3f   :  { %p7565_p0 = por %p7564_p13, %p7563_p12 }
  0x41   :  { %p7566_p1 = pnand %p7565_p0, %p7559_p11 }
  0x43   :  { %7569 = shalt.err (!%p7566_p1)
}
  0x44   :  { %72 = dma.hbm_to_vmem [thread:$0]  %s7912_s4, 96, %s70_s5, [#allocation9]  }
  0x45   :  { %s7632_s10 = smov [#allocation13]  }
  0x46   :  { %s89_s11 = sshll.u32 %s7632_s10, 4  ;;  %s90_s11 = int_to_ptr.vmem [resolvable:$true] %s89_s11 }
  0x47   :  { %s7578_s12 = scalar_lea.vmem %s90_s11, 96  ;;  %p7583_p3 = scmp.lt.s32.totalorder %s90_s11, %s90_s11 }
  0x48   :  { %p7579_p2 = scmp.ne.s32.totalorder %s90_s11, %s7578_s12  ;;  %p7584_p4 = scmp.lt.s32.totalorder %s7578_s12, %s7578_s12 }
  0x4a   :  { %p7585_p5 = por %p7584_p4, %p7583_p3 }
  0x4c   :  { %p7586_p6 = pnand %p7585_p5, %p7579_p2 }
  0x4e   :  { %7589 = shalt.err (!%p7586_p6)
}
  0x4f   :  { %92 = dma.hbm_to_vmem [thread:$0]  %s7914_s6, 96, %s90_s11, [#allocation12]  }
  0x50   :  { %7610 = dma.done.wait [#allocation3], 1536  }
  0x51   :  { %7611 = vsyncadd [#allocation3], 4294965760 }
  0x52   :  { %7612 = dma.done.wait [#allocation6], 49280  }
  0x53   :  { %7613 = vsyncadd [#allocation6], 4294918016 }
  0x54   :  { %7614 = dma.done.wait [#allocation9], 49248  }
  0x55   :  { %7615 = vsyncadd [#allocation9], 4294918048 }
  0x56   :  { %7616 = dma.done.wait [#allocation12], 192  }
  0x57   :  { %7617 = vsyncadd [#allocation12], 4294967104  ;;  %v188_v0 = vld [vmem:[#allocation5 + $0x1c0] sm:$0xff]  ;;  %v115_v54 = vld [vmem:[#allocation2 + $0x8] sm:$0xff]  ;;  %s7633_s4 = smov [#allocation14]  }
  0x58   :  { %v192_v1 = vld [vmem:[#allocation5 + $0x1e0] sm:$0xff]  ;;  %v121_v55 = vld [vmem:[#allocation2 + $0x38] sm:$0xff]  ;;  %v123_v60 = vld [vmem:[#allocation2 + $0x48] sm:$0xff]  ;;  %s6060_s6 = sshll.u32 %s7633_s4, 4  ;;  %s6061_s6 = int_to_ptr.vmem [resolvable:$true] %s6060_s6 }
  0x59   :  { %v316_v2 = vld [vmem:[#allocation5 + $0x5c0] sm:$0xff]  ;;  %v6132_v3 = vcombine.high %v188_v0, %v192_v1  ;;  %v6131_v5 = vcombine.low %v188_v0, %v192_v1  ;;  %v7698_v58 = vpack.c.bf16 %v121_v55, %v115_v54  ;;  %v117_v59 = vld [vmem:[#allocation2 + $0x18] sm:$0xff]  ;;  %s7590_s14 = scalar_lea.vmem %s6061_s6, 1536  ;;  %p7595_p8 = scmp.lt.s32.totalorder %s6061_s6, %s6061_s6 }
  0x5a   :  { %v320_v4 = vld [vmem:[#allocation5 + $0x5e0] sm:$0xff]  ;;  %v7700_v63 = vpack.c.bf16 %v123_v60, %v117_v59  ;;  %p7591_p7 = scmp.ne.s32.totalorder %s6061_s6, %s7590_s14  ;;  %p7596_p9 = scmp.lt.s32.totalorder %s7590_s14, %s7590_s14 }
  0x5b   :  { %v180_v6 = vld [vmem:[#allocation5 + $0x180] sm:$0xff]  ;;  %v6260_v8 = vcombine.high %v316_v2, %v320_v4  ;;  %v6259_v9 = vcombine.low %v316_v2, %v320_v4  ;;  %2478 = vmatprep.subr.bf16.mxu0 %v6132_v3  ;;  %2510 = vmatprep.mubr.bf16.mxu0 %v7698_v58 }
  0x5c   :  { %v184_v7 = vld [vmem:[#allocation5 + $0x1a0] sm:$0xff]  ;;  %2479 = vmatpush1.bf16.msra.mxu0 %v6131_v5  ;;  %2553 = vmatprep.mubr.bf16.mxu1 %v7700_v63  ;;  %p7597_p10 = por %p7596_p9, %p7595_p8 }
  0x5d   :  { %v6124_v10 = vcombine.high %v180_v6, %v184_v7  ;;  %v308_v11 = vld [vmem:[#allocation5 + $0x580] sm:$0xff]  ;;  %2521 = vmatprep.subr.bf16.mxu1 %v6260_v8  ;;  %v6123_v18 = vcombine.low %v180_v6, %v184_v7 }
  0x5e   :  { %v312_v12 = vld [vmem:[#allocation5 + $0x5a0] sm:$0xff]  ;;  %2522 = vmatpush1.bf16.msra.mxu1 %v6259_v9  ;;  %p7598_p11 = pnand %p7597_p10, %p7591_p7 }
  0x5f   :  { %v172_v13 = vld [vmem:[#allocation5 + $0x140] sm:$0xff]  ;;  %v6252_v14 = vcombine.high %v308_v11, %v312_v12  ;;  %2480 = vmatprep.subr.bf16.mxu0 %v6124_v10  ;;  %v6251_v19 = vcombine.low %v308_v11, %v312_v12 }
  0x60   :  { %v176_v15 = vld [vmem:[#allocation5 + $0x160] sm:$0xff]  ;;  %2481 = vmatpush1.bf16.msra.mxu0 %v6123_v18 }
  0x61   :  { %v300_v16 = vld [vmem:[#allocation5 + $0x540] sm:$0xff]  ;;  %v6116_v20 = vcombine.high %v172_v13, %v176_v15  ;;  %2523 = vmatprep.subr.bf16.mxu1 %v6252_v14  ;;  %v6115_v26 = vcombine.low %v172_v13, %v176_v15 }
  0x62   :  { %v304_v17 = vld [vmem:[#allocation5 + $0x560] sm:$0xff]  ;;  %2524 = vmatpush1.bf16.msra.mxu1 %v6251_v19 }
  0x63   :  { %v6244_v21 = vcombine.high %v300_v16, %v304_v17  ;;  %v164_v22 = vld [vmem:[#allocation5 + $0x100] sm:$0xff]  ;;  %2482 = vmatprep.subr.bf16.mxu0 %v6116_v20  ;;  %v6243_v27 = vcombine.low %v300_v16, %v304_v17 }
  0x64   :  { %v168_v23 = vld [vmem:[#allocation5 + $0x120] sm:$0xff]  ;;  %2483 = vmatpush1.bf16.msra.mxu0 %v6115_v26 }
  0x65   :  { %v292_v24 = vld [vmem:[#allocation5 + $0x500] sm:$0xff]  ;;  %v6108_v28 = vcombine.high %v164_v22, %v168_v23  ;;  %2525 = vmatprep.subr.bf16.mxu1 %v6244_v21  ;;  %v6107_v34 = vcombine.low %v164_v22, %v168_v23 }
  0x66   :  { %v296_v25 = vld [vmem:[#allocation5 + $0x520] sm:$0xff]  ;;  %2526 = vmatpush1.bf16.msra.mxu1 %v6243_v27 }
  0x67   :  { %v6236_v29 = vcombine.high %v292_v24, %v296_v25  ;;  %v156_v30 = vld [vmem:[#allocation5 + $0xc0] sm:$0xff]  ;;  %2484 = vmatprep.subr.bf16.mxu0 %v6108_v28  ;;  %v6235_v35 = vcombine.low %v292_v24, %v296_v25 }
  0x68   :  { %v160_v31 = vld [vmem:[#allocation5 + $0xe0] sm:$0xff]  ;;  %2485 = vmatpush1.bf16.msra.mxu0 %v6107_v34 }
  0x69   :  { %v284_v32 = vld [vmem:[#allocation5 + $0x4c0] sm:$0xff]  ;;  %v6100_v36 = vcombine.high %v156_v30, %v160_v31  ;;  %2527 = vmatprep.subr.bf16.mxu1 %v6236_v29  ;;  %v6099_v42 = vcombine.low %v156_v30, %v160_v31 }
  0x6a   :  { %v288_v33 = vld [vmem:[#allocation5 + $0x4e0] sm:$0xff]  ;;  %2528 = vmatpush1.bf16.msra.mxu1 %v6235_v35 }
  0x6b   :  { %v6228_v37 = vcombine.high %v284_v32, %v288_v33  ;;  %v148_v38 = vld [vmem:[#allocation5 + $0x80] sm:$0xff]  ;;  %2486 = vmatprep.subr.bf16.mxu0 %v6100_v36  ;;  %v6227_v43 = vcombine.low %v284_v32, %v288_v33 }
  0x6c   :  { %v152_v39 = vld [vmem:[#allocation5 + $0xa0] sm:$0xff]  ;;  %2487 = vmatpush1.bf16.msra.mxu0 %v6099_v42 }
  0x6d   :  { %v276_v40 = vld [vmem:[#allocation5 + $0x480] sm:$0xff]  ;;  %v6092_v44 = vcombine.high %v148_v38, %v152_v39  ;;  %2529 = vmatprep.subr.bf16.mxu1 %v6228_v37  ;;  %v6091_v50 = vcombine.low %v148_v38, %v152_v39 }
  0x6e   :  { %v280_v41 = vld [vmem:[#allocation5 + $0x4a0] sm:$0xff]  ;;  %2530 = vmatpush1.bf16.msra.mxu1 %v6227_v43 }
  0x6f   :  { %v6220_v45 = vcombine.high %v276_v40, %v280_v41  ;;  %v140_v46 = vld [vmem:[#allocation5 + $0x40] sm:$0xff]  ;;  %2488 = vmatprep.subr.bf16.mxu0 %v6092_v44  ;;  %v6219_v51 = vcombine.low %v276_v40, %v280_v41 }
  0x70   :  { %v144_v47 = vld [vmem:[#allocation5 + $0x60] sm:$0xff]  ;;  %2489 = vmatpush1.bf16.msra.mxu0 %v6091_v50 }
  0x71   :  { %v268_v48 = vld [vmem:[#allocation5 + $0x440] sm:$0xff]  ;;  %v6084_v52 = vcombine.high %v140_v46, %v144_v47  ;;  %2531 = vmatprep.subr.bf16.mxu1 %v6220_v45  ;;  %v6083_v0 = vcombine.low %v140_v46, %v144_v47 }
  0x72   :  { %v272_v49 = vld [vmem:[#allocation5 + $0x460] sm:$0xff]  ;;  %2532 = vmatpush1.bf16.msra.mxu1 %v6219_v51 }
  0x73   :  { %v132_v53 = vld [vmem:[#allocation5] sm:$0xff]  ;;  %v6212_v56 = vcombine.high %v268_v48, %v272_v49  ;;  %2490 = vmatprep.subr.bf16.mxu0 %v6084_v52  ;;  %v6211_v1 = vcombine.low %v268_v48, %v272_v49 }
  0x74   :  { %v136_v57 = vld [vmem:[#allocation5 + $0x20] sm:$0xff]  ;;  %2491 = vmatpush1.bf16.msra.mxu0 %v6083_v0 }
  0x75   :  { %v260_v61 = vld [vmem:[#allocation5 + $0x400] sm:$0xff]  ;;  %v6076_v2 = vcombine.high %v132_v53, %v136_v57  ;;  %2533 = vmatprep.subr.bf16.mxu1 %v6212_v56  ;;  %v6075_v8 = vcombine.low %v132_v53, %v136_v57 }
  0x76   :  { %v264_v62 = vld [vmem:[#allocation5 + $0x420] sm:$0xff]  ;;  %2534 = vmatpush1.bf16.msra.mxu1 %v6211_v1 }
  0x77   :  { %v6204_v3 = vcombine.high %v260_v61, %v264_v62  ;;  %v252_v4 = vld [vmem:[#allocation5 + $0x3c0] sm:$0xff]  ;;  %2492 = vmatprep.subr.bf16.mxu0 %v6076_v2  ;;  %v6203_v9 = vcombine.low %v260_v61, %v264_v62 }
  0x78   :  { %v256_v5 = vld [vmem:[#allocation5 + $0x3e0] sm:$0xff]  ;;  %2493 = vmatpush1.bf16.msra.mxu0 %v6075_v8  ;;  %v189_v8 = vld [vmem:[#allocation5 + $0x1c8] sm:$0xff] }
  0x79   :  { %v380_v6 = vld [vmem:[#allocation5 + $0x7c0] sm:$0xff]  ;;  %v6196_v10 = vcombine.high %v252_v4, %v256_v5  ;;  %2535 = vmatprep.subr.bf16.mxu1 %v6204_v3  ;;  %v6195_v16 = vcombine.low %v252_v4, %v256_v5 }
  0x7a   :  { %v384_v7 = vld [vmem:[#allocation5 + $0x7e0] sm:$0xff]  ;;  %2536 = vmatpush1.bf16.msra.mxu1 %v6203_v9  ;;  %v193_v9 = vld [vmem:[#allocation5 + $0x1e8] sm:$0xff] }
  0x7b   :  { %v6324_v11 = vcombine.high %v380_v6, %v384_v7  ;;  %v244_v12 = vld [vmem:[#allocation5 + $0x380] sm:$0xff]  ;;  %2494 = vmatprep.subr.bf16.mxu0 %v6196_v10  ;;  %v6323_v17 = vcombine.low %v380_v6, %v384_v7 }
  0x7c   :  { %v248_v13 = vld [vmem:[#allocation5 + $0x3a0] sm:$0xff]  ;;  %2495 = vmatpush2.bf16.msra.mxu0 %v6195_v16 }
  0x7d   :  { %v372_v14 = vld [vmem:[#allocation5 + $0x780] sm:$0xff]  ;;  %v6188_v18 = vcombine.high %v244_v12, %v248_v13  ;;  %2537 = vmatprep.subr.bf16.mxu1 %v6324_v11  ;;  %v6187_v24 = vcombine.low %v244_v12, %v248_v13  ;;  %v120_v12 = vld [vmem:[#allocation2 + $0x30] sm:$0xff] }
  0x7e   :  { %v376_v15 = vld [vmem:[#allocation5 + $0x7a0] sm:$0xff]  ;;  %2538 = vmatpush2.bf16.msra.mxu1 %v6323_v17  ;;  %v6134_v17 = vcombine.high %v189_v8, %v193_v9 }
  0x7f   :  { %v6316_v19 = vcombine.high %v372_v14, %v376_v15  ;;  %v236_v20 = vld [vmem:[#allocation5 + $0x340] sm:$0xff]  ;;  %2496 = vmatprep.subr.bf16.mxu0 %v6188_v18  ;;  %v6315_v25 = vcombine.low %v372_v14, %v376_v15  ;;  %v116_v14 = vld [vmem:[#allocation2 + $0x10] sm:$0xff] }
  0x80   :  { %v240_v21 = vld [vmem:[#allocation5 + $0x360] sm:$0xff]  ;;  %2497 = vmatpush2.bf16.msra.mxu0 %v6187_v24  ;;  %v125_v24 = vld [vmem:[#allocation2 + $0x58] sm:$0xff] }
  0x81   :  { %v364_v22 = vld [vmem:[#allocation5 + $0x740] sm:$0xff]  ;;  %v6180_v26 = vcombine.high %v236_v20, %v240_v21  ;;  %2539 = vmatprep.subr.bf16.mxu1 %v6316_v19  ;;  %v6179_v32 = vcombine.low %v236_v20, %v240_v21  ;;  %v181_v20 = vld [vmem:[#allocation5 + $0x188] sm:$0xff] }
  0x82   :  { %v368_v23 = vld [vmem:[#allocation5 + $0x760] sm:$0xff]  ;;  %2540 = vmatpush2.bf16.msra.mxu1 %v6315_v25 }
  0x83   :  { %v6308_v27 = vcombine.high %v364_v22, %v368_v23  ;;  %v228_v28 = vld [vmem:[#allocation5 + $0x300] sm:$0xff]  ;;  %2498 = vmatprep.subr.bf16.mxu0 %v6180_v26  ;;  %v6307_v33 = vcombine.low %v364_v22, %v368_v23  ;;  %v185_v22 = vld [vmem:[#allocation5 + $0x1a8] sm:$0xff] }
  0x84   :  { %v232_v29 = vld [vmem:[#allocation5 + $0x320] sm:$0xff]  ;;  %2499 = vmatpush2.bf16.msra.mxu0 %v6179_v32  ;;  %v119_v23 = vld [vmem:[#allocation2 + $0x28] sm:$0xff] }
  0x85   :  { %v356_v30 = vld [vmem:[#allocation5 + $0x700] sm:$0xff]  ;;  %v6172_v34 = vcombine.high %v228_v28, %v232_v29  ;;  %2541 = vmatprep.subr.bf16.mxu1 %v6308_v27  ;;  %v6171_v40 = vcombine.low %v228_v28, %v232_v29  ;;  %v6133_v27 = vcombine.low %v189_v8, %v193_v9  ;;  %v6126_v29 = vcombine.high %v181_v20, %v185_v22 }
  0x86   :  { %v360_v31 = vld [vmem:[#allocation5 + $0x720] sm:$0xff]  ;;  %2542 = vmatpush2.bf16.msra.mxu1 %v6307_v33  ;;  %v7708_v32 = vpack.c.bf16 %v125_v24, %v119_v23  ;;  %v173_v33 = vld [vmem:[#allocation5 + $0x148] sm:$0xff] }
  0x87   :  { %v6300_v35 = vcombine.high %v356_v30, %v360_v31  ;;  %v220_v36 = vld [vmem:[#allocation5 + $0x2c0] sm:$0xff]  ;;  %2500 = vmatprep.subr.bf16.mxu0 %v6172_v34  ;;  %v6299_v41 = vcombine.low %v356_v30, %v360_v31  ;;  %v177_v34 = vld [vmem:[#allocation5 + $0x168] sm:$0xff] }
  0x88   :  { %v224_v37 = vld [vmem:[#allocation5 + $0x2e0] sm:$0xff]  ;;  %2501 = vmatpush2.bf16.msra.mxu0 %v6171_v40  ;;  %v6118_v40 = vcombine.high %v173_v33, %v177_v34 }
  0x89   :  { %v348_v38 = vld [vmem:[#allocation5 + $0x6c0] sm:$0xff]  ;;  %v6164_v42 = vcombine.high %v220_v36, %v224_v37  ;;  %2543 = vmatprep.subr.bf16.mxu1 %v6300_v35  ;;  %v6163_v48 = vcombine.low %v220_v36, %v224_v37  ;;  %v6125_v36 = vcombine.low %v181_v20, %v185_v22  ;;  %v257_v20 = vld [vmem:[#allocation5 + $0x3e8] sm:$0xff] }
  0x8a   :  { %v352_v39 = vld [vmem:[#allocation5 + $0x6e0] sm:$0xff]  ;;  %2544 = vmatpush2.bf16.msra.mxu1 %v6299_v41  ;;  %v165_v41 = vld [vmem:[#allocation5 + $0x108] sm:$0xff] }
  0x8b   :  { %v6292_v43 = vcombine.high %v348_v38, %v352_v39  ;;  %v212_v44 = vld [vmem:[#allocation5 + $0x280] sm:$0xff]  ;;  %2502 = vmatprep.subr.bf16.mxu0 %v6164_v42  ;;  %v6291_v49 = vcombine.low %v348_v38, %v352_v39  ;;  %v169_v42 = vld [vmem:[#allocation5 + $0x128] sm:$0xff] }
  0x8c   :  { %v216_v45 = vld [vmem:[#allocation5 + $0x2a0] sm:$0xff]  ;;  %2503 = vmatpush2.bf16.msra.mxu0 %v6163_v48  ;;  %v157_v48 = vld [vmem:[#allocation5 + $0xc8] sm:$0xff] }
  0x8d   :  { %v340_v46 = vld [vmem:[#allocation5 + $0x680] sm:$0xff]  ;;  %v6156_v50 = vcombine.high %v212_v44, %v216_v45  ;;  %2545 = vmatprep.subr.bf16.mxu1 %v6292_v43  ;;  %v6155_v56 = vcombine.low %v212_v44, %v216_v45  ;;  %v6117_v44 = vcombine.low %v173_v33, %v177_v34 }
  0x8e   :  { %v344_v47 = vld [vmem:[#allocation5 + $0x6a0] sm:$0xff]  ;;  %2546 = vmatpush2.bf16.msra.mxu1 %v6291_v49  ;;  %v6110_v49 = vcombine.high %v165_v41, %v169_v42 }
  0x8f   :  { %v6284_v51 = vcombine.high %v340_v46, %v344_v47  ;;  %v204_v52 = vld [vmem:[#allocation5 + $0x240] sm:$0xff]  ;;  %2504 = vmatprep.subr.bf16.mxu0 %v6156_v50  ;;  %v6283_v57 = vcombine.low %v340_v46, %v344_v47  ;;  %v161_v50 = vld [vmem:[#allocation5 + $0xe8] sm:$0xff] }
  0x90   :  { %v208_v53 = vld [vmem:[#allocation5 + $0x260] sm:$0xff]  ;;  %2505 = vmatpush2.bf16.msra.mxu0 %v6155_v56  ;;  %v149_v56 = vld [vmem:[#allocation5 + $0x88] sm:$0xff] }
  0x91   :  { %v332_v54 = vld [vmem:[#allocation5 + $0x640] sm:$0xff]  ;;  %v6148_v59 = vcombine.high %v204_v52, %v208_v53  ;;  %2547 = vmatprep.subr.bf16.mxu1 %v6284_v51  ;;  %v6147_v2 = vcombine.low %v204_v52, %v208_v53  ;;  %v6109_v52 = vcombine.low %v165_v41, %v169_v42 }
  0x92   :  { %v336_v55 = vld [vmem:[#allocation5 + $0x660] sm:$0xff]  ;;  %2548 = vmatpush2.bf16.msra.mxu1 %v6283_v57  ;;  %v6102_v57 = vcombine.high %v157_v48, %v161_v50 }
  0x93   :  { %v6276_v60 = vcombine.high %v332_v54, %v336_v55  ;;  %v196_v61 = vld [vmem:[#allocation5 + $0x200] sm:$0xff]  ;;  %2506 = vmatprep.subr.bf16.mxu0 %v6148_v59  ;;  %v6275_v3 = vcombine.low %v332_v54, %v336_v55  ;;  %v153_v59 = vld [vmem:[#allocation5 + $0xa8] sm:$0xff] }
  0x94   :  { %v200_v62 = vld [vmem:[#allocation5 + $0x220] sm:$0xff]  ;;  %2507 = vmatpush2.bf16.msra.mxu0 %v6147_v2  ;;  %v141_v2 = vld [vmem:[#allocation5 + $0x48] sm:$0xff] }
  0x95   :  { %v324_v0 = vld [vmem:[#allocation5 + $0x600] sm:$0xff]  ;;  %v6140_v4 = vcombine.high %v196_v61, %v200_v62  ;;  %2549 = vmatprep.subr.bf16.mxu1 %v6276_v60  ;;  %v6139_v10 = vcombine.low %v196_v61, %v200_v62  ;;  %v6101_v61 = vcombine.low %v157_v48, %v161_v50 }
  0x96   :  { %v328_v1 = vld [vmem:[#allocation5 + $0x620] sm:$0xff]  ;;  %2550 = vmatpush2.bf16.msra.mxu1 %v6275_v3  ;;  %v6094_v3 = vcombine.high %v149_v56, %v153_v59 }
  0x97   :  { %v6268_v5 = vcombine.high %v324_v0, %v328_v1  ;;  %v444_v6 = vld [vmem:[#allocation5 + $0x9c0] sm:$0xff]  ;;  %2508 = vmatprep.subr.bf16.mxu0 %v6140_v4  ;;  %v6267_v13 = vcombine.low %v324_v0, %v328_v1  ;;  %v145_v4 = vld [vmem:[#allocation5 + $0x68] sm:$0xff] }
  0x98   :  { %v448_v7 = vld [vmem:[#allocation5 + $0x9e0] sm:$0xff]  ;;  %2509 = vmatpush2.bf16.msra.mxu0 %v6139_v10  ;;  %v133_v10 = vld [vmem:[#allocation5 + $0x8] sm:$0xff] }
  0x99   :  { %v114_v11 = vld [vmem:[#allocation2] sm:$0xff]  ;;  %v6388_v16 = vcombine.high %v444_v6, %v448_v7  ;;  %2551 = vmatprep.subr.bf16.mxu1 %v6268_v5  ;;  %v6387_v26 = vcombine.low %v444_v6, %v448_v7  ;;  %v6093_v6 = vcombine.low %v149_v56, %v153_v59 }
  0x9a   :  { %v122_v15 = vld [vmem:[#allocation2 + $0x40] sm:$0xff]  ;;  %v7704_v21 = vpack.c.bf16 %v120_v12, %v114_v11  ;;  %2552 = vmatpush2.bf16.msra.mxu1 %v6267_v13  ;;  %v6086_v11 = vcombine.high %v141_v2, %v145_v4  ;;  %v137_v12 = vld [vmem:[#allocation5 + $0x28] sm:$0xff] }
  0x9b   :  { %v436_v18 = vld [vmem:[#allocation5 + $0x980] sm:$0xff]  ;;  %v7706_v25 = vpack.c.bf16 %v122_v15, %v116_v14  ;;  %2564 = vmatprep.subr.bf16.mxu0 %v6388_v16  ;;  %2607 = vmatprep.subr.bf16.mxu1 %v6134_v17  ;;  %v6085_v14 = vcombine.low %v141_v2, %v145_v4  ;;  %v6077_v23 = vcombine.low %v133_v10, %v137_v12 }
  0x9c   :  { %v440_v19 = vld [vmem:[#allocation5 + $0x9a0] sm:$0xff]  ;;  %2511 = vmatmul.mubr.bf16.vlgmr.msra.gmra.mxu0 %v7704_v21 }
  0x9d   :  { %v6380_v28 = vcombine.high %v436_v18, %v440_v19  ;;  %v428_v30 = vld [vmem:[#allocation5 + $0x940] sm:$0xff]  ;;  %2554 = vmatmul.mubr.bf16.vlgmr.msra.gmra.mxu1 %v7706_v25  ;;  %2565 = vmatpush1.bf16.msra.mxu0 %v6387_v26  ;;  %v6379_v35 = vcombine.low %v436_v18, %v440_v19  ;;  %v253_v18 = vld [vmem:[#allocation5 + $0x3c8] sm:$0xff]  ;;  %v6078_v19 = vcombine.high %v133_v10, %v137_v12 }
  0x9e   :  { %v432_v31 = vld [vmem:[#allocation5 + $0x960] sm:$0xff]  ;;  %2608 = vmatpush1.bf16.msra.mxu1 %v6133_v27  ;;  %2596 = vmatprep.mubr.bf16.mxu0 %v7708_v32  ;;  %v6197_v33 = vcombine.low %v253_v18, %v257_v20 }
  0x9f   :  { %2566 = vmatprep.subr.bf16.mxu0 %v6380_v28  ;;  %v6372_v37 = vcombine.high %v428_v30, %v432_v31  ;;  %v420_v38 = vld [vmem:[#allocation5 + $0x900] sm:$0xff]  ;;  %2609 = vmatprep.subr.bf16.mxu1 %v6126_v29  ;;  %v6371_v43 = vcombine.low %v428_v30, %v432_v31  ;;  %v245_v28 = vld [vmem:[#allocation5 + $0x388] sm:$0xff]  ;;  %v6198_v29 = vcombine.high %v253_v18, %v257_v20 }
  0xa0   :  { %v424_v39 = vld [vmem:[#allocation5 + $0x920] sm:$0xff]  ;;  %2639 = vmatprep.mubr.bf16.mxu1 %v7698_v58  ;;  %v249_v30 = vld [vmem:[#allocation5 + $0x3a8] sm:$0xff] }
  0xa1   :  { %2567 = vmatpush1.bf16.msra.mxu0 %v6379_v35  ;;  %v6364_v45 = vcombine.high %v420_v38, %v424_v39  ;;  %v412_v46 = vld [vmem:[#allocation5 + $0x8c0] sm:$0xff]  ;;  %v6363_v51 = vcombine.low %v420_v38, %v424_v39  ;;  %v6190_v38 = vcombine.high %v245_v28, %v249_v30  ;;  %v241_v39 = vld [vmem:[#allocation5 + $0x368] sm:$0xff]  ;;  %v6189_v41 = vcombine.low %v245_v28, %v249_v30  ;;  %v124_v28 = vld [vmem:[#allocation2 + $0x50] sm:$0xff] }
  0xa2   :  { %2610 = vmatpush1.bf16.msra.mxu1 %v6125_v36  ;;  %2568 = vmatprep.subr.bf16.mxu0 %v6372_v37  ;;  %v416_v47 = vld [vmem:[#allocation5 + $0x8e0] sm:$0xff]  ;;  %v237_v37 = vld [vmem:[#allocation5 + $0x348] sm:$0xff] }
  0xa3   :  { %2611 = vmatprep.subr.bf16.mxu1 %v6118_v40  ;;  %v6356_v53 = vcombine.high %v412_v46, %v416_v47  ;;  %v404_v54 = vld [vmem:[#allocation5 + $0x880] sm:$0xff]  ;;  %v6355_v60 = vcombine.low %v412_v46, %v416_v47  ;;  %v6182_v46 = vcombine.high %v237_v37, %v241_v39  ;;  %v233_v47 = vld [vmem:[#allocation5 + $0x328] sm:$0xff] }
  0xa4   :  { %v408_v55 = vld [vmem:[#allocation5 + $0x8a0] sm:$0xff] }
  0xa5   :  { %2569 = vmatpush1.bf16.msra.mxu0 %v6371_v43  ;;  %v6348_v62 = vcombine.high %v404_v54, %v408_v55  ;;  %v396_v0 = vld [vmem:[#allocation5 + $0x840] sm:$0xff]  ;;  %v6347_v5 = vcombine.low %v404_v54, %v408_v55  ;;  %v225_v55 = vld [vmem:[#allocation5 + $0x2e8] sm:$0xff] }
  0xa6   :  { %2612 = vmatpush1.bf16.msra.mxu1 %v6117_v44  ;;  %2570 = vmatprep.subr.bf16.mxu0 %v6364_v45  ;;  %v400_v1 = vld [vmem:[#allocation5 + $0x860] sm:$0xff]  ;;  %v229_v45 = vld [vmem:[#allocation5 + $0x308] sm:$0xff] }
  0xa7   :  { %2613 = vmatprep.subr.bf16.mxu1 %v6110_v49  ;;  %v6340_v7 = vcombine.high %v396_v0, %v400_v1  ;;  %v388_v8 = vld [vmem:[#allocation5 + $0x800] sm:$0xff]  ;;  %v6339_v13 = vcombine.low %v396_v0, %v400_v1  ;;  %v6181_v49 = vcombine.low %v237_v37, %v241_v39  ;;  %v6174_v54 = vcombine.high %v229_v45, %v233_v47  ;;  %v217_v1 = vld [vmem:[#allocation5 + $0x2a8] sm:$0xff] }
  0xa8   :  { %v392_v9 = vld [vmem:[#allocation5 + $0x820] sm:$0xff] }
  0xa9   :  { %2571 = vmatpush1.bf16.msra.mxu0 %v6363_v51  ;;  %v6332_v15 = vcombine.high %v388_v8, %v392_v9  ;;  %v508_v16 = vld [vmem:[#allocation5 + $0xbc0] sm:$0xff]  ;;  %v6331_v22 = vcombine.low %v388_v8, %v392_v9  ;;  %v209_v9 = vld [vmem:[#allocation5 + $0x268] sm:$0xff] }
  0xaa   :  { %2614 = vmatpush1.bf16.msra.mxu1 %v6109_v52  ;;  %2572 = vmatprep.subr.bf16.mxu0 %v6356_v53  ;;  %v512_v17 = vld [vmem:[#allocation5 + $0xbe0] sm:$0xff]  ;;  %v221_v53 = vld [vmem:[#allocation5 + $0x2c8] sm:$0xff] }
  0xab   :  { %2615 = vmatprep.subr.bf16.mxu1 %v6102_v57  ;;  %v6452_v24 = vcombine.high %v508_v16, %v512_v17  ;;  %v500_v26 = vld [vmem:[#allocation5 + $0xb80] sm:$0xff]  ;;  %v6451_v31 = vcombine.low %v508_v16, %v512_v17  ;;  %v6173_v57 = vcombine.low %v229_v45, %v233_v47  ;;  %v6166_v0 = vcombine.high %v221_v53, %v225_v55  ;;  %v201_v17 = vld [vmem:[#allocation5 + $0x228] sm:$0xff] }
  0xac   :  { %v504_v27 = vld [vmem:[#allocation5 + $0xba0] sm:$0xff]  ;;  %v433_v47 = vld [vmem:[#allocation5 + $0x968] sm:$0xff] }
  0xad   :  { %2573 = vmatpush1.bf16.msra.mxu0 %v6355_v60  ;;  %v6444_v34 = vcombine.high %v500_v26, %v504_v27  ;;  %v492_v35 = vld [vmem:[#allocation5 + $0xb40] sm:$0xff]  ;;  %v6443_v40 = vcombine.low %v500_v26, %v504_v27 }
  0xae   :  { %2616 = vmatpush1.bf16.msra.mxu1 %v6101_v61  ;;  %2574 = vmatprep.subr.bf16.mxu0 %v6348_v62  ;;  %v496_v36 = vld [vmem:[#allocation5 + $0xb60] sm:$0xff]  ;;  %v213_v62 = vld [vmem:[#allocation5 + $0x288] sm:$0xff] }
  0xaf   :  { %2617 = vmatprep.subr.bf16.mxu1 %v6094_v3  ;;  %v6436_v42 = vcombine.high %v492_v35, %v496_v36  ;;  %v484_v43 = vld [vmem:[#allocation5 + $0xb00] sm:$0xff]  ;;  %v6435_v48 = vcombine.low %v492_v35, %v496_v36  ;;  %v6165_v3 = vcombine.low %v221_v53, %v225_v55  ;;  %v6158_v8 = vcombine.high %v213_v62, %v217_v1  ;;  %v313_v35 = vld [vmem:[#allocation5 + $0x5a8] sm:$0xff] }
  0xb0   :  { %v488_v44 = vld [vmem:[#allocation5 + $0xb20] sm:$0xff]  ;;  %v437_v36 = vld [vmem:[#allocation5 + $0x988] sm:$0xff] }
  0xb1   :  { %2575 = vmatpush1.bf16.msra.mxu0 %v6347_v5  ;;  %v6428_v50 = vcombine.high %v484_v43, %v488_v44  ;;  %v476_v51 = vld [vmem:[#allocation5 + $0xac0] sm:$0xff]  ;;  %v6427_v56 = vcombine.low %v484_v43, %v488_v44  ;;  %v301_v43 = vld [vmem:[#allocation5 + $0x548] sm:$0xff] }
  0xb2   :  { %2618 = vmatpush1.bf16.msra.mxu1 %v6093_v6  ;;  %2576 = vmatprep.subr.bf16.mxu0 %v6340_v7  ;;  %v480_v52 = vld [vmem:[#allocation5 + $0xae0] sm:$0xff]  ;;  %v205_v7 = vld [vmem:[#allocation5 + $0x248] sm:$0xff] }
  0xb3   :  { %2619 = vmatprep.subr.bf16.mxu1 %v6086_v11  ;;  %v6420_v59 = vcombine.high %v476_v51, %v480_v52  ;;  %v468_v60 = vld [vmem:[#allocation5 + $0xa80] sm:$0xff]  ;;  %v6419_v2 = vcombine.low %v476_v51, %v480_v52  ;;  %v6157_v11 = vcombine.low %v213_v62, %v217_v1  ;;  %v6150_v16 = vcombine.high %v205_v7, %v209_v9  ;;  %v305_v44 = vld [vmem:[#allocation5 + $0x568] sm:$0xff] }
  0xb4   :  { %v472_v61 = vld [vmem:[#allocation5 + $0xaa0] sm:$0xff]  ;;  %v293_v51 = vld [vmem:[#allocation5 + $0x508] sm:$0xff] }
  0xb5   :  { %2577 = vmatpush1.bf16.msra.mxu0 %v6339_v13  ;;  %v6412_v4 = vcombine.high %v468_v60, %v472_v61  ;;  %v460_v5 = vld [vmem:[#allocation5 + $0xa40] sm:$0xff]  ;;  %v6411_v10 = vcombine.low %v468_v60, %v472_v61  ;;  %v297_v52 = vld [vmem:[#allocation5 + $0x528] sm:$0xff] }
  0xb6   :  { %2620 = vmatpush1.bf16.msra.mxu1 %v6085_v14  ;;  %2578 = vmatprep.subr.bf16.mxu0 %v6332_v15  ;;  %v464_v6 = vld [vmem:[#allocation5 + $0xa60] sm:$0xff]  ;;  %v197_v15 = vld [vmem:[#allocation5 + $0x208] sm:$0xff] }
  0xb7   :  { %2621 = vmatprep.subr.bf16.mxu1 %v6078_v19  ;;  %v6404_v12 = vcombine.high %v460_v5, %v464_v6  ;;  %v452_v13 = vld [vmem:[#allocation5 + $0xa00] sm:$0xff]  ;;  %v6403_v18 = vcombine.low %v460_v5, %v464_v6  ;;  %v6149_v19 = vcombine.low %v205_v7, %v209_v9  ;;  %v6142_v26 = vcombine.high %v197_v15, %v201_v17  ;;  %v421_v53 = vld [vmem:[#allocation5 + $0x908] sm:$0xff] }
  0xb8   :  { %v456_v14 = vld [vmem:[#allocation5 + $0xa20] sm:$0xff]  ;;  %v425_v55 = vld [vmem:[#allocation5 + $0x928] sm:$0xff] }
  0xb9   :  { %2579 = vmatpush1.bf16.msra.mxu0 %v6331_v22  ;;  %v6396_v20 = vcombine.high %v452_v13, %v456_v14  ;;  %v317_v22 = vld [vmem:[#allocation5 + $0x5c8] sm:$0xff]  ;;  %v118_v27 = vld [vmem:[#allocation2 + $0x20] sm:$0xff]  ;;  %v6395_v30 = vcombine.low %v452_v13, %v456_v14 }
  0xba   :  { %2622 = vmatpush1.bf16.msra.mxu1 %v6077_v23  ;;  %2580 = vmatprep.subr.bf16.mxu0 %v6452_v24  ;;  %v321_v23 = vld [vmem:[#allocation5 + $0x5e8] sm:$0xff]  ;;  %v7714_v39 = vpack.c.bf16 %v124_v28, %v118_v27 }
  0xbb   :  { %2623 = vmatprep.subr.bf16.mxu1 %v6198_v29  ;;  %v445_v24 = vld [vmem:[#allocation5 + $0x9c8] sm:$0xff] }
  0xbc   :  { %v449_v29 = vld [vmem:[#allocation5 + $0x9e8] sm:$0xff] }
  0xbd   :  { %2581 = vmatpush2.bf16.msra.mxu0 %v6451_v31  ;;  %v6141_v31 = vcombine.low %v197_v15, %v201_v17  ;;  %v6390_v37 = vcombine.high %v445_v24, %v449_v29  ;;  %v285_v60 = vld [vmem:[#allocation5 + $0x4c8] sm:$0xff] }
  0xbe   :  { %2624 = vmatpush2.bf16.msra.mxu1 %v6197_v33  ;;  %2582 = vmatprep.subr.bf16.mxu0 %v6444_v34  ;;  %v6262_v33 = vcombine.high %v317_v22, %v321_v23  ;;  %v309_v34 = vld [vmem:[#allocation5 + $0x588] sm:$0xff] }
  0xbf   :  { %2625 = vmatprep.subr.bf16.mxu1 %v6190_v38  ;;  %v441_v38 = vld [vmem:[#allocation5 + $0x9a8] sm:$0xff] }
  0xc0   :  { %v6382_v45 = vcombine.high %v437_v36, %v441_v38  ;;  %v289_v61 = vld [vmem:[#allocation5 + $0x4e8] sm:$0xff] }
  0xc1   :  { %2583 = vmatpush2.bf16.msra.mxu0 %v6443_v40  ;;  %v6261_v40 = vcombine.low %v317_v22, %v321_v23  ;;  %v413_v62 = vld [vmem:[#allocation5 + $0x8c8] sm:$0xff] }
  0xc2   :  { %2626 = vmatpush2.bf16.msra.mxu1 %v6189_v41  ;;  %2584 = vmatprep.subr.bf16.mxu0 %v6436_v42  ;;  %v6389_v41 = vcombine.low %v445_v24, %v449_v29  ;;  %v6254_v42 = vcombine.high %v309_v34, %v313_v35  ;;  %v417_v1 = vld [vmem:[#allocation5 + $0x8e8] sm:$0xff] }
  0xc3   :  { %2627 = vmatprep.subr.bf16.mxu1 %v6182_v46  ;;  %v429_v46 = vld [vmem:[#allocation5 + $0x948] sm:$0xff] }
  0xc4   :  { %v277_v5 = vld [vmem:[#allocation5 + $0x488] sm:$0xff] }
  0xc5   :  { %2585 = vmatpush2.bf16.msra.mxu0 %v6435_v48  ;;  %v6253_v48 = vcombine.low %v309_v34, %v313_v35  ;;  %v281_v6 = vld [vmem:[#allocation5 + $0x4a8] sm:$0xff] }
  0xc6   :  { %2628 = vmatpush2.bf16.msra.mxu1 %v6181_v49  ;;  %2586 = vmatprep.subr.bf16.mxu0 %v6428_v50  ;;  %v6381_v49 = vcombine.low %v437_v36, %v441_v38  ;;  %v6246_v50 = vcombine.high %v301_v43, %v305_v44  ;;  %v405_v7 = vld [vmem:[#allocation5 + $0x888] sm:$0xff] }
  0xc7   :  { %2629 = vmatprep.subr.bf16.mxu1 %v6174_v54  ;;  %v6374_v54 = vcombine.high %v429_v46, %v433_v47  ;;  %v409_v9 = vld [vmem:[#allocation5 + $0x8a8] sm:$0xff] }
  0xc8   :  { %v269_v13 = vld [vmem:[#allocation5 + $0x448] sm:$0xff] }
  0xc9   :  { %2587 = vmatpush2.bf16.msra.mxu0 %v6427_v56  ;;  %v6245_v56 = vcombine.low %v301_v43, %v305_v44  ;;  %v273_v14 = vld [vmem:[#allocation5 + $0x468] sm:$0xff] }
  0xca   :  { %2630 = vmatpush2.bf16.msra.mxu1 %v6173_v57  ;;  %2588 = vmatprep.subr.bf16.mxu0 %v6420_v59  ;;  %v6373_v57 = vcombine.low %v429_v46, %v433_v47  ;;  %v6238_v59 = vcombine.high %v293_v51, %v297_v52  ;;  %v397_v15 = vld [vmem:[#allocation5 + $0x848] sm:$0xff]  ;;  %v6213_v28 = vcombine.low %v269_v13, %v273_v14 }
  0xcb   :  { %2631 = vmatprep.subr.bf16.mxu1 %v6166_v0  ;;  %v6366_v0 = vcombine.high %v421_v53, %v425_v55  ;;  %v401_v17 = vld [vmem:[#allocation5 + $0x868] sm:$0xff] }
  0xcc   :  { %v261_v22 = vld [vmem:[#allocation5 + $0x408] sm:$0xff]  ;;  %v6341_v29 = vcombine.low %v397_v15, %v401_v17 }
  0xcd   :  { %2589 = vmatpush2.bf16.msra.mxu0 %v6419_v2  ;;  %v6237_v2 = vcombine.low %v293_v51, %v297_v52  ;;  %v265_v23 = vld [vmem:[#allocation5 + $0x428] sm:$0xff] }
  0xce   :  { %2632 = vmatpush2.bf16.msra.mxu1 %v6165_v3  ;;  %2590 = vmatprep.subr.bf16.mxu0 %v6412_v4  ;;  %v6365_v3 = vcombine.low %v421_v53, %v425_v55  ;;  %v6230_v4 = vcombine.high %v285_v60, %v289_v61  ;;  %v389_v24 = vld [vmem:[#allocation5 + $0x808] sm:$0xff] }
  0xcf   :  { %2633 = vmatprep.subr.bf16.mxu1 %v6158_v8  ;;  %v6358_v8 = vcombine.high %v413_v62, %v417_v1  ;;  %v393_v27 = vld [vmem:[#allocation5 + $0x828] sm:$0xff] }
  0xd0   :  { %v509_v34 = vld [vmem:[#allocation5 + $0xbc8] sm:$0xff]  ;;  %v6334_v35 = vcombine.high %v389_v24, %v393_v27  ;;  %v6333_v38 = vcombine.low %v389_v24, %v393_v27 }
  0xd1   :  { %2591 = vmatpush2.bf16.msra.mxu0 %v6411_v10  ;;  %v6229_v10 = vcombine.low %v285_v60, %v289_v61  ;;  %v513_v36 = vld [vmem:[#allocation5 + $0xbe8] sm:$0xff] }
  0xd2   :  { %2634 = vmatpush2.bf16.msra.mxu1 %v6157_v11  ;;  %2592 = vmatprep.subr.bf16.mxu0 %v6404_v12  ;;  %v6357_v11 = vcombine.low %v413_v62, %v417_v1  ;;  %v6222_v12 = vcombine.high %v277_v5, %v281_v6  ;;  %v501_v43 = vld [vmem:[#allocation5 + $0xb88] sm:$0xff]  ;;  %v6454_v44 = vcombine.high %v509_v34, %v513_v36 }
  0xd3   :  { %2635 = vmatprep.subr.bf16.mxu1 %v6150_v16  ;;  %v6350_v16 = vcombine.high %v405_v7, %v409_v9  ;;  %v6453_v47 = vcombine.low %v509_v34, %v513_v36  ;;  %v493_v51 = vld [vmem:[#allocation5 + $0xb48] sm:$0xff] }
  0xd4   :  { %v497_v53 = vld [vmem:[#allocation5 + $0xb68] sm:$0xff] }
  0xd5   :  { %2593 = vmatpush2.bf16.msra.mxu0 %v6403_v18  ;;  %v6221_v18 = vcombine.low %v277_v5, %v281_v6  ;;  %v485_v60 = vld [vmem:[#allocation5 + $0xb08] sm:$0xff]  ;;  %v6438_v61 = vcombine.high %v493_v51, %v497_v53  ;;  %v6437_v1 = vcombine.low %v493_v51, %v497_v53  ;;  %v314_v51 = vld [vmem:[#allocation5 + $0x5b0] sm:$0xff] }
  0xd6   :  { %2636 = vmatpush2.bf16.msra.mxu1 %v6149_v19  ;;  %2594 = vmatprep.subr.bf16.mxu0 %v6396_v20  ;;  %v6349_v19 = vcombine.low %v405_v7, %v409_v9  ;;  %v6214_v20 = vcombine.high %v269_v13, %v273_v14  ;;  %v489_v62 = vld [vmem:[#allocation5 + $0xb28] sm:$0xff] }
  0xd7   :  { %2637 = vmatprep.subr.bf16.mxu1 %v6142_v26  ;;  %v6342_v26 = vcombine.high %v397_v15, %v401_v17  ;;  %v477_v5 = vld [vmem:[#allocation5 + $0xac8] sm:$0xff]  ;;  %v6430_v6 = vcombine.high %v485_v60, %v489_v62  ;;  %v6429_v9 = vcombine.low %v485_v60, %v489_v62  ;;  %v306_v60 = vld [vmem:[#allocation5 + $0x570] sm:$0xff] }
  0xd8   :  { %v481_v7 = vld [vmem:[#allocation5 + $0xae8] sm:$0xff] }
  0xd9   :  { %2595 = vmatpush2.bf16.msra.mxu0 %v6395_v30  ;;  %v6206_v30 = vcombine.high %v261_v22, %v265_v23  ;;  %v469_v13 = vld [vmem:[#allocation5 + $0xa88] sm:$0xff]  ;;  %v6422_v14 = vcombine.high %v477_v5, %v481_v7  ;;  %v6421_v17 = vcombine.low %v477_v5, %v481_v7  ;;  %v298_v5 = vld [vmem:[#allocation5 + $0x530] sm:$0xff] }
  0xda   :  { %2638 = vmatpush2.bf16.msra.mxu1 %v6141_v31  ;;  %2650 = vmatprep.subr.bf16.mxu0 %v6262_v33  ;;  %v381_v31 = vld [vmem:[#allocation5 + $0x7c8] sm:$0xff] }
  0xdb   :  { %2693 = vmatprep.subr.bf16.mxu1 %v6390_v37  ;;  %v385_v33 = vld [vmem:[#allocation5 + $0x7e8] sm:$0xff]  ;;  %v6205_v37 = vcombine.low %v261_v22, %v265_v23 }
  0xdc   :  { %2597 = vmatmul.mubr.bf16.vlgmr.msra.gmra.mxu0 %v7714_v39  ;;  %v6325_v46 = vcombine.low %v381_v31, %v385_v33  ;;  %v473_v15 = vld [vmem:[#allocation5 + $0xaa8] sm:$0xff] }
  0xdd   :  { %2640 = vmatmul.mubr.bf16.vlgmr.msra.gmra.mxu1 %v7704_v21  ;;  %2651 = vmatpush1.bf16.msra.mxu0 %v6261_v40  ;;  %v6326_v40 = vcombine.high %v381_v31, %v385_v33  ;;  %v461_v22 = vld [vmem:[#allocation5 + $0xa48] sm:$0xff]  ;;  %v6414_v23 = vcombine.high %v469_v13, %v473_v15  ;;  %v6413_v27 = vcombine.low %v469_v13, %v473_v15  ;;  %v290_v13 = vld [vmem:[#allocation5 + $0x4f0] sm:$0xff] }
  0xde   :  { %2694 = vmatpush1.bf16.msra.mxu1 %v6389_v41  ;;  %2652 = vmatprep.subr.bf16.mxu0 %v6254_v42  ;;  %v373_v41 = vld [vmem:[#allocation5 + $0x788] sm:$0xff] }
  0xdf   :  { %2695 = vmatprep.subr.bf16.mxu1 %v6382_v45  ;;  %2682 = vmatprep.mubr.bf16.mxu0 %v7700_v63  ;;  %v377_v42 = vld [vmem:[#allocation5 + $0x7a8] sm:$0xff] }
  0xe0   :  { %2725 = vmatprep.mubr.bf16.mxu1 %v7708_v32  ;;  %v505_v45 = vld [vmem:[#allocation5 + $0xba8] sm:$0xff] }
  0xe1   :  { %2653 = vmatpush1.bf16.msra.mxu0 %v6253_v48  ;;  %v6318_v48 = vcombine.high %v373_v41, %v377_v42  ;;  %v6446_v52 = vcombine.high %v501_v43, %v505_v45  ;;  %v6445_v55 = vcombine.low %v501_v43, %v505_v45  ;;  %v465_v24 = vld [vmem:[#allocation5 + $0xa68] sm:$0xff]  ;;  %v322_v43 = vld [vmem:[#allocation5 + $0x5f0] sm:$0xff] }
  0xe2   :  { %2696 = vmatpush1.bf16.msra.mxu1 %v6381_v49  ;;  %2654 = vmatprep.subr.bf16.mxu0 %v6246_v50  ;;  %v365_v49 = vld [vmem:[#allocation5 + $0x748] sm:$0xff]  ;;  %v6406_v33 = vcombine.high %v461_v22, %v465_v24  ;;  %v6405_v36 = vcombine.low %v461_v22, %v465_v24  ;;  %v282_v22 = vld [vmem:[#allocation5 + $0x4b0] sm:$0xff] }
  0xe3   :  { %2697 = vmatprep.subr.bf16.mxu1 %v6374_v54  ;;  %v369_v50 = vld [vmem:[#allocation5 + $0x768] sm:$0xff]  ;;  %v6317_v54 = vcombine.low %v373_v41, %v377_v42  ;;  %v318_v41 = vld [vmem:[#allocation5 + $0x5d0] sm:$0xff] }
  0xe4   :  { %v453_v31 = vld [vmem:[#allocation5 + $0xa08] sm:$0xff]  ;;  %v6263_v53 = vcombine.low %v318_v41, %v322_v43 }
  0xe5   :  { %2655 = vmatpush1.bf16.msra.mxu0 %v6245_v56  ;;  %v6310_v56 = vcombine.high %v365_v49, %v369_v50  ;;  %v457_v34 = vld [vmem:[#allocation5 + $0xa28] sm:$0xff] }
  0xe6   :  { %2698 = vmatpush1.bf16.msra.mxu1 %v6373_v57  ;;  %2656 = vmatprep.subr.bf16.mxu0 %v6238_v59  ;;  %v357_v57 = vld [vmem:[#allocation5 + $0x708] sm:$0xff]  ;;  %v6398_v42 = vcombine.high %v453_v31, %v457_v34  ;;  %v6397_v45 = vcombine.low %v453_v31, %v457_v34  ;;  %v274_v31 = vld [vmem:[#allocation5 + $0x470] sm:$0xff] }
  0xe7   :  { %2699 = vmatprep.subr.bf16.mxu1 %v6366_v0  ;;  %v361_v59 = vld [vmem:[#allocation5 + $0x728] sm:$0xff]  ;;  %v6309_v0 = vcombine.low %v365_v49, %v369_v50  ;;  %v310_v49 = vld [vmem:[#allocation5 + $0x590] sm:$0xff]  ;;  %v6264_v50 = vcombine.high %v318_v41, %v322_v43 }
  0xe8   :  { %v6255_v62 = vcombine.low %v310_v49, %v314_v51  ;;  %v266_v41 = vld [vmem:[#allocation5 + $0x430] sm:$0xff] }
  0xe9   :  { %2657 = vmatpush1.bf16.msra.mxu0 %v6237_v2  ;;  %v6302_v2 = vcombine.high %v357_v57, %v361_v59 }
  0xea   :  { %2700 = vmatpush1.bf16.msra.mxu1 %v6365_v3  ;;  %2658 = vmatprep.subr.bf16.mxu0 %v6230_v4  ;;  %v349_v3 = vld [vmem:[#allocation5 + $0x6c8] sm:$0xff] }
  0xeb   :  { %2701 = vmatprep.subr.bf16.mxu1 %v6358_v8  ;;  %v353_v4 = vld [vmem:[#allocation5 + $0x6e8] sm:$0xff]  ;;  %v6301_v8 = vcombine.low %v357_v57, %v361_v59  ;;  %v302_v57 = vld [vmem:[#allocation5 + $0x550] sm:$0xff]  ;;  %v6256_v59 = vcombine.high %v310_v49, %v314_v51 }
  0xec   :  { %v6247_v7 = vcombine.low %v302_v57, %v306_v60  ;;  %v386_v49 = vld [vmem:[#allocation5 + $0x7f0] sm:$0xff] }
  0xed   :  { %2659 = vmatpush1.bf16.msra.mxu0 %v6229_v10  ;;  %v6294_v10 = vcombine.high %v349_v3, %v353_v4 }
  0xee   :  { %2702 = vmatpush1.bf16.msra.mxu1 %v6357_v11  ;;  %2660 = vmatprep.subr.bf16.mxu0 %v6222_v12  ;;  %v341_v11 = vld [vmem:[#allocation5 + $0x688] sm:$0xff] }
  0xef   :  { %2703 = vmatprep.subr.bf16.mxu1 %v6350_v16  ;;  %v345_v12 = vld [vmem:[#allocation5 + $0x6a8] sm:$0xff]  ;;  %v6293_v16 = vcombine.low %v349_v3, %v353_v4  ;;  %v294_v3 = vld [vmem:[#allocation5 + $0x510] sm:$0xff]  ;;  %v6248_v4 = vcombine.high %v302_v57, %v306_v60 }
  0xf0   :  { %v6239_v15 = vcombine.low %v294_v3, %v298_v5  ;;  %v378_v57 = vld [vmem:[#allocation5 + $0x7b0] sm:$0xff] }
  0xf1   :  { %2661 = vmatpush1.bf16.msra.mxu0 %v6221_v18  ;;  %v6286_v18 = vcombine.high %v341_v11, %v345_v12 }
  0xf2   :  { %2704 = vmatpush1.bf16.msra.mxu1 %v6349_v19  ;;  %2662 = vmatprep.subr.bf16.mxu0 %v6214_v20  ;;  %v333_v19 = vld [vmem:[#allocation5 + $0x648] sm:$0xff] }
  0xf3   :  { %2705 = vmatprep.subr.bf16.mxu1 %v6342_v26  ;;  %v337_v20 = vld [vmem:[#allocation5 + $0x668] sm:$0xff]  ;;  %v6285_v26 = vcombine.low %v341_v11, %v345_v12  ;;  %v286_v11 = vld [vmem:[#allocation5 + $0x4d0] sm:$0xff]  ;;  %v6240_v12 = vcombine.high %v294_v3, %v298_v5 }
  0xf4   :  { %v6231_v24 = vcombine.low %v286_v11, %v290_v13  ;;  %v370_v3 = vld [vmem:[#allocation5 + $0x770] sm:$0xff] }
  0xf5   :  { %2663 = vmatpush1.bf16.msra.mxu0 %v6213_v28  ;;  %v6278_v28 = vcombine.high %v333_v19, %v337_v20 }
  0xf6   :  { %2706 = vmatpush1.bf16.msra.mxu1 %v6341_v29  ;;  %2664 = vmatprep.subr.bf16.mxu0 %v6206_v30  ;;  %v325_v29 = vld [vmem:[#allocation5 + $0x608] sm:$0xff] }
  0xf7   :  { %2707 = vmatprep.subr.bf16.mxu1 %v6334_v35  ;;  %v329_v30 = vld [vmem:[#allocation5 + $0x628] sm:$0xff]  ;;  %v6277_v35 = vcombine.low %v333_v19, %v337_v20  ;;  %v278_v19 = vld [vmem:[#allocation5 + $0x490] sm:$0xff]  ;;  %v6232_v20 = vcombine.high %v286_v11, %v290_v13 }
  0xf8   :  { %v6223_v34 = vcombine.low %v278_v19, %v282_v22  ;;  %v362_v11 = vld [vmem:[#allocation5 + $0x730] sm:$0xff] }
  0xf9   :  { %2665 = vmatpush1.bf16.msra.mxu0 %v6205_v37  ;;  %v6270_v37 = vcombine.high %v325_v29, %v329_v30 }
  0xfa   :  { %2708 = vmatpush1.bf16.msra.mxu1 %v6333_v38  ;;  %2666 = vmatprep.subr.bf16.mxu0 %v6326_v40  ;;  %v190_v38 = vld [vmem:[#allocation5 + $0x1d0] sm:$0xff] }
  0xfb   :  { %2709 = vmatprep.subr.bf16.mxu1 %v6454_v44  ;;  %v194_v40 = vld [vmem:[#allocation5 + $0x1f0] sm:$0xff]  ;;  %v6269_v44 = vcombine.low %v325_v29, %v329_v30  ;;  %v6224_v30 = vcombine.high %v278_v19, %v282_v22 }
  0xfc   :  { %v270_v29 = vld [vmem:[#allocation5 + $0x450] sm:$0xff] }
  0xfd   :  { %2667 = vmatpush2.bf16.msra.mxu0 %v6325_v46  ;;  %v6136_v46 = vcombine.high %v190_v38, %v194_v40  ;;  %v6215_v43 = vcombine.low %v270_v29, %v274_v31  ;;  %v354_v19 = vld [vmem:[#allocation5 + $0x6f0] sm:$0xff] }
  0xfe   :  { %2710 = vmatpush2.bf16.msra.mxu1 %v6453_v47  ;;  %2668 = vmatprep.subr.bf16.mxu0 %v6318_v48  ;;  %v182_v47 = vld [vmem:[#allocation5 + $0x190] sm:$0xff] }
  0xff   :  { %2711 = vmatprep.subr.bf16.mxu1 %v6446_v52  ;;  %v186_v48 = vld [vmem:[#allocation5 + $0x1b0] sm:$0xff]  ;;  %v6135_v52 = vcombine.low %v190_v38, %v194_v40  ;;  %v6216_v40 = vcombine.high %v270_v29, %v274_v31 }
 0x100   :  { %v262_v38 = vld [vmem:[#allocation5 + $0x410] sm:$0xff] }
 0x101   :  { %2669 = vmatpush2.bf16.msra.mxu0 %v6317_v54  ;;  %v6128_v54 = vcombine.high %v182_v47, %v186_v48  ;;  %v6207_v51 = vcombine.low %v262_v38, %v266_v41  ;;  %v346_v29 = vld [vmem:[#allocation5 + $0x6b0] sm:$0xff] }
 0x102   :  { %2712 = vmatpush2.bf16.msra.mxu1 %v6445_v55  ;;  %2670 = vmatprep.subr.bf16.mxu0 %v6310_v56  ;;  %v174_v55 = vld [vmem:[#allocation5 + $0x150] sm:$0xff] }
 0x103   :  { %2713 = vmatprep.subr.bf16.mxu1 %v6438_v61  ;;  %v178_v56 = vld [vmem:[#allocation5 + $0x170] sm:$0xff]  ;;  %v6127_v61 = vcombine.low %v182_v47, %v186_v48  ;;  %v6208_v48 = vcombine.high %v262_v38, %v266_v41  ;;  %v518_v41 = vlaneseq }
 0x104   :  { %v382_v47 = vld [vmem:[#allocation5 + $0x7d0] sm:$0xff] }
 0x105   :  { %2671 = vmatpush2.bf16.msra.mxu0 %v6309_v0  ;;  %v6120_v0 = vcombine.high %v174_v55, %v178_v56  ;;  %v6327_v60 = vcombine.low %v382_v47, %v386_v49  ;;  %v338_v38 = vld [vmem:[#allocation5 + $0x670] sm:$0xff] }
 0x106   :  { %2714 = vmatpush2.bf16.msra.mxu1 %v6437_v1  ;;  %2672 = vmatprep.subr.bf16.mxu0 %v6302_v2  ;;  %v166_v1 = vld [vmem:[#allocation5 + $0x110] sm:$0xff] }
 0x107   :  { %2715 = vmatprep.subr.bf16.mxu1 %v6430_v6  ;;  %v170_v2 = vld [vmem:[#allocation5 + $0x130] sm:$0xff]  ;;  %v6119_v6 = vcombine.low %v174_v55, %v178_v56  ;;  %v6328_v56 = vcombine.high %v382_v47, %v386_v49 }
 0x108   :  { %v374_v55 = vld [vmem:[#allocation5 + $0x790] sm:$0xff] }
 0x109   :  { %2673 = vmatpush2.bf16.msra.mxu0 %v6301_v8  ;;  %v6112_v8 = vcombine.high %v166_v1, %v170_v2  ;;  %v6319_v5 = vcombine.low %v374_v55, %v378_v57 }
 0x10a   :  { %2716 = vmatpush2.bf16.msra.mxu1 %v6429_v9  ;;  %2674 = vmatprep.subr.bf16.mxu0 %v6294_v10  ;;  %v158_v9 = vld [vmem:[#allocation5 + $0xd0] sm:$0xff] }
 0x10b   :  { %2717 = vmatprep.subr.bf16.mxu1 %v6422_v14  ;;  %v162_v10 = vld [vmem:[#allocation5 + $0xf0] sm:$0xff]  ;;  %v6111_v14 = vcombine.low %v166_v1, %v170_v2  ;;  %v6320_v2 = vcombine.high %v374_v55, %v378_v57  ;;  %v191_v55 = vld [vmem:[#allocation5 + $0x1d8] sm:$0xff] }
 0x10c   :  { %v366_v1 = vld [vmem:[#allocation5 + $0x750] sm:$0xff]  ;;  %v195_v57 = vld [vmem:[#allocation5 + $0x1f8] sm:$0xff] }
 0x10d   :  { %2675 = vmatpush2.bf16.msra.mxu0 %v6293_v16  ;;  %v6104_v16 = vcombine.high %v158_v9, %v162_v10  ;;  %v6311_v13 = vcombine.low %v366_v1, %v370_v3 }
 0x10e   :  { %2718 = vmatpush2.bf16.msra.mxu1 %v6421_v17  ;;  %2676 = vmatprep.subr.bf16.mxu0 %v6286_v18  ;;  %v150_v17 = vld [vmem:[#allocation5 + $0x90] sm:$0xff] }
 0x10f   :  { %2719 = vmatprep.subr.bf16.mxu1 %v6414_v23  ;;  %v154_v18 = vld [vmem:[#allocation5 + $0xb0] sm:$0xff]  ;;  %v6103_v23 = vcombine.low %v158_v9, %v162_v10  ;;  %v6312_v10 = vcombine.high %v366_v1, %v370_v3  ;;  %v183_v3 = vld [vmem:[#allocation5 + $0x198] sm:$0xff] }
 0x110   :  { %v358_v9 = vld [vmem:[#allocation5 + $0x710] sm:$0xff] }
 0x111   :  { %2677 = vmatpush2.bf16.msra.mxu0 %v6285_v26  ;;  %v6096_v26 = vcombine.high %v150_v17, %v154_v18  ;;  %v6303_v22 = vcombine.low %v358_v9, %v362_v11  ;;  %v438_v1 = vld [vmem:[#allocation5 + $0x990] sm:$0xff] }
 0x112   :  { %2720 = vmatpush2.bf16.msra.mxu1 %v6413_v27  ;;  %2678 = vmatprep.subr.bf16.mxu0 %v6278_v28  ;;  %v142_v27 = vld [vmem:[#allocation5 + $0x50] sm:$0xff] }
 0x113   :  { %2721 = vmatprep.subr.bf16.mxu1 %v6406_v33  ;;  %v146_v28 = vld [vmem:[#allocation5 + $0x70] sm:$0xff]  ;;  %v6095_v33 = vcombine.low %v150_v17, %v154_v18  ;;  %v6304_v18 = vcombine.high %v358_v9, %v362_v11 }
 0x114   :  { %v350_v17 = vld [vmem:[#allocation5 + $0x6d0] sm:$0xff] }
 0x115   :  { %2679 = vmatpush2.bf16.msra.mxu0 %v6277_v35  ;;  %v6088_v35 = vcombine.high %v142_v27, %v146_v28  ;;  %v6295_v31 = vcombine.low %v350_v17, %v354_v19  ;;  %v430_v11 = vld [vmem:[#allocation5 + $0x950] sm:$0xff] }
 0x116   :  { %2722 = vmatpush2.bf16.msra.mxu1 %v6405_v36  ;;  %2680 = vmatprep.subr.bf16.mxu0 %v6270_v37  ;;  %v134_v36 = vld [vmem:[#allocation5 + $0x10] sm:$0xff] }
 0x117   :  { %2723 = vmatprep.subr.bf16.mxu1 %v6398_v42  ;;  %v138_v37 = vld [vmem:[#allocation5 + $0x30] sm:$0xff]  ;;  %v6087_v42 = vcombine.low %v142_v27, %v146_v28  ;;  %v6296_v28 = vcombine.high %v350_v17, %v354_v19 }
 0x118   :  { %v342_v27 = vld [vmem:[#allocation5 + $0x690] sm:$0xff] }
 0x119   :  { %2681 = vmatpush2.bf16.msra.mxu0 %v6269_v44  ;;  %v6080_v44 = vcombine.high %v134_v36, %v138_v37 }
 0x11a   :  { %2724 = vmatpush2.bf16.msra.mxu1 %v6397_v45  ;;  %2736 = vmatprep.subr.bf16.mxu0 %v6136_v46  ;;  %v254_v45 = vld [vmem:[#allocation5 + $0x3d0] sm:$0xff] }
 0x11b   :  { %2779 = vmatprep.subr.bf16.mxu1 %v6264_v50  ;;  %v258_v46 = vld [vmem:[#allocation5 + $0x3f0] sm:$0xff]  ;;  %v6079_v50 = vcombine.low %v134_v36, %v138_v37  ;;  %v6288_v37 = vcombine.high %v342_v27, %v346_v29 }
 0x11c   :  { %2683 = vmatmul.mubr.bf16.vlgmr.msra.gmra.mxu0 %v7706_v25  ;;  %v334_v36 = vld [vmem:[#allocation5 + $0x650] sm:$0xff] }
 0x11d   :  { %2726 = vmatmul.mubr.bf16.vlgmr.msra.gmra.mxu1 %v7714_v39  ;;  %2737 = vmatpush1.bf16.msra.mxu0 %v6135_v52  ;;  %v6200_v52 = vcombine.high %v254_v45, %v258_v46  ;;  %v6280_v47 = vcombine.high %v334_v36, %v338_v38 }
 0x11e   :  { %2780 = vmatpush1.bf16.msra.mxu1 %v6263_v53  ;;  %2738 = vmatprep.subr.bf16.mxu0 %v6128_v54  ;;  %v246_v53 = vld [vmem:[#allocation5 + $0x390] sm:$0xff] }
 0x11f   :  { %2781 = vmatprep.subr.bf16.mxu1 %v6256_v59  ;;  %2768 = vmatprep.mubr.bf16.mxu0 %v7698_v58  ;;  %v250_v54 = vld [vmem:[#allocation5 + $0x3b0] sm:$0xff]  ;;  %v6199_v59 = vcombine.low %v254_v45, %v258_v46 }
 0x120   :  { %2811 = vmatprep.mubr.bf16.mxu1 %v7700_v63  ;;  %v202_v45 = vld [vmem:[#allocation5 + $0x230] sm:$0xff] }
 0x121   :  { %2739 = vmatpush1.bf16.msra.mxu0 %v6127_v61  ;;  %v6192_v61 = vcombine.high %v246_v53, %v250_v54  ;;  %v326_v46 = vld [vmem:[#allocation5 + $0x610] sm:$0xff] }
 0x122   :  { %2782 = vmatpush1.bf16.msra.mxu1 %v6255_v62  ;;  %2740 = vmatprep.subr.bf16.mxu0 %v6120_v0  ;;  %v238_v62 = vld [vmem:[#allocation5 + $0x350] sm:$0xff] }
 0x123   :  { %2783 = vmatprep.subr.bf16.mxu1 %v6248_v4  ;;  %v242_v0 = vld [vmem:[#allocation5 + $0x370] sm:$0xff]  ;;  %v6191_v4 = vcombine.low %v246_v53, %v250_v54 }
 0x124   :  { %v446_v53 = vld [vmem:[#allocation5 + $0x9d0] sm:$0xff] }
 0x125   :  { %2741 = vmatpush1.bf16.msra.mxu0 %v6119_v6  ;;  %v6184_v6 = vcombine.high %v238_v62, %v242_v0  ;;  %v450_v54 = vld [vmem:[#allocation5 + $0x9f0] sm:$0xff] }
 0x126   :  { %2784 = vmatpush1.bf16.msra.mxu1 %v6247_v7  ;;  %2742 = vmatprep.subr.bf16.mxu0 %v6112_v8  ;;  %v230_v7 = vld [vmem:[#allocation5 + $0x310] sm:$0xff] }
 0x127   :  { %2785 = vmatprep.subr.bf16.mxu1 %v6240_v12  ;;  %v234_v8 = vld [vmem:[#allocation5 + $0x330] sm:$0xff]  ;;  %v6183_v12 = vcombine.low %v238_v62, %v242_v0  ;;  %v6392_v0 = vcombine.high %v446_v53, %v450_v54 }
 0x129   :  { %2743 = vmatpush1.bf16.msra.mxu0 %v6111_v14  ;;  %v6176_v14 = vcombine.high %v230_v7, %v234_v8 }
 0x12a   :  { %2786 = vmatpush1.bf16.msra.mxu1 %v6239_v15  ;;  %2744 = vmatprep.subr.bf16.mxu0 %v6104_v16  ;;  %v222_v15 = vld [vmem:[#allocation5 + $0x2d0] sm:$0xff] }
 0x12b   :  { %2787 = vmatprep.subr.bf16.mxu1 %v6232_v20  ;;  %v226_v16 = vld [vmem:[#allocation5 + $0x2f0] sm:$0xff]  ;;  %v6175_v20 = vcombine.low %v230_v7, %v234_v8  ;;  %v6391_v7 = vcombine.low %v446_v53, %v450_v54  ;;  %v6137_v8 = vcombine.low %v191_v55, %v195_v57 }
 0x12d   :  { %2745 = vmatpush1.bf16.msra.mxu0 %v6103_v23  ;;  %v6168_v23 = vcombine.high %v222_v15, %v226_v16 }
 0x12e   :  { %2788 = vmatpush1.bf16.msra.mxu1 %v6231_v24  ;;  %2746 = vmatprep.subr.bf16.mxu0 %v6096_v26  ;;  %v214_v24 = vld [vmem:[#allocation5 + $0x290] sm:$0xff] }
 0x12f   :  { %2789 = vmatprep.subr.bf16.mxu1 %v6224_v30  ;;  %v218_v26 = vld [vmem:[#allocation5 + $0x2b0] sm:$0xff]  ;;  %v6167_v30 = vcombine.low %v222_v15, %v226_v16  ;;  %v179_v15 = vld [vmem:[#allocation5 + $0x178] sm:$0xff] }
 0x131   :  { %2747 = vmatpush1.bf16.msra.mxu0 %v6095_v33  ;;  %v6160_v33 = vcombine.high %v214_v24, %v218_v26 }
 0x132   :  { %2790 = vmatpush1.bf16.msra.mxu1 %v6223_v34  ;;  %2748 = vmatprep.subr.bf16.mxu0 %v6088_v35  ;;  %v206_v34 = vld [vmem:[#allocation5 + $0x250] sm:$0xff] }
 0x133   :  { %2791 = vmatprep.subr.bf16.mxu1 %v6216_v40  ;;  %v210_v35 = vld [vmem:[#allocation5 + $0x270] sm:$0xff]  ;;  %v6159_v40 = vcombine.low %v214_v24, %v218_v26 }
 0x134   :  { %v6151_v49 = vcombine.low %v206_v34, %v210_v35 }
 0x135   :  { %2749 = vmatpush1.bf16.msra.mxu0 %v6087_v42  ;;  %v6287_v42 = vcombine.low %v342_v27, %v346_v29  ;;  %v422_v27 = vld [vmem:[#allocation5 + $0x910] sm:$0xff] }
 0x136   :  { %2792 = vmatpush1.bf16.msra.mxu1 %v6215_v43  ;;  %2750 = vmatprep.subr.bf16.mxu0 %v6080_v44  ;;  %v6152_v43 = vcombine.high %v206_v34, %v210_v35  ;;  %v198_v44 = vld [vmem:[#allocation5 + $0x210] sm:$0xff] }
 0x137   :  { %2793 = vmatprep.subr.bf16.mxu1 %v6208_v48  ;;  %v330_v48 = vld [vmem:[#allocation5 + $0x630] sm:$0xff] }
 0x138   :  { %v6271_v62 = vcombine.low %v326_v46, %v330_v48 }
 0x139   :  { %2751 = vmatpush1.bf16.msra.mxu0 %v6079_v50  ;;  %v7724_v50 = vshrl.u32 %v518_v41, 7  ;;  %v414_v41 = vld [vmem:[#allocation5 + $0x8d0] sm:$0xff] }
 0x13a   :  { %2794 = vmatpush1.bf16.msra.mxu1 %v6207_v51  ;;  %2752 = vmatprep.subr.bf16.mxu0 %v6200_v52  ;;  %v6279_v51 = vcombine.low %v334_v36, %v338_v38  ;;  %v6144_v52 = vcombine.high %v198_v44, %v202_v45 }
 0x13b   :  { %2795 = vmatprep.subr.bf16.mxu1 %v6328_v56  ;;  %v6272_v56 = vcombine.high %v326_v46, %v330_v48  ;;  %v406_v48 = vld [vmem:[#allocation5 + $0x890] sm:$0xff] }
 0x13d   :  { %2753 = vmatpush2.bf16.msra.mxu0 %v6199_v59  ;;  %v7726_v59 = vld [vmem:[#allocation7] sm:$0xff] }
 0x13e   :  { %2796 = vmatpush2.bf16.msra.mxu1 %v6327_v60  ;;  %2754 = vmatprep.subr.bf16.mxu0 %v6192_v61  ;;  %v6143_v60 = vcombine.low %v198_v44, %v202_v45  ;;  %v7729_v61 = vsub.s32 0, %v7724_v50  ;;  %v163_v44 = vld [vmem:[#allocation5 + $0xf8] sm:$0xff] }
 0x13f   :  { %2797 = vmatprep.subr.bf16.mxu1 %v6320_v2  ;;  %v442_v2 = vld [vmem:[#allocation5 + $0x9b0] sm:$0xff] }
 0x140   :  { %v6384_v9 = vcombine.high %v438_v1, %v442_v2 }
 0x141   :  { %2755 = vmatpush2.bf16.msra.mxu0 %v6191_v4  ;;  %v6138_v4 = vcombine.high %v191_v55, %v195_v57  ;;  %v398_v57 = vld [vmem:[#allocation5 + $0x850] sm:$0xff] }
 0x142   :  { %2798 = vmatpush2.bf16.msra.mxu1 %v6319_v5  ;;  %2756 = vmatprep.subr.bf16.mxu0 %v6184_v6  ;;  %v187_v5 = vld [vmem:[#allocation5 + $0x1b8] sm:$0xff]  ;;  %v521_v6 = vrot.slane %v7726_v59, %v7729_v61 }
 0x143   :  { %2799 = vmatprep.subr.bf16.mxu1 %v6312_v10  ;;  %v6130_v10 = vcombine.high %v183_v3, %v187_v5 }
 0x145   :  { %2757 = vmatpush2.bf16.msra.mxu0 %v6183_v12  ;;  %v434_v12 = vld [vmem:[#allocation5 + $0x970] sm:$0xff] }
 0x146   :  { %2800 = vmatpush2.bf16.msra.mxu1 %v6311_v13  ;;  %2758 = vmatprep.subr.bf16.mxu0 %v6176_v14  ;;  %v175_v14 = vld [vmem:[#allocation5 + $0x158] sm:$0xff]  ;;  %v6375_v34 = vcombine.low %v430_v11, %v434_v12 }
 0x147   :  { %2801 = vmatprep.subr.bf16.mxu1 %v6304_v18  ;;  %v6383_v18 = vcombine.low %v438_v1, %v442_v2  ;;  %v6122_v26 = vcombine.high %v175_v14, %v179_v15  ;;  %v6121_v36 = vcombine.low %v175_v14, %v179_v15  ;;  %v514_v14 = vld [vmem:[#allocation5 + $0xbf0] sm:$0xff]  ;;  %v255_v15 = vld [vmem:[#allocation5 + $0x3d8] sm:$0xff] }
 0x149   :  { %2759 = vmatpush2.bf16.msra.mxu0 %v6175_v20  ;;  %v6129_v20 = vcombine.low %v183_v3, %v187_v5  ;;  %v390_v5 = vld [vmem:[#allocation5 + $0x810] sm:$0xff] }
 0x14a   :  { %2802 = vmatpush2.bf16.msra.mxu1 %v6303_v22  ;;  %2760 = vmatprep.subr.bf16.mxu0 %v6168_v23  ;;  %v6376_v22 = vcombine.high %v430_v11, %v434_v12 }
 0x14b   :  { %2803 = vmatprep.subr.bf16.mxu1 %v6296_v28  ;;  %v426_v28 = vld [vmem:[#allocation5 + $0x930] sm:$0xff] }
 0x14c   :  { %v6367_v45 = vcombine.low %v422_v27, %v426_v28 }
 0x14d   :  { %2761 = vmatpush2.bf16.msra.mxu0 %v6167_v30  ;;  %v167_v30 = vld [vmem:[#allocation5 + $0x118] sm:$0xff] }
 0x14e   :  { %2804 = vmatpush2.bf16.msra.mxu1 %v6295_v31  ;;  %2762 = vmatprep.subr.bf16.mxu0 %v6160_v33  ;;  %v171_v31 = vld [vmem:[#allocation5 + $0x138] sm:$0xff] }
 0x14f   :  { %2805 = vmatprep.subr.bf16.mxu1 %v6288_v37  ;;  %v6368_v37 = vcombine.high %v422_v27, %v426_v28  ;;  %v506_v27 = vld [vmem:[#allocation5 + $0xbb0] sm:$0xff]  ;;  %v247_v28 = vld [vmem:[#allocation5 + $0x398] sm:$0xff] }
 0x151   :  { %2763 = vmatpush2.bf16.msra.mxu0 %v6159_v40  ;;  %v6114_v40 = vcombine.high %v167_v30, %v171_v31 }
 0x152   :  { %2806 = vmatpush2.bf16.msra.mxu1 %v6287_v42  ;;  %2764 = vmatprep.subr.bf16.mxu0 %v6152_v43  ;;  %v418_v42 = vld [vmem:[#allocation5 + $0x8f0] sm:$0xff]  ;;  %v159_v43 = vld [vmem:[#allocation5 + $0xd8] sm:$0xff] }
 0x153   :  { %2807 = vmatprep.subr.bf16.mxu1 %v6280_v47  ;;  %v6360_v46 = vcombine.high %v414_v41, %v418_v42  ;;  %v6106_v47 = vcombine.high %v159_v43, %v163_v44  ;;  %v6359_v53 = vcombine.low %v414_v41, %v418_v42  ;;  %v6105_v54 = vcombine.low %v159_v43, %v163_v44 }
 0x155   :  { %2765 = vmatpush2.bf16.msra.mxu0 %v6151_v49  ;;  %v410_v49 = vld [vmem:[#allocation5 + $0x8b0] sm:$0xff] }
 0x156   :  { %2808 = vmatpush2.bf16.msra.mxu1 %v6279_v51  ;;  %2766 = vmatprep.subr.bf16.mxu0 %v6144_v52  ;;  %v151_v51 = vld [vmem:[#allocation5 + $0x98] sm:$0xff]  ;;  %v6352_v55 = vcombine.high %v406_v48, %v410_v49  ;;  %v6351_v1 = vcombine.low %v406_v48, %v410_v49 }
 0x157   :  { %2809 = vmatprep.subr.bf16.mxu1 %v6272_v56  ;;  %v155_v52 = vld [vmem:[#allocation5 + $0xb8] sm:$0xff] }
 0x158   :  { %v6098_v56 = vcombine.high %v151_v51, %v155_v52  ;;  %v6097_v2 = vcombine.low %v151_v51, %v155_v52 }
 0x159   :  { %2767 = vmatpush2.bf16.msra.mxu0 %v6143_v60  ;;  %v402_v60 = vld [vmem:[#allocation5 + $0x870] sm:$0xff] }
 0x15a   :  { %2810 = vmatpush2.bf16.msra.mxu1 %v6271_v62  ;;  %2822 = vmatprep.subr.bf16.mxu0 %v6392_v0  ;;  %v143_v62 = vld [vmem:[#allocation5 + $0x58] sm:$0xff]  ;;  %v6344_v3 = vcombine.high %v398_v57, %v402_v60 }
 0x15b   :  { %2865 = vmatprep.subr.bf16.mxu1 %v6138_v4  ;;  %v147_v0 = vld [vmem:[#allocation5 + $0x78] sm:$0xff] }
 0x15c   :  { %v2512_v13 = vpop.f32.mrf.mxu0  ;;  %2769 = vmatmul.mubr.bf16.vlgmr.msra.gmra.mxu0 %v7704_v21  ;;  %v6090_v4 = vcombine.high %v143_v62, %v147_v0 }
 0x15d   :  { %v2513_v16 = vadd.f32 %v2512_v13, %v521_v6  ;;  %v2555_v17 = vpop.f32.mrf.mxu1  ;;  %2812 = vmatmul.mubr.bf16.vlgmr.msra.gmra.mxu1 %v7706_v25  ;;  %2823 = vmatpush1.bf16.msra.mxu0 %v6391_v7  ;;  %v135_v7 = vld [vmem:[#allocation5 + $0x18] sm:$0xff]  ;;  %v510_v13 = vld [vmem:[#allocation5 + $0xbd0] sm:$0xff] }
 0x15e   :  { %2866 = vmatpush1.bf16.msra.mxu1 %v6137_v8  ;;  %v7735_v19 = vpop.f32.mrf.mxu0  ;;  %2824 = vmatprep.subr.bf16.mxu0 %v6384_v9  ;;  %v139_v8 = vld [vmem:[#allocation5 + $0x38] sm:$0xff]  ;;  %v6343_v9 = vcombine.low %v398_v57, %v402_v60 }
 0x15f   :  { %v7737_v23 = vadd.f32 %v2555_v17, %v2513_v16  ;;  %v7739_v24 = vpop.f32.mrf.mxu1  ;;  %2867 = vmatprep.subr.bf16.mxu1 %v6130_v10  ;;  %2854 = vmatprep.mubr.bf16.mxu0 %v7708_v32  ;;  %v6089_v10 = vcombine.low %v143_v62, %v147_v0  ;;  %v6082_v12 = vcombine.high %v135_v7, %v139_v8  ;;  %v259_v16 = vld [vmem:[#allocation5 + $0x3f8] sm:$0xff] }
 0x160   :  { %v2516_v29 = vpop.f32.mrf.mxu0  ;;  %2897 = vmatprep.mubr.bf16.mxu1 %v7698_v58  ;;  %v6113_v58 = vcombine.low %v167_v30, %v171_v31  ;;  %v6455_v30 = vcombine.low %v510_v13, %v514_v14  ;;  %v6201_v31 = vcombine.low %v255_v15, %v259_v16 }
 0x161   :  { %v2517_v33 = vadd.f32 %v2516_v29, %v521_v6  ;;  %2825 = vmatpush1.bf16.msra.mxu0 %v6383_v18  ;;  %v2559_v35 = vpop.f32.mrf.mxu1  ;;  %v394_v6 = vld [vmem:[#allocation5 + $0x830] sm:$0xff]  ;;  %v6081_v18 = vcombine.low %v135_v7, %v139_v8  ;;  %v251_v29 = vld [vmem:[#allocation5 + $0x3b8] sm:$0xff] }
 0x162   :  { %2868 = vmatpush1.bf16.msra.mxu1 %v6129_v20  ;;  %2826 = vmatprep.subr.bf16.mxu0 %v6376_v22  ;;  %v6336_v11 = vcombine.high %v390_v5, %v394_v6  ;;  %v6335_v17 = vcombine.low %v390_v5, %v394_v6  ;;  %v6456_v20 = vcombine.high %v510_v13, %v514_v14 }
 0x163   :  { %v7743_v38 = vadd.f32 %v2559_v35, %v2517_v33  ;;  %2869 = vmatprep.subr.bf16.mxu1 %v6122_v26  ;;  %v6202_v22 = vcombine.high %v255_v15, %v259_v16  ;;  %v502_v26 = vld [vmem:[#allocation5 + $0xb90] sm:$0xff]  ;;  %v6193_v42 = vcombine.low %v247_v28, %v251_v29 }
 0x164   :  { %v6448_v33 = vcombine.high %v502_v26, %v506_v27  ;;  %v494_v35 = vld [vmem:[#allocation5 + $0xb50] sm:$0xff]  ;;  %v6447_v41 = vcombine.low %v502_v26, %v506_v27 }
 0x165   :  { %2827 = vmatpush1.bf16.msra.mxu0 %v6375_v34  ;;  %v6194_v34 = vcombine.high %v247_v28, %v251_v29 }
 0x166   :  { %2870 = vmatpush1.bf16.msra.mxu1 %v6121_v36  ;;  %2828 = vmatprep.subr.bf16.mxu0 %v6368_v37  ;;  %v498_v36 = vld [vmem:[#allocation5 + $0xb70] sm:$0xff]  ;;  %v239_v37 = vld [vmem:[#allocation5 + $0x358] sm:$0xff] }
 0x167   :  { %2871 = vmatprep.subr.bf16.mxu1 %v6114_v40  ;;  %v243_v40 = vld [vmem:[#allocation5 + $0x378] sm:$0xff]  ;;  %v6440_v43 = vcombine.high %v494_v35, %v498_v36  ;;  %v6439_v48 = vcombine.low %v494_v35, %v498_v36 }
 0x168   :  { %v6186_v44 = vcombine.high %v239_v37, %v243_v40  ;;  %v6185_v49 = vcombine.low %v239_v37, %v243_v40 }
 0x169   :  { %2829 = vmatpush1.bf16.msra.mxu0 %v6367_v45  ;;  %v486_v45 = vld [vmem:[#allocation5 + $0xb10] sm:$0xff] }
 0x16a   :  { %2872 = vmatpush1.bf16.msra.mxu1 %v6113_v58  ;;  %2830 = vmatprep.subr.bf16.mxu0 %v6360_v46  ;;  %v490_v58 = vld [vmem:[#allocation5 + $0xb30] sm:$0xff]  ;;  %v231_v46 = vld [vmem:[#allocation5 + $0x318] sm:$0xff] }
 0x16b   :  { %2873 = vmatprep.subr.bf16.mxu1 %v6106_v47  ;;  %v235_v47 = vld [vmem:[#allocation5 + $0x338] sm:$0xff]  ;;  %v6432_v51 = vcombine.high %v486_v45, %v490_v58  ;;  %v6431_v57 = vcombine.low %v486_v45, %v490_v58  ;;  %v7745_v58 = vpop.f32.mrf.mxu0 }
 0x16c   :  { %v6178_v52 = vcombine.high %v231_v46, %v235_v47  ;;  %v6177_v60 = vcombine.low %v231_v46, %v235_v47 }
 0x16d   :  { %2831 = vmatpush1.bf16.msra.mxu0 %v6359_v53  ;;  %v478_v53 = vld [vmem:[#allocation5 + $0xad0] sm:$0xff] }
 0x16e   :  { %2874 = vmatpush1.bf16.msra.mxu1 %v6105_v54  ;;  %2832 = vmatprep.subr.bf16.mxu0 %v6352_v55  ;;  %v482_v54 = vld [vmem:[#allocation5 + $0xaf0] sm:$0xff]  ;;  %v223_v55 = vld [vmem:[#allocation5 + $0x2d8] sm:$0xff] }
 0x16f   :  { %2875 = vmatprep.subr.bf16.mxu1 %v6098_v56  ;;  %v227_v56 = vld [vmem:[#allocation5 + $0x2f8] sm:$0xff]  ;;  %v6424_v62 = vcombine.high %v478_v53, %v482_v54  ;;  %v6423_v5 = vcombine.low %v478_v53, %v482_v54 }
 0x170   :  { %v6170_v0 = vcombine.high %v223_v55, %v227_v56  ;;  %v6169_v6 = vcombine.low %v223_v55, %v227_v56  ;;  %v431_v53 = vld [vmem:[#allocation5 + $0x958] sm:$0xff] }
 0x171   :  { %2833 = vmatpush1.bf16.msra.mxu0 %v6351_v1  ;;  %v470_v1 = vld [vmem:[#allocation5 + $0xa90] sm:$0xff]  ;;  %v435_v54 = vld [vmem:[#allocation5 + $0x978] sm:$0xff] }
 0x172   :  { %2876 = vmatpush1.bf16.msra.mxu1 %v6097_v2  ;;  %2834 = vmatprep.subr.bf16.mxu0 %v6344_v3  ;;  %v474_v2 = vld [vmem:[#allocation5 + $0xab0] sm:$0xff]  ;;  %v215_v3 = vld [vmem:[#allocation5 + $0x298] sm:$0xff] }
 0x173   :  { %2877 = vmatprep.subr.bf16.mxu1 %v6090_v4  ;;  %v219_v4 = vld [vmem:[#allocation5 + $0x2b8] sm:$0xff]  ;;  %v6416_v7 = vcombine.high %v470_v1, %v474_v2  ;;  %v6415_v13 = vcombine.low %v470_v1, %v474_v2 }
 0x174   :  { %v6162_v8 = vcombine.high %v215_v3, %v219_v4  ;;  %v6161_v14 = vcombine.low %v215_v3, %v219_v4  ;;  %v295_v1 = vld [vmem:[#allocation5 + $0x518] sm:$0xff] }
 0x175   :  { %2835 = vmatpush1.bf16.msra.mxu0 %v6343_v9  ;;  %v462_v9 = vld [vmem:[#allocation5 + $0xa50] sm:$0xff]  ;;  %v299_v2 = vld [vmem:[#allocation5 + $0x538] sm:$0xff] }
 0x176   :  { %2878 = vmatpush1.bf16.msra.mxu1 %v6089_v10  ;;  %2836 = vmatprep.subr.bf16.mxu0 %v6336_v11  ;;  %v466_v10 = vld [vmem:[#allocation5 + $0xa70] sm:$0xff]  ;;  %v207_v11 = vld [vmem:[#allocation5 + $0x258] sm:$0xff] }
 0x177   :  { %2879 = vmatprep.subr.bf16.mxu1 %v6082_v12  ;;  %v211_v12 = vld [vmem:[#allocation5 + $0x278] sm:$0xff]  ;;  %v6408_v15 = vcombine.high %v462_v9, %v466_v10  ;;  %v6407_v26 = vcombine.low %v462_v9, %v466_v10 }
 0x178   :  { %v6154_v16 = vcombine.high %v207_v11, %v211_v12  ;;  %v6153_v27 = vcombine.low %v207_v11, %v211_v12  ;;  %v423_v4 = vld [vmem:[#allocation5 + $0x918] sm:$0xff] }
 0x179   :  { %2837 = vmatpush1.bf16.msra.mxu0 %v6335_v17  ;;  %v454_v17 = vld [vmem:[#allocation5 + $0xa10] sm:$0xff]  ;;  %v287_v11 = vld [vmem:[#allocation5 + $0x4d8] sm:$0xff] }
 0x17a   :  { %2880 = vmatpush1.bf16.msra.mxu1 %v6081_v18  ;;  %2838 = vmatprep.subr.bf16.mxu0 %v6456_v20  ;;  %v458_v18 = vld [vmem:[#allocation5 + $0xa30] sm:$0xff]  ;;  %v199_v20 = vld [vmem:[#allocation5 + $0x218] sm:$0xff] }
 0x17b   :  { %2881 = vmatprep.subr.bf16.mxu1 %v6202_v22  ;;  %v203_v22 = vld [vmem:[#allocation5 + $0x238] sm:$0xff]  ;;  %v6400_v28 = vcombine.high %v454_v17, %v458_v18  ;;  %v6399_v35 = vcombine.low %v454_v17, %v458_v18 }
 0x17c   :  { %v6146_v29 = vcombine.high %v199_v20, %v203_v22  ;;  %v6145_v36 = vcombine.low %v199_v20, %v203_v22  ;;  %v291_v12 = vld [vmem:[#allocation5 + $0x4f8] sm:$0xff] }
 0x17d   :  { %2839 = vmatpush2.bf16.msra.mxu0 %v6455_v30  ;;  %v319_v30 = vld [vmem:[#allocation5 + $0x5d8] sm:$0xff] }
 0x17e   :  { %2882 = vmatpush2.bf16.msra.mxu1 %v6201_v31  ;;  %2840 = vmatprep.subr.bf16.mxu0 %v6448_v33  ;;  %v323_v31 = vld [vmem:[#allocation5 + $0x5f8] sm:$0xff] }
 0x17f   :  { %2883 = vmatprep.subr.bf16.mxu1 %v6194_v34  ;;  %v447_v33 = vld [vmem:[#allocation5 + $0x9d8] sm:$0xff]  ;;  %v6266_v37 = vcombine.high %v319_v30, %v323_v31  ;;  %v6265_v45 = vcombine.low %v319_v30, %v323_v31 }
 0x180   :  { %v451_v34 = vld [vmem:[#allocation5 + $0x9f8] sm:$0xff] }
 0x181   :  { %2841 = vmatpush2.bf16.msra.mxu0 %v6447_v41  ;;  %v6394_v40 = vcombine.high %v447_v33, %v451_v34  ;;  %v311_v41 = vld [vmem:[#allocation5 + $0x598] sm:$0xff]  ;;  %v6393_v46 = vcombine.low %v447_v33, %v451_v34 }
 0x182   :  { %2884 = vmatpush2.bf16.msra.mxu1 %v6193_v42  ;;  %2842 = vmatprep.subr.bf16.mxu0 %v6440_v43  ;;  %v315_v42 = vld [vmem:[#allocation5 + $0x5b8] sm:$0xff] }
 0x183   :  { %2885 = vmatprep.subr.bf16.mxu1 %v6186_v44  ;;  %v439_v43 = vld [vmem:[#allocation5 + $0x998] sm:$0xff]  ;;  %v6258_v47 = vcombine.high %v311_v41, %v315_v42  ;;  %v6257_v56 = vcombine.low %v311_v41, %v315_v42 }
 0x184   :  { %v443_v44 = vld [vmem:[#allocation5 + $0x9b8] sm:$0xff] }
 0x185   :  { %2843 = vmatpush2.bf16.msra.mxu0 %v6439_v48  ;;  %v6386_v48 = vcombine.high %v439_v43, %v443_v44  ;;  %v279_v17 = vld [vmem:[#allocation5 + $0x498] sm:$0xff] }
 0x186   :  { %2886 = vmatpush2.bf16.msra.mxu1 %v6185_v49  ;;  %2844 = vmatprep.subr.bf16.mxu0 %v6432_v51  ;;  %v303_v49 = vld [vmem:[#allocation5 + $0x558] sm:$0xff] }
 0x187   :  { %2887 = vmatprep.subr.bf16.mxu1 %v6178_v52  ;;  %v307_v51 = vld [vmem:[#allocation5 + $0x578] sm:$0xff] }
 0x188   :  { %v283_v18 = vld [vmem:[#allocation5 + $0x4b8] sm:$0xff] }
 0x189   :  { %2845 = vmatpush2.bf16.msra.mxu0 %v6431_v57  ;;  %v407_v20 = vld [vmem:[#allocation5 + $0x898] sm:$0xff] }
 0x18a   :  { %2888 = vmatpush2.bf16.msra.mxu1 %v6177_v60  ;;  %2846 = vmatprep.subr.bf16.mxu0 %v6424_v62  ;;  %v6385_v60 = vcombine.low %v439_v43, %v443_v44  ;;  %v6250_v62 = vcombine.high %v303_v49, %v307_v51  ;;  %v411_v22 = vld [vmem:[#allocation5 + $0x8b8] sm:$0xff] }
 0x18b   :  { %2889 = vmatprep.subr.bf16.mxu1 %v6170_v0  ;;  %v6378_v0 = vcombine.high %v431_v53, %v435_v54  ;;  %v271_v30 = vld [vmem:[#allocation5 + $0x458] sm:$0xff] }
 0x18c   :  { %v275_v31 = vld [vmem:[#allocation5 + $0x478] sm:$0xff] }
 0x18d   :  { %2847 = vmatpush2.bf16.msra.mxu0 %v6423_v5  ;;  %v427_v5 = vld [vmem:[#allocation5 + $0x938] sm:$0xff] }
 0x18e   :  { %2890 = vmatpush2.bf16.msra.mxu1 %v6169_v6  ;;  %2848 = vmatprep.subr.bf16.mxu0 %v6416_v7  ;;  %v6377_v6 = vcombine.low %v431_v53, %v435_v54  ;;  %v6242_v7 = vcombine.high %v295_v1, %v299_v2  ;;  %v6370_v10 = vcombine.high %v423_v4, %v427_v5  ;;  %v399_v33 = vld [vmem:[#allocation5 + $0x858] sm:$0xff] }
 0x18f   :  { %2891 = vmatprep.subr.bf16.mxu1 %v6162_v8  ;;  %v403_v34 = vld [vmem:[#allocation5 + $0x878] sm:$0xff] }
 0x190   :  { %v263_v41 = vld [vmem:[#allocation5 + $0x418] sm:$0xff] }
 0x191   :  { %2849 = vmatpush2.bf16.msra.mxu0 %v6415_v13  ;;  %v419_v13 = vld [vmem:[#allocation5 + $0x8f8] sm:$0xff] }
 0x192   :  { %2892 = vmatpush2.bf16.msra.mxu1 %v6161_v14  ;;  %2850 = vmatprep.subr.bf16.mxu0 %v6408_v15  ;;  %v6234_v15 = vcombine.high %v287_v11, %v291_v12  ;;  %v267_v42 = vld [vmem:[#allocation5 + $0x438] sm:$0xff] }
 0x193   :  { %2893 = vmatprep.subr.bf16.mxu1 %v6154_v16  ;;  %v391_v43 = vld [vmem:[#allocation5 + $0x818] sm:$0xff]  ;;  %v6209_v54 = vcombine.low %v263_v41, %v267_v42 }
 0x194   :  { %v395_v44 = vld [vmem:[#allocation5 + $0x838] sm:$0xff] }
 0x195   :  { %2851 = vmatpush2.bf16.msra.mxu0 %v6407_v26  ;;  %v6233_v26 = vcombine.low %v287_v11, %v291_v12  ;;  %v515_v53 = vld [vmem:[#allocation5 + $0xbf8] sm:$0xff] }
 0x196   :  { %2894 = vmatpush2.bf16.msra.mxu1 %v6153_v27  ;;  %2852 = vmatprep.subr.bf16.mxu0 %v6400_v28  ;;  %v6226_v28 = vcombine.high %v279_v17, %v283_v18 }
 0x197   :  { %2895 = vmatprep.subr.bf16.mxu1 %v6146_v29  ;;  %v6354_v29 = vcombine.high %v407_v20, %v411_v22 }
 0x199   :  { %2853 = vmatpush2.bf16.msra.mxu0 %v6399_v35  ;;  %v6225_v35 = vcombine.low %v279_v17, %v283_v18 }
 0x19a   :  { %2896 = vmatpush2.bf16.msra.mxu1 %v6145_v36  ;;  %2908 = vmatprep.subr.bf16.mxu0 %v6266_v37  ;;  %v6353_v36 = vcombine.low %v407_v20, %v411_v22  ;;  %v6218_v37 = vcombine.high %v271_v30, %v275_v31  ;;  %v351_v20 = vld [vmem:[#allocation5 + $0x6d8] sm:$0xff] }
 0x19b   :  { %2951 = vmatprep.subr.bf16.mxu1 %v6394_v40  ;;  %v6346_v40 = vcombine.high %v399_v33, %v403_v34  ;;  %v355_v22 = vld [vmem:[#allocation5 + $0x6f8] sm:$0xff] }
 0x19c   :  { %v2598_v52 = vpop.f32.mrf.mxu0  ;;  %2855 = vmatmul.mubr.bf16.vlgmr.msra.gmra.mxu0 %v7714_v39 }
 0x19d   :  { %v2599_v55 = vadd.f32 %v2598_v52, %v7737_v23  ;;  %2898 = vmatmul.mubr.bf16.vlgmr.msra.gmra.mxu1 %v7704_v21  ;;  %2909 = vmatpush1.bf16.msra.mxu0 %v6265_v45  ;;  %v6249_v23 = vcombine.low %v303_v49, %v307_v51  ;;  %v6217_v45 = vcombine.low %v271_v30, %v275_v31  ;;  %v383_v49 = vld [vmem:[#allocation5 + $0x7d8] sm:$0xff] }
 0x19e   :  { %2952 = vmatpush1.bf16.msra.mxu1 %v6393_v46  ;;  %v7750_v57 = vpop.f32.mrf.mxu0  ;;  %2910 = vmatprep.subr.bf16.mxu0 %v6258_v47  ;;  %v6345_v46 = vcombine.low %v399_v33, %v403_v34  ;;  %v6210_v47 = vcombine.high %v263_v41, %v267_v42  ;;  %v387_v51 = vld [vmem:[#allocation5 + $0x7f8] sm:$0xff]  ;;  %v6298_v30 = vcombine.high %v351_v20, %v355_v22 }
 0x19f   :  { %2953 = vmatprep.subr.bf16.mxu1 %v6386_v48  ;;  %2940 = vmatprep.mubr.bf16.mxu0 %v7700_v63  ;;  %v2994_v8 = vmax.f32 %v2599_v55, 0.0  ;;  %v415_v63 = vld [vmem:[#allocation5 + $0x8d8] sm:$0xff]  ;;  %v6338_v48 = vcombine.high %v391_v43, %v395_v44  ;;  %v6337_v55 = vcombine.low %v391_v43, %v395_v44 }
 0x1a0   :  { %v2602_v3 = vpop.f32.mrf.mxu0  ;;  %2983 = vmatprep.mubr.bf16.mxu1 %v7708_v32  ;;  %v6241_v32 = vcombine.low %v295_v1, %v299_v2  ;;  %v6362_v16 = vcombine.high %v415_v63, %v419_v13  ;;  %v6361_v27 = vcombine.low %v415_v63, %v419_v13  ;;  %v511_v52 = vld [vmem:[#allocation5 + $0xbd8] sm:$0xff] }
 0x1a1   :  { %v2603_v21 = vadd.f32 %v2602_v3, %v7743_v38  ;;  %2911 = vmatpush1.bf16.msra.mxu0 %v6257_v56  ;;  %v6369_v38 = vcombine.low %v423_v4, %v427_v5  ;;  %v6330_v56 = vcombine.high %v383_v49, %v387_v51  ;;  %v503_v1 = vld [vmem:[#allocation5 + $0xb98] sm:$0xff]  ;;  %v6329_v3 = vcombine.low %v383_v49, %v387_v51  ;;  %v2561_v49 = vpop.f32.mrf.mxu1 }
 0x1a2   :  { %2954 = vmatpush1.bf16.msra.mxu1 %v6385_v60  ;;  %2912 = vmatprep.subr.bf16.mxu0 %v6250_v62  ;;  %v6458_v60 = vcombine.high %v511_v52, %v515_v53  ;;  %v375_v62 = vld [vmem:[#allocation5 + $0x798] sm:$0xff]  ;;  %v6457_v4 = vcombine.low %v511_v52, %v515_v53 }
 0x1a3   :  { %v3002_v9 = vmax.f32 %v2603_v21, 0.0  ;;  %2955 = vmatprep.subr.bf16.mxu1 %v6378_v0  ;;  %v379_v0 = vld [vmem:[#allocation5 + $0x7b8] sm:$0xff] }
 0x1a4   :  { %v507_v2 = vld [vmem:[#allocation5 + $0xbb8] sm:$0xff]  ;;  %v6322_v5 = vcombine.high %v375_v62, %v379_v0 }
 0x1a5   :  { %v7755_v14 = vpack.c.bf16 %v3002_v9, %v2994_v8  ;;  %2913 = vmatpush1.bf16.msra.mxu0 %v6249_v23  ;;  %v6450_v21 = vcombine.high %v503_v1, %v507_v2  ;;  %v367_v23 = vld [vmem:[#allocation5 + $0x758] sm:$0xff]  ;;  %v6321_v9 = vcombine.low %v375_v62, %v379_v0 }
 0x1a6   :  { %2956 = vmatpush1.bf16.msra.mxu1 %v6377_v6  ;;  %2914 = vmatprep.subr.bf16.mxu0 %v6242_v7  ;;  %v371_v6 = vld [vmem:[#allocation5 + $0x778] sm:$0xff] }
 0x1a7   :  { %2957 = vmatprep.subr.bf16.mxu1 %v6370_v10  ;;  %v495_v7 = vld [vmem:[#allocation5 + $0xb58] sm:$0xff]  ;;  %v6449_v10 = vcombine.low %v503_v1, %v507_v2  ;;  %v6314_v11 = vcombine.high %v367_v23, %v371_v6 }
 0x1a8   :  { %v499_v8 = vld [vmem:[#allocation5 + $0xb78] sm:$0xff] }
 0x1a9   :  { %2915 = vmatpush1.bf16.msra.mxu0 %v6241_v32  ;;  %v6442_v12 = vcombine.high %v495_v7, %v499_v8  ;;  %v359_v63 = vld [vmem:[#allocation5 + $0x718] sm:$0xff] }
 0x1aa   :  { %2958 = vmatpush1.bf16.msra.mxu1 %v6369_v38  ;;  %2916 = vmatprep.subr.bf16.mxu0 %v6234_v15  ;;  %v363_v13 = vld [vmem:[#allocation5 + $0x738] sm:$0xff]  ;;  %v6313_v15 = vcombine.low %v367_v23, %v371_v6 }
 0x1ab   :  { %2959 = vmatprep.subr.bf16.mxu1 %v6362_v16  ;;  %v487_v32 = vld [vmem:[#allocation5 + $0xb18] sm:$0xff]  ;;  %v6441_v16 = vcombine.low %v495_v7, %v499_v8  ;;  %v6306_v17 = vcombine.high %v359_v63, %v363_v13 }
 0x1ac   :  { %v491_v38 = vld [vmem:[#allocation5 + $0xb38] sm:$0xff] }
 0x1ad   :  { %2917 = vmatpush1.bf16.msra.mxu0 %v6233_v26  ;;  %v6434_v18 = vcombine.high %v487_v32, %v491_v38  ;;  %v479_v26 = vld [vmem:[#allocation5 + $0xad8] sm:$0xff] }
 0x1ae   :  { %2960 = vmatpush1.bf16.msra.mxu1 %v6361_v27  ;;  %2918 = vmatprep.subr.bf16.mxu0 %v6226_v28  ;;  %v483_v27 = vld [vmem:[#allocation5 + $0xaf8] sm:$0xff]  ;;  %v6305_v28 = vcombine.low %v359_v63, %v363_v13 }
 0x1af   :  { %2961 = vmatprep.subr.bf16.mxu1 %v6354_v29  ;;  %v6433_v29 = vcombine.low %v487_v32, %v491_v38  ;;  %v6426_v31 = vcombine.high %v479_v26, %v483_v27  ;;  %v343_v33 = vld [vmem:[#allocation5 + $0x698] sm:$0xff]  ;;  %v6425_v41 = vcombine.low %v479_v26, %v483_v27 }
 0x1b0   :  { %v347_v34 = vld [vmem:[#allocation5 + $0x6b8] sm:$0xff] }
 0x1b1   :  { %2919 = vmatpush1.bf16.msra.mxu0 %v6225_v35  ;;  %v7758_v35 = vsub.s32 1, %v7724_v50  ;;  %v6290_v42 = vcombine.high %v343_v33, %v347_v34  ;;  %v335_v44 = vld [vmem:[#allocation5 + $0x658] sm:$0xff]  ;;  %v6289_v51 = vcombine.low %v343_v33, %v347_v34 }
 0x1b2   :  { %2962 = vmatpush1.bf16.msra.mxu1 %v6353_v36  ;;  %2920 = vmatprep.subr.bf16.mxu0 %v6218_v37  ;;  %v471_v36 = vld [vmem:[#allocation5 + $0xa98] sm:$0xff] }
 0x1b3   :  { %2963 = vmatprep.subr.bf16.mxu1 %v6346_v40  ;;  %v475_v37 = vld [vmem:[#allocation5 + $0xab8] sm:$0xff]  ;;  %v6297_v40 = vcombine.low %v351_v20, %v355_v22 }
 0x1b4   :  { %v6418_v43 = vcombine.high %v471_v36, %v475_v37  ;;  %v6417_v53 = vcombine.low %v471_v36, %v475_v37  ;;  %v331_v62 = vld [vmem:[#allocation5 + $0x638] sm:$0xff] }
 0x1b5   :  { %2921 = vmatpush1.bf16.msra.mxu0 %v6217_v45  ;;  %v339_v45 = vld [vmem:[#allocation5 + $0x678] sm:$0xff] }
 0x1b6   :  { %2964 = vmatpush1.bf16.msra.mxu1 %v6345_v46  ;;  %2922 = vmatprep.subr.bf16.mxu0 %v6210_v47  ;;  %v525_v46 = vrot.slane %v7726_v59, %v7758_v35  ;;  %v463_v47 = vld [vmem:[#allocation5 + $0xa58] sm:$0xff] }
 0x1b7   :  { %2965 = vmatprep.subr.bf16.mxu1 %v6338_v48  ;;  %v467_v48 = vld [vmem:[#allocation5 + $0xa78] sm:$0xff] }
 0x1b8   :  { %v2519_v52 = vadd.f32 %v7745_v58, %v525_v46  ;;  %v2515_v0 = vadd.f32 %v7735_v19, %v525_v46  ;;  %v455_v1 = vld [vmem:[#allocation5 + $0xa18] sm:$0xff]  ;;  %v6409_v58 = vcombine.low %v463_v47, %v467_v48 }
 0x1b9   :  { %2923 = vmatpush1.bf16.msra.mxu0 %v6209_v54  ;;  %v6282_v54 = vcombine.high %v335_v44, %v339_v45  ;;  %v459_v2 = vld [vmem:[#allocation5 + $0xa38] sm:$0xff] }
 0x1ba   :  { %2966 = vmatpush1.bf16.msra.mxu1 %v6337_v55  ;;  %2924 = vmatprep.subr.bf16.mxu0 %v6330_v56  ;;  %v7763_v55 = vpop.f32.mrf.mxu1  ;;  %v6410_v56 = vcombine.high %v463_v47, %v467_v48  ;;  %v6402_v6 = vcombine.high %v455_v1, %v459_v2  ;;  %v2558_v7 = vadd.f32 %v7739_v24, %v2515_v0  ;;  %v6862_v13 = vld [vmem:[#allocation8 + $0x454] ss:$24 sps:$4 sm:$0xff]   ;;  %v6857_v38 = vld [vmem:[#allocation8 + $0x150] ss:$24 sps:$4 sm:$0xff]   ;;  %v6875_v48 = vld [vmem:[#allocation8 + $0xc0] ss:$24 sps:$4 sm:$0xff]  }
 0x1bb   :  { %2967 = vmatprep.subr.bf16.mxu1 %v6458_v60  ;;  %v327_v60 = vld [vmem:[#allocation5 + $0x618] sm:$0xff]  ;;  %v6889_v0 = vld [vmem:[#allocation8 + $0x64] ss:$24 sps:$4 sm:$0xff]  }
 0x1bc   :  { %v2643_v23 = vpop.f32.mrf.mxu1  ;;  %v6273_v19 = vcombine.low %v327_v60, %v331_v62  ;;  %v6874_v34 = vld [vmem:[#allocation8 + $0x3f4] ss:$24 sps:$4 sm:$0xff]  }
 0x1bd   :  { %2925 = vmatpush2.bf16.msra.mxu0 %v6329_v3  ;;  %v2604_v3 = vpop.f32.mrf.mxu0 }
 0x1be   :  { %2968 = vmatpush2.bf16.msra.mxu1 %v6457_v4  ;;  %2926 = vmatprep.subr.bf16.mxu0 %v6322_v5  ;;  %v6281_v4 = vcombine.low %v335_v44, %v339_v45  ;;  %v2562_v5 = vadd.f32 %v2561_v49, %v2519_v52  ;;  %v7771_v63 = vpop.f32.mrf.mxu1  ;;  %v6880_v45 = vld [vmem:[#allocation8 + $0x3c4] ss:$24 sps:$4 sm:$0xff]   ;;  %v6878_v49 = vld [vmem:[#allocation8 + $0x3c0] ss:$24 sps:$4 sm:$0xff]  }
 0x1bf   :  { %2969 = vmatprep.subr.bf16.mxu1 %v6450_v21  ;;  %v6274_v21 = vcombine.high %v327_v60, %v331_v62  ;;  %v6881_v60 = vld [vmem:[#allocation8 + $0x90] ss:$24 sps:$4 sm:$0xff]  }
 0x1c0   :  { %v2605_v8 = vadd.f32 %v2604_v3, %v2562_v5  ;;  %v6884_v62 = vld [vmem:[#allocation8 + $0x390] ss:$24 sps:$4 sm:$0xff]   ;;  %v6890_v3 = vld [vmem:[#allocation8 + $0x360] ss:$24 sps:$4 sm:$0xff]   ;;  %v6898_v5 = vld [vmem:[#allocation8 + $0x334] ss:$24 sps:$4 sm:$0xff]  }
 0x1c1   :  { %2927 = vmatpush2.bf16.msra.mxu0 %v6321_v9  ;;  %v7768_v9 = vsub.s32 3, %v7724_v50 }
 0x1c2   :  { %2970 = vmatpush2.bf16.msra.mxu1 %v6449_v10  ;;  %2928 = vmatprep.subr.bf16.mxu0 %v6314_v11  ;;  %v2601_v10 = vadd.f32 %v7750_v57, %v2558_v7  ;;  %v6401_v11 = vcombine.low %v455_v1, %v459_v2  ;;  %v3003_v32 = vmax.f32 %v2605_v8, 0.0  ;;  %v6865_v57 = vld [vmem:[#allocation8 + $0x124] ss:$24 sps:$4 sm:$0xff]   ;;  %v6887_v2 = vld [vmem:[#allocation8 + $0x60] ss:$24 sps:$4 sm:$0xff]  }
 0x1c3   :  { %2971 = vmatprep.subr.bf16.mxu1 %v6442_v12  ;;  %v6859_v12 = vld [vmem:[#allocation8 + $0x154] ss:$24 sps:$4 sm:$0xff]   ;;  %v533_v24 = vrot.slane %v7726_v59, %v7768_v9  ;;  %v6863_v59 = vld [vmem:[#allocation8 + $0x120] ss:$24 sps:$4 sm:$0xff]   ;;  %v6892_v1 = vld [vmem:[#allocation8 + $0x364] ss:$24 sps:$4 sm:$0xff]  }
 0x1c4   :  { %v6899_v7 = vld [vmem:[#allocation8] ss:$24 sps:$4 sm:$0xff]  }
 0x1c5   :  { %2929 = vmatpush2.bf16.msra.mxu0 %v6313_v15  ;;  %v2995_v15 = vmax.f32 %v2601_v10, 0.0  ;;  %v2644_v26 = vadd.f32 %v2643_v23, %v533_v24  ;;  %v6901_v23 = vld [vmem:[#allocation8 + $0x4] ss:$24 sps:$4 sm:$0xff]   ;;  %v6902_v8 = vld [vmem:[#allocation8 + $0x300] ss:$24 sps:$4 sm:$0xff]  }
 0x1c6   :  { %2972 = vmatpush2.bf16.msra.mxu1 %v6441_v16  ;;  %2930 = vmatprep.subr.bf16.mxu0 %v6306_v17  ;;  %v6860_v16 = vld [vmem:[#allocation8 + $0x450] ss:$24 sps:$4 sm:$0xff]   ;;  %v2647_v17 = vpop.f32.mrf.mxu1  ;;  %v6910_v10 = vld [vmem:[#allocation8 + $0x5d4] ss:$24 sps:$4 sm:$0xff]  }
 0x1c7   :  { %2973 = vmatprep.subr.bf16.mxu1 %v6434_v18  ;;  %v6868_v18 = vld [vmem:[#allocation8 + $0x424] ss:$24 sps:$4 sm:$0xff]   ;;  %v7775_v20 = vpack.c.bf16 %v3003_v32, %v2995_v15  ;;  %v6919_v15 = vld [vmem:[#allocation8 + $0x274] ss:$24 sps:$4 sm:$0xff]  }
 0x1c8   :  { %v6916_v32 = vld [vmem:[#allocation8 + $0x5a4] ss:$24 sps:$4 sm:$0xff]  }
 0x1c9   :  { %2931 = vmatpush2.bf16.msra.mxu0 %v6305_v28 }
 0x1ca   :  { %2974 = vmatpush2.bf16.msra.mxu1 %v6433_v29  ;;  %2932 = vmatprep.subr.bf16.mxu0 %v6298_v30  ;;  %v6866_v29 = vld [vmem:[#allocation8 + $0x420] ss:$24 sps:$4 sm:$0xff]   ;;  %v6871_v30 = vld [vmem:[#allocation8 + $0xf4] ss:$24 sps:$4 sm:$0xff]  }
 0x1cb   :  { %2975 = vmatprep.subr.bf16.mxu1 %v6426_v31 }
 0x1cd   :  { %2933 = vmatpush2.bf16.msra.mxu0 %v6297_v40 }
 0x1ce   :  { %2976 = vmatpush2.bf16.msra.mxu1 %v6425_v41  ;;  %2934 = vmatprep.subr.bf16.mxu0 %v6290_v42  ;;  %v6872_v41 = vld [vmem:[#allocation8 + $0x3f0] ss:$24 sps:$4 sm:$0xff]   ;;  %v6877_v42 = vld [vmem:[#allocation8 + $0xc4] ss:$24 sps:$4 sm:$0xff]  }
 0x1cf   :  { %2977 = vmatprep.subr.bf16.mxu1 %v6418_v43 }
 0x1d1   :  { %2935 = vmatpush2.bf16.msra.mxu0 %v6289_v51  ;;  %v6883_v51 = vld [vmem:[#allocation8 + $0x94] ss:$24 sps:$4 sm:$0xff]  }
 0x1d2   :  { %2978 = vmatpush2.bf16.msra.mxu1 %v6417_v53  ;;  %2936 = vmatprep.subr.bf16.mxu0 %v6282_v54  ;;  %v6886_v54 = vld [vmem:[#allocation8 + $0x394] ss:$24 sps:$4 sm:$0xff]  }
 0x1d3   :  { %2979 = vmatprep.subr.bf16.mxu1 %v6410_v56 }
 0x1d5   :  { %2937 = vmatpush2.bf16.msra.mxu0 %v6281_v4  ;;  %v6895_v4 = vld [vmem:[#allocation8 + $0x34] ss:$24 sps:$4 sm:$0xff]  }
 0x1d6   :  { %2980 = vmatpush2.bf16.msra.mxu1 %v6409_v58  ;;  %2938 = vmatprep.subr.bf16.mxu0 %v6274_v21  ;;  %v6893_v58 = vld [vmem:[#allocation8 + $0x30] ss:$24 sps:$4 sm:$0xff]  }
 0x1d7   :  { %2981 = vmatprep.subr.bf16.mxu1 %v6402_v6  ;;  %v6896_v21 = vld [vmem:[#allocation8 + $0x330] ss:$24 sps:$4 sm:$0xff]   ;;  %v6904_v6 = vld [vmem:[#allocation8 + $0x304] ss:$24 sps:$4 sm:$0xff]  }
 0x1d9   :  { %2939 = vmatpush2.bf16.msra.mxu0 %v6273_v19  ;;  %v6907_v19 = vld [vmem:[#allocation8 + $0x2d4] ss:$24 sps:$4 sm:$0xff]  }
 0x1da   :  { %2982 = vmatpush2.bf16.msra.mxu1 %v6401_v11  ;;  %5354 = vmatprep.subr.bf16.mxu0 %v6859_v12  ;;  %v6905_v11 = vld [vmem:[#allocation8 + $0x2d0] ss:$24 sps:$4 sm:$0xff]  }
 0x1db   :  { %5397 = vmatprep.subr.bf16.mxu1 %v6862_v13  ;;  %v6908_v12 = vld [vmem:[#allocation8 + $0x5d0] ss:$24 sps:$4 sm:$0xff]   ;;  %v6913_v13 = vld [vmem:[#allocation8 + $0x2a4] ss:$24 sps:$4 sm:$0xff]  }
 0x1dc   :  { %v7777_v22 = vpop.f32.mrf.mxu0  ;;  %2941 = vmatmul.mubr.bf16.vlgmr.msra.gmra.mxu0 %v7706_v25  ;;  %v2648_v25 = vadd.f32 %v2647_v17, %v533_v24  ;;  %v6911_v24 = vld [vmem:[#allocation8 + $0x2a0] ss:$24 sps:$4 sm:$0xff]   ;;  %v6917_v17 = vld [vmem:[#allocation8 + $0x270] ss:$24 sps:$4 sm:$0xff]  }
 0x1dd   :  { %v7780_v27 = vpop.f32.mrf.mxu1  ;;  %2984 = vmatmul.mubr.bf16.vlgmr.msra.gmra.mxu1 %v7714_v39  ;;  %5355 = vmatpush1.bf16.msra.mxu0 %v6857_v38  ;;  %v6869_v39 = vld [vmem:[#allocation8 + $0xf0] ss:$24 sps:$4 sm:$0xff]   ;;  %v6914_v38 = vld [vmem:[#allocation8 + $0x5a0] ss:$24 sps:$4 sm:$0xff]  }
 0x1de   :  { %5386 = vmatprep.mubr.bf16.mxu0 %v7775_v20  ;;  %5398 = vmatpush1.bf16.msra.mxu1 %v6860_v16  ;;  %v2686_v28 = vpop.f32.mrf.mxu0  ;;  %v6922_v16 = vld [vmem:[#allocation8 + $0x574] ss:$24 sps:$4 sm:$0xff]  }
 0x1df   :  { %v2687_v31 = vadd.f32 %v2686_v28, %v2644_v26  ;;  %v2729_v33 = vpop.f32.mrf.mxu1  ;;  %5356 = vmatprep.subr.bf16.mxu0 %v6865_v57  ;;  %5399 = vmatprep.subr.bf16.mxu1 %v6868_v18  ;;  %v6920_v57 = vld [vmem:[#allocation8 + $0x570] ss:$24 sps:$4 sm:$0xff]   ;;  %v6925_v18 = vld [vmem:[#allocation8 + $0x244] ss:$24 sps:$4 sm:$0xff]   ;;  %v6923_v28 = vld [vmem:[#allocation8 + $0x240] ss:$24 sps:$4 sm:$0xff]  }
 0x1e0   :  { %v7784_v36 = vpop.f32.mrf.mxu0  ;;  %v6928_v26 = vld [vmem:[#allocation8 + $0x544] ss:$24 sps:$4 sm:$0xff]  }
 0x1e1   :  { %v7786_v37 = vpop.f32.mrf.mxu1  ;;  %5357 = vmatpush1.bf16.msra.mxu0 %v6863_v59  ;;  %v2730_v43 = vadd.f32 %v2729_v33, %v2687_v31  ;;  %v7792_v59 = vsub.s32 2, %v7724_v50  ;;  %v6934_v31 = vld [vmem:[#allocation8 + $0x514] ss:$24 sps:$4 sm:$0xff]   ;;  %v7794_v33 = vld [vmem:[#allocation7] sm:$0xff] }
 0x1e2   :  { %5400 = vmatpush1.bf16.msra.mxu1 %v6866_v29  ;;  %v2690_v40 = vpop.f32.mrf.mxu0  ;;  %5358 = vmatprep.subr.bf16.mxu0 %v6871_v30  ;;  %v6926_v29 = vld [vmem:[#allocation8 + $0x540] ss:$24 sps:$4 sm:$0xff]   ;;  %v6931_v30 = vld [vmem:[#allocation8 + $0x214] ss:$24 sps:$4 sm:$0xff]  }
 0x1e3   :  { %v2691_v44 = vadd.f32 %v2690_v40, %v2648_v25  ;;  %5401 = vmatprep.subr.bf16.mxu1 %v6874_v34  ;;  %v2733_v46 = vpop.f32.mrf.mxu1  ;;  %v2997_v52 = vmax.f32 %v2730_v43, 0.0  ;;  %v529_v34 = vrot.slane %v7794_v33, %v7792_v59  ;;  %v6929_v25 = vld [vmem:[#allocation8 + $0x210] ss:$24 sps:$4 sm:$0xff]   ;;  %v6937_v40 = vld [vmem:[#allocation8 + $0x1e4] ss:$24 sps:$4 sm:$0xff]  }
 0x1e4   :  { %v6935_v43 = vld [vmem:[#allocation8 + $0x1e0] ss:$24 sps:$4 sm:$0xff]  }
 0x1e5   :  { %v2734_v47 = vadd.f32 %v2733_v46, %v2691_v44  ;;  %5359 = vmatpush1.bf16.msra.mxu0 %v6869_v39  ;;  %v6932_v39 = vld [vmem:[#allocation8 + $0x510] ss:$24 sps:$4 sm:$0xff]   ;;  %v6938_v44 = vld [vmem:[#allocation8 + $0x4e0] ss:$24 sps:$4 sm:$0xff]   ;;  %v2642_v46 = vadd.f32 %v7763_v55, %v529_v34 }
 0x1e6   :  { %5402 = vmatpush1.bf16.msra.mxu1 %v6872_v41  ;;  %5360 = vmatprep.subr.bf16.mxu0 %v6877_v42  ;;  %v6940_v41 = vld [vmem:[#allocation8 + $0x4e4] ss:$24 sps:$4 sm:$0xff]   ;;  %v2646_v42 = vadd.f32 %v7771_v63, %v529_v34  ;;  %v6947_v55 = vld [vmem:[#allocation8 + $0x180] ss:$24 sps:$4 sm:$0xff]   ;;  %v6979_v34 = vld [vmem:[#allocation8 + $0x8d4] ss:$24 sps:$4 sm:$0xff]  }
 0x1e7   :  { %v3005_v53 = vmax.f32 %v2734_v47, 0.0  ;;  %5403 = vmatprep.subr.bf16.mxu1 %v6880_v45  ;;  %v6943_v45 = vld [vmem:[#allocation8 + $0x1b4] ss:$24 sps:$4 sm:$0xff]   ;;  %v6949_v63 = vld [vmem:[#allocation8 + $0x184] ss:$24 sps:$4 sm:$0xff]  }
 0x1e8   :  { %v2689_v47 = vadd.f32 %v7784_v36, %v2646_v42  ;;  %v6950_v36 = vld [vmem:[#allocation8 + $0x480] ss:$24 sps:$4 sm:$0xff]   ;;  %v7052_v42 = vld [vmem:[#allocation8 + $0xbd0] ss:$24 sps:$4 sm:$0xff]  }
 0x1e9   :  { %v7788_v56 = vpack.c.bf16 %v3005_v53, %v2997_v52  ;;  %5361 = vmatpush1.bf16.msra.mxu0 %v6875_v48  ;;  %v6946_v48 = vld [vmem:[#allocation8 + $0x4b4] ss:$24 sps:$4 sm:$0xff]   ;;  %v6944_v52 = vld [vmem:[#allocation8 + $0x4b0] ss:$24 sps:$4 sm:$0xff]  }
 0x1ea   :  { %5404 = vmatpush1.bf16.msra.mxu1 %v6878_v49  ;;  %5362 = vmatprep.subr.bf16.mxu0 %v6883_v51  ;;  %v2685_v49 = vadd.f32 %v7777_v22, %v2642_v46  ;;  %v6941_v51 = vld [vmem:[#allocation8 + $0x1b0] ss:$24 sps:$4 sm:$0xff]   ;;  %v2732_v53 = vadd.f32 %v7786_v37, %v2689_v47  ;;  %v7006_v22 = vld [vmem:[#allocation8 + $0xa54] ss:$24 sps:$4 sm:$0xff]   ;;  %v7058_v46 = vld [vmem:[#allocation8 + $0xba0] ss:$24 sps:$4 sm:$0xff]  }
 0x1eb   :  { %5429 = vmatprep.mubr.bf16.mxu1 %v7788_v56  ;;  %5405 = vmatprep.subr.bf16.mxu1 %v6886_v54  ;;  %v6952_v54 = vld [vmem:[#allocation8 + $0x484] ss:$24 sps:$4 sm:$0xff]   ;;  %v7004_v37 = vld [vmem:[#allocation8 + $0xa50] ss:$24 sps:$4 sm:$0xff]   ;;  %v7066_v47 = vld [vmem:[#allocation8 + $0xb74] ss:$24 sps:$4 sm:$0xff]  }
 0x1ed   :  { %5363 = vmatpush1.bf16.msra.mxu0 %v6881_v60  ;;  %v2728_v60 = vadd.f32 %v7780_v27, %v2685_v49  ;;  %v7012_v27 = vld [vmem:[#allocation8 + $0xa24] ss:$24 sps:$4 sm:$0xff]  }
 0x1ee   :  { %5406 = vmatpush1.bf16.msra.mxu1 %v6884_v62  ;;  %5364 = vmatprep.subr.bf16.mxu0 %v6889_v0  ;;  %v6955_v62 = vld [vmem:[#allocation8 + $0x754] ss:$24 sps:$4 sm:$0xff]   ;;  %v3004_v0 = vmax.f32 %v2732_v53, 0.0  ;;  %v6988_v49 = vld [vmem:[#allocation8 + $0x844] ss:$24 sps:$4 sm:$0xff]  }
 0x1ef   :  { %5407 = vmatprep.subr.bf16.mxu1 %v6892_v1  ;;  %v2996_v1 = vmax.f32 %v2728_v60, 0.0  ;;  %v6991_v53 = vld [vmem:[#allocation8 + $0x814] ss:$24 sps:$4 sm:$0xff]  }
 0x1f0   :  { %v7078_v60 = vld [vmem:[#allocation8 + $0xb14] ss:$24 sps:$4 sm:$0xff]  }
 0x1f1   :  { %5365 = vmatpush1.bf16.msra.mxu0 %v6887_v2  ;;  %v6953_v2 = vld [vmem:[#allocation8 + $0x750] ss:$24 sps:$4 sm:$0xff]  }
 0x1f2   :  { %5408 = vmatpush1.bf16.msra.mxu1 %v6890_v3  ;;  %5366 = vmatprep.subr.bf16.mxu0 %v6895_v4  ;;  %v6958_v3 = vld [vmem:[#allocation8 + $0x724] ss:$24 sps:$4 sm:$0xff]   ;;  %v7804_v4 = vpack.c.bf16 %v3004_v0, %v2996_v1 }
 0x1f3   :  { %5409 = vmatprep.subr.bf16.mxu1 %v6898_v5  ;;  %v6956_v5 = vld [vmem:[#allocation8 + $0x720] ss:$24 sps:$4 sm:$0xff]   ;;  %v7084_v0 = vld [vmem:[#allocation8 + $0xae4] ss:$24 sps:$4 sm:$0xff]  }
 0x1f5   :  { %5367 = vmatpush1.bf16.msra.mxu0 %v6893_v58  ;;  %v6961_v58 = vld [vmem:[#allocation8 + $0x6f4] ss:$24 sps:$4 sm:$0xff]  }
 0x1f6   :  { %5410 = vmatpush1.bf16.msra.mxu1 %v6896_v21  ;;  %5368 = vmatprep.subr.bf16.mxu0 %v6901_v23  ;;  %v7010_v21 = vld [vmem:[#allocation8 + $0xa20] ss:$24 sps:$4 sm:$0xff]   ;;  %v7018_v23 = vld [vmem:[#allocation8 + $0x9f4] ss:$24 sps:$4 sm:$0xff]  }
 0x1f7   :  { %5411 = vmatprep.subr.bf16.mxu1 %v6904_v6  ;;  %v6959_v6 = vld [vmem:[#allocation8 + $0x6f0] ss:$24 sps:$4 sm:$0xff]  }
 0x1f9   :  { %5369 = vmatpush1.bf16.msra.mxu0 %v6899_v7  ;;  %v6964_v7 = vld [vmem:[#allocation8 + $0x6c4] ss:$24 sps:$4 sm:$0xff]  }
 0x1fa   :  { %5412 = vmatpush1.bf16.msra.mxu1 %v6902_v8  ;;  %5370 = vmatprep.subr.bf16.mxu0 %v6907_v19  ;;  %v7016_v8 = vld [vmem:[#allocation8 + $0x9f0] ss:$24 sps:$4 sm:$0xff]   ;;  %v7024_v19 = vld [vmem:[#allocation8 + $0x9c4] ss:$24 sps:$4 sm:$0xff]  }
 0x1fb   :  { %5413 = vmatprep.subr.bf16.mxu1 %v6910_v10  ;;  %v6962_v10 = vld [vmem:[#allocation8 + $0x6c0] ss:$24 sps:$4 sm:$0xff]  }
 0x1fd   :  { %5371 = vmatpush2.bf16.msra.mxu0 %v6905_v11  ;;  %v6967_v11 = vld [vmem:[#allocation8 + $0x694] ss:$24 sps:$4 sm:$0xff]  }
 0x1fe   :  { %5414 = vmatpush2.bf16.msra.mxu1 %v6908_v12  ;;  %5372 = vmatprep.subr.bf16.mxu0 %v6913_v13  ;;  %v7022_v12 = vld [vmem:[#allocation8 + $0x9c0] ss:$24 sps:$4 sm:$0xff]   ;;  %v7030_v13 = vld [vmem:[#allocation8 + $0x994] ss:$24 sps:$4 sm:$0xff]  }
 0x1ff   :  { %5415 = vmatprep.subr.bf16.mxu1 %v6916_v32  ;;  %v6965_v32 = vld [vmem:[#allocation8 + $0x690] ss:$24 sps:$4 sm:$0xff]  }
 0x201   :  { %5373 = vmatpush2.bf16.msra.mxu0 %v6911_v24  ;;  %v6970_v24 = vld [vmem:[#allocation8 + $0x664] ss:$24 sps:$4 sm:$0xff]  }
 0x202   :  { %5416 = vmatpush2.bf16.msra.mxu1 %v6914_v38  ;;  %5374 = vmatprep.subr.bf16.mxu0 %v6919_v15  ;;  %v7028_v38 = vld [vmem:[#allocation8 + $0x990] ss:$24 sps:$4 sm:$0xff]   ;;  %v7036_v15 = vld [vmem:[#allocation8 + $0x964] ss:$24 sps:$4 sm:$0xff]  }
 0x203   :  { %5417 = vmatprep.subr.bf16.mxu1 %v6922_v16  ;;  %v6968_v16 = vld [vmem:[#allocation8 + $0x660] ss:$24 sps:$4 sm:$0xff]  }
 0x205   :  { %5375 = vmatpush2.bf16.msra.mxu0 %v6917_v17  ;;  %v6973_v17 = vld [vmem:[#allocation8 + $0x634] ss:$24 sps:$4 sm:$0xff]  }
 0x206   :  { %5418 = vmatpush2.bf16.msra.mxu1 %v6920_v57  ;;  %5376 = vmatprep.subr.bf16.mxu0 %v6925_v18  ;;  %v7034_v57 = vld [vmem:[#allocation8 + $0x960] ss:$24 sps:$4 sm:$0xff]   ;;  %v7042_v18 = vld [vmem:[#allocation8 + $0x934] ss:$24 sps:$4 sm:$0xff]  }
 0x207   :  { %5419 = vmatprep.subr.bf16.mxu1 %v6928_v26  ;;  %v6971_v26 = vld [vmem:[#allocation8 + $0x630] ss:$24 sps:$4 sm:$0xff]  }
 0x209   :  { %5377 = vmatpush2.bf16.msra.mxu0 %v6923_v28  ;;  %v6976_v28 = vld [vmem:[#allocation8 + $0x604] ss:$24 sps:$4 sm:$0xff]  }
 0x20a   :  { %5420 = vmatpush2.bf16.msra.mxu1 %v6926_v29  ;;  %5378 = vmatprep.subr.bf16.mxu0 %v6931_v30  ;;  %v7040_v29 = vld [vmem:[#allocation8 + $0x930] ss:$24 sps:$4 sm:$0xff]   ;;  %v7048_v30 = vld [vmem:[#allocation8 + $0x904] ss:$24 sps:$4 sm:$0xff]  }
 0x20b   :  { %5421 = vmatprep.subr.bf16.mxu1 %v6934_v31  ;;  %v6974_v31 = vld [vmem:[#allocation8 + $0x600] ss:$24 sps:$4 sm:$0xff]  }
 0x20d   :  { %5379 = vmatpush2.bf16.msra.mxu0 %v6929_v25  ;;  %v7046_v25 = vld [vmem:[#allocation8 + $0x900] ss:$24 sps:$4 sm:$0xff]  }
 0x20e   :  { %5422 = vmatpush2.bf16.msra.mxu1 %v6932_v39  ;;  %5380 = vmatprep.subr.bf16.mxu0 %v6937_v40  ;;  %v7054_v39 = vld [vmem:[#allocation8 + $0xbd4] ss:$24 sps:$4 sm:$0xff]   ;;  %v6977_v40 = vld [vmem:[#allocation8 + $0x8d0] ss:$24 sps:$4 sm:$0xff]  }
 0x20f   :  { %5423 = vmatprep.subr.bf16.mxu1 %v6940_v41  ;;  %v6982_v41 = vld [vmem:[#allocation8 + $0x8a4] ss:$24 sps:$4 sm:$0xff]  }
 0x211   :  { %5381 = vmatpush2.bf16.msra.mxu0 %v6935_v43  ;;  %v7060_v43 = vld [vmem:[#allocation8 + $0xba4] ss:$24 sps:$4 sm:$0xff]  }
 0x212   :  { %5424 = vmatpush2.bf16.msra.mxu1 %v6938_v44  ;;  %5382 = vmatprep.subr.bf16.mxu0 %v6943_v45  ;;  %v6980_v44 = vld [vmem:[#allocation8 + $0x8a0] ss:$24 sps:$4 sm:$0xff]   ;;  %v6985_v45 = vld [vmem:[#allocation8 + $0x874] ss:$24 sps:$4 sm:$0xff]  }
 0x213   :  { %5425 = vmatprep.subr.bf16.mxu1 %v6946_v48  ;;  %v6983_v48 = vld [vmem:[#allocation8 + $0x870] ss:$24 sps:$4 sm:$0xff]  }
 0x215   :  { %5383 = vmatpush2.bf16.msra.mxu0 %v6941_v51  ;;  %v7064_v51 = vld [vmem:[#allocation8 + $0xb70] ss:$24 sps:$4 sm:$0xff]  }
 0x216   :  { %5426 = vmatpush2.bf16.msra.mxu1 %v6944_v52  ;;  %5384 = vmatprep.subr.bf16.mxu0 %v6949_v63  ;;  %v7072_v52 = vld [vmem:[#allocation8 + $0xb44] ss:$24 sps:$4 sm:$0xff]   ;;  %v6986_v63 = vld [vmem:[#allocation8 + $0x840] ss:$24 sps:$4 sm:$0xff]  }
 0x217   :  { %5427 = vmatprep.subr.bf16.mxu1 %v6952_v54  ;;  %v7070_v54 = vld [vmem:[#allocation8 + $0xb40] ss:$24 sps:$4 sm:$0xff]  }
 0x219   :  { %5385 = vmatpush2.bf16.msra.mxu0 %v6947_v55  ;;  %v6989_v55 = vld [vmem:[#allocation8 + $0x810] ss:$24 sps:$4 sm:$0xff]  }
 0x21a   :  { %5428 = vmatpush2.bf16.msra.mxu1 %v6950_v36  ;;  %5440 = vmatprep.subr.bf16.mxu0 %v6955_v62  ;;  %v6994_v36 = vld [vmem:[#allocation8 + $0x7e4] ss:$24 sps:$4 sm:$0xff]   ;;  %v7076_v62 = vld [vmem:[#allocation8 + $0xb10] ss:$24 sps:$4 sm:$0xff]  }
 0x21b   :  { %5483 = vmatprep.subr.bf16.mxu1 %v7006_v22  ;;  %v6992_v22 = vld [vmem:[#allocation8 + $0x7e0] ss:$24 sps:$4 sm:$0xff]  }
 0x21c   :  { %5387 = vmatmul.mubr.bf16.vlgmr.msra.gmra.mxu0 %v7755_v14  ;;  %v2770_v1 = vpop.f32.mrf.mxu0 }
 0x21d   :  { %5430 = vmatmul.mubr.bf16.vlgmr.msra.gmra.mxu1 %v7804_v4  ;;  %5441 = vmatpush1.bf16.msra.mxu0 %v6953_v2  ;;  %v6997_v2 = vld [vmem:[#allocation8 + $0x7b4] ss:$24 sps:$4 sm:$0xff]  }
 0x21e   :  { %5442 = vmatprep.subr.bf16.mxu0 %v6958_v3  ;;  %5484 = vmatpush1.bf16.msra.mxu1 %v7004_v37  ;;  %v7082_v3 = vld [vmem:[#allocation8 + $0xae0] ss:$24 sps:$4 sm:$0xff]   ;;  %v7090_v37 = vld [vmem:[#allocation8 + $0xab4] ss:$24 sps:$4 sm:$0xff]  }
 0x21f   :  { %5485 = vmatprep.subr.bf16.mxu1 %v7012_v27  ;;  %v6995_v27 = vld [vmem:[#allocation8 + $0x7b0] ss:$24 sps:$4 sm:$0xff]  }
 0x221   :  { %5443 = vmatpush1.bf16.msra.mxu0 %v6956_v5  ;;  %v2772_v5 = vpop.f32.mrf.mxu0 }
 0x222   :  { %5444 = vmatprep.subr.bf16.mxu0 %v6961_v58  ;;  %5486 = vmatpush1.bf16.msra.mxu1 %v7010_v21  ;;  %v7000_v58 = vld [vmem:[#allocation8 + $0x784] ss:$24 sps:$4 sm:$0xff]   ;;  %v7088_v21 = vld [vmem:[#allocation8 + $0xab0] ss:$24 sps:$4 sm:$0xff]  }
 0x223   :  { %5487 = vmatprep.subr.bf16.mxu1 %v7018_v23  ;;  %v7809_v23 = vsub.s32 5, %v7724_v50 }
 0x225   :  { %5445 = vmatpush1.bf16.msra.mxu0 %v6959_v6  ;;  %v7096_v6 = vld [vmem:[#allocation8 + $0xa84] ss:$24 sps:$4 sm:$0xff]  }
 0x226   :  { %5446 = vmatprep.subr.bf16.mxu0 %v6964_v7  ;;  %5488 = vmatpush1.bf16.msra.mxu1 %v7016_v8  ;;  %v7812_v7 = vsub.s32 4, %v7724_v50  ;;  %v2813_v8 = vpop.f32.mrf.mxu1 }
 0x227   :  { %5489 = vmatprep.subr.bf16.mxu1 %v7024_v19  ;;  %v6998_v19 = vld [vmem:[#allocation8 + $0x780] ss:$24 sps:$4 sm:$0xff]  }
 0x229   :  { %5447 = vmatpush1.bf16.msra.mxu0 %v6962_v10  ;;  %v2774_v10 = vpop.f32.mrf.mxu0 }
 0x22a   :  { %5448 = vmatprep.subr.bf16.mxu0 %v6967_v11  ;;  %5490 = vmatpush1.bf16.msra.mxu1 %v7022_v12  ;;  %v7003_v11 = vld [vmem:[#allocation8 + $0x15c] ss:$24 sps:$4 sm:$0xff]   ;;  %v7094_v12 = vld [vmem:[#allocation8 + $0xa80] ss:$24 sps:$4 sm:$0xff]  }
 0x22b   :  { %5491 = vmatprep.subr.bf16.mxu1 %v7030_v13  ;;  %v541_v13 = vrot.slane %v7794_v33, %v7809_v23 }
 0x22d   :  { %5449 = vmatpush1.bf16.msra.mxu0 %v6965_v32  ;;  %v7102_v32 = vld [vmem:[#allocation8 + $0x45c] ss:$24 sps:$4 sm:$0xff]  }
 0x22e   :  { %5450 = vmatprep.subr.bf16.mxu0 %v6970_v24  ;;  %5492 = vmatpush1.bf16.msra.mxu1 %v7028_v38  ;;  %v537_v24 = vrot.slane %v7794_v33, %v7812_v7  ;;  %v2815_v38 = vpop.f32.mrf.mxu1 }
 0x22f   :  { %5493 = vmatprep.subr.bf16.mxu1 %v7036_v15  ;;  %v2776_v15 = vpop.f32.mrf.mxu0 }
 0x231   :  { %5451 = vmatpush1.bf16.msra.mxu0 %v6968_v16  ;;  %v2773_v16 = vadd.f32 %v2772_v5, %v541_v13  ;;  %v7043_v5 = vld [vmem:[#allocation8 + $0x8] ss:$24 sps:$4 sm:$0xff]  }
 0x232   :  { %5452 = vmatprep.subr.bf16.mxu0 %v6973_v17  ;;  %5494 = vmatpush1.bf16.msra.mxu1 %v7034_v57  ;;  %v2775_v17 = vadd.f32 %v2774_v10, %v537_v24  ;;  %v2771_v57 = vadd.f32 %v2770_v1, %v537_v24  ;;  %v7033_v1 = vld [vmem:[#allocation8 + $0x6c] ss:$24 sps:$4 sm:$0xff]   ;;  %v7075_v24 = vld [vmem:[#allocation8 + $0x21c] ss:$24 sps:$4 sm:$0xff]  }
 0x233   :  { %5495 = vmatprep.subr.bf16.mxu1 %v7042_v18  ;;  %v2817_v18 = vpop.f32.mrf.mxu1 }
 0x235   :  { %5453 = vmatpush1.bf16.msra.mxu0 %v6971_v26 }
 0x236   :  { %5454 = vmatprep.subr.bf16.mxu0 %v6976_v28  ;;  %5496 = vmatpush1.bf16.msra.mxu1 %v7040_v29  ;;  %v2777_v28 = vadd.f32 %v2776_v15, %v541_v13  ;;  %v544_v15 = vsub.s32 6, %v7724_v50 }
 0x237   :  { %5497 = vmatprep.subr.bf16.mxu1 %v7048_v30  ;;  %v2816_v30 = vadd.f32 %v2815_v38, %v2773_v16  ;;  %v548_v38 = vsub.s32 7, %v7724_v50 }
 0x239   :  { %5455 = vmatpush1.bf16.msra.mxu0 %v6974_v31  ;;  %v2818_v31 = vadd.f32 %v2817_v18, %v2775_v17  ;;  %v7073_v17 = vld [vmem:[#allocation8 + $0x218] ss:$24 sps:$4 sm:$0xff]   ;;  %v549_v18 = vrot.slane %v7794_v33, %v548_v38  ;;  %v7120_v38 = vld [vmem:[#allocation8 + $0x3cc] ss:$24 sps:$4 sm:$0xff]  }
 0x23a   :  { %5456 = vmatprep.subr.bf16.mxu0 %v6979_v34  ;;  %5498 = vmatpush1.bf16.msra.mxu1 %v7046_v25  ;;  %v2814_v34 = vadd.f32 %v2813_v8, %v2771_v57  ;;  %v2819_v25 = vpop.f32.mrf.mxu1  ;;  %v7055_v8 = vld [vmem:[#allocation8 + $0x2a8] ss:$24 sps:$4 sm:$0xff]   ;;  %v7081_v57 = vld [vmem:[#allocation8 + $0x1ec] ss:$24 sps:$4 sm:$0xff]  }
 0x23b   :  { %5499 = vmatprep.subr.bf16.mxu1 %v7054_v39 }
 0x23d   :  { %5457 = vmatpush2.bf16.msra.mxu0 %v6977_v40  ;;  %v2820_v40 = vadd.f32 %v2819_v25, %v2777_v28 }
 0x23e   :  { %5458 = vmatprep.subr.bf16.mxu0 %v6982_v41  ;;  %5500 = vmatpush2.bf16.msra.mxu1 %v7052_v42 }
 0x23f   :  { %5501 = vmatprep.subr.bf16.mxu1 %v7060_v43 }
 0x241   :  { %5459 = vmatpush2.bf16.msra.mxu0 %v6980_v44 }
 0x242   :  { %5460 = vmatprep.subr.bf16.mxu0 %v6985_v45  ;;  %5502 = vmatpush2.bf16.msra.mxu1 %v7058_v46 }
 0x243   :  { %5503 = vmatprep.subr.bf16.mxu1 %v7066_v47 }
 0x245   :  { %5461 = vmatpush2.bf16.msra.mxu0 %v6983_v48 }
 0x246   :  { %5462 = vmatprep.subr.bf16.mxu0 %v6988_v49  ;;  %5504 = vmatpush2.bf16.msra.mxu1 %v7064_v51 }
 0x247   :  { %5505 = vmatprep.subr.bf16.mxu1 %v7072_v52  ;;  %v7001_v52 = vld [vmem:[#allocation8 + $0x158] ss:$24 sps:$4 sm:$0xff]  }
 0x249   :  { %5463 = vmatpush2.bf16.msra.mxu0 %v6986_v63 }
 0x24a   :  { %5464 = vmatprep.subr.bf16.mxu0 %v6991_v53  ;;  %5506 = vmatpush2.bf16.msra.mxu1 %v7070_v54  ;;  %v7009_v53 = vld [vmem:[#allocation8 + $0x12c] ss:$24 sps:$4 sm:$0xff]   ;;  %v7007_v54 = vld [vmem:[#allocation8 + $0x128] ss:$24 sps:$4 sm:$0xff]  }
 0x24b   :  { %5507 = vmatprep.subr.bf16.mxu1 %v7078_v60  ;;  %v7015_v60 = vld [vmem:[#allocation8 + $0xfc] ss:$24 sps:$4 sm:$0xff]  }
 0x24d   :  { %5465 = vmatpush2.bf16.msra.mxu0 %v6989_v55  ;;  %v7013_v55 = vld [vmem:[#allocation8 + $0xf8] ss:$24 sps:$4 sm:$0xff]  }
 0x24e   :  { %5466 = vmatprep.subr.bf16.mxu0 %v6994_v36  ;;  %5508 = vmatpush2.bf16.msra.mxu1 %v7076_v62  ;;  %v7021_v36 = vld [vmem:[#allocation8 + $0xcc] ss:$24 sps:$4 sm:$0xff]   ;;  %v7019_v62 = vld [vmem:[#allocation8 + $0xc8] ss:$24 sps:$4 sm:$0xff]  }
 0x24f   :  { %5509 = vmatprep.subr.bf16.mxu1 %v7084_v0  ;;  %v7027_v0 = vld [vmem:[#allocation8 + $0x9c] ss:$24 sps:$4 sm:$0xff]  }
 0x251   :  { %5467 = vmatpush2.bf16.msra.mxu0 %v6992_v22  ;;  %v7025_v22 = vld [vmem:[#allocation8 + $0x98] ss:$24 sps:$4 sm:$0xff]  }
 0x252   :  { %5468 = vmatprep.subr.bf16.mxu0 %v6997_v2  ;;  %5510 = vmatpush2.bf16.msra.mxu1 %v7082_v3  ;;  %v7031_v2 = vld [vmem:[#allocation8 + $0x68] ss:$24 sps:$4 sm:$0xff]   ;;  %v7039_v3 = vld [vmem:[#allocation8 + $0x3c] ss:$24 sps:$4 sm:$0xff]  }
 0x253   :  { %5511 = vmatprep.subr.bf16.mxu1 %v7090_v37  ;;  %v7037_v37 = vld [vmem:[#allocation8 + $0x38] ss:$24 sps:$4 sm:$0xff]  }
 0x255   :  { %5469 = vmatpush2.bf16.msra.mxu0 %v6995_v27  ;;  %v7045_v27 = vld [vmem:[#allocation8 + $0xc] ss:$24 sps:$4 sm:$0xff]  }
 0x256   :  { %5470 = vmatprep.subr.bf16.mxu0 %v7000_v58  ;;  %5512 = vmatpush2.bf16.msra.mxu1 %v7088_v21  ;;  %v7051_v58 = vld [vmem:[#allocation8 + $0x2dc] ss:$24 sps:$4 sm:$0xff]   ;;  %v7049_v21 = vld [vmem:[#allocation8 + $0x2d8] ss:$24 sps:$4 sm:$0xff]  }
 0x257   :  { %5513 = vmatprep.subr.bf16.mxu1 %v7096_v6  ;;  %v7057_v6 = vld [vmem:[#allocation8 + $0x2ac] ss:$24 sps:$4 sm:$0xff]  }
 0x259   :  { %5471 = vmatpush2.bf16.msra.mxu0 %v6998_v19  ;;  %v7063_v19 = vld [vmem:[#allocation8 + $0x27c] ss:$24 sps:$4 sm:$0xff]  }
 0x25a   :  { %5526 = vmatprep.subr.bf16.mxu0 %v7003_v11  ;;  %5514 = vmatpush2.bf16.msra.mxu1 %v7094_v12  ;;  %v7061_v11 = vld [vmem:[#allocation8 + $0x278] ss:$24 sps:$4 sm:$0xff]   ;;  %v7069_v12 = vld [vmem:[#allocation8 + $0x24c] ss:$24 sps:$4 sm:$0xff]  }
 0x25b   :  { %5569 = vmatprep.subr.bf16.mxu1 %v7102_v32  ;;  %v7067_v32 = vld [vmem:[#allocation8 + $0x248] ss:$24 sps:$4 sm:$0xff]  }
 0x25c   :  { %v2856_v26 = vpop.f32.mrf.mxu0 }
 0x25d   :  { %v2857_v43 = vadd.f32 %v2856_v26, %v2814_v34  ;;  %v2899_v10 = vpop.f32.mrf.mxu1  ;;  %v545_v26 = vrot.slane %v7794_v33, %v544_v15  ;;  %v7123_v15 = vld [vmem:[#allocation8 + $0x69c] ss:$24 sps:$4 sm:$0xff]  }
 0x25e   :  { %v2858_v29 = vpop.f32.mrf.mxu0 }
 0x25f   :  { %v2859_v41 = vadd.f32 %v2858_v29, %v2816_v30  ;;  %v2998_v49 = vmax.f32 %v2857_v43, 0.0  ;;  %v2901_v13 = vpop.f32.mrf.mxu1  ;;  %v7079_v29 = vld [vmem:[#allocation8 + $0x1e8] ss:$24 sps:$4 sm:$0xff]   ;;  %v7085_v43 = vld [vmem:[#allocation8 + $0x1b8] ss:$24 sps:$4 sm:$0xff]  }
 0x260   :  { %v2860_v39 = vpop.f32.mrf.mxu0  ;;  %v2902_v34 = vadd.f32 %v2901_v13, %v549_v18  ;;  %v7117_v13 = vld [vmem:[#allocation8 + $0x6cc] ss:$24 sps:$4 sm:$0xff]  }
 0x261   :  { %v2861_v42 = vadd.f32 %v2860_v39, %v2818_v31  ;;  %v2999_v47 = vmax.f32 %v2859_v41, 0.0  ;;  %v2903_v16 = vpop.f32.mrf.mxu1  ;;  %v7087_v31 = vld [vmem:[#allocation8 + $0x1bc] ss:$24 sps:$4 sm:$0xff]  }
 0x262   :  { %v2862_v44 = vpop.f32.mrf.mxu0  ;;  %v2904_v50 = vadd.f32 %v2903_v16, %v545_v26  ;;  %v7118_v16 = vld [vmem:[#allocation8 + $0x3c8] ss:$24 sps:$4 sm:$0xff]  }
 0x263   :  { %v2863_v45 = vadd.f32 %v2862_v44, %v2820_v40  ;;  %v3006_v46 = vmax.f32 %v2861_v42, 0.0  ;;  %v2905_v28 = vpop.f32.mrf.mxu1  ;;  %v2900_v40 = vadd.f32 %v2899_v10, %v545_v26  ;;  %v7106_v10 = vld [vmem:[#allocation8 + $0x428] ss:$24 sps:$4 sm:$0xff]   ;;  %v7124_v26 = vld [vmem:[#allocation8 + $0x398] ss:$24 sps:$4 sm:$0xff]  }
 0x265   :  { %v3007_v48 = vmax.f32 %v2863_v45, 0.0  ;;  %v7820_v63 = vpack.c.bf16 %v3006_v46, %v2998_v49  ;;  %v7093_v45 = vld [vmem:[#allocation8 + $0x18c] ss:$24 sps:$4 sm:$0xff]   ;;  %v2906_v46 = vadd.f32 %v2905_v28, %v549_v18  ;;  %v7127_v28 = vld [vmem:[#allocation8 + $0x668] ss:$24 sps:$4 sm:$0xff]  }
 0x266   :  { %v7129_v18 = vld [vmem:[#allocation8 + $0x66c] ss:$24 sps:$4 sm:$0xff]  }
 0x267   :  { %v7818_v51 = vpack.c.bf16 %v3007_v48, %v2999_v47 }
 0x269   :  { %5472 = vmatprep.mubr.bf16.mxu0 %v7818_v51 }
 0x26a   :  { %5473 = vmatmul.mubr.bf16.vlgmr.msra.gmra.mxu0 %v7820_v63 }
 0x26b   :  { %5527 = vmatpush1.bf16.msra.mxu0 %v7001_v52  ;;  %5558 = vmatprep.mubr.bf16.mxu0 %v7775_v20 }
 0x26c   :  { %5528 = vmatprep.subr.bf16.mxu0 %v7009_v53 }
 0x26f   :  { %5529 = vmatpush1.bf16.msra.mxu0 %v7007_v54 }
 0x270   :  { %5530 = vmatprep.subr.bf16.mxu0 %v7015_v60  ;;  %v7091_v60 = vld [vmem:[#allocation8 + $0x188] ss:$24 sps:$4 sm:$0xff]  }
 0x273   :  { %5531 = vmatpush1.bf16.msra.mxu0 %v7013_v55 }
 0x274   :  { %5532 = vmatprep.subr.bf16.mxu0 %v7021_v36  ;;  %v7099_v36 = vld [vmem:[#allocation8 + $0x75c] ss:$24 sps:$4 sm:$0xff]  }
 0x277   :  { %5533 = vmatpush1.bf16.msra.mxu0 %v7019_v62 }
 0x278   :  { %5534 = vmatprep.subr.bf16.mxu0 %v7027_v0 }
 0x27b   :  { %5535 = vmatpush1.bf16.msra.mxu0 %v7025_v22 }
 0x27c   :  { %5536 = vmatprep.subr.bf16.mxu0 %v7033_v1 }
 0x27f   :  { %5537 = vmatpush1.bf16.msra.mxu0 %v7031_v2 }
 0x280   :  { %5538 = vmatprep.subr.bf16.mxu0 %v7039_v3  ;;  %v7097_v3 = vld [vmem:[#allocation8 + $0x758] ss:$24 sps:$4 sm:$0xff]  }
 0x283   :  { %5539 = vmatpush1.bf16.msra.mxu0 %v7037_v37  ;;  %v7105_v37 = vld [vmem:[#allocation8 + $0x72c] ss:$24 sps:$4 sm:$0xff]  }
 0x284   :  { %5540 = vmatprep.subr.bf16.mxu0 %v7045_v27 }
 0x287   :  { %5541 = vmatpush1.bf16.msra.mxu0 %v7043_v5 }
 0x288   :  { %5542 = vmatprep.subr.bf16.mxu0 %v7051_v58  ;;  %v7100_v58 = vld [vmem:[#allocation8 + $0x458] ss:$24 sps:$4 sm:$0xff]  }
 0x28b   :  { %5543 = vmatpush2.bf16.msra.mxu0 %v7049_v21 }
 0x28c   :  { %5544 = vmatprep.subr.bf16.mxu0 %v7057_v6  ;;  %v7103_v6 = vld [vmem:[#allocation8 + $0x728] ss:$24 sps:$4 sm:$0xff]  }
 0x28f   :  { %5545 = vmatpush2.bf16.msra.mxu0 %v7055_v8  ;;  %v7108_v8 = vld [vmem:[#allocation8 + $0x42c] ss:$24 sps:$4 sm:$0xff]  }
 0x290   :  { %5546 = vmatprep.subr.bf16.mxu0 %v7063_v19  ;;  %v7111_v19 = vld [vmem:[#allocation8 + $0x6fc] ss:$24 sps:$4 sm:$0xff]  }
 0x293   :  { %5547 = vmatpush2.bf16.msra.mxu0 %v7061_v11  ;;  %v7109_v11 = vld [vmem:[#allocation8 + $0x6f8] ss:$24 sps:$4 sm:$0xff]  }
 0x294   :  { %5548 = vmatprep.subr.bf16.mxu0 %v7069_v12  ;;  %v7114_v12 = vld [vmem:[#allocation8 + $0x3fc] ss:$24 sps:$4 sm:$0xff]  }
 0x297   :  { %5549 = vmatpush2.bf16.msra.mxu0 %v7067_v32  ;;  %v7112_v32 = vld [vmem:[#allocation8 + $0x3f8] ss:$24 sps:$4 sm:$0xff]  }
 0x298   :  { %5550 = vmatprep.subr.bf16.mxu0 %v7075_v24  ;;  %v7115_v24 = vld [vmem:[#allocation8 + $0x6c8] ss:$24 sps:$4 sm:$0xff]  }
 0x29b   :  { %5551 = vmatpush2.bf16.msra.mxu0 %v7073_v17  ;;  %v7121_v17 = vld [vmem:[#allocation8 + $0x698] ss:$24 sps:$4 sm:$0xff]  }
 0x29c   :  { %v2942_v30 = vpop.f32.mrf.mxu0  ;;  %5552 = vmatprep.subr.bf16.mxu0 %v7081_v57  ;;  %v7126_v57 = vld [vmem:[#allocation8 + $0x39c] ss:$24 sps:$4 sm:$0xff]  }
 0x29d   :  { %v2985_v25 = vpop.f32.mrf.mxu1  ;;  %v2943_v33 = vadd.f32 %v2942_v30, %v2900_v40  ;;  %v7135_v30 = vld [vmem:[#allocation8 + $0x63c] ss:$24 sps:$4 sm:$0xff]   ;;  %v7136_v40 = vld [vmem:[#allocation8 + $0x338] ss:$24 sps:$4 sm:$0xff]  }
 0x29e   :  { %v2944_v39 = vpop.f32.mrf.mxu0 }
 0x29f   :  { %v2945_v41 = vadd.f32 %v2944_v39, %v2902_v34  ;;  %v2987_v42 = vpop.f32.mrf.mxu1  ;;  %5553 = vmatpush2.bf16.msra.mxu0 %v7079_v29  ;;  %v2986_v62 = vadd.f32 %v2985_v25, %v2943_v33  ;;  %v7132_v29 = vld [vmem:[#allocation8 + $0x36c] ss:$24 sps:$4 sm:$0xff]   ;;  %v7133_v34 = vld [vmem:[#allocation8 + $0x638] ss:$24 sps:$4 sm:$0xff]   ;;  %v7138_v25 = vld [vmem:[#allocation8 + $0x33c] ss:$24 sps:$4 sm:$0xff]  }
 0x2a0   :  { %v2946_v44 = vpop.f32.mrf.mxu0  ;;  %5554 = vmatprep.subr.bf16.mxu0 %v7087_v31  ;;  %v7130_v31 = vld [vmem:[#allocation8 + $0x368] ss:$24 sps:$4 sm:$0xff]   ;;  %v7141_v39 = vld [vmem:[#allocation8 + $0x60c] ss:$24 sps:$4 sm:$0xff]   ;;  %v7148_v33 = vld [vmem:[#allocation8 + $0x5d8] ss:$24 sps:$4 sm:$0xff]  }
 0x2a1   :  { %v2947_v47 = vadd.f32 %v2946_v44, %v2904_v50  ;;  %v2989_v48 = vpop.f32.mrf.mxu1  ;;  %v2988_v52 = vadd.f32 %v2987_v42, %v2945_v41  ;;  %v3000_v27 = vmax.f32 %v2986_v62, 0.0  ;;  %v7139_v50 = vld [vmem:[#allocation8 + $0x608] ss:$24 sps:$4 sm:$0xff]   ;;  %v7144_v41 = vld [vmem:[#allocation8 + $0x30c] ss:$24 sps:$4 sm:$0xff]  }
 0x2a2   :  { %v2948_v49 = vpop.f32.mrf.mxu0  ;;  %v7147_v42 = vld [vmem:[#allocation8 + $0x8dc] ss:$24 sps:$4 sm:$0xff]   ;;  %v7145_v44 = vld [vmem:[#allocation8 + $0x8d8] ss:$24 sps:$4 sm:$0xff]   ;;  %v7168_v62 = vld [vmem:[#allocation8 + $0x54c] ss:$24 sps:$4 sm:$0xff]  }
 0x2a3   :  { %v2990_v53 = vadd.f32 %v2989_v48, %v2947_v47  ;;  %v2949_v54 = vadd.f32 %v2948_v49, %v2906_v46  ;;  %5555 = vmatpush2.bf16.msra.mxu0 %v7085_v43  ;;  %v2991_v55 = vpop.f32.mrf.mxu1  ;;  %v3001_v22 = vmax.f32 %v2988_v52, 0.0  ;;  %v7142_v43 = vld [vmem:[#allocation8 + $0x308] ss:$24 sps:$4 sm:$0xff]   ;;  %v7153_v46 = vld [vmem:[#allocation8 + $0x8ac] ss:$24 sps:$4 sm:$0xff]  }
 0x2a4   :  { %5556 = vmatprep.subr.bf16.mxu0 %v7093_v45  ;;  %v7150_v45 = vld [vmem:[#allocation8 + $0x5dc] ss:$24 sps:$4 sm:$0xff]   ;;  %v7151_v47 = vld [vmem:[#allocation8 + $0x8a8] ss:$24 sps:$4 sm:$0xff]   ;;  %v7156_v48 = vld [vmem:[#allocation8 + $0x5ac] ss:$24 sps:$4 sm:$0xff]  }
 0x2a5   :  { %v2992_v0 = vadd.f32 %v2991_v55, %v2949_v54  ;;  %v3008_v1 = vmax.f32 %v2990_v53, 0.0  ;;  %v7159_v49 = vld [vmem:[#allocation8 + $0x87c] ss:$24 sps:$4 sm:$0xff]   ;;  %v7154_v52 = vld [vmem:[#allocation8 + $0x5a8] ss:$24 sps:$4 sm:$0xff]  }
 0x2a6   :  { %v7157_v53 = vld [vmem:[#allocation8 + $0x878] ss:$24 sps:$4 sm:$0xff]   ;;  %v7162_v54 = vld [vmem:[#allocation8 + $0x57c] ss:$24 sps:$4 sm:$0xff]  }
 0x2a7   :  { %v3009_v2 = vmax.f32 %v2992_v0, 0.0  ;;  %5557 = vmatpush2.bf16.msra.mxu0 %v7091_v60  ;;  %v7832_v21 = vpack.c.bf16 %v3008_v1, %v3000_v27  ;;  %v7165_v60 = vld [vmem:[#allocation8 + $0x84c] ss:$24 sps:$4 sm:$0xff]   ;;  %v7160_v55 = vld [vmem:[#allocation8 + $0x578] ss:$24 sps:$4 sm:$0xff]  }
 0x2a8   :  { %5612 = vmatprep.subr.bf16.mxu0 %v7099_v36  ;;  %v7163_v36 = vld [vmem:[#allocation8 + $0x848] ss:$24 sps:$4 sm:$0xff]   ;;  %v7171_v0 = vld [vmem:[#allocation8 + $0x81c] ss:$24 sps:$4 sm:$0xff]   ;;  %v7169_v1 = vld [vmem:[#allocation8 + $0x818] ss:$24 sps:$4 sm:$0xff]  }
 0x2a9   :  { %v7829_v5 = vpack.c.bf16 %v3009_v2, %v3001_v22  ;;  %v7166_v22 = vld [vmem:[#allocation8 + $0x548] ss:$24 sps:$4 sm:$0xff]   ;;  %v7174_v2 = vld [vmem:[#allocation8 + $0x51c] ss:$24 sps:$4 sm:$0xff]  }
 0x2aa   :  { %5559 = vmatmul.mubr.bf16.vlgmr.msra.gmra.mxu0 %v7755_v14  ;;  %v7175_v27 = vld [vmem:[#allocation8 + $0x7e8] ss:$24 sps:$4 sm:$0xff]  }
 0x2ab   :  { %5613 = vmatpush1.bf16.msra.mxu0 %v7097_v3  ;;  %5644 = vmatprep.mubr.bf16.mxu0 %v7818_v51  ;;  %v7177_v3 = vld [vmem:[#allocation8 + $0x7ec] ss:$24 sps:$4 sm:$0xff]  }
 0x2ac   :  { %5515 = vmatprep.mubr.bf16.mxu1 %v7829_v5  ;;  %5614 = vmatprep.subr.bf16.mxu0 %v7105_v37  ;;  %v7172_v37 = vld [vmem:[#allocation8 + $0x518] ss:$24 sps:$4 sm:$0xff]  }
 0x2ad   :  { %5516 = vmatmul.mubr.bf16.vlgmr.msra.gmra.mxu1 %v7832_v21 }
 0x2ae   :  { %5570 = vmatpush1.bf16.msra.mxu1 %v7100_v58  ;;  %5601 = vmatprep.mubr.bf16.mxu1 %v7788_v56  ;;  %v7180_v58 = vld [vmem:[#allocation8 + $0x4ec] ss:$24 sps:$4 sm:$0xff]  }
 0x2af   :  { %5615 = vmatpush1.bf16.msra.mxu0 %v7103_v6  ;;  %5571 = vmatprep.subr.bf16.mxu1 %v7108_v8  ;;  %v7183_v6 = vld [vmem:[#allocation8 + $0x7bc] ss:$24 sps:$4 sm:$0xff]   ;;  %v7178_v8 = vld [vmem:[#allocation8 + $0x4e8] ss:$24 sps:$4 sm:$0xff]  }
 0x2b0   :  { %5616 = vmatprep.subr.bf16.mxu0 %v7111_v19  ;;  %v7181_v19 = vld [vmem:[#allocation8 + $0x7b8] ss:$24 sps:$4 sm:$0xff]  }
 0x2b2   :  { %5572 = vmatpush1.bf16.msra.mxu1 %v7106_v10  ;;  %v7186_v10 = vld [vmem:[#allocation8 + $0x4bc] ss:$24 sps:$4 sm:$0xff]  }
 0x2b3   :  { %5617 = vmatpush1.bf16.msra.mxu0 %v7109_v11  ;;  %5573 = vmatprep.subr.bf16.mxu1 %v7114_v12  ;;  %v7189_v11 = vld [vmem:[#allocation8 + $0x78c] ss:$24 sps:$4 sm:$0xff]   ;;  %v7184_v12 = vld [vmem:[#allocation8 + $0x4b8] ss:$24 sps:$4 sm:$0xff]  }
 0x2b4   :  { %5618 = vmatprep.subr.bf16.mxu0 %v7117_v13  ;;  %v7187_v13 = vld [vmem:[#allocation8 + $0x788] ss:$24 sps:$4 sm:$0xff]  }
 0x2b6   :  { %5574 = vmatpush1.bf16.msra.mxu1 %v7112_v32  ;;  %v7192_v32 = vld [vmem:[#allocation8 + $0x48c] ss:$24 sps:$4 sm:$0xff]  }
 0x2b7   :  { %5619 = vmatpush1.bf16.msra.mxu0 %v7115_v24  ;;  %5575 = vmatprep.subr.bf16.mxu1 %v7120_v38  ;;  %v7195_v24 = vld [vmem:[#allocation8 + $0x164] ss:$24 sps:$4 sm:$0xff]   ;;  %v7190_v38 = vld [vmem:[#allocation8 + $0x488] ss:$24 sps:$4 sm:$0xff]  }
 0x2b8   :  { %5620 = vmatprep.subr.bf16.mxu0 %v7123_v15  ;;  %v7193_v15 = vld [vmem:[#allocation8 + $0x160] ss:$24 sps:$4 sm:$0xff]  }
 0x2ba   :  { %5576 = vmatpush1.bf16.msra.mxu1 %v7118_v16  ;;  %v7198_v16 = vld [vmem:[#allocation8 + $0xa5c] ss:$24 sps:$4 sm:$0xff]  }
 0x2bb   :  { %5621 = vmatpush1.bf16.msra.mxu0 %v7121_v17  ;;  %5577 = vmatprep.subr.bf16.mxu1 %v7126_v57  ;;  %v7201_v17 = vld [vmem:[#allocation8 + $0x134] ss:$24 sps:$4 sm:$0xff]   ;;  %v7196_v57 = vld [vmem:[#allocation8 + $0xa58] ss:$24 sps:$4 sm:$0xff]  }
 0x2bc   :  { %5622 = vmatprep.subr.bf16.mxu0 %v7129_v18  ;;  %v7199_v18 = vld [vmem:[#allocation8 + $0x130] ss:$24 sps:$4 sm:$0xff]  }
 0x2be   :  { %5578 = vmatpush1.bf16.msra.mxu1 %v7124_v26  ;;  %v7204_v26 = vld [vmem:[#allocation8 + $0xa2c] ss:$24 sps:$4 sm:$0xff]  }
 0x2bf   :  { %5623 = vmatpush1.bf16.msra.mxu0 %v7127_v28  ;;  %5579 = vmatprep.subr.bf16.mxu1 %v7132_v29  ;;  %v7207_v28 = vld [vmem:[#allocation8 + $0x104] ss:$24 sps:$4 sm:$0xff]   ;;  %v7202_v29 = vld [vmem:[#allocation8 + $0xa28] ss:$24 sps:$4 sm:$0xff]  }
 0x2c0   :  { %5624 = vmatprep.subr.bf16.mxu0 %v7135_v30  ;;  %v7205_v30 = vld [vmem:[#allocation8 + $0x100] ss:$24 sps:$4 sm:$0xff]  }
 0x2c2   :  { %5580 = vmatpush1.bf16.msra.mxu1 %v7130_v31  ;;  %v7210_v31 = vld [vmem:[#allocation8 + $0x9fc] ss:$24 sps:$4 sm:$0xff]  }
 0x2c3   :  { %5625 = vmatpush1.bf16.msra.mxu0 %v7133_v34  ;;  %5581 = vmatprep.subr.bf16.mxu1 %v7138_v25  ;;  %v7213_v34 = vld [vmem:[#allocation8 + $0xd4] ss:$24 sps:$4 sm:$0xff]   ;;  %v7208_v25 = vld [vmem:[#allocation8 + $0x9f8] ss:$24 sps:$4 sm:$0xff]  }
 0x2c4   :  { %5626 = vmatprep.subr.bf16.mxu0 %v7141_v39  ;;  %v7216_v39 = vld [vmem:[#allocation8 + $0x9cc] ss:$24 sps:$4 sm:$0xff]  }
 0x2c6   :  { %5582 = vmatpush1.bf16.msra.mxu1 %v7136_v40  ;;  %v7219_v40 = vld [vmem:[#allocation8 + $0xa4] ss:$24 sps:$4 sm:$0xff]  }
 0x2c7   :  { %5627 = vmatpush1.bf16.msra.mxu0 %v7139_v50  ;;  %5583 = vmatprep.subr.bf16.mxu1 %v7144_v41  ;;  %v7214_v50 = vld [vmem:[#allocation8 + $0x9c8] ss:$24 sps:$4 sm:$0xff]  }
 0x2c8   :  { %5628 = vmatprep.subr.bf16.mxu0 %v7147_v42  ;;  %v7217_v41 = vld [vmem:[#allocation8 + $0xa0] ss:$24 sps:$4 sm:$0xff]   ;;  %v7222_v42 = vld [vmem:[#allocation8 + $0x99c] ss:$24 sps:$4 sm:$0xff]  }
 0x2ca   :  { %5584 = vmatpush1.bf16.msra.mxu1 %v7142_v43  ;;  %v7225_v43 = vld [vmem:[#allocation8 + $0x74] ss:$24 sps:$4 sm:$0xff]  }
 0x2cb   :  { %5629 = vmatpush2.bf16.msra.mxu0 %v7145_v44  ;;  %5585 = vmatprep.subr.bf16.mxu1 %v7150_v45  ;;  %v7220_v44 = vld [vmem:[#allocation8 + $0x998] ss:$24 sps:$4 sm:$0xff]  }
 0x2cc   :  { %5630 = vmatprep.subr.bf16.mxu0 %v7153_v46  ;;  %v7223_v45 = vld [vmem:[#allocation8 + $0x70] ss:$24 sps:$4 sm:$0xff]   ;;  %v7228_v46 = vld [vmem:[#allocation8 + $0x96c] ss:$24 sps:$4 sm:$0xff]  }
 0x2ce   :  { %5586 = vmatpush2.bf16.msra.mxu1 %v7148_v33  ;;  %v7231_v33 = vld [vmem:[#allocation8 + $0x44] ss:$24 sps:$4 sm:$0xff]  }
 0x2cf   :  { %5631 = vmatpush2.bf16.msra.mxu0 %v7151_v47  ;;  %5587 = vmatprep.subr.bf16.mxu1 %v7156_v48  ;;  %v7226_v47 = vld [vmem:[#allocation8 + $0x968] ss:$24 sps:$4 sm:$0xff]  }
 0x2d0   :  { %5632 = vmatprep.subr.bf16.mxu0 %v7159_v49  ;;  %v7229_v48 = vld [vmem:[#allocation8 + $0x40] ss:$24 sps:$4 sm:$0xff]   ;;  %v7234_v49 = vld [vmem:[#allocation8 + $0x93c] ss:$24 sps:$4 sm:$0xff]  }
 0x2d2   :  { %5588 = vmatpush2.bf16.msra.mxu1 %v7154_v52  ;;  %v7237_v52 = vld [vmem:[#allocation8 + $0x14] ss:$24 sps:$4 sm:$0xff]  }
 0x2d3   :  { %5633 = vmatpush2.bf16.msra.mxu0 %v7157_v53  ;;  %5589 = vmatprep.subr.bf16.mxu1 %v7162_v54  ;;  %v7232_v53 = vld [vmem:[#allocation8 + $0x938] ss:$24 sps:$4 sm:$0xff]  }
 0x2d4   :  { %5634 = vmatprep.subr.bf16.mxu0 %v7165_v60  ;;  %v7235_v54 = vld [vmem:[#allocation8 + $0x10] ss:$24 sps:$4 sm:$0xff]   ;;  %v7240_v60 = vld [vmem:[#allocation8 + $0x90c] ss:$24 sps:$4 sm:$0xff]  }
 0x2d6   :  { %5590 = vmatpush2.bf16.msra.mxu1 %v7160_v55  ;;  %v7243_v55 = vld [vmem:[#allocation8 + $0x2e4] ss:$24 sps:$4 sm:$0xff]  }
 0x2d7   :  { %5635 = vmatpush2.bf16.msra.mxu0 %v7163_v36  ;;  %5591 = vmatprep.subr.bf16.mxu1 %v7168_v62  ;;  %v7238_v36 = vld [vmem:[#allocation8 + $0x908] ss:$24 sps:$4 sm:$0xff]  }
 0x2d8   :  { %5636 = vmatprep.subr.bf16.mxu0 %v7171_v0  ;;  %v7241_v62 = vld [vmem:[#allocation8 + $0x2e0] ss:$24 sps:$4 sm:$0xff]   ;;  %v7246_v0 = vld [vmem:[#allocation8 + $0xbdc] ss:$24 sps:$4 sm:$0xff]  }
 0x2da   :  { %5592 = vmatpush2.bf16.msra.mxu1 %v7166_v22  ;;  %v7249_v22 = vld [vmem:[#allocation8 + $0x2b4] ss:$24 sps:$4 sm:$0xff]  }
 0x2db   :  { %5637 = vmatpush2.bf16.msra.mxu0 %v7169_v1  ;;  %5593 = vmatprep.subr.bf16.mxu1 %v7174_v2  ;;  %v7244_v1 = vld [vmem:[#allocation8 + $0xbd8] ss:$24 sps:$4 sm:$0xff]  }
 0x2dc   :  { %5638 = vmatprep.subr.bf16.mxu0 %v7177_v3  ;;  %v7247_v2 = vld [vmem:[#allocation8 + $0x2b0] ss:$24 sps:$4 sm:$0xff]   ;;  %v7252_v3 = vld [vmem:[#allocation8 + $0xbac] ss:$24 sps:$4 sm:$0xff]  }
 0x2de   :  { %5594 = vmatpush2.bf16.msra.mxu1 %v7172_v37  ;;  %v7255_v37 = vld [vmem:[#allocation8 + $0x284] ss:$24 sps:$4 sm:$0xff]  }
 0x2df   :  { %5639 = vmatpush2.bf16.msra.mxu0 %v7175_v27  ;;  %5595 = vmatprep.subr.bf16.mxu1 %v7180_v58  ;;  %v7250_v27 = vld [vmem:[#allocation8 + $0xba8] ss:$24 sps:$4 sm:$0xff]  }
 0x2e0   :  { %5640 = vmatprep.subr.bf16.mxu0 %v7183_v6  ;;  %v7253_v58 = vld [vmem:[#allocation8 + $0x280] ss:$24 sps:$4 sm:$0xff]   ;;  %v7258_v6 = vld [vmem:[#allocation8 + $0xb7c] ss:$24 sps:$4 sm:$0xff]  }
 0x2e2   :  { %5596 = vmatpush2.bf16.msra.mxu1 %v7178_v8  ;;  %v7261_v8 = vld [vmem:[#allocation8 + $0x254] ss:$24 sps:$4 sm:$0xff]  }
 0x2e3   :  { %5641 = vmatpush2.bf16.msra.mxu0 %v7181_v19  ;;  %5597 = vmatprep.subr.bf16.mxu1 %v7186_v10  ;;  %v7256_v19 = vld [vmem:[#allocation8 + $0xb78] ss:$24 sps:$4 sm:$0xff]  }
 0x2e4   :  { %5642 = vmatprep.subr.bf16.mxu0 %v7189_v11  ;;  %v7259_v10 = vld [vmem:[#allocation8 + $0x250] ss:$24 sps:$4 sm:$0xff]   ;;  %v7264_v11 = vld [vmem:[#allocation8 + $0xb4c] ss:$24 sps:$4 sm:$0xff]  }
 0x2e6   :  { %5598 = vmatpush2.bf16.msra.mxu1 %v7184_v12  ;;  %v7267_v12 = vld [vmem:[#allocation8 + $0x224] ss:$24 sps:$4 sm:$0xff]  }
 0x2e7   :  { %5643 = vmatpush2.bf16.msra.mxu0 %v7187_v13  ;;  %5599 = vmatprep.subr.bf16.mxu1 %v7192_v32  ;;  %v7262_v13 = vld [vmem:[#allocation8 + $0xb48] ss:$24 sps:$4 sm:$0xff]  }
 0x2e8   :  { %5698 = vmatprep.subr.bf16.mxu0 %v7195_v24  ;;  %v7265_v32 = vld [vmem:[#allocation8 + $0x220] ss:$24 sps:$4 sm:$0xff]   ;;  %v7270_v24 = vld [vmem:[#allocation8 + $0xb1c] ss:$24 sps:$4 sm:$0xff]  }
 0x2ea   :  { %5600 = vmatpush2.bf16.msra.mxu1 %v7190_v38  ;;  %5645 = vmatmul.mubr.bf16.vlgmr.msra.gmra.mxu0 %v7820_v63  ;;  %v7273_v38 = vld [vmem:[#allocation8 + $0x1f4] ss:$24 sps:$4 sm:$0xff]  }
 0x2eb   :  { %5699 = vmatpush1.bf16.msra.mxu0 %v7193_v15  ;;  %5730 = vmatprep.mubr.bf16.mxu0 %v7775_v20  ;;  %v7211_v20 = vld [vmem:[#allocation8 + $0xd0] ss:$24 sps:$4 sm:$0xff]  }
 0x2ec   :  { %5655 = vmatprep.subr.bf16.mxu1 %v7198_v16  ;;  %5700 = vmatprep.subr.bf16.mxu0 %v7201_v17  ;;  %v7268_v15 = vld [vmem:[#allocation8 + $0xb18] ss:$24 sps:$4 sm:$0xff]   ;;  %v7276_v17 = vld [vmem:[#allocation8 + $0xaec] ss:$24 sps:$4 sm:$0xff]  }
 0x2ed   :  { %5602 = vmatmul.mubr.bf16.vlgmr.msra.gmra.mxu1 %v7804_v4  ;;  %v7271_v16 = vld [vmem:[#allocation8 + $0x1f0] ss:$24 sps:$4 sm:$0xff]  }
 0x2ee   :  { %5656 = vmatpush1.bf16.msra.mxu1 %v7196_v57  ;;  %5687 = vmatprep.mubr.bf16.mxu1 %v7829_v5  ;;  %v7279_v57 = vld [vmem:[#allocation8 + $0x1c4] ss:$24 sps:$4 sm:$0xff]  }
 0x2ef   :  { %5701 = vmatpush1.bf16.msra.mxu0 %v7199_v18  ;;  %5657 = vmatprep.subr.bf16.mxu1 %v7204_v26  ;;  %v7274_v18 = vld [vmem:[#allocation8 + $0xae8] ss:$24 sps:$4 sm:$0xff]  }
 0x2f0   :  { %5702 = vmatprep.subr.bf16.mxu0 %v7207_v28  ;;  %v7277_v26 = vld [vmem:[#allocation8 + $0x1c0] ss:$24 sps:$4 sm:$0xff]   ;;  %v7282_v28 = vld [vmem:[#allocation8 + $0xabc] ss:$24 sps:$4 sm:$0xff]  }
 0x2f2   :  { %5658 = vmatpush1.bf16.msra.mxu1 %v7202_v29  ;;  %v7285_v29 = vld [vmem:[#allocation8 + $0x194] ss:$24 sps:$4 sm:$0xff]  }
 0x2f3   :  { %5703 = vmatpush1.bf16.msra.mxu0 %v7205_v30  ;;  %5659 = vmatprep.subr.bf16.mxu1 %v7210_v31  ;;  %v7280_v30 = vld [vmem:[#allocation8 + $0xab8] ss:$24 sps:$4 sm:$0xff]  }
 0x2f4   :  { %5704 = vmatprep.subr.bf16.mxu0 %v7213_v34  ;;  %v7283_v31 = vld [vmem:[#allocation8 + $0x190] ss:$24 sps:$4 sm:$0xff]   ;;  %v7288_v34 = vld [vmem:[#allocation8 + $0xa8c] ss:$24 sps:$4 sm:$0xff]  }
 0x2f6   :  { %5660 = vmatpush1.bf16.msra.mxu1 %v7208_v25  ;;  %v7291_v25 = vld [vmem:[#allocation8 + $0x764] ss:$24 sps:$4 sm:$0xff]  }
 0x2f7   :  { %5705 = vmatpush1.bf16.msra.mxu0 %v7211_v20  ;;  %5661 = vmatprep.subr.bf16.mxu1 %v7216_v39  ;;  %v7286_v20 = vld [vmem:[#allocation8 + $0xa88] ss:$24 sps:$4 sm:$0xff]  }
 0x2f8   :  { %5706 = vmatprep.subr.bf16.mxu0 %v7219_v40  ;;  %v7289_v39 = vld [vmem:[#allocation8 + $0x760] ss:$24 sps:$4 sm:$0xff]   ;;  %v7294_v40 = vld [vmem:[#allocation8 + $0x464] ss:$24 sps:$4 sm:$0xff]  }
 0x2fa   :  { %5662 = vmatpush1.bf16.msra.mxu1 %v7214_v50  ;;  %v7297_v50 = vld [vmem:[#allocation8 + $0x734] ss:$24 sps:$4 sm:$0xff]  }
 0x2fb   :  { %5707 = vmatpush1.bf16.msra.mxu0 %v7217_v41  ;;  %5663 = vmatprep.subr.bf16.mxu1 %v7222_v42  ;;  %v7292_v41 = vld [vmem:[#allocation8 + $0x460] ss:$24 sps:$4 sm:$0xff]   ;;  %v7295_v42 = vld [vmem:[#allocation8 + $0x730] ss:$24 sps:$4 sm:$0xff]  }
 0x2fc   :  { %5708 = vmatprep.subr.bf16.mxu0 %v7225_v43  ;;  %v7300_v43 = vld [vmem:[#allocation8 + $0x434] ss:$24 sps:$4 sm:$0xff]  }
 0x2fe   :  { %5664 = vmatpush1.bf16.msra.mxu1 %v7220_v44  ;;  %v7303_v44 = vld [vmem:[#allocation8 + $0x704] ss:$24 sps:$4 sm:$0xff]  }
 0x2ff   :  { %5709 = vmatpush1.bf16.msra.mxu0 %v7223_v45  ;;  %5665 = vmatprep.subr.bf16.mxu1 %v7228_v46  ;;  %v7298_v45 = vld [vmem:[#allocation8 + $0x430] ss:$24 sps:$4 sm:$0xff]   ;;  %v7301_v46 = vld [vmem:[#allocation8 + $0x700] ss:$24 sps:$4 sm:$0xff]  }
 0x300   :  { %5710 = vmatprep.subr.bf16.mxu0 %v7231_v33  ;;  %v7306_v33 = vld [vmem:[#allocation8 + $0x404] ss:$24 sps:$4 sm:$0xff]  }
 0x302   :  { %5666 = vmatpush1.bf16.msra.mxu1 %v7226_v47  ;;  %v7304_v47 = vld [vmem:[#allocation8 + $0x400] ss:$24 sps:$4 sm:$0xff]  }
 0x303   :  { %5711 = vmatpush1.bf16.msra.mxu0 %v7229_v48  ;;  %5667 = vmatprep.subr.bf16.mxu1 %v7234_v49  ;;  %v7312_v48 = vld [vmem:[#allocation8 + $0x3d4] ss:$24 sps:$4 sm:$0xff]   ;;  %v7315_v49 = vld [vmem:[#allocation8 + $0x6a4] ss:$24 sps:$4 sm:$0xff]  }
 0x304   :  { %5712 = vmatprep.subr.bf16.mxu0 %v7237_v52  ;;  %v7310_v52 = vld [vmem:[#allocation8 + $0x3d0] ss:$24 sps:$4 sm:$0xff]  }
 0x306   :  { %5668 = vmatpush1.bf16.msra.mxu1 %v7232_v53  ;;  %v7318_v53 = vld [vmem:[#allocation8 + $0x3a4] ss:$24 sps:$4 sm:$0xff]  }
 0x307   :  { %5713 = vmatpush1.bf16.msra.mxu0 %v7235_v54  ;;  %5669 = vmatprep.subr.bf16.mxu1 %v7240_v60  ;;  %v7321_v54 = vld [vmem:[#allocation8 + $0x674] ss:$24 sps:$4 sm:$0xff]   ;;  %v7316_v60 = vld [vmem:[#allocation8 + $0x3a0] ss:$24 sps:$4 sm:$0xff]  }
 0x308   :  { %5714 = vmatprep.subr.bf16.mxu0 %v7243_v55  ;;  %v7319_v55 = vld [vmem:[#allocation8 + $0x670] ss:$24 sps:$4 sm:$0xff]  }
 0x30a   :  { %5670 = vmatpush1.bf16.msra.mxu1 %v7238_v36  ;;  %v7324_v36 = vld [vmem:[#allocation8 + $0x374] ss:$24 sps:$4 sm:$0xff]  }
 0x30b   :  { %5715 = vmatpush2.bf16.msra.mxu0 %v7241_v62  ;;  %5671 = vmatprep.subr.bf16.mxu1 %v7246_v0  ;;  %v7327_v62 = vld [vmem:[#allocation8 + $0x644] ss:$24 sps:$4 sm:$0xff]   ;;  %v7322_v0 = vld [vmem:[#allocation8 + $0x370] ss:$24 sps:$4 sm:$0xff]  }
 0x30c   :  { %5716 = vmatprep.subr.bf16.mxu0 %v7249_v22  ;;  %v7325_v22 = vld [vmem:[#allocation8 + $0x640] ss:$24 sps:$4 sm:$0xff]  }
 0x30e   :  { %5672 = vmatpush2.bf16.msra.mxu1 %v7244_v1  ;;  %v7330_v1 = vld [vmem:[#allocation8 + $0x344] ss:$24 sps:$4 sm:$0xff]  }
 0x30f   :  { %5717 = vmatpush2.bf16.msra.mxu0 %v7247_v2  ;;  %5673 = vmatprep.subr.bf16.mxu1 %v7252_v3  ;;  %v7333_v2 = vld [vmem:[#allocation8 + $0x614] ss:$24 sps:$4 sm:$0xff]   ;;  %v7328_v3 = vld [vmem:[#allocation8 + $0x340] ss:$24 sps:$4 sm:$0xff]  }
 0x310   :  { %5718 = vmatprep.subr.bf16.mxu0 %v7255_v37  ;;  %v7331_v37 = vld [vmem:[#allocation8 + $0x610] ss:$24 sps:$4 sm:$0xff]  }
 0x312   :  { %5674 = vmatpush2.bf16.msra.mxu1 %v7250_v27  ;;  %v7336_v27 = vld [vmem:[#allocation8 + $0x314] ss:$24 sps:$4 sm:$0xff]  }
 0x313   :  { %5719 = vmatpush2.bf16.msra.mxu0 %v7253_v58  ;;  %5675 = vmatprep.subr.bf16.mxu1 %v7258_v6  ;;  %v7339_v58 = vld [vmem:[#allocation8 + $0x8e4] ss:$24 sps:$4 sm:$0xff]   ;;  %v7334_v6 = vld [vmem:[#allocation8 + $0x310] ss:$24 sps:$4 sm:$0xff]  }
 0x314   :  { %5720 = vmatprep.subr.bf16.mxu0 %v7261_v8  ;;  %v7337_v8 = vld [vmem:[#allocation8 + $0x8e0] ss:$24 sps:$4 sm:$0xff]  }
 0x316   :  { %5676 = vmatpush2.bf16.msra.mxu1 %v7256_v19  ;;  %v7342_v19 = vld [vmem:[#allocation8 + $0x5e4] ss:$24 sps:$4 sm:$0xff]  }
 0x317   :  { %5721 = vmatpush2.bf16.msra.mxu0 %v7259_v10  ;;  %5677 = vmatprep.subr.bf16.mxu1 %v7264_v11  ;;  %v7345_v10 = vld [vmem:[#allocation8 + $0x8b4] ss:$24 sps:$4 sm:$0xff]   ;;  %v7340_v11 = vld [vmem:[#allocation8 + $0x5e0] ss:$24 sps:$4 sm:$0xff]  }
 0x318   :  { %5722 = vmatprep.subr.bf16.mxu0 %v7267_v12  ;;  %v7343_v12 = vld [vmem:[#allocation8 + $0x8b0] ss:$24 sps:$4 sm:$0xff]  }
 0x31a   :  { %5678 = vmatpush2.bf16.msra.mxu1 %v7262_v13  ;;  %v7348_v13 = vld [vmem:[#allocation8 + $0x5b4] ss:$24 sps:$4 sm:$0xff]  }
 0x31b   :  { %5723 = vmatpush2.bf16.msra.mxu0 %v7265_v32  ;;  %5679 = vmatprep.subr.bf16.mxu1 %v7270_v24  ;;  %v7351_v32 = vld [vmem:[#allocation8 + $0x884] ss:$24 sps:$4 sm:$0xff]   ;;  %v7346_v24 = vld [vmem:[#allocation8 + $0x5b0] ss:$24 sps:$4 sm:$0xff]  }
 0x31c   :  { %5724 = vmatprep.subr.bf16.mxu0 %v7273_v38  ;;  %v7349_v38 = vld [vmem:[#allocation8 + $0x880] ss:$24 sps:$4 sm:$0xff]  }
 0x31e   :  { %5680 = vmatpush2.bf16.msra.mxu1 %v7268_v15  ;;  %v7354_v15 = vld [vmem:[#allocation8 + $0x584] ss:$24 sps:$4 sm:$0xff]  }
 0x31f   :  { %5725 = vmatpush2.bf16.msra.mxu0 %v7271_v16  ;;  %5681 = vmatprep.subr.bf16.mxu1 %v7276_v17  ;;  %v7357_v16 = vld [vmem:[#allocation8 + $0x854] ss:$24 sps:$4 sm:$0xff]   ;;  %v7352_v17 = vld [vmem:[#allocation8 + $0x580] ss:$24 sps:$4 sm:$0xff]  }
 0x320   :  { %5726 = vmatprep.subr.bf16.mxu0 %v7279_v57  ;;  %v7355_v57 = vld [vmem:[#allocation8 + $0x850] ss:$24 sps:$4 sm:$0xff]  }
 0x322   :  { %5682 = vmatpush2.bf16.msra.mxu1 %v7274_v18  ;;  %v7360_v18 = vld [vmem:[#allocation8 + $0x554] ss:$24 sps:$4 sm:$0xff]  }
 0x323   :  { %5727 = vmatpush2.bf16.msra.mxu0 %v7277_v26  ;;  %5683 = vmatprep.subr.bf16.mxu1 %v7282_v28  ;;  %v7363_v26 = vld [vmem:[#allocation8 + $0x824] ss:$24 sps:$4 sm:$0xff]   ;;  %v7358_v28 = vld [vmem:[#allocation8 + $0x550] ss:$24 sps:$4 sm:$0xff]  }
 0x324   :  { %5728 = vmatprep.subr.bf16.mxu0 %v7285_v29  ;;  %v7361_v29 = vld [vmem:[#allocation8 + $0x820] ss:$24 sps:$4 sm:$0xff]  }
 0x326   :  { %5684 = vmatpush2.bf16.msra.mxu1 %v7280_v30  ;;  %v7366_v30 = vld [vmem:[#allocation8 + $0x524] ss:$24 sps:$4 sm:$0xff]  }
 0x327   :  { %5729 = vmatpush2.bf16.msra.mxu0 %v7283_v31  ;;  %5685 = vmatprep.subr.bf16.mxu1 %v7288_v34  ;;  %v7369_v31 = vld [vmem:[#allocation8 + $0x7f4] ss:$24 sps:$4 sm:$0xff]   ;;  %v7364_v34 = vld [vmem:[#allocation8 + $0x520] ss:$24 sps:$4 sm:$0xff]  }
 0x328   :  { %5784 = vmatprep.subr.bf16.mxu0 %v7291_v25  ;;  %v7367_v25 = vld [vmem:[#allocation8 + $0x7f0] ss:$24 sps:$4 sm:$0xff]  }
 0x32a   :  { %5686 = vmatpush2.bf16.msra.mxu1 %v7286_v20  ;;  %5731 = vmatmul.mubr.bf16.vlgmr.msra.gmra.mxu0 %v7755_v14  ;;  %v7309_v14 = vld [vmem:[#allocation8 + $0x6d4] ss:$24 sps:$4 sm:$0xff]  }
 0x32b   :  { %5785 = vmatpush1.bf16.msra.mxu0 %v7289_v39  ;;  %5816 = vmatprep.mubr.bf16.mxu0 %v7818_v51  ;;  %v7307_v51 = vld [vmem:[#allocation8 + $0x6d0] ss:$24 sps:$4 sm:$0xff]   ;;  %v7372_v20 = vld [vmem:[#allocation8 + $0x4f4] ss:$24 sps:$4 sm:$0xff]   ;;  %v7375_v39 = vld [vmem:[#allocation8 + $0x7c4] ss:$24 sps:$4 sm:$0xff]  }
 0x32c   :  { %5741 = vmatprep.subr.bf16.mxu1 %v7294_v40  ;;  %5786 = vmatprep.subr.bf16.mxu0 %v7297_v50  ;;  %v7370_v40 = vld [vmem:[#allocation8 + $0x4f0] ss:$24 sps:$4 sm:$0xff]   ;;  %v7373_v50 = vld [vmem:[#allocation8 + $0x7c0] ss:$24 sps:$4 sm:$0xff]  }
 0x32d   :  { %5688 = vmatmul.mubr.bf16.vlgmr.msra.gmra.mxu1 %v7832_v21 }
 0x32e   :  { %5742 = vmatpush1.bf16.msra.mxu1 %v7292_v41  ;;  %5773 = vmatprep.mubr.bf16.mxu1 %v7788_v56  ;;  %v7313_v56 = vld [vmem:[#allocation8 + $0x6a0] ss:$24 sps:$4 sm:$0xff]   ;;  %v7378_v41 = vld [vmem:[#allocation8 + $0x4c4] ss:$24 sps:$4 sm:$0xff]  }
 0x32f   :  { %5787 = vmatpush1.bf16.msra.mxu0 %v7295_v42  ;;  %5743 = vmatprep.subr.bf16.mxu1 %v7300_v43  ;;  %v7381_v42 = vld [vmem:[#allocation8 + $0x794] ss:$24 sps:$4 sm:$0xff]   ;;  %v7376_v43 = vld [vmem:[#allocation8 + $0x4c0] ss:$24 sps:$4 sm:$0xff]  }
 0x330   :  { %5788 = vmatprep.subr.bf16.mxu0 %v7303_v44  ;;  %v7379_v44 = vld [vmem:[#allocation8 + $0x790] ss:$24 sps:$4 sm:$0xff]  }
 0x332   :  { %5744 = vmatpush1.bf16.msra.mxu1 %v7298_v45  ;;  %v7384_v45 = vld [vmem:[#allocation8 + $0x494] ss:$24 sps:$4 sm:$0xff]  }
 0x333   :  { %5789 = vmatpush1.bf16.msra.mxu0 %v7301_v46  ;;  %5745 = vmatprep.subr.bf16.mxu1 %v7306_v33  ;;  %v7382_v46 = vld [vmem:[#allocation8 + $0x490] ss:$24 sps:$4 sm:$0xff]   ;;  %v7387_v33 = vld [vmem:[#allocation8 + $0xa64] ss:$24 sps:$4 sm:$0xff]  }
 0x334   :  { %5790 = vmatprep.subr.bf16.mxu0 %v7309_v14  ;;  %v7385_v14 = vld [vmem:[#allocation8 + $0xa60] ss:$24 sps:$4 sm:$0xff]  }
 0x336   :  { %5746 = vmatpush1.bf16.msra.mxu1 %v7304_v47  ;;  %v7390_v47 = vld [vmem:[#allocation8 + $0xa34] ss:$24 sps:$4 sm:$0xff]  }
 0x337   :  { %5791 = vmatpush1.bf16.msra.mxu0 %v7307_v51  ;;  %5747 = vmatprep.subr.bf16.mxu1 %v7312_v48  ;;  %v7388_v51 = vld [vmem:[#allocation8 + $0xa30] ss:$24 sps:$4 sm:$0xff]   ;;  %v7393_v48 = vld [vmem:[#allocation8 + $0xa04] ss:$24 sps:$4 sm:$0xff]  }
 0x338   :  { %5792 = vmatprep.subr.bf16.mxu0 %v7315_v49  ;;  %v7391_v49 = vld [vmem:[#allocation8 + $0xa00] ss:$24 sps:$4 sm:$0xff]  }
 0x33a   :  { %5748 = vmatpush1.bf16.msra.mxu1 %v7310_v52  ;;  %v7396_v52 = vld [vmem:[#allocation8 + $0x9d4] ss:$24 sps:$4 sm:$0xff]  }
 0x33b   :  { %5793 = vmatpush1.bf16.msra.mxu0 %v7313_v56  ;;  %5749 = vmatprep.subr.bf16.mxu1 %v7318_v53  ;;  %v7394_v56 = vld [vmem:[#allocation8 + $0x9d0] ss:$24 sps:$4 sm:$0xff]   ;;  %v7399_v53 = vld [vmem:[#allocation8 + $0x9a4] ss:$24 sps:$4 sm:$0xff]  }
 0x33c   :  { %5794 = vmatprep.subr.bf16.mxu0 %v7321_v54  ;;  %v7402_v54 = vld [vmem:[#allocation8 + $0x974] ss:$24 sps:$4 sm:$0xff]  }
 0x33e   :  { %5750 = vmatpush1.bf16.msra.mxu1 %v7316_v60  ;;  %v7405_v60 = vld [vmem:[#allocation8 + $0x944] ss:$24 sps:$4 sm:$0xff]  }
 0x33f   :  { %5795 = vmatpush1.bf16.msra.mxu0 %v7319_v55  ;;  %5751 = vmatprep.subr.bf16.mxu1 %v7324_v36  ;;  %v7408_v55 = vld [vmem:[#allocation8 + $0x914] ss:$24 sps:$4 sm:$0xff]   ;;  %v7406_v36 = vld [vmem:[#allocation8 + $0x910] ss:$24 sps:$4 sm:$0xff]  }
 0x340   :  { %5796 = vmatprep.subr.bf16.mxu0 %v7327_v62  ;;  %v7411_v62 = vld [vmem:[#allocation8 + $0xbe4] ss:$24 sps:$4 sm:$0xff]  }
 0x342   :  { %5752 = vmatpush1.bf16.msra.mxu1 %v7322_v0  ;;  %v7409_v0 = vld [vmem:[#allocation8 + $0xbe0] ss:$24 sps:$4 sm:$0xff]  }
 0x343   :  { %5797 = vmatpush1.bf16.msra.mxu0 %v7325_v22  ;;  %5753 = vmatprep.subr.bf16.mxu1 %v7330_v1  ;;  %v7414_v22 = vld [vmem:[#allocation8 + $0xbb4] ss:$24 sps:$4 sm:$0xff]   ;;  %v7412_v1 = vld [vmem:[#allocation8 + $0xbb0] ss:$24 sps:$4 sm:$0xff]  }
 0x344   :  { %5798 = vmatprep.subr.bf16.mxu0 %v7333_v2  ;;  %v7417_v2 = vld [vmem:[#allocation8 + $0xb84] ss:$24 sps:$4 sm:$0xff]  }
 0x346   :  { %5754 = vmatpush1.bf16.msra.mxu1 %v7328_v3  ;;  %v7415_v3 = vld [vmem:[#allocation8 + $0xb80] ss:$24 sps:$4 sm:$0xff]  }
 0x347   :  { %5799 = vmatpush1.bf16.msra.mxu0 %v7331_v37  ;;  %5755 = vmatprep.subr.bf16.mxu1 %v7336_v27  ;;  %v7420_v37 = vld [vmem:[#allocation8 + $0xb54] ss:$24 sps:$4 sm:$0xff]   ;;  %v7418_v27 = vld [vmem:[#allocation8 + $0xb50] ss:$24 sps:$4 sm:$0xff]  }
 0x348   :  { %5800 = vmatprep.subr.bf16.mxu0 %v7339_v58  ;;  %v7423_v58 = vld [vmem:[#allocation8 + $0xb24] ss:$24 sps:$4 sm:$0xff]  }
 0x34a   :  { %5756 = vmatpush1.bf16.msra.mxu1 %v7334_v6  ;;  %v7421_v6 = vld [vmem:[#allocation8 + $0xb20] ss:$24 sps:$4 sm:$0xff]  }
 0x34b   :  { %5801 = vmatpush2.bf16.msra.mxu0 %v7337_v8  ;;  %5757 = vmatprep.subr.bf16.mxu1 %v7342_v19  ;;  %v7426_v8 = vld [vmem:[#allocation8 + $0xaf4] ss:$24 sps:$4 sm:$0xff]   ;;  %v7424_v19 = vld [vmem:[#allocation8 + $0xaf0] ss:$24 sps:$4 sm:$0xff]  }
 0x34c   :  { %5802 = vmatprep.subr.bf16.mxu0 %v7345_v10  ;;  %v7429_v10 = vld [vmem:[#allocation8 + $0xac4] ss:$24 sps:$4 sm:$0xff]  }
 0x34e   :  { %5758 = vmatpush2.bf16.msra.mxu1 %v7340_v11  ;;  %v7427_v11 = vld [vmem:[#allocation8 + $0xac0] ss:$24 sps:$4 sm:$0xff]  }
 0x34f   :  { %5803 = vmatpush2.bf16.msra.mxu0 %v7343_v12  ;;  %5759 = vmatprep.subr.bf16.mxu1 %v7348_v13  ;;  %v7432_v12 = vld [vmem:[#allocation8 + $0xa94] ss:$24 sps:$4 sm:$0xff]   ;;  %v7430_v13 = vld [vmem:[#allocation8 + $0xa90] ss:$24 sps:$4 sm:$0xff]  }
 0x350   :  { %5804 = vmatprep.subr.bf16.mxu0 %v7351_v32  ;;  %v5388_v32 = vpop.f32.mrf.mxu0 }
 0x352   :  { %5760 = vmatpush2.bf16.msra.mxu1 %v7346_v24  ;;  %v5390_v24 = vpop.f32.mrf.mxu0 }
 0x353   :  { %5805 = vmatpush2.bf16.msra.mxu0 %v7349_v38  ;;  %5761 = vmatprep.subr.bf16.mxu1 %v7354_v15  ;;  %v5431_v38 = vpop.f32.mrf.mxu1 }
 0x354   :  { %5806 = vmatprep.subr.bf16.mxu0 %v7357_v16  ;;  %v5392_v15 = vpop.f32.mrf.mxu0 }
 0x355   :  { %v5433_v16 = vpop.f32.mrf.mxu1 }
 0x356   :  { %5762 = vmatpush2.bf16.msra.mxu1 %v7352_v17  ;;  %v5394_v17 = vpop.f32.mrf.mxu0 }
 0x357   :  { %5807 = vmatpush2.bf16.msra.mxu0 %v7355_v57  ;;  %5763 = vmatprep.subr.bf16.mxu1 %v7360_v18  ;;  %v5435_v18 = vpop.f32.mrf.mxu1 }
 0x358   :  { %5808 = vmatprep.subr.bf16.mxu0 %v7363_v26  ;;  %v5474_v57 = vpop.f32.mrf.mxu0 }
 0x35a   :  { %5764 = vmatpush2.bf16.msra.mxu1 %v7358_v28  ;;  %v5476_v26 = vpop.f32.mrf.mxu0  ;;  %v5437_v28 = vpop.f32.mrf.mxu1 }
 0x35b   :  { %5809 = vmatpush2.bf16.msra.mxu0 %v7361_v29  ;;  %5765 = vmatprep.subr.bf16.mxu1 %v7366_v30 }
 0x35c   :  { %5810 = vmatprep.subr.bf16.mxu0 %v7369_v31  ;;  %v5478_v29 = vpop.f32.mrf.mxu0 }
 0x35e   :  { %5766 = vmatpush2.bf16.msra.mxu1 %v7364_v34  ;;  %v5480_v31 = vpop.f32.mrf.mxu0 }
 0x35f   :  { %5811 = vmatpush2.bf16.msra.mxu0 %v7367_v25  ;;  %5767 = vmatprep.subr.bf16.mxu1 %v7372_v20 }
 0x360   :  { %5812 = vmatprep.subr.bf16.mxu0 %v7375_v39 }
 0x362   :  { %5768 = vmatpush2.bf16.msra.mxu1 %v7370_v40 }
 0x363   :  { %5813 = vmatpush2.bf16.msra.mxu0 %v7373_v50  ;;  %5769 = vmatprep.subr.bf16.mxu1 %v7378_v41 }
 0x364   :  { %5814 = vmatprep.subr.bf16.mxu0 %v7381_v42 }
 0x366   :  { %5770 = vmatpush2.bf16.msra.mxu1 %v7376_v43 }
 0x367   :  { %5815 = vmatpush2.bf16.msra.mxu0 %v7379_v44  ;;  %5771 = vmatprep.subr.bf16.mxu1 %v7384_v45 }
 0x36a   :  { %5772 = vmatpush2.bf16.msra.mxu1 %v7382_v46  ;;  %5817 = vmatmul.mubr.bf16.vlgmr.msra.gmra.mxu0 %v7820_v63  ;;  %v7397_v63 = vld [vmem:[#allocation8 + $0x9a0] ss:$24 sps:$4 sm:$0xff]   ;;  %v5560_v25 = vpop.f32.mrf.mxu0 }
 0x36b   :  { %5827 = vmatprep.subr.bf16.mxu1 %v7387_v33 }
 0x36c   :  { %v5562_v39 = vpop.f32.mrf.mxu0 }
 0x36d   :  { %5774 = vmatmul.mubr.bf16.vlgmr.msra.gmra.mxu1 %v7804_v4  ;;  %v7400_v4 = vld [vmem:[#allocation8 + $0x970] ss:$24 sps:$4 sm:$0xff]   ;;  %v5517_v30 = vpop.f32.mrf.mxu1 }
 0x36e   :  { %5828 = vmatpush1.bf16.msra.mxu1 %v7385_v14  ;;  %5859 = vmatprep.mubr.bf16.mxu1 %v7829_v5  ;;  %v7403_v5 = vld [vmem:[#allocation8 + $0x940] ss:$24 sps:$4 sm:$0xff]  }
 0x36f   :  { %5829 = vmatprep.subr.bf16.mxu1 %v7390_v47  ;;  %v5519_v34 = vpop.f32.mrf.mxu1  ;;  %v3402_v47 = vld [vmem:[#allocation10] sm:$0x3f] }
 0x371   :  { %v7850_v20 = vpop.f32.mrf.mxu1 }
 0x372   :  { %5830 = vmatpush1.bf16.msra.mxu1 %v7388_v51  ;;  %v3411_v51 = vrot.slane %v3402_v47, %v7758_v35 }
 0x373   :  { %5831 = vmatprep.subr.bf16.mxu1 %v7393_v48  ;;  %v5523_v40 = vpop.f32.mrf.mxu1 }
 0x376   :  { %5832 = vmatpush1.bf16.msra.mxu1 %v7391_v49 }
 0x377   :  { %5833 = vmatprep.subr.bf16.mxu1 %v7396_v52  ;;  %v3407_v52 = vrot.slane %v3402_v47, %v7729_v61 }
 0x37a   :  { %5834 = vmatpush1.bf16.msra.mxu1 %v7394_v56  ;;  %v3415_v56 = vrot.slane %v3402_v47, %v7792_v59 }
 0x37b   :  { %5835 = vmatprep.subr.bf16.mxu1 %v7399_v53 }
 0x37e   :  { %5836 = vmatpush1.bf16.msra.mxu1 %v7397_v63  ;;  %v5391_v63 = vadd.f32 %v5390_v24, %v3411_v51 }
 0x37f   :  { %5837 = vmatprep.subr.bf16.mxu1 %v7402_v54 }
 0x382   :  { %5838 = vmatpush1.bf16.msra.mxu1 %v7400_v4  ;;  %v5389_v4 = vadd.f32 %v5388_v32, %v3407_v52 }
 0x383   :  { %5839 = vmatprep.subr.bf16.mxu1 %v7405_v60  ;;  %v5561_v60 = vadd.f32 %v5560_v25, %v3415_v56 }
 0x386   :  { %5840 = vmatpush1.bf16.msra.mxu1 %v7403_v5  ;;  %v3419_v5 = vrot.slane %v3402_v47, %v7768_v9 }
 0x387   :  { %5841 = vmatprep.subr.bf16.mxu1 %v7408_v55 }
 0x38a   :  { %5842 = vmatpush1.bf16.msra.mxu1 %v7406_v36  ;;  %v5395_v36 = vadd.f32 %v5394_v17, %v3411_v51  ;;  %v3423_v17 = vrot.slane %v3402_v47, %v7812_v7 }
 0x38b   :  { %5843 = vmatprep.subr.bf16.mxu1 %v7411_v62  ;;  %v5434_v62 = vadd.f32 %v5433_v16, %v5391_v63 }
 0x38e   :  { %5844 = vmatpush2.bf16.msra.mxu1 %v7409_v0 }
 0x38f   :  { %5845 = vmatprep.subr.bf16.mxu1 %v7414_v22 }
 0x392   :  { %5846 = vmatpush2.bf16.msra.mxu1 %v7412_v1  ;;  %v5432_v1 = vadd.f32 %v5431_v38, %v5389_v4 }
 0x393   :  { %5847 = vmatprep.subr.bf16.mxu1 %v7417_v2  ;;  %v5393_v2 = vadd.f32 %v5392_v15, %v3407_v52 }
 0x395   :  { %v5436_v32 = vadd.f32 %v5435_v18, %v5393_v2 }
 0x396   :  { %5848 = vmatpush2.bf16.msra.mxu1 %v7415_v3  ;;  %v5477_v3 = vadd.f32 %v5476_v26, %v5434_v62  ;;  %v7443_v62 = vld [vmem:[#allocation2 + $0x18] sm:$0xff] }
 0x397   :  { %5849 = vmatprep.subr.bf16.mxu1 %v7420_v37  ;;  %v5563_v37 = vadd.f32 %v5562_v39, %v3419_v5  ;;  %v5479_v15 = vadd.f32 %v5478_v29, %v5436_v32  ;;  %v3427_v39 = vrot.slane %v3402_v47, %v7809_v23 }
 0x39a   :  { %5850 = vmatpush2.bf16.msra.mxu1 %v7418_v27 }
 0x39b   :  { %5851 = vmatprep.subr.bf16.mxu1 %v7423_v58 }
 0x39e   :  { %5852 = vmatpush2.bf16.msra.mxu1 %v7421_v6 }
 0x39f   :  { %5853 = vmatprep.subr.bf16.mxu1 %v7426_v8  ;;  %v5438_v8 = vadd.f32 %v5437_v28, %v5395_v36 }
 0x3a1   :  { %v5481_v16 = vadd.f32 %v5480_v31, %v5438_v8  ;;  %v5522_v31 = vadd.f32 %v7850_v20, %v5479_v15 }
 0x3a2   :  { %5854 = vmatpush2.bf16.msra.mxu1 %v7424_v19  ;;  %v5475_v19 = vadd.f32 %v5474_v57, %v5432_v1 }
 0x3a3   :  { %5855 = vmatprep.subr.bf16.mxu1 %v7429_v10  ;;  %v5520_v10 = vadd.f32 %v5519_v34, %v5477_v3  ;;  %v5524_v57 = vadd.f32 %v5523_v40, %v5481_v16 }
 0x3a4   :  { %v5518_v24 = vadd.f32 %v5517_v30, %v5475_v19 }
 0x3a6   :  { %5856 = vmatpush2.bf16.msra.mxu1 %v7427_v11 }
 0x3a7   :  { %5857 = vmatprep.subr.bf16.mxu1 %v7432_v12 }
 0x3aa   :  { %5858 = vmatpush2.bf16.msra.mxu1 %v7430_v13 }
 0x3ad   :  { %5860 = vmatmul.mubr.bf16.vlgmr.msra.gmra.mxu1 %v7832_v21  ;;  %v5564_v21 = vpop.f32.mrf.mxu0  ;;  %v5603_v50 = vpop.f32.mrf.mxu1 }
 0x3ae   :  { %v5604_v0 = vadd.f32 %v5603_v50, %v5561_v60  ;;  %v5565_v27 = vadd.f32 %v5564_v21, %v3415_v56  ;;  %v7438_v21 = vld [vmem:[#allocation2 + $0x8] sm:$0xff] }
 0x3af   :  { %v5566_v41 = vpop.f32.mrf.mxu0  ;;  %v5605_v42 = vpop.f32.mrf.mxu1  ;;  %v7858_v51 = vadd.f32 %v7438_v21, %v5520_v10 }
 0x3b0   :  { %v5606_v11 = vadd.f32 %v5605_v42, %v5563_v37  ;;  %v5567_v26 = vadd.f32 %v5566_v41, %v3419_v5  ;;  %v7442_v5 = vld [vmem:[#allocation2 + $0x30] sm:$0xff] }
 0x3b1   :  { %v5646_v43 = vpop.f32.mrf.mxu0  ;;  %v5607_v44 = vpop.f32.mrf.mxu1  ;;  %v5876_v20 = vadd.f32 %v7442_v5, %v5522_v31 }
 0x3b2   :  { %v5608_v12 = vadd.f32 %v5607_v44, %v5565_v27  ;;  %v5647_v13 = vadd.f32 %v5646_v43, %v5604_v0  ;;  %v7439_v43 = vld [vmem:[#allocation2] sm:$0xff] }
 0x3b3   :  { %v5648_v45 = vpop.f32.mrf.mxu0  ;;  %v5609_v46 = vpop.f32.mrf.mxu1  ;;  %v7860_v18 = vadd.f32 %v7439_v43, %v5518_v24  ;;  %v7446_v24 = vld [vmem:[#allocation2 + $0x20] sm:$0xff] }
 0x3b4   :  { %v5649_v28 = vadd.f32 %v5648_v45, %v5606_v11  ;;  %v5610_v30 = vadd.f32 %v5609_v46, %v5567_v26  ;;  %v7441_v45 = vld [vmem:[#allocation2 + $0x38] sm:$0xff]  ;;  %v7447_v26 = vld [vmem:[#allocation2 + $0x28] sm:$0xff] }
 0x3b5   :  { %v5650_v33 = vpop.f32.mrf.mxu0  ;;  %v5882_v40 = vadd.f32 %v7858_v51, %v7860_v18 }
 0x3b6   :  { %v5651_v34 = vadd.f32 %v5650_v33, %v5608_v12  ;;  %v7867_v33 = vadd.f32 %v7441_v45, %v5524_v57 }
 0x3b7   :  { %v5652_v48 = vpop.f32.mrf.mxu0 }
 0x3b8   :  { %v5653_v46 = vadd.f32 %v5652_v48, %v5610_v30  ;;  %v5889_v27 = vadd.f32 %v7867_v33, %v5876_v20 }
 0x3ea   :  { %v5732_v53 = vpop.f32.mrf.mxu0 }
 0x3eb   :  { %v5733_v44 = vadd.f32 %v5732_v53, %v3423_v17 }
 0x3ec   :  { %v5734_v55 = vpop.f32.mrf.mxu0 }
 0x3ed   :  { %v5689_v14 = vpop.f32.mrf.mxu1  ;;  %v5735_v56 = vadd.f32 %v5734_v55, %v3427_v39 }
 0x3ee   :  { %v5736_v58 = vpop.f32.mrf.mxu0  ;;  %v5690_v25 = vadd.f32 %v5689_v14, %v5647_v13  ;;  %v7440_v14 = vld [vmem:[#allocation2 + $0x10] sm:$0xff]  ;;  %v7445_v13 = vld [vmem:[#allocation2 + $0x48] sm:$0xff] }
 0x3ef   :  { %v5691_v49 = vpop.f32.mrf.mxu1  ;;  %v5737_v60 = vadd.f32 %v5736_v58, %v3423_v17 }
 0x3f0   :  { %v5738_v50 = vpop.f32.mrf.mxu0  ;;  %v7863_v52 = vadd.f32 %v7440_v14, %v5690_v25  ;;  %v5692_v29 = vadd.f32 %v5691_v49, %v5649_v28 }
 0x3f1   :  { %v5693_v54 = vpop.f32.mrf.mxu1  ;;  %v5739_v1 = vadd.f32 %v5738_v50, %v3427_v39 }
 0x3f2   :  { %v5694_v41 = vadd.f32 %v5693_v54, %v5651_v34  ;;  %v5883_v36 = vadd.f32 %v5882_v40, %v7863_v52  ;;  %v5873_v49 = vadd.f32 %v7443_v62, %v5692_v29  ;;  %v7444_v54 = vld [vmem:[#allocation2 + $0x40] sm:$0xff]  ;;  %v7448_v34 = vld [vmem:[#allocation2 + $0x50] sm:$0xff] }
 0x3f3   :  { %v5695_v22 = vpop.f32.mrf.mxu1 }
 0x3f4   :  { %v5878_v0 = vadd.f32 %v7444_v54, %v5694_v41  ;;  %v5696_v2 = vadd.f32 %v5695_v22, %v5653_v46  ;;  %v5884_v12 = vadd.f32 %v5883_v36, %v5873_v49 }
 0x3f6   :  { %v5890_v10 = vadd.f32 %v5889_v27, %v5878_v0  ;;  %v5879_v32 = vadd.f32 %v7445_v13, %v5696_v2 }
 0x3f8   :  { %v5891_v28 = vadd.f32 %v5890_v10, %v5879_v32 }
 0x42a   :  { %v5818_v42 = vpop.f32.mrf.mxu0 }
 0x42c   :  { %v5820_v4 = vpop.f32.mrf.mxu0 }
 0x42d   :  { %v5775_v6 = vpop.f32.mrf.mxu1 }
 0x42e   :  { %v5776_v63 = vadd.f32 %v5775_v6, %v5733_v44  ;;  %v5822_v6 = vpop.f32.mrf.mxu0  ;;  %v7449_v44 = vld [vmem:[#allocation2 + $0x58] sm:$0xff] }
 0x42f   :  { %v5777_v38 = vpop.f32.mrf.mxu1 }
 0x430   :  { %v5778_v53 = vadd.f32 %v5777_v38, %v5735_v56  ;;  %v5819_v37 = vadd.f32 %v5818_v42, %v5776_v63  ;;  %v5824_v50 = vpop.f32.mrf.mxu0 }
 0x431   :  { %v5779_v47 = vpop.f32.mrf.mxu1 }
 0x432   :  { %v5780_v3 = vadd.f32 %v5779_v47, %v5737_v60  ;;  %v5821_v19 = vadd.f32 %v5820_v4, %v5778_v53 }
 0x433   :  { %v5781_v55 = vpop.f32.mrf.mxu1 }
 0x434   :  { %v5782_v58 = vadd.f32 %v5781_v55, %v5739_v1  ;;  %v5823_v25 = vadd.f32 %v5822_v6, %v5780_v3 }
 0x436   :  { %v5825_v15 = vadd.f32 %v5824_v50, %v5782_v58 }
 0x46d   :  { %v5861_v8 = vpop.f32.mrf.mxu1 }
 0x46e   :  { %v5862_v48 = vadd.f32 %v5861_v8, %v5819_v37 }
 0x46f   :  { %v5863_v11 = vpop.f32.mrf.mxu1 }
 0x470   :  { %v5874_v17 = vadd.f32 %v7446_v24, %v5862_v48  ;;  %v5864_v16 = vadd.f32 %v5863_v11, %v5821_v19 }
 0x471   :  { %v5865_v22 = vpop.f32.mrf.mxu1 }
 0x472   :  { %v5866_v38 = vadd.f32 %v5865_v22, %v5823_v25  ;;  %v5875_v39 = vadd.f32 %v7447_v26, %v5864_v16  ;;  %v5885_v21 = vadd.f32 %v5884_v12, %v5874_v17  ;;  %v5999_v26 = vld [vmem:[#allocation13] sm:$0x3f] }
 0x473   :  { %v5867_v57 = vpop.f32.mrf.mxu1 }
 0x474   :  { %v5880_v42 = vadd.f32 %v7448_v34, %v5866_v38  ;;  %v5868_v43 = vadd.f32 %v5867_v57, %v5825_v15  ;;  %v5886_v30 = vadd.f32 %v5885_v21, %v5875_v39  ;;  %v5955_v15 = vld [vmem:[#allocation11] sm:$0x3f]  ;;  %v6004_v21 = vrot.slane %v5999_v26, %v7729_v61 }
 0x475   :  { %v5964_v57 = vrot.slane %v5955_v15, %v7758_v35 }
 0x476   :  { %v5881_v31 = vadd.f32 %v7449_v44, %v5868_v43  ;;  %5887 = vadd.xlane.f32.xlu0 %v5886_v30  ;;  %v5892_v14 = vadd.f32 %v5891_v28, %v5880_v42  ;;  %v6008_v28 = vrot.slane %v5999_v26, %v7758_v35  ;;  %v5972_v43 = vrot.slane %v5955_v15, %v7768_v9 }
 0x477   :  { %v5976_v30 = vrot.slane %v5955_v15, %v7812_v7  ;;  %v5980_v44 = vrot.slane %v5955_v15, %v7809_v23  ;;  %v6020_v35 = vrot.slane %v5999_v26, %v7812_v7 }
 0x478   :  { %v5893_v29 = vadd.f32 %v5892_v14, %v5881_v31 }
 0x47a   :  { %5894 = vadd.xlane.f32.xlu0 %v5893_v29 }
 0x4ff   :  { %v5888_v41 = vpop.xlane.xlu0 %5887 }
 0x500   :  { %v5897_v47 = vmul.f32 0.0013020834, %v5888_v41 }
 0x502   :  { %v5899_v56 = vsub.f32 %v7860_v18, %v5897_v47  ;;  %v5900_v63 = vsub.f32 %v7858_v51, %v5897_v47  ;;  %v5901_v40 = vsub.f32 %v7863_v52, %v5897_v47  ;;  %v5902_v4 = vsub.f32 %v5873_v49, %v5897_v47 }
 0x503   :  { %v5895_v45 = vpop.xlane.xlu0 %5894  ;;  %v5903_v5 = vsub.f32 %v5874_v17, %v5897_v47  ;;  %v5904_v18 = vsub.f32 %v5875_v39, %v5897_v47  ;;  %v5960_v39 = vrot.slane %v5955_v15, %v7729_v61  ;;  %v6012_v47 = vrot.slane %v5999_v26, %v7792_v59 }
 0x504   :  { %v5898_v60 = vmul.f32 0.0013020834, %v5895_v45  ;;  %v5911_v46 = vmul.f32 %v5899_v56, %v5899_v56  ;;  %v5912_v53 = vmul.f32 %v5900_v63, %v5900_v63  ;;  %v5913_v36 = vmul.f32 %v5901_v40, %v5901_v40 }
 0x505   :  { %v5914_v2 = vmul.f32 %v5902_v4, %v5902_v4  ;;  %v5915_v37 = vmul.f32 %v5903_v5, %v5903_v5  ;;  %v5916_v8 = vmul.f32 %v5904_v18, %v5904_v18  ;;  %v6016_v61 = vrot.slane %v5999_v26, %v7768_v9 }
 0x506   :  { %v5923_v62 = vadd.f32 %v5912_v53, %v5911_v46  ;;  %v7874_v54 = vsub.f32 %v5876_v20, %v5898_v60  ;;  %v7877_v55 = vsub.f32 %v7867_v33, %v5898_v60  ;;  %v7879_v1 = vsub.f32 %v5878_v0, %v5898_v60 }
 0x507   :  { %v5908_v3 = vsub.f32 %v5879_v32, %v5898_v60  ;;  %v5909_v6 = vsub.f32 %v5880_v42, %v5898_v60  ;;  %v5910_v58 = vsub.f32 %v5881_v31, %v5898_v60  ;;  %v5968_v42 = vrot.slane %v5955_v15, %v7792_v59 }
 0x508   :  { %v5924_v51 = vadd.f32 %v5923_v62, %v5913_v36  ;;  %v5917_v52 = vmul.f32 %v7874_v54, %v7874_v54  ;;  %v5918_v49 = vmul.f32 %v7877_v55, %v7877_v55  ;;  %v5919_v20 = vmul.f32 %v7879_v1, %v7879_v1 }
 0x509   :  { %v5920_v48 = vmul.f32 %v5908_v3, %v5908_v3  ;;  %v5921_v11 = vmul.f32 %v5909_v6, %v5909_v6  ;;  %v5922_v13 = vmul.f32 %v5910_v58, %v5910_v58  ;;  %v6024_v46 = vrot.slane %v5999_v26, %v7809_v23 }
 0x50a   :  { %v5925_v27 = vadd.f32 %v5924_v51, %v5914_v2  ;;  %v5930_v33 = vadd.f32 %v5918_v49, %v5917_v52 }
 0x50c   :  { %v5926_v0 = vadd.f32 %v5925_v27, %v5915_v37  ;;  %v5931_v19 = vadd.f32 %v5930_v33, %v5919_v20 }
 0x50e   :  { %v5927_v10 = vadd.f32 %v5926_v0, %v5916_v8  ;;  %v5932_v12 = vadd.f32 %v5931_v19, %v5920_v48 }
 0x510   :  { %5928 = vadd.xlane.f32.xlu1 %v5927_v10  ;;  %v5933_v32 = vadd.f32 %v5932_v12, %v5921_v11 }
 0x512   :  { %v5934_v24 = vadd.f32 %v5933_v32, %v5922_v13 }
 0x514   :  { %5935 = vadd.xlane.f32.xlu1 %v5934_v24 }
 0x599   :  { %v5929_v17 = vpop.xlane.xlu1 %5928 }
 0x59a   :  { %v5937_v16 = vmul.f32 0.0013020834, %v5929_v17 }
 0x59c   :  { %v5939_v25 = vadd.f32 1e-05, %v5937_v16 }
 0x59d   :  { %v5936_v50 = vpop.xlane.xlu1 %5935 }
 0x59e   :  { %7433 = vrsqrt.f32 %v5939_v25  ;;  %v5938_v22 = vmul.f32 0.0013020834, %v5936_v50 }
 0x5a0   :  { %v5940_v38 = vadd.f32 1e-05, %v5938_v22 }
 0x5a2   :  { %7435 = vrsqrt.f32 %v5940_v38 }
 0x5ab   :  { %v7434_v34 = vpop.eup %7433 }
 0x5ac   :  { %v5943_v31 = vmul.f32 %v7434_v34, %v5899_v56  ;;  %v5944_v14 = vmul.f32 %v7434_v34, %v5900_v63  ;;  %v5945_v29 = vmul.f32 %v7434_v34, %v5901_v40  ;;  %v5946_v41 = vmul.f32 %v7434_v34, %v5902_v4 }
 0x5ad   :  { %v5947_v45 = vmul.f32 %v7434_v34, %v5903_v5  ;;  %v5948_v60 = vmul.f32 %v7434_v34, %v5904_v18 }
 0x5ae   :  { %v5987_v53 = vmul.f32 %v5960_v39, %v5943_v31  ;;  %v5988_v36 = vmul.f32 %v5964_v57, %v5944_v14  ;;  %v5989_v2 = vmul.f32 %v5968_v42, %v5945_v29  ;;  %v5990_v51 = vmul.f32 %v5972_v43, %v5946_v41 }
 0x5af   :  { %v7436_v62 = vpop.eup %7435  ;;  %v5991_v52 = vmul.f32 %v5976_v30, %v5947_v45  ;;  %v5992_v56 = vmul.f32 %v5980_v44, %v5948_v60 }
 0x5b0   :  { %v5949_v63 = vmul.f32 %v7436_v62, %v7874_v54  ;;  %v5950_v40 = vmul.f32 %v7436_v62, %v7877_v55  ;;  %v5951_v59 = vmul.f32 %v7436_v62, %v7879_v1  ;;  %v5952_v9 = vmul.f32 %v7436_v62, %v5908_v3 }
 0x5b1   :  { %v5953_v4 = vmul.f32 %v7436_v62, %v5909_v6  ;;  %v5954_v5 = vmul.f32 %v7436_v62, %v5910_v58  ;;  %v6031_v18 = vadd.f32 %v6004_v21, %v5987_v53  ;;  %v6032_v7 = vadd.f32 %v6008_v28, %v5988_v36 }
 0x5b2   :  { %v5993_v49 = vmul.f32 %v5960_v39, %v5949_v63  ;;  %v5994_v23 = vmul.f32 %v5964_v57, %v5950_v40  ;;  %v5995_v37 = vmul.f32 %v5968_v42, %v5951_v59  ;;  %v5996_v27 = vmul.f32 %v5972_v43, %v5952_v9 }
 0x5b3   :  { %v5997_v20 = vmul.f32 %v5976_v30, %v5953_v4  ;;  %v5998_v33 = vmul.f32 %v5980_v44, %v5954_v5  ;;  %v6033_v8 = vadd.f32 %v6012_v47, %v5989_v2  ;;  %v6034_v0 = vadd.f32 %v6016_v61, %v5990_v51  ;;  %6043 = vst [vmem:[#allocation14] sm:$0xff] %v6031_v18 }
 0x5b4   :  { %6044 = vst [vmem:[#allocation14 + $0x8] sm:$0xff] %v6032_v7  ;;  %v6035_v54 = vadd.f32 %v6020_v35, %v5991_v52  ;;  %v6036_v55 = vadd.f32 %v6024_v46, %v5992_v56  ;;  %v6037_v1 = vadd.f32 %v6004_v21, %v5993_v49  ;;  %v6038_v3 = vadd.f32 %v6008_v28, %v5994_v23 }
 0x5b5   :  { %v6039_v6 = vadd.f32 %v6012_v47, %v5995_v37  ;;  %v6040_v58 = vadd.f32 %v6016_v61, %v5996_v27  ;;  %v6041_v48 = vadd.f32 %v6020_v35, %v5997_v20  ;;  %v6042_v19 = vadd.f32 %v6024_v46, %v5998_v33  ;;  %6045 = vst [vmem:[#allocation14 + $0x10] sm:$0xff] %v6033_v8 }
 0x5b6   :  { %6046 = vst [vmem:[#allocation14 + $0x18] sm:$0xff] %v6034_v0  ;;  %6047 = vst [vmem:[#allocation14 + $0x20] sm:$0xff] %v6035_v54 }
 0x5b7   :  { %6048 = vst [vmem:[#allocation14 + $0x28] sm:$0xff] %v6036_v55  ;;  %6049 = vst [vmem:[#allocation14 + $0x30] sm:$0xff] %v6037_v1 }
 0x5b8   :  { %6050 = vst [vmem:[#allocation14 + $0x38] sm:$0xff] %v6038_v3  ;;  %6051 = vst [vmem:[#allocation14 + $0x40] sm:$0xff] %v6039_v6 }
 0x5b9   :  { %6052 = vst [vmem:[#allocation14 + $0x48] sm:$0xff] %v6040_v58  ;;  %6053 = vst [vmem:[#allocation14 + $0x50] sm:$0xff] %v6041_v48 }
 0x5ba   :  { %6054 = vst [vmem:[#allocation14 + $0x58] sm:$0xff] %v6042_v19 }
 0x5bb   :  { %7601 = shalt.err (!%p7598_p11)
}
 0x5bc   :  { %6066 = dma.vmem_to_hbm [thread:$0]  %s6061_s6, 1536, %s7915_s7, [#allocation4], %s7628_s3, %s7628_s3, %s7629_s22  }
 0x5bd   :  { %7618 = dma.done.wait [#allocation4], 1536  }
 0x5be   :  { %7619 = vsyncadd [#allocation4], 4294965760 }
 0x5bf   :  { %6070 = vsyncpa [#allocation3], 1 }
 0x5c0   :  { %6071 = vsyncpa [#allocation6], 1 }
 0x5c1   :  { %6072 = vsyncpa [#allocation9], 1 }
 0x5c2   :  { %6073 = vsyncpa [#allocation12], 1 }
 0x5c3   :  { %6074 = vsyncpa [#allocation4], 1 }

</bundles_post_ra>
